<compile_context>
chip_gen: v5e
topology: v5e:2x2
jax: 0.10.0
libtpu: 0.0.40
codegen_flags: <defaults>
</compile_context>

<pallas_src>
import functools

import jax
import jax.numpy as jnp
from jax.experimental import pallas as pl
from jax.experimental.pallas import tpu as pltpu


def _round_up(x, m):
    return ((x + m - 1) // m) * m


# ----------------------------------------------------------------------------
# Fused conv block: Conv2d(valid) -> MaxPool2d(2) -> ReLU  (one pallas_call)
# ----------------------------------------------------------------------------

def _conv_pool_relu_kernel(a_ref, w_ref, b_ref, o_ref):
    # a_ref: (4, tp, K) bf16 -- 4 pooling quadrants of the same tp pooled rows
    # w_ref: (K, Cout) bf16, b_ref: (1, Cout) f32, o_ref: (tp, Cout) bf16
    q, tp, K = a_ref.shape
    cout = o_ref.shape[-1]
    # One long-M MXU dot (free collapse of leading dims; tp is a multiple of 16).
    a = a_ref[...].reshape(q * tp, K)
    y = jnp.dot(a, w_ref[...], preferred_element_type=jnp.float32)
    y = y.reshape(q, tp, cout)
    # 2x2 max as an elementwise tree; bias is constant across the 4 pooled
    # candidates so it is added after the max.
    m = jnp.maximum(jnp.maximum(y[0], y[1]), jnp.maximum(y[2], y[3])) + b_ref[...]
    # bf16 writeback: halves inter-layer HBM write + next-layer read traffic.
    o_ref[...] = jnp.maximum(m, 0.0).astype(o_ref.dtype)


def _pick_tp(M, K, cout, target_block_bytes=2 << 20, vmem_budget_bytes=10 << 20):
    """Pooled-row tile: ~2 MiB input blocks, v5e-safe VMEM, >=2 grid steps."""
    row_bytes = 4 * K * 2                       # one pooled row: 4 quadrants, bf16
    tp = max(16, (target_block_bytes // row_bytes) // 16 * 16)
    # double-buffered input + output blocks (+ resident weights) under budget
    per_row = 2 * (4 * K * 2) + 2 * (cout * 2)
    tp_cap = (vmem_budget_bytes - 2 * K * cout * 2) // per_row
    tp = min(tp, max(16, (tp_cap // 16) * 16))
    if M >= 32:                                 # >=2 grid steps -> v7x megacore
        tp = min(tp, _round_up(-(-M // 2), 16))
    return min(tp, _round_up(M, 16))


def conv_pool_relu_block(x, w, b, k):
    """x: NHWC (f32 or bf16), w: (k*k*Cin, Cout) rows ordered (kh, kw, cin),
    b: (Cout,).  Returns pooled+ReLU'd NHWC activation in bf16."""
    N, H, W, Cin = x.shape
    Ho, Wo = H - k + 1, W - k + 1
    Hp, Wp = Ho // 2, Wo // 2            # MaxPool2d(2) with floor
    K = k * k * Cin
    Cout = w.shape[1]
    M = N * Hp * Wp                      # pooled rows

    x = x.astype(jnp.bfloat16)           # patches are built & stored in bf16

    # Quadrant-major im2col (XLA glue): quadrant q=(dy,dx) holds the conv
    # patches whose output lands at pooled pixel (hp, wp), i.e. conv position
    # (2*hp+dy, 2*wp+dx).
    quads = []
    for dy in range(2):
        for dx in range(2):
            cols = []
            for ky in range(k):
                for kx in range(k):
                    y0, x0 = dy + ky, dx + kx
                    cols.append(jax.lax.slice(
                        x,
                        (0, y0, x0, 0),
                        (N, y0 + 2 * (Hp - 1) + 1, x0 + 2 * (Wp - 1) + 1, Cin),
                        (1, 2, 2, 1)))
            quads.append(jnp.concatenate(cols, axis=-1).reshape(M, K))
    patches = jnp.stack(quads, axis=0)                     # (4, M, K) bf16

    tp = _pick_tp(M, K, Cout)
    Mp = _round_up(M, tp)
    if Mp != M:
        # Padded rows only ever produce relu(bias) garbage that is sliced off.
        patches = jnp.pad(patches, ((0, 0), (0, Mp - M), (0, 0)))

    out = pl.pallas_call(
        _conv_pool_relu_kernel,
        out_shape=jax.ShapeDtypeStruct((Mp, Cout), jnp.bfloat16),
        grid=(Mp // tp,),
        in_specs=[
            pl.BlockSpec((4, tp, K), lambda i: (0, i, 0)),
            pl.BlockSpec((K, Cout), lambda i: (0, 0)),     # full weight resident
            pl.BlockSpec((1, Cout), lambda i: (0, 0)),
        ],
        out_specs=pl.BlockSpec((tp, Cout), lambda i: (i, 0)),
        compiler_params=pltpu.CompilerParams(
            dimension_semantics=("parallel",)),
    )(patches, w.astype(jnp.bfloat16), b.reshape(1, Cout).astype(jnp.float32))

    return out[:M].reshape(N, Hp, Wp, Cout)


# ----------------------------------------------------------------------------
# Fused dense head: dense1 -> LN -> ReLU -> dense2 -> LN, action_value -> ReLU,
#                   relu(add) -> q        (one pallas_call, no concatenate)
# ----------------------------------------------------------------------------

def _head_kernel(feat_ref, vars_ref, act_ref,
                 w1f_ref, w1v_ref, b1_ref, g1_ref, be1_ref,
                 w2_ref, b2_ref, g2_ref, be2_ref,
                 wa_ref, ba_ref, wq_ref, bq_ref,
                 o_ref):
    def layernorm(x, g, b):
        mu = jnp.mean(x, axis=-1, keepdims=True)
        var = jnp.mean((x - mu) ** 2, axis=-1, keepdims=True)
        return (x - mu) * jax.lax.rsqrt(var + 1e-5) * g + b

    # dense1 on cat([flat, vars]) == flat @ W1[:F] + vars @ W1[F:]
    # MXU operands are bf16; accumulation and all LN/ReLU math are f32.
    sv = (jnp.dot(feat_ref[...], w1f_ref[...], preferred_element_type=jnp.float32)
          + jnp.dot(vars_ref[...], w1v_ref[...], preferred_element_type=jnp.float32)
          + b1_ref[...])
    sv = jnp.maximum(layernorm(sv, g1_ref[...], be1_ref[...]), 0.0)
    sv = jnp.dot(sv.astype(jnp.bfloat16), w2_ref[...],
                 preferred_element_type=jnp.float32) + b2_ref[...]
    sv = layernorm(sv, g2_ref[...], be2_ref[...])

    av = jnp.dot(act_ref[...], wa_ref[...],
                 preferred_element_type=jnp.float32) + ba_ref[...]
    av = jnp.maximum(av, 0.0)

    sav = jnp.maximum(sv + av, 0.0)
    # q head (out_features = 1): VPU multiply + lane reduce, not an MXU dot.
    o_ref[...] = jnp.sum(sav * wq_ref[...], axis=-1, keepdims=True) + bq_ref[...]


def critic_head(flat, vars_, action, p):
    B = flat.shape[0]
    args = (
        flat.astype(jnp.bfloat16),
        vars_.astype(jnp.bfloat16),
        action.astype(jnp.bfloat16),
        p["w1f"].astype(jnp.bfloat16), p["w1v"].astype(jnp.bfloat16),
        p["b1"], p["g1"], p["be1"],
        p["w2"].astype(jnp.bfloat16), p["b2"], p["g2"], p["be2"],
        p["wa"].astype(jnp.bfloat16), p["ba"], p["wq"], p["bq"],
    )
    in_specs = [pl.BlockSpec(a.shape, lambda i: (0, 0)) for a in args]
    # TODO(synk): for large batch / the 5168-dim dense1, tile over B
    # ("parallel") and over dense1's K dim, and set vmem_limit_bytes.
    return pl.pallas_call(
        _head_kernel,
        out_shape=jax.ShapeDtypeStruct((B, 1), jnp.float32),
        grid=(1,),
        in_specs=in_specs,
        out_specs=pl.BlockSpec((B, 1), lambda i: (0, 0)),
    )(*args)


# ----------------------------------------------------------------------------
# Full forward
# ----------------------------------------------------------------------------

def critic_forward(params, state_nchw, vars_, action):
    N, C, H, W = state_nchw.shape
    # NCHW -> NHWC.  Cin == 1 in this model, so this is a free reshape.
    if C == 1:
        x = state_nchw.reshape(N, H, W, 1)
    else:
        x = jnp.transpose(state_nchw, (0, 2, 3, 1))

    for (w, b, k) in params["convs"]:
        x = conv_pool_relu_block(x, w, b, k)

    n, hp, wp, c = x.shape
    if hp == 1 and wp == 1:
        flat = x.reshape(n, c)       # identical to NCHW flatten when 1x1 spatial
    else:
        flat = jnp.transpose(x, (0, 3, 1, 2)).reshape(n, -1)   # match torch order

    return critic_head(flat, vars_, action, params["head"])


# ----------------------------------------------------------------------------
# Deterministic synthetic parameter init (shapes from Critic.__init__)
# ----------------------------------------------------------------------------

def init_params(key, flat_dim, vars_dim, dense1_dims, dense2_dims, n_actions):
    keys = iter(jax.random.split(key, 32))

    def uni(shape, bound):
        return jax.random.uniform(next(keys), shape, jnp.float32, -bound, bound)

    # Conv weights stored as (k*k*Cin, Cout) with row order (kh, kw, cin).
    # NOTE: real PyTorch Conv2d weights (cout, cin, kh, kw) must be permuted to
    # (kh, kw, cin, cout) then reshaped before loading into this layout.
    conv_cfg = [(5, 1, 32), (3, 32, 64), (3, 64, 64), (3, 64, 128), (1, 128, 128)]
    convs = []
    for k, cin, cout in conv_cfg:
        fan_in = k * k * cin
        bound = 1.0 / jnp.sqrt(fan_in)
        convs.append((uni((fan_in, cout), bound), uni((cout,), bound), k))

    feat_dim = flat_dim + vars_dim
    f1 = 1.0 / jnp.sqrt(dense1_dims)   # torch: 1/sqrt(weight.size()[0]) = out_features
    f2 = 1.0 / jnp.sqrt(dense2_dims)
    f3 = 0.003
    fa = 1.0 / jnp.sqrt(n_actions)

    w1 = uni((feat_dim, dense1_dims), f1)
    head = dict(
        w1f=w1[:flat_dim], w1v=w1[flat_dim:], b1=uni((1, dense1_dims), f1),
        g1=jnp.ones((1, dense1_dims), jnp.float32),
        be1=jnp.zeros((1, dense1_dims), jnp.float32),
        w2=uni((dense1_dims, dense2_dims), f2), b2=uni((1, dense2_dims), f2),
        g2=jnp.ones((1, dense2_dims), jnp.float32),
        be2=jnp.zeros((1, dense2_dims), jnp.float32),
        wa=uni((n_actions, dense2_dims), fa), ba=uni((1, dense2_dims), fa),
        wq=uni((1, dense2_dims), f3), bq=uni((1, 1), f3),
    )
    return {"convs": convs, "head": head}


# ----------------------------------------------------------------------------

if __name__ == "__main__":
    B, H, W = 2, 64, 64          # 64x64 -> conv/pool chain -> 1x1x128 features
    vars_dim, n_actions = 8, 4
    dense1_dims, dense2_dims = 32, 32
    flat_dim = 128 * 1 * 1       # stands in for the hard-coded 5168 - vars_dim

    key = jax.random.PRNGKey(0)
    kp, ks, kv, ka = jax.random.split(key, 4)
    params = init_params(kp, flat_dim, vars_dim, dense1_dims, dense2_dims,
                         n_actions)

    state = jax.random.normal(ks, (B, 1, H, W), jnp.float32)   # NCHW input
    vars_ = jax.random.normal(kv, (B, vars_dim), jnp.float32)
    action = jax.random.normal(ka, (B, n_actions), jnp.float32)

    fwd = jax.jit(functools.partial(critic_forward, params))
    q = fwd(state, vars_, action)
    jax.block_until_ready(q)
    assert q.shape == (B, 1) and q.dtype == jnp.float32
    print("KERNEL_OK")
</pallas_src>

<mosaic_0001>
module attributes {stable_mosaic.version = 11 : i64} {
  func.func @_conv_pool_relu_kernel(%arg0: i32, %arg1: memref<4x912x25xbf16, #tpu.memory_space<vmem>>, %arg2: memref<25x32xbf16, #tpu.memory_space<vmem>>, %arg3: memref<1x32xf32, #tpu.memory_space<vmem>>, %arg4: memref<912x32xbf16, #tpu.memory_space<vmem>>) attributes {dimension_semantics = [#tpu.dimension_semantics<parallel>], iteration_bounds = array<i64: 2>, scalar_prefetch = 0 : i64, scratch_operands = 0 : i64, tpu.core_type = #tpu.core_type<tc>, window_params = [{transform_indices = @transform_0, window_bounds = array<i64: 4, 912, 25>}, {pipeline_mode = #tpu.pipeline_mode<synchronous>, transform_indices = @transform_1, window_bounds = array<i64: 25, 32>}, {pipeline_mode = #tpu.pipeline_mode<synchronous>, transform_indices = @transform_2, window_bounds = array<i64: 1, 32>}, {transform_indices = @transform_3, window_bounds = array<i64: 912, 32>}]} {
    %c0 = arith.constant 0 : index
    %c0_0 = arith.constant 0 : index
    %c0_1 = arith.constant 0 : index
    %0 = vector.load %arg1[%c0, %c0_0, %c0_1] : memref<4x912x25xbf16, #tpu.memory_space<vmem>>, vector<4x912x25xbf16>
    %1 = vector.shape_cast %0 : vector<4x912x25xbf16> to vector<3648x25xbf16>
    %c0_2 = arith.constant 0 : index
    %c0_3 = arith.constant 0 : index
    %2 = vector.load %arg2[%c0_2, %c0_3] : memref<25x32xbf16, #tpu.memory_space<vmem>>, vector<25x32xbf16>
    %cst = arith.constant dense<0.000000e+00> : vector<3648x32xf32>
    %3 = tpu.matmul %1, %2, %cst {dimension_numbers = #tpu.dot_dimension_numbers<[1], [0], [0], [1], [0, 0, 1, 1], [], []>} : vector<3648x25xbf16>, vector<25x32xbf16>, vector<3648x32xf32> -> vector<3648x32xf32>
    %4 = vector.shape_cast %3 : vector<3648x32xf32> to vector<4x912x32xf32>
    %5 = vector.extract_strided_slice %4 {offsets = [0, 0, 0], sizes = [1, 912, 32], strides = [1, 1, 1]} : vector<4x912x32xf32> to vector<1x912x32xf32>
    %6 = vector.shape_cast %5 : vector<1x912x32xf32> to vector<912x32xf32>
    %7 = vector.extract_strided_slice %4 {offsets = [1, 0, 0], sizes = [1, 912, 32], strides = [1, 1, 1]} : vector<4x912x32xf32> to vector<1x912x32xf32>
    %8 = vector.shape_cast %7 : vector<1x912x32xf32> to vector<912x32xf32>
    %9 = arith.maximumf %6, %8 : vector<912x32xf32>
    %10 = vector.extract_strided_slice %4 {offsets = [2, 0, 0], sizes = [1, 912, 32], strides = [1, 1, 1]} : vector<4x912x32xf32> to vector<1x912x32xf32>
    %11 = vector.shape_cast %10 : vector<1x912x32xf32> to vector<912x32xf32>
    %12 = vector.extract_strided_slice %4 {offsets = [3, 0, 0], sizes = [1, 912, 32], strides = [1, 1, 1]} : vector<4x912x32xf32> to vector<1x912x32xf32>
    %13 = vector.shape_cast %12 : vector<1x912x32xf32> to vector<912x32xf32>
    %14 = arith.maximumf %11, %13 : vector<912x32xf32>
    %15 = arith.maximumf %9, %14 : vector<912x32xf32>
    %c0_4 = arith.constant 0 : index
    %c0_5 = arith.constant 0 : index
    %16 = vector.load %arg3[%c0_4, %c0_5] : memref<1x32xf32, #tpu.memory_space<vmem>>, vector<1x32xf32>
    %17 = vector.broadcast %16 : vector<1x32xf32> to vector<912x32xf32>
    %18 = arith.addf %15, %17 : vector<912x32xf32>
    %cst_6 = arith.constant 0.000000e+00 : f32
    %19 = vector.broadcast %cst_6 : f32 to vector<912x32xf32>
    %20 = arith.maximumf %18, %19 : vector<912x32xf32>
    %21 = arith.truncf %20 : vector<912x32xf32> to vector<912x32xbf16>
    %c0_7 = arith.constant 0 : index
    %c0_8 = arith.constant 0 : index
    %22 = vector.load %arg4[%c0_7, %c0_8] : memref<912x32xbf16, #tpu.memory_space<vmem>>, vector<912x32xbf16>
    tpu.vector_store %arg4[%c0_7, %c0_8], %21 {strides = array<i32>} : memref<912x32xbf16, #tpu.memory_space<vmem>>, vector<912x32xbf16>,
    return
  }
  func.func @transform_0(%arg0: i32) -> (i32, i32, i32) {
    %c0_i32 = arith.constant 0 : i32
    %c0_i32_0 = arith.constant 0 : i32
    %c0_i32_1 = arith.constant 0 : i32
    return %c0_i32, %arg0, %c0_i32_0 : i32, i32, i32
  }
  func.func @transform_1(%arg0: i32) -> (i32, i32) {
    %c0_i32 = arith.constant 0 : i32
    %c0_i32_0 = arith.constant 0 : i32
    %c0_i32_1 = arith.constant 0 : i32
    return %c0_i32, %c0_i32_0 : i32, i32
  }
  func.func @transform_2(%arg0: i32) -> (i32, i32) {
    %c0_i32 = arith.constant 0 : i32
    %c0_i32_0 = arith.constant 0 : i32
    %c0_i32_1 = arith.constant 0 : i32
    return %c0_i32, %c0_i32_0 : i32, i32
  }
  func.func @transform_3(%arg0: i32) -> (i32, i32) {
    %c0_i32 = arith.constant 0 : i32
    %c0_i32_0 = arith.constant 0 : i32
    return %arg0, %c0_i32 : i32, i32
  }
}

module attributes {stable_mosaic.version = 11 : i64} {
  func.func @_conv_pool_relu_kernel(%arg0: i32, %arg1: memref<4x208x288xbf16, #tpu.memory_space<vmem>>, %arg2: memref<288x64xbf16, #tpu.memory_space<vmem>>, %arg3: memref<1x64xf32, #tpu.memory_space<vmem>>, %arg4: memref<208x64xbf16, #tpu.memory_space<vmem>>) attributes {dimension_semantics = [#tpu.dimension_semantics<parallel>], iteration_bounds = array<i64: 2>, scalar_prefetch = 0 : i64, scratch_operands = 0 : i64, tpu.core_type = #tpu.core_type<tc>, window_params = [{transform_indices = @transform_0, window_bounds = array<i64: 4, 208, 288>}, {pipeline_mode = #tpu.pipeline_mode<synchronous>, transform_indices = @transform_1, window_bounds = array<i64: 288, 64>}, {pipeline_mode = #tpu.pipeline_mode<synchronous>, transform_indices = @transform_2, window_bounds = array<i64: 1, 64>}, {transform_indices = @transform_3, window_bounds = array<i64: 208, 64>}]} {
    %c0 = arith.constant 0 : index
    %c0_0 = arith.constant 0 : index
    %c0_1 = arith.constant 0 : index
    %0 = vector.load %arg1[%c0, %c0_0, %c0_1] : memref<4x208x288xbf16, #tpu.memory_space<vmem>>, vector<4x208x288xbf16>
    %1 = vector.shape_cast %0 : vector<4x208x288xbf16> to vector<832x288xbf16>
    %c0_2 = arith.constant 0 : index
    %c0_3 = arith.constant 0 : index
    %2 = vector.load %arg2[%c0_2, %c0_3] : memref<288x64xbf16, #tpu.memory_space<vmem>>, vector<288x64xbf16>
    %cst = arith.constant dense<0.000000e+00> : vector<832x64xf32>
    %3 = tpu.matmul %1, %2, %cst {dimension_numbers = #tpu.dot_dimension_numbers<[1], [0], [0], [1], [0, 0, 1, 1], [], []>} : vector<832x288xbf16>, vector<288x64xbf16>, vector<832x64xf32> -> vector<832x64xf32>
    %4 = vector.shape_cast %3 : vector<832x64xf32> to vector<4x208x64xf32>
    %5 = vector.extract_strided_slice %4 {offsets = [0, 0, 0], sizes = [1, 208, 64], strides = [1, 1, 1]} : vector<4x208x64xf32> to vector<1x208x64xf32>
    %6 = vector.shape_cast %5 : vector<1x208x64xf32> to vector<208x64xf32>
    %7 = vector.extract_strided_slice %4 {offsets = [1, 0, 0], sizes = [1, 208, 64], strides = [1, 1, 1]} : vector<4x208x64xf32> to vector<1x208x64xf32>
    %8 = vector.shape_cast %7 : vector<1x208x64xf32> to vector<208x64xf32>
    %9 = arith.maximumf %6, %8 : vector<208x64xf32>
    %10 = vector.extract_strided_slice %4 {offsets = [2, 0, 0], sizes = [1, 208, 64], strides = [1, 1, 1]} : vector<4x208x64xf32> to vector<1x208x64xf32>
    %11 = vector.shape_cast %10 : vector<1x208x64xf32> to vector<208x64xf32>
    %12 = vector.extract_strided_slice %4 {offsets = [3, 0, 0], sizes = [1, 208, 64], strides = [1, 1, 1]} : vector<4x208x64xf32> to vector<1x208x64xf32>
    %13 = vector.shape_cast %12 : vector<1x208x64xf32> to vector<208x64xf32>
    %14 = arith.maximumf %11, %13 : vector<208x64xf32>
    %15 = arith.maximumf %9, %14 : vector<208x64xf32>
    %c0_4 = arith.constant 0 : index
    %c0_5 = arith.constant 0 : index
    %16 = vector.load %arg3[%c0_4, %c0_5] : memref<1x64xf32, #tpu.memory_space<vmem>>, vector<1x64xf32>
    %17 = vector.broadcast %16 : vector<1x64xf32> to vector<208x64xf32>
    %18 = arith.addf %15, %17 : vector<208x64xf32>
    %cst_6 = arith.constant 0.000000e+00 : f32
    %19 = vector.broadcast %cst_6 : f32 to vector<208x64xf32>
    %20 = arith.maximumf %18, %19 : vector<208x64xf32>
    %21 = arith.truncf %20 : vector<208x64xf32> to vector<208x64xbf16>
    %c0_7 = arith.constant 0 : index
    %c0_8 = arith.constant 0 : index
    %22 = vector.load %arg4[%c0_7, %c0_8] : memref<208x64xbf16, #tpu.memory_space<vmem>>, vector<208x64xbf16>
    tpu.vector_store %arg4[%c0_7, %c0_8], %21 {strides = array<i32>} : memref<208x64xbf16, #tpu.memory_space<vmem>>, vector<208x64xbf16>,
    return
  }
  func.func @transform_0(%arg0: i32) -> (i32, i32, i32) {
    %c0_i32 = arith.constant 0 : i32
    %c0_i32_0 = arith.constant 0 : i32
    %c0_i32_1 = arith.constant 0 : i32
    return %c0_i32, %arg0, %c0_i32_0 : i32, i32, i32
  }
  func.func @transform_1(%arg0: i32) -> (i32, i32) {
    %c0_i32 = arith.constant 0 : i32
    %c0_i32_0 = arith.constant 0 : i32
    %c0_i32_1 = arith.constant 0 : i32
    return %c0_i32, %c0_i32_0 : i32, i32
  }
  func.func @transform_2(%arg0: i32) -> (i32, i32) {
    %c0_i32 = arith.constant 0 : i32
    %c0_i32_0 = arith.constant 0 : i32
    %c0_i32_1 = arith.constant 0 : i32
    return %c0_i32, %c0_i32_0 : i32, i32
  }
  func.func @transform_3(%arg0: i32) -> (i32, i32) {
    %c0_i32 = arith.constant 0 : i32
    %c0_i32_0 = arith.constant 0 : i32
    return %arg0, %c0_i32 : i32, i32
  }
}

module attributes {stable_mosaic.version = 11 : i64} {
  func.func @_conv_pool_relu_kernel(%arg0: i32, %arg1: memref<4x48x576xbf16, #tpu.memory_space<vmem>>, %arg2: memref<576x64xbf16, #tpu.memory_space<vmem>>, %arg3: memref<1x64xf32, #tpu.memory_space<vmem>>, %arg4: memref<48x64xbf16, #tpu.memory_space<vmem>>) attributes {dimension_semantics = [#tpu.dimension_semantics<parallel>], iteration_bounds = array<i64: 2>, scalar_prefetch = 0 : i64, scratch_operands = 0 : i64, tpu.core_type = #tpu.core_type<tc>, window_params = [{transform_indices = @transform_0, window_bounds = array<i64: 4, 48, 576>}, {pipeline_mode = #tpu.pipeline_mode<synchronous>, transform_indices = @transform_1, window_bounds = array<i64: 576, 64>}, {pipeline_mode = #tpu.pipeline_mode<synchronous>, transform_indices = @transform_2, window_bounds = array<i64: 1, 64>}, {transform_indices = @transform_3, window_bounds = array<i64: 48, 64>}]} {
    %c0 = arith.constant 0 : index
    %c0_0 = arith.constant 0 : index
    %c0_1 = arith.constant 0 : index
    %0 = vector.load %arg1[%c0, %c0_0, %c0_1] : memref<4x48x576xbf16, #tpu.memory_space<vmem>>, vector<4x48x576xbf16>
    %1 = vector.shape_cast %0 : vector<4x48x576xbf16> to vector<192x576xbf16>
    %c0_2 = arith.constant 0 : index
    %c0_3 = arith.constant 0 : index
    %2 = vector.load %arg2[%c0_2, %c0_3] : memref<576x64xbf16, #tpu.memory_space<vmem>>, vector<576x64xbf16>
    %cst = arith.constant dense<0.000000e+00> : vector<192x64xf32>
    %3 = tpu.matmul %1, %2, %cst {dimension_numbers = #tpu.dot_dimension_numbers<[1], [0], [0], [1], [0, 0, 1, 1], [], []>} : vector<192x576xbf16>, vector<576x64xbf16>, vector<192x64xf32> -> vector<192x64xf32>
    %4 = vector.shape_cast %3 : vector<192x64xf32> to vector<4x48x64xf32>
    %5 = vector.extract_strided_slice %4 {offsets = [0, 0, 0], sizes = [1, 48, 64], strides = [1, 1, 1]} : vector<4x48x64xf32> to vector<1x48x64xf32>
    %6 = vector.shape_cast %5 : vector<1x48x64xf32> to vector<48x64xf32>
    %7 = vector.extract_strided_slice %4 {offsets = [1, 0, 0], sizes = [1, 48, 64], strides = [1, 1, 1]} : vector<4x48x64xf32> to vector<1x48x64xf32>
    %8 = vector.shape_cast %7 : vector<1x48x64xf32> to vector<48x64xf32>
    %9 = arith.maximumf %6, %8 : vector<48x64xf32>
    %10 = vector.extract_strided_slice %4 {offsets = [2, 0, 0], sizes = [1, 48, 64], strides = [1, 1, 1]} : vector<4x48x64xf32> to vector<1x48x64xf32>
    %11 = vector.shape_cast %10 : vector<1x48x64xf32> to vector<48x64xf32>
    %12 = vector.extract_strided_slice %4 {offsets = [3, 0, 0], sizes = [1, 48, 64], strides = [1, 1, 1]} : vector<4x48x64xf32> to vector<1x48x64xf32>
    %13 = vector.shape_cast %12 : vector<1x48x64xf32> to vector<48x64xf32>
    %14 = arith.maximumf %11, %13 : vector<48x64xf32>
    %15 = arith.maximumf %9, %14 : vector<48x64xf32>
    %c0_4 = arith.constant 0 : index
    %c0_5 = arith.constant 0 : index
    %16 = vector.load %arg3[%c0_4, %c0_5] : memref<1x64xf32, #tpu.memory_space<vmem>>, vector<1x64xf32>
    %17 = vector.broadcast %16 : vector<1x64xf32> to vector<48x64xf32>
    %18 = arith.addf %15, %17 : vector<48x64xf32>
    %cst_6 = arith.constant 0.000000e+00 : f32
    %19 = vector.broadcast %cst_6 : f32 to vector<48x64xf32>
    %20 = arith.maximumf %18, %19 : vector<48x64xf32>
    %21 = arith.truncf %20 : vector<48x64xf32> to vector<48x64xbf16>
    %c0_7 = arith.constant 0 : index
    %c0_8 = arith.constant 0 : index
    %22 = vector.load %arg4[%c0_7, %c0_8] : memref<48x64xbf16, #tpu.memory_space<vmem>>, vector<48x64xbf16>
    tpu.vector_store %arg4[%c0_7, %c0_8], %21 {strides = array<i32>} : memref<48x64xbf16, #tpu.memory_space<vmem>>, vector<48x64xbf16>,
    return
  }
  func.func @transform_0(%arg0: i32) -> (i32, i32, i32) {
    %c0_i32 = arith.constant 0 : i32
    %c0_i32_0 = arith.constant 0 : i32
    %c0_i32_1 = arith.constant 0 : i32
    return %c0_i32, %arg0, %c0_i32_0 : i32, i32, i32
  }
  func.func @transform_1(%arg0: i32) -> (i32, i32) {
    %c0_i32 = arith.constant 0 : i32
    %c0_i32_0 = arith.constant 0 : i32
    %c0_i32_1 = arith.constant 0 : i32
    return %c0_i32, %c0_i32_0 : i32, i32
  }
  func.func @transform_2(%arg0: i32) -> (i32, i32) {
    %c0_i32 = arith.constant 0 : i32
    %c0_i32_0 = arith.constant 0 : i32
    %c0_i32_1 = arith.constant 0 : i32
    return %c0_i32, %c0_i32_0 : i32, i32
  }
  func.func @transform_3(%arg0: i32) -> (i32, i32) {
    %c0_i32 = arith.constant 0 : i32
    %c0_i32_0 = arith.constant 0 : i32
    return %arg0, %c0_i32 : i32, i32
  }
}

module attributes {stable_mosaic.version = 11 : i64} {
  func.func @_conv_pool_relu_kernel(%arg0: i32, %arg1: memref<4x16x576xbf16, #tpu.memory_space<vmem>>, %arg2: memref<576x128xbf16, #tpu.memory_space<vmem>>, %arg3: memref<1x128xf32, #tpu.memory_space<vmem>>, %arg4: memref<16x128xbf16, #tpu.memory_space<vmem>>) attributes {dimension_semantics = [#tpu.dimension_semantics<parallel>], iteration_bounds = array<i64: 1>, scalar_prefetch = 0 : i64, scratch_operands = 0 : i64, tpu.core_type = #tpu.core_type<tc>, window_params = [{transform_indices = @transform_0, window_bounds = array<i64: 4, 16, 576>}, {pipeline_mode = #tpu.pipeline_mode<synchronous>, transform_indices = @transform_1, window_bounds = array<i64: 576, 128>}, {pipeline_mode = #tpu.pipeline_mode<synchronous>, transform_indices = @transform_2, window_bounds = array<i64: 1, 128>}, {transform_indices = @transform_3, window_bounds = array<i64: 16, 128>}]} {
    %c0 = arith.constant 0 : index
    %c0_0 = arith.constant 0 : index
    %c0_1 = arith.constant 0 : index
    %0 = vector.load %arg1[%c0, %c0_0, %c0_1] : memref<4x16x576xbf16, #tpu.memory_space<vmem>>, vector<4x16x576xbf16>
    %1 = vector.shape_cast %0 : vector<4x16x576xbf16> to vector<64x576xbf16>
    %c0_2 = arith.constant 0 : index
    %c0_3 = arith.constant 0 : index
    %2 = vector.load %arg2[%c0_2, %c0_3] : memref<576x128xbf16, #tpu.memory_space<vmem>>, vector<576x128xbf16>
    %cst = arith.constant dense<0.000000e+00> : vector<64x128xf32>
    %3 = tpu.matmul %1, %2, %cst {dimension_numbers = #tpu.dot_dimension_numbers<[1], [0], [0], [1], [0, 0, 1, 1], [], []>} : vector<64x576xbf16>, vector<576x128xbf16>, vector<64x128xf32> -> vector<64x128xf32>
    %4 = vector.shape_cast %3 : vector<64x128xf32> to vector<4x16x128xf32>
    %5 = vector.extract_strided_slice %4 {offsets = [0, 0, 0], sizes = [1, 16, 128], strides = [1, 1, 1]} : vector<4x16x128xf32> to vector<1x16x128xf32>
    %6 = vector.shape_cast %5 : vector<1x16x128xf32> to vector<16x128xf32>
    %7 = vector.extract_strided_slice %4 {offsets = [1, 0, 0], sizes = [1, 16, 128], strides = [1, 1, 1]} : vector<4x16x128xf32> to vector<1x16x128xf32>
    %8 = vector.shape_cast %7 : vector<1x16x128xf32> to vector<16x128xf32>
    %9 = arith.maximumf %6, %8 : vector<16x128xf32>
    %10 = vector.extract_strided_slice %4 {offsets = [2, 0, 0], sizes = [1, 16, 128], strides = [1, 1, 1]} : vector<4x16x128xf32> to vector<1x16x128xf32>
    %11 = vector.shape_cast %10 : vector<1x16x128xf32> to vector<16x128xf32>
    %12 = vector.extract_strided_slice %4 {offsets = [3, 0, 0], sizes = [1, 16, 128], strides = [1, 1, 1]} : vector<4x16x128xf32> to vector<1x16x128xf32>
    %13 = vector.shape_cast %12 : vector<1x16x128xf32> to vector<16x128xf32>
    %14 = arith.maximumf %11, %13 : vector<16x128xf32>
    %15 = arith.maximumf %9, %14 : vector<16x128xf32>
    %c0_4 = arith.constant 0 : index
    %c0_5 = arith.constant 0 : index
    %16 = vector.load %arg3[%c0_4, %c0_5] : memref<1x128xf32, #tpu.memory_space<vmem>>, vector<1x128xf32>
    %17 = vector.broadcast %16 : vector<1x128xf32> to vector<16x128xf32>
    %18 = arith.addf %15, %17 : vector<16x128xf32>
    %cst_6 = arith.constant 0.000000e+00 : f32
    %19 = vector.broadcast %cst_6 : f32 to vector<16x128xf32>
    %20 = arith.maximumf %18, %19 : vector<16x128xf32>
    %21 = arith.truncf %20 : vector<16x128xf32> to vector<16x128xbf16>
    %c0_7 = arith.constant 0 : index
    %c0_8 = arith.constant 0 : index
    %22 = vector.load %arg4[%c0_7, %c0_8] : memref<16x128xbf16, #tpu.memory_space<vmem>>, vector<16x128xbf16>
    tpu.vector_store %arg4[%c0_7, %c0_8], %21 {strides = array<i32>} : memref<16x128xbf16, #tpu.memory_space<vmem>>, vector<16x128xbf16>,
    return
  }
  func.func @transform_0(%arg0: i32) -> (i32, i32, i32) {
    %c0_i32 = arith.constant 0 : i32
    %c0_i32_0 = arith.constant 0 : i32
    %c0_i32_1 = arith.constant 0 : i32
    return %c0_i32, %arg0, %c0_i32_0 : i32, i32, i32
  }
  func.func @transform_1(%arg0: i32) -> (i32, i32) {
    %c0_i32 = arith.constant 0 : i32
    %c0_i32_0 = arith.constant 0 : i32
    %c0_i32_1 = arith.constant 0 : i32
    return %c0_i32, %c0_i32_0 : i32, i32
  }
  func.func @transform_2(%arg0: i32) -> (i32, i32) {
    %c0_i32 = arith.constant 0 : i32
    %c0_i32_0 = arith.constant 0 : i32
    %c0_i32_1 = arith.constant 0 : i32
    return %c0_i32, %c0_i32_0 : i32, i32
  }
  func.func @transform_3(%arg0: i32) -> (i32, i32) {
    %c0_i32 = arith.constant 0 : i32
    %c0_i32_0 = arith.constant 0 : i32
    return %arg0, %c0_i32 : i32, i32
  }
}

module attributes {stable_mosaic.version = 11 : i64} {
  func.func @_conv_pool_relu_kernel(%arg0: i32, %arg1: memref<4x16x128xbf16, #tpu.memory_space<vmem>>, %arg2: memref<128x128xbf16, #tpu.memory_space<vmem>>, %arg3: memref<1x128xf32, #tpu.memory_space<vmem>>, %arg4: memref<16x128xbf16, #tpu.memory_space<vmem>>) attributes {dimension_semantics = [#tpu.dimension_semantics<parallel>], iteration_bounds = array<i64: 1>, scalar_prefetch = 0 : i64, scratch_operands = 0 : i64, tpu.core_type = #tpu.core_type<tc>, window_params = [{transform_indices = @transform_0, window_bounds = array<i64: 4, 16, 128>}, {pipeline_mode = #tpu.pipeline_mode<synchronous>, transform_indices = @transform_1, window_bounds = array<i64: 128, 128>}, {pipeline_mode = #tpu.pipeline_mode<synchronous>, transform_indices = @transform_2, window_bounds = array<i64: 1, 128>}, {transform_indices = @transform_3, window_bounds = array<i64: 16, 128>}]} {
    %c0 = arith.constant 0 : index
    %c0_0 = arith.constant 0 : index
    %c0_1 = arith.constant 0 : index
    %0 = vector.load %arg1[%c0, %c0_0, %c0_1] : memref<4x16x128xbf16, #tpu.memory_space<vmem>>, vector<4x16x128xbf16>
    %1 = vector.shape_cast %0 : vector<4x16x128xbf16> to vector<64x128xbf16>
    %c0_2 = arith.constant 0 : index
    %c0_3 = arith.constant 0 : index
    %2 = vector.load %arg2[%c0_2, %c0_3] : memref<128x128xbf16, #tpu.memory_space<vmem>>, vector<128x128xbf16>
    %cst = arith.constant dense<0.000000e+00> : vector<64x128xf32>
    %3 = tpu.matmul %1, %2, %cst {dimension_numbers = #tpu.dot_dimension_numbers<[1], [0], [0], [1], [0, 0, 1, 1], [], []>} : vector<64x128xbf16>, vector<128x128xbf16>, vector<64x128xf32> -> vector<64x128xf32>
    %4 = vector.shape_cast %3 : vector<64x128xf32> to vector<4x16x128xf32>
    %5 = vector.extract_strided_slice %4 {offsets = [0, 0, 0], sizes = [1, 16, 128], strides = [1, 1, 1]} : vector<4x16x128xf32> to vector<1x16x128xf32>
    %6 = vector.shape_cast %5 : vector<1x16x128xf32> to vector<16x128xf32>
    %7 = vector.extract_strided_slice %4 {offsets = [1, 0, 0], sizes = [1, 16, 128], strides = [1, 1, 1]} : vector<4x16x128xf32> to vector<1x16x128xf32>
    %8 = vector.shape_cast %7 : vector<1x16x128xf32> to vector<16x128xf32>
    %9 = arith.maximumf %6, %8 : vector<16x128xf32>
    %10 = vector.extract_strided_slice %4 {offsets = [2, 0, 0], sizes = [1, 16, 128], strides = [1, 1, 1]} : vector<4x16x128xf32> to vector<1x16x128xf32>
    %11 = vector.shape_cast %10 : vector<1x16x128xf32> to vector<16x128xf32>
    %12 = vector.extract_strided_slice %4 {offsets = [3, 0, 0], sizes = [1, 16, 128], strides = [1, 1, 1]} : vector<4x16x128xf32> to vector<1x16x128xf32>
    %13 = vector.shape_cast %12 : vector<1x16x128xf32> to vector<16x128xf32>
    %14 = arith.maximumf %11, %13 : vector<16x128xf32>
    %15 = arith.maximumf %9, %14 : vector<16x128xf32>
    %c0_4 = arith.constant 0 : index
    %c0_5 = arith.constant 0 : index
    %16 = vector.load %arg3[%c0_4, %c0_5] : memref<1x128xf32, #tpu.memory_space<vmem>>, vector<1x128xf32>
    %17 = vector.broadcast %16 : vector<1x128xf32> to vector<16x128xf32>
    %18 = arith.addf %15, %17 : vector<16x128xf32>
    %cst_6 = arith.constant 0.000000e+00 : f32
    %19 = vector.broadcast %cst_6 : f32 to vector<16x128xf32>
    %20 = arith.maximumf %18, %19 : vector<16x128xf32>
    %21 = arith.truncf %20 : vector<16x128xf32> to vector<16x128xbf16>
    %c0_7 = arith.constant 0 : index
    %c0_8 = arith.constant 0 : index
    %22 = vector.load %arg4[%c0_7, %c0_8] : memref<16x128xbf16, #tpu.memory_space<vmem>>, vector<16x128xbf16>
    tpu.vector_store %arg4[%c0_7, %c0_8], %21 {strides = array<i32>} : memref<16x128xbf16, #tpu.memory_space<vmem>>, vector<16x128xbf16>,
    return
  }
  func.func @transform_0(%arg0: i32) -> (i32, i32, i32) {
    %c0_i32 = arith.constant 0 : i32
    %c0_i32_0 = arith.constant 0 : i32
    %c0_i32_1 = arith.constant 0 : i32
    return %c0_i32, %arg0, %c0_i32_0 : i32, i32, i32
  }
  func.func @transform_1(%arg0: i32) -> (i32, i32) {
    %c0_i32 = arith.constant 0 : i32
    %c0_i32_0 = arith.constant 0 : i32
    %c0_i32_1 = arith.constant 0 : i32
    return %c0_i32, %c0_i32_0 : i32, i32
  }
  func.func @transform_2(%arg0: i32) -> (i32, i32) {
    %c0_i32 = arith.constant 0 : i32
    %c0_i32_0 = arith.constant 0 : i32
    %c0_i32_1 = arith.constant 0 : i32
    return %c0_i32, %c0_i32_0 : i32, i32
  }
  func.func @transform_3(%arg0: i32) -> (i32, i32) {
    %c0_i32 = arith.constant 0 : i32
    %c0_i32_0 = arith.constant 0 : i32
    return %arg0, %c0_i32 : i32, i32
  }
}

module attributes {stable_mosaic.version = 11 : i64} {
  func.func @_head_kernel(%arg0: i32, %arg1: memref<2x128xbf16, #tpu.memory_space<vmem>>, %arg2: memref<2x8xbf16, #tpu.memory_space<vmem>>, %arg3: memref<2x4xbf16, #tpu.memory_space<vmem>>, %arg4: memref<128x32xbf16, #tpu.memory_space<vmem>>, %arg5: memref<8x32xbf16, #tpu.memory_space<vmem>>, %arg6: memref<1x32xf32, #tpu.memory_space<vmem>>, %arg7: memref<1x32xf32, #tpu.memory_space<vmem>>, %arg8: memref<1x32xf32, #tpu.memory_space<vmem>>, %arg9: memref<32x32xbf16, #tpu.memory_space<vmem>>, %arg10: memref<1x32xf32, #tpu.memory_space<vmem>>, %arg11: memref<1x32xf32, #tpu.memory_space<vmem>>, %arg12: memref<1x32xf32, #tpu.memory_space<vmem>>, %arg13: memref<4x32xbf16, #tpu.memory_space<vmem>>, %arg14: memref<1x32xf32, #tpu.memory_space<vmem>>, %arg15: memref<1x32xf32, #tpu.memory_space<vmem>>, %arg16: memref<1x1xf32, #tpu.memory_space<vmem>>, %arg17: memref<2x1xf32, #tpu.memory_space<vmem>>) attributes {dimension_semantics = [#tpu.dimension_semantics<arbitrary>], iteration_bounds = array<i64: 1>, scalar_prefetch = 0 : i64, scratch_operands = 0 : i64, tpu.core_type = #tpu.core_type<tc>, window_params = [{pipeline_mode = #tpu.pipeline_mode<synchronous>, transform_indices = @transform_0, window_bounds = array<i64: 2, 128>}, {pipeline_mode = #tpu.pipeline_mode<synchronous>, transform_indices = @transform_1, window_bounds = array<i64: 2, 8>}, {pipeline_mode = #tpu.pipeline_mode<synchronous>, transform_indices = @transform_2, window_bounds = array<i64: 2, 4>}, {pipeline_mode = #tpu.pipeline_mode<synchronous>, transform_indices = @transform_3, window_bounds = array<i64: 128, 32>}, {pipeline_mode = #tpu.pipeline_mode<synchronous>, transform_indices = @transform_4, window_bounds = array<i64: 8, 32>}, {pipeline_mode = #tpu.pipeline_mode<synchronous>, transform_indices = @transform_5, window_bounds = array<i64: 1, 32>}, {pipeline_mode = #tpu.pipeline_mode<synchronous>, transform_indices = @transform_6, window_bounds = array<i64: 1, 32>}, {pipeline_mode = #tpu.pipeline_mode<synchronous>, transform_indices = @transform_7, window_bounds = array<i64: 1, 32>}, {pipeline_mode = #tpu.pipeline_mode<synchronous>, transform_indices = @transform_8, window_bounds = array<i64: 32, 32>}, {pipeline_mode = #tpu.pipeline_mode<synchronous>, transform_indices = @transform_9, window_bounds = array<i64: 1, 32>}, {pipeline_mode = #tpu.pipeline_mode<synchronous>, transform_indices = @transform_10, window_bounds = array<i64: 1, 32>}, {pipeline_mode = #tpu.pipeline_mode<synchronous>, transform_indices = @transform_11, window_bounds = array<i64: 1, 32>}, {pipeline_mode = #tpu.pipeline_mode<synchronous>, transform_indices = @transform_12, window_bounds = array<i64: 4, 32>}, {pipeline_mode = #tpu.pipeline_mode<synchronous>, transform_indices = @transform_13, window_bounds = array<i64: 1, 32>}, {pipeline_mode = #tpu.pipeline_mode<synchronous>, transform_indices = @transform_14, window_bounds = array<i64: 1, 32>}, {pipeline_mode = #tpu.pipeline_mode<synchronous>, transform_indices = @transform_15, window_bounds = array<i64: 1, 1>}, {pipeline_mode = #tpu.pipeline_mode<synchronous>, transform_indices = @transform_16, window_bounds = array<i64: 2, 1>}]} {
    %c0 = arith.constant 0 : index
    %c0_0 = arith.constant 0 : index
    %0 = vector.load %arg1[%c0, %c0_0] : memref<2x128xbf16, #tpu.memory_space<vmem>>, vector<2x128xbf16>
    %c0_1 = arith.constant 0 : index
    %c0_2 = arith.constant 0 : index
    %1 = vector.load %arg4[%c0_1, %c0_2] : memref<128x32xbf16, #tpu.memory_space<vmem>>, vector<128x32xbf16>
    %cst = arith.constant dense<0.000000e+00> : vector<2x32xf32>
    %2 = tpu.matmul %0, %1, %cst {dimension_numbers = #tpu.dot_dimension_numbers<[1], [0], [0], [1], [0, 0, 1, 1], [], []>} : vector<2x128xbf16>, vector<128x32xbf16>, vector<2x32xf32> -> vector<2x32xf32>
    %c0_3 = arith.constant 0 : index
    %c0_4 = arith.constant 0 : index
    %3 = vector.load %arg2[%c0_3, %c0_4] : memref<2x8xbf16, #tpu.memory_space<vmem>>, vector<2x8xbf16>
    %c0_5 = arith.constant 0 : index
    %c0_6 = arith.constant 0 : index
    %4 = vector.load %arg5[%c0_5, %c0_6] : memref<8x32xbf16, #tpu.memory_space<vmem>>, vector<8x32xbf16>
    %cst_7 = arith.constant dense<0.000000e+00> : vector<2x32xf32>
    %5 = tpu.matmul %3, %4, %cst_7 {dimension_numbers = #tpu.dot_dimension_numbers<[1], [0], [0], [1], [0, 0, 1, 1], [], []>} : vector<2x8xbf16>, vector<8x32xbf16>, vector<2x32xf32> -> vector<2x32xf32>
    %6 = arith.addf %2, %5 : vector<2x32xf32>
    %c0_8 = arith.constant 0 : index
    %c0_9 = arith.constant 0 : index
    %7 = vector.load %arg6[%c0_8, %c0_9] : memref<1x32xf32, #tpu.memory_space<vmem>>, vector<1x32xf32>
    %8 = vector.broadcast %7 : vector<1x32xf32> to vector<2x32xf32>
    %9 = arith.addf %6, %8 : vector<2x32xf32>
    %c0_10 = arith.constant 0 : index
    %c0_11 = arith.constant 0 : index
    %10 = vector.load %arg7[%c0_10, %c0_11] : memref<1x32xf32, #tpu.memory_space<vmem>>, vector<1x32xf32>
    %c0_12 = arith.constant 0 : index
    %c0_13 = arith.constant 0 : index
    %11 = vector.load %arg8[%c0_12, %c0_13] : memref<1x32xf32, #tpu.memory_space<vmem>>, vector<1x32xf32>
    %cst_14 = arith.constant dense<0.000000e+00> : vector<2xf32>
    %12 = vector.multi_reduction <add>, %9, %cst_14 [1] : vector<2x32xf32> to vector<2xf32>
    %13 = vector.shape_cast %12 : vector<2xf32> to vector<2x1xf32>
    %cst_15 = arith.constant 3.200000e+01 : f32
    %14 = vector.broadcast %cst_15 : f32 to vector<2x1xf32>
    %15 = arith.divf %13, %14 : vector<2x1xf32>
    %16 = vector.broadcast %15 : vector<2x1xf32> to vector<2x32xf32>
    %17 = arith.subf %9, %16 : vector<2x32xf32>
    %18 = arith.mulf %17, %17 : vector<2x32xf32>
    %cst_16 = arith.constant dense<0.000000e+00> : vector<2xf32>
    %19 = vector.multi_reduction <add>, %18, %cst_16 [1] : vector<2x32xf32> to vector<2xf32>
    %20 = vector.shape_cast %19 : vector<2xf32> to vector<2x1xf32>
    %cst_17 = arith.constant 3.200000e+01 : f32
    %21 = vector.broadcast %cst_17 : f32 to vector<2x1xf32>
    %22 = arith.divf %20, %21 : vector<2x1xf32>
    %23 = vector.broadcast %15 : vector<2x1xf32> to vector<2x32xf32>
    %24 = arith.subf %9, %23 : vector<2x32xf32>
    %cst_18 = arith.constant 9.99999974E-6 : f32
    %25 = vector.broadcast %cst_18 : f32 to vector<2x1xf32>
    %26 = arith.addf %22, %25 : vector<2x1xf32>
    %27 = math.rsqrt %26 : vector<2x1xf32>
    %28 = vector.broadcast %27 : vector<2x1xf32> to vector<2x32xf32>
    %29 = arith.mulf %24, %28 : vector<2x32xf32>
    %30 = vector.broadcast %10 : vector<1x32xf32> to vector<2x32xf32>
    %31 = arith.mulf %29, %30 : vector<2x32xf32>
    %32 = vector.broadcast %11 : vector<1x32xf32> to vector<2x32xf32>
    %33 = arith.addf %31, %32 : vector<2x32xf32>
    %cst_19 = arith.constant 0.000000e+00 : f32
    %34 = vector.broadcast %cst_19 : f32 to vector<2x32xf32>
    %35 = arith.maximumf %33, %34 : vector<2x32xf32>
    %36 = arith.truncf %35 : vector<2x32xf32> to vector<2x32xbf16>
    %c0_20 = arith.constant 0 : index
    %c0_21 = arith.constant 0 : index
    %37 = vector.load %arg9[%c0_20, %c0_21] : memref<32x32xbf16, #tpu.memory_space<vmem>>, vector<32x32xbf16>
    %cst_22 = arith.constant dense<0.000000e+00> : vector<2x32xf32>
    %38 = tpu.matmul %36, %37, %cst_22 {dimension_numbers = #tpu.dot_dimension_numbers<[1], [0], [0], [1], [0, 0, 1, 1], [], []>} : vector<2x32xbf16>, vector<32x32xbf16>, vector<2x32xf32> -> vector<2x32xf32>
    %c0_23 = arith.constant 0 : index
    %c0_24 = arith.constant 0 : index
    %39 = vector.load %arg10[%c0_23, %c0_24] : memref<1x32xf32, #tpu.memory_space<vmem>>, vector<1x32xf32>
    %40 = vector.broadcast %39 : vector<1x32xf32> to vector<2x32xf32>
    %41 = arith.addf %38, %40 : vector<2x32xf32>
    %c0_25 = arith.constant 0 : index
    %c0_26 = arith.constant 0 : index
    %42 = vector.load %arg11[%c0_25, %c0_26] : memref<1x32xf32, #tpu.memory_space<vmem>>, vector<1x32xf32>
    %c0_27 = arith.constant 0 : index
    %c0_28 = arith.constant 0 : index
    %43 = vector.load %arg12[%c0_27, %c0_28] : memref<1x32xf32, #tpu.memory_space<vmem>>, vector<1x32xf32>
    %cst_29 = arith.constant dense<0.000000e+00> : vector<2xf32>
    %44 = vector.multi_reduction <add>, %41, %cst_29 [1] : vector<2x32xf32> to vector<2xf32>
    %45 = vector.shape_cast %44 : vector<2xf32> to vector<2x1xf32>
    %cst_30 = arith.constant 3.200000e+01 : f32
    %46 = vector.broadcast %cst_30 : f32 to vector<2x1xf32>
    %47 = arith.divf %45, %46 : vector<2x1xf32>
    %48 = vector.broadcast %47 : vector<2x1xf32> to vector<2x32xf32>
    %49 = arith.subf %41, %48 : vector<2x32xf32>
    %50 = arith.mulf %49, %49 : vector<2x32xf32>
    %cst_31 = arith.constant dense<0.000000e+00> : vector<2xf32>
    %51 = vector.multi_reduction <add>, %50, %cst_31 [1] : vector<2x32xf32> to vector<2xf32>
    %52 = vector.shape_cast %51 : vector<2xf32> to vector<2x1xf32>
    %cst_32 = arith.constant 3.200000e+01 : f32
    %53 = vector.broadcast %cst_32 : f32 to vector<2x1xf32>
    %54 = arith.divf %52, %53 : vector<2x1xf32>
    %55 = vector.broadcast %47 : vector<2x1xf32> to vector<2x32xf32>
    %56 = arith.subf %41, %55 : vector<2x32xf32>
    %cst_33 = arith.constant 9.99999974E-6 : f32
    %57 = vector.broadcast %cst_33 : f32 to vector<2x1xf32>
    %58 = arith.addf %54, %57 : vector<2x1xf32>
    %59 = math.rsqrt %58 : vector<2x1xf32>
    %60 = vector.broadcast %59 : vector<2x1xf32> to vector<2x32xf32>
    %61 = arith.mulf %56, %60 : vector<2x32xf32>
    %62 = vector.broadcast %42 : vector<1x32xf32> to vector<2x32xf32>
    %63 = arith.mulf %61, %62 : vector<2x32xf32>
    %64 = vector.broadcast %43 : vector<1x32xf32> to vector<2x32xf32>
    %65 = arith.addf %63, %64 : vector<2x32xf32>
    %c0_34 = arith.constant 0 : index
    %c0_35 = arith.constant 0 : index
    %66 = vector.load %arg3[%c0_34, %c0_35] : memref<2x4xbf16, #tpu.memory_space<vmem>>, vector<2x4xbf16>
    %c0_36 = arith.constant 0 : index
    %c0_37 = arith.constant 0 : index
    %67 = vector.load %arg13[%c0_36, %c0_37] : memref<4x32xbf16, #tpu.memory_space<vmem>>, vector<4x32xbf16>
    %cst_38 = arith.constant dense<0.000000e+00> : vector<2x32xf32>
    %68 = tpu.matmul %66, %67, %cst_38 {dimension_numbers = #tpu.dot_dimension_numbers<[1], [0], [0], [1], [0, 0, 1, 1], [], []>} : vector<2x4xbf16>, vector<4x32xbf16>, vector<2x32xf32> -> vector<2x32xf32>
    %c0_39 = arith.constant 0 : index
    %c0_40 = arith.constant 0 : index
    %69 = vector.load %arg14[%c0_39, %c0_40] : memref<1x32xf32, #tpu.memory_space<vmem>>, vector<1x32xf32>
    %70 = vector.broadcast %69 : vector<1x32xf32> to vector<2x32xf32>
    %71 = arith.addf %68, %70 : vector<2x32xf32>
    %cst_41 = arith.constant 0.000000e+00 : f32
    %72 = vector.broadcast %cst_41 : f32 to vector<2x32xf32>
    %73 = arith.maximumf %71, %72 : vector<2x32xf32>
    %74 = arith.addf %65, %73 : vector<2x32xf32>
    %cst_42 = arith.constant 0.000000e+00 : f32
    %75 = vector.broadcast %cst_42 : f32 to vector<2x32xf32>
    %76 = arith.maximumf %74, %75 : vector<2x32xf32>
    %c0_43 = arith.constant 0 : index
    %c0_44 = arith.constant 0 : index
    %77 = vector.load %arg15[%c0_43, %c0_44] : memref<1x32xf32, #tpu.memory_space<vmem>>, vector<1x32xf32>
    %78 = vector.broadcast %77 : vector<1x32xf32> to vector<2x32xf32>
    %79 = arith.mulf %76, %78 : vector<2x32xf32>
    %cst_45 = arith.constant dense<0.000000e+00> : vector<2xf32>
    %80 = vector.multi_reduction <add>, %79, %cst_45 [1] : vector<2x32xf32> to vector<2xf32>
    %81 = vector.shape_cast %80 : vector<2xf32> to vector<2x1xf32>
    %c0_46 = arith.constant 0 : index
    %c0_47 = arith.constant 0 : index
    %82 = vector.load %arg16[%c0_46, %c0_47] : memref<1x1xf32, #tpu.memory_space<vmem>>, vector<1x1xf32>
    %83 = vector.broadcast %82 : vector<1x1xf32> to vector<2x1xf32>
    %84 = arith.addf %81, %83 : vector<2x1xf32>
    %c0_48 = arith.constant 0 : index
    %c0_49 = arith.constant 0 : index
    %85 = vector.load %arg17[%c0_48, %c0_49] : memref<2x1xf32, #tpu.memory_space<vmem>>, vector<2x1xf32>
    tpu.vector_store %arg17[%c0_48, %c0_49], %84 {strides = array<i32>} : memref<2x1xf32, #tpu.memory_space<vmem>>, vector<2x1xf32>,
    return
  }
  func.func @transform_0(%arg0: i32) -> (i32, i32) {
    %c0_i32 = arith.constant 0 : i32
    %c0_i32_0 = arith.constant 0 : i32
    %c0_i32_1 = arith.constant 0 : i32
    return %c0_i32, %c0_i32_0 : i32, i32
  }
  func.func @transform_1(%arg0: i32) -> (i32, i32) {
    %c0_i32 = arith.constant 0 : i32
    %c0_i32_0 = arith.constant 0 : i32
    %c0_i32_1 = arith.constant 0 : i32
    return %c0_i32, %c0_i32_0 : i32, i32
  }
  func.func @transform_2(%arg0: i32) -> (i32, i32) {
    %c0_i32 = arith.constant 0 : i32
    %c0_i32_0 = arith.constant 0 : i32
    %c0_i32_1 = arith.constant 0 : i32
    return %c0_i32, %c0_i32_0 : i32, i32
  }
  func.func @transform_3(%arg0: i32) -> (i32, i32) {
    %c0_i32 = arith.constant 0 : i32
    %c0_i32_0 = arith.constant 0 : i32
    %c0_i32_1 = arith.constant 0 : i32
    return %c0_i32, %c0_i32_0 : i32, i32
  }
  func.func @transform_4(%arg0: i32) -> (i32, i32) {
    %c0_i32 = arith.constant 0 : i32
    %c0_i32_0 = arith.constant 0 : i32
    %c0_i32_1 = arith.constant 0 : i32
    return %c0_i32, %c0_i32_0 : i32, i32
  }
  func.func @transform_5(%arg0: i32) -> (i32, i32) {
    %c0_i32 = arith.constant 0 : i32
    %c0_i32_0 = arith.constant 0 : i32
    %c0_i32_1 = arith.constant 0 : i32
    return %c0_i32, %c0_i32_0 : i32, i32
  }
  func.func @transform_6(%arg0: i32) -> (i32, i32) {
    %c0_i32 = arith.constant 0 : i32
    %c0_i32_0 = arith.constant 0 : i32
    %c0_i32_1 = arith.constant 0 : i32
    return %c0_i32, %c0_i32_0 : i32, i32
  }
  func.func @transform_7(%arg0: i32) -> (i32, i32) {
    %c0_i32 = arith.constant 0 : i32
    %c0_i32_0 = arith.constant 0 : i32
    %c0_i32_1 = arith.constant 0 : i32
    return %c0_i32, %c0_i32_0 : i32, i32
  }
  func.func @transform_8(%arg0: i32) -> (i32, i32) {
    %c0_i32 = arith.constant 0 : i32
    %c0_i32_0 = arith.constant 0 : i32
    %c0_i32_1 = arith.constant 0 : i32
    return %c0_i32, %c0_i32_0 : i32, i32
  }
  func.func @transform_9(%arg0: i32) -> (i32, i32) {
    %c0_i32 = arith.constant 0 : i32
    %c0_i32_0 = arith.constant 0 : i32
    %c0_i32_1 = arith.constant 0 : i32
    return %c0_i32, %c0_i32_0 : i32, i32
  }
  func.func @transform_10(%arg0: i32) -> (i32, i32) {
    %c0_i32 = arith.constant 0 : i32
    %c0_i32_0 = arith.constant 0 : i32
    %c0_i32_1 = arith.constant 0 : i32
    return %c0_i32, %c0_i32_0 : i32, i32
  }
  func.func @transform_11(%arg0: i32) -> (i32, i32) {
    %c0_i32 = arith.constant 0 : i32
    %c0_i32_0 = arith.constant 0 : i32
    %c0_i32_1 = arith.constant 0 : i32
    return %c0_i32, %c0_i32_0 : i32, i32
  }
  func.func @transform_12(%arg0: i32) -> (i32, i32) {
    %c0_i32 = arith.constant 0 : i32
    %c0_i32_0 = arith.constant 0 : i32
    %c0_i32_1 = arith.constant 0 : i32
    return %c0_i32, %c0_i32_0 : i32, i32
  }
  func.func @transform_13(%arg0: i32) -> (i32, i32) {
    %c0_i32 = arith.constant 0 : i32
    %c0_i32_0 = arith.constant 0 : i32
    %c0_i32_1 = arith.constant 0 : i32
    return %c0_i32, %c0_i32_0 : i32, i32
  }
  func.func @transform_14(%arg0: i32) -> (i32, i32) {
    %c0_i32 = arith.constant 0 : i32
    %c0_i32_0 = arith.constant 0 : i32
    %c0_i32_1 = arith.constant 0 : i32
    return %c0_i32, %c0_i32_0 : i32, i32
  }
  func.func @transform_15(%arg0: i32) -> (i32, i32) {
    %c0_i32 = arith.constant 0 : i32
    %c0_i32_0 = arith.constant 0 : i32
    %c0_i32_1 = arith.constant 0 : i32
    return %c0_i32, %c0_i32_0 : i32, i32
  }
  func.func @transform_16(%arg0: i32) -> (i32, i32) {
    %c0_i32 = arith.constant 0 : i32
    %c0_i32_0 = arith.constant 0 : i32
    %c0_i32_1 = arith.constant 0 : i32
    return %c0_i32, %c0_i32_0 : i32, i32
  }
}

</mosaic_0001>

<bundles_post_ra>
// kernel: critic_forward.6
= control target key start
LH: loop header
LB: loop body
LE: loop exit
PB: predicated region body
PF: predicated region fallthrough
CT: control target
= control target key end

     0   :  { %s9683_s12 = smov 0   ;;  %s9685_s13 = smov 0   ;;  %s11026_s0 = inlined_call_operand.vmem [shape: bf16[4,1824,25], index: 0, kind: input, shape index: {}]   ;;  %s11027_s1 = inlined_call_operand.vmem [shape: bf16[25,32], index: 1, kind: input, shape index: {}]   ;;  %s11028_s2 = inlined_call_operand.vmem [shape: f32[1,32], index: 2, kind: input, shape index: {}]   ;;  %s11029_s3 = inlined_call_operand.vmem [shape: bf16[1824,32], index: 3, kind: output, shape index: {}]  }
   0x1   :  { %s9687_s14 = smov 0  }
   0x2 LB: > { %s8213_s15 = sadd.s32 4294967295, %s9660_s14   ;;  %s9700_s16 = sadd.s32 1, %s9660_s14   ;;  %s9660_s14 = sphi %s9687_s14, %s11032_s14   ;;  %s9656_s13 = sphi %s9685_s13, %s11031_s13   ;;  %s9652_s12 = sphi %s9683_s12, %s11030_s12  }
   0x3   : > { %s17_s17 = ssub.s32 %s9660_s14, %s9700_s16  ;;  %s20_s18 = sadd.s32 1, %s9656_s13 }
   0x4   : > { %p18_p0 = scmp.eq.s32.totalorder %s17_s17, 0  ;;  %p27_p1 = scmp.ne.s32.totalorder %s9656_s13, %s9652_s12 }
   0x5   : > { %p28_p2 = scmp.eq.s32.totalorder %s9660_s14, 0  ;;  %p8216_p4 = scmp.ge.s32.totalorder %s9660_s14, 2 }
   0x6   : > { %s9709_s19 = scalar_select %p18_p0, %s9656_s13, %s20_s18  }
   0x7   : > { %p29_p3 = por %p28_p2, %p27_p1  ;;  %127 = sbr.rel (%p8216_p4) target bundleno = 245 (0xf5), region = 24 }
   0xc   : > { %130 = sbr.rel (!%p29_p3) target bundleno = 245 (0xf5), region = 28  ;;  %s132_s20 = sand.u32 (%p29_p3), 1, %s9656_s13  }
   0xd   : > { %s9370_s21 = smul.u32 (%p29_p3), 456, %s9660_s14 }
   0xe   : > { %s9607_s22 = smul.u32 (%p29_p3), 1824, %s132_s20 }
   0xf   : > { %s9717_s25 = scalar_lea.vmem (%p29_p3), %s11026_s0, %s9370_s21 }
  0x10   : > { %v154_v0 = vld [vmem:[%s9717_s25] sm:$0xff] (%p29_p3)   ;;  %v158_v1 = vld [vmem:[%s9717_s25 + $0x8] sm:$0xff] (%p29_p3)   ;;  %v162_v2 = vld [vmem:[%s9717_s25 + $0x10] sm:$0xff] (%p29_p3)   ;;  %s9722_s26 = scalar_lea.vmem (%p29_p3), [#allocation2], %s9607_s22 }
  0x11   : > { %155 = vst [vmem:[%s9722_s26] sm:$0xff] %v154_v0   ;;  %v166_v3 = vld [vmem:[%s9717_s25 + $0x18] sm:$0xff]   ;;  %v170_v4 = vld [vmem:[%s9717_s25 + $0x20] sm:$0xff]   ;;  %v174_v5 = vld [vmem:[%s9717_s25 + $0x28] sm:$0xff]  }
  0x12   : > { %159 = vst [vmem:[%s9722_s26 + $0x8] sm:$0xff] %v158_v1   ;;  %v178_v6 = vld [vmem:[%s9717_s25 + $0x30] sm:$0xff]   ;;  %v182_v7 = vld [vmem:[%s9717_s25 + $0x38] sm:$0xff]   ;;  %v186_v8 = vld [vmem:[%s9717_s25 + $0x40] sm:$0xff]  }
  0x13   : > { %163 = vst [vmem:[%s9722_s26 + $0x10] sm:$0xff] %v162_v2   ;;  %v190_v9 = vld [vmem:[%s9717_s25 + $0x48] sm:$0xff]   ;;  %v194_v10 = vld [vmem:[%s9717_s25 + $0x50] sm:$0xff]   ;;  %v198_v11 = vld [vmem:[%s9717_s25 + $0x58] sm:$0xff]  }
  0x14   : > { %167 = vst [vmem:[%s9722_s26 + $0x18] sm:$0xff] %v166_v3   ;;  %v202_v12 = vld [vmem:[%s9717_s25 + $0x60] sm:$0xff]   ;;  %v206_v13 = vld [vmem:[%s9717_s25 + $0x68] sm:$0xff]   ;;  %v210_v14 = vld [vmem:[%s9717_s25 + $0x70] sm:$0xff]  }
  0x15   : > { %171 = vst [vmem:[%s9722_s26 + $0x20] sm:$0xff] %v170_v4   ;;  %v214_v15 = vld [vmem:[%s9717_s25 + $0x78] sm:$0xff]   ;;  %v218_v16 = vld [vmem:[%s9717_s25 + $0x80] sm:$0xff]   ;;  %v222_v17 = vld [vmem:[%s9717_s25 + $0x88] sm:$0xff]  }
  0x16   : > { %175 = vst [vmem:[%s9722_s26 + $0x28] sm:$0xff] %v174_v5   ;;  %v226_v18 = vld [vmem:[%s9717_s25 + $0x90] sm:$0xff]   ;;  %v230_v19 = vld [vmem:[%s9717_s25 + $0x98] sm:$0xff]   ;;  %v234_v20 = vld [vmem:[%s9717_s25 + $0xa0] sm:$0xff]  }
  0x17   : > { %179 = vst [vmem:[%s9722_s26 + $0x30] sm:$0xff] %v178_v6   ;;  %v238_v21 = vld [vmem:[%s9717_s25 + $0xa8] sm:$0xff]   ;;  %v242_v22 = vld [vmem:[%s9717_s25 + $0xb0] sm:$0xff]   ;;  %v246_v23 = vld [vmem:[%s9717_s25 + $0xb8] sm:$0xff]  }
  0x18   : > { %183 = vst [vmem:[%s9722_s26 + $0x38] sm:$0xff] %v182_v7   ;;  %v250_v24 = vld [vmem:[%s9717_s25 + $0xc0] sm:$0xff]   ;;  %v254_v25 = vld [vmem:[%s9717_s25 + $0xc8] sm:$0xff]   ;;  %v258_v26 = vld [vmem:[%s9717_s25 + $0xd0] sm:$0xff]  }
  0x19   : > { %187 = vst [vmem:[%s9722_s26 + $0x40] sm:$0xff] %v186_v8   ;;  %v262_v27 = vld [vmem:[%s9717_s25 + $0xd8] sm:$0xff]   ;;  %v266_v28 = vld [vmem:[%s9717_s25 + $0xe0] sm:$0xff]   ;;  %v270_v29 = vld [vmem:[%s9717_s25 + $0xe8] sm:$0xff]  }
  0x1a   : > { %191 = vst [vmem:[%s9722_s26 + $0x48] sm:$0xff] %v190_v9   ;;  %v274_v30 = vld [vmem:[%s9717_s25 + $0xf0] sm:$0xff]   ;;  %v278_v31 = vld [vmem:[%s9717_s25 + $0xf8] sm:$0xff]   ;;  %v282_v32 = vld [vmem:[%s9717_s25 + $0x100] sm:$0xff]  }
  0x1b   : > { %195 = vst [vmem:[%s9722_s26 + $0x50] sm:$0xff] %v194_v10   ;;  %v286_v33 = vld [vmem:[%s9717_s25 + $0x108] sm:$0xff]   ;;  %v290_v34 = vld [vmem:[%s9717_s25 + $0x110] sm:$0xff]   ;;  %v294_v35 = vld [vmem:[%s9717_s25 + $0x118] sm:$0xff]  }
  0x1c   : > { %199 = vst [vmem:[%s9722_s26 + $0x58] sm:$0xff] %v198_v11   ;;  %v298_v36 = vld [vmem:[%s9717_s25 + $0x120] sm:$0xff]   ;;  %v302_v37 = vld [vmem:[%s9717_s25 + $0x128] sm:$0xff]   ;;  %v306_v38 = vld [vmem:[%s9717_s25 + $0x130] sm:$0xff]  }
  0x1d   : > { %203 = vst [vmem:[%s9722_s26 + $0x60] sm:$0xff] %v202_v12   ;;  %v310_v39 = vld [vmem:[%s9717_s25 + $0x138] sm:$0xff]   ;;  %v314_v40 = vld [vmem:[%s9717_s25 + $0x140] sm:$0xff]   ;;  %v318_v41 = vld [vmem:[%s9717_s25 + $0x148] sm:$0xff]  }
  0x1e   : > { %207 = vst [vmem:[%s9722_s26 + $0x68] sm:$0xff] %v206_v13   ;;  %v322_v42 = vld [vmem:[%s9717_s25 + $0x150] sm:$0xff]   ;;  %v326_v43 = vld [vmem:[%s9717_s25 + $0x158] sm:$0xff]   ;;  %v330_v44 = vld [vmem:[%s9717_s25 + $0x160] sm:$0xff]  }
  0x1f   : > { %211 = vst [vmem:[%s9722_s26 + $0x70] sm:$0xff] %v210_v14   ;;  %v334_v45 = vld [vmem:[%s9717_s25 + $0x168] sm:$0xff]   ;;  %v338_v46 = vld [vmem:[%s9717_s25 + $0x170] sm:$0xff]   ;;  %v342_v47 = vld [vmem:[%s9717_s25 + $0x178] sm:$0xff]  }
  0x20   : > { %215 = vst [vmem:[%s9722_s26 + $0x78] sm:$0xff] %v214_v15   ;;  %v346_v48 = vld [vmem:[%s9717_s25 + $0x180] sm:$0xff]   ;;  %v350_v49 = vld [vmem:[%s9717_s25 + $0x188] sm:$0xff]   ;;  %v354_v50 = vld [vmem:[%s9717_s25 + $0x190] sm:$0xff]  }
  0x21   : > { %219 = vst [vmem:[%s9722_s26 + $0x80] sm:$0xff] %v218_v16   ;;  %v358_v51 = vld [vmem:[%s9717_s25 + $0x198] sm:$0xff]   ;;  %v362_v52 = vld [vmem:[%s9717_s25 + $0x1a0] sm:$0xff]   ;;  %v366_v53 = vld [vmem:[%s9717_s25 + $0x1a8] sm:$0xff]  }
  0x22   : > { %223 = vst [vmem:[%s9722_s26 + $0x88] sm:$0xff] %v222_v17   ;;  %v370_v54 = vld [vmem:[%s9717_s25 + $0x1b0] sm:$0xff]   ;;  %v374_v55 = vld [vmem:[%s9717_s25 + $0x1b8] sm:$0xff]   ;;  %v378_v56 = vld [vmem:[%s9717_s25 + $0x1c0] sm:$0xff]  }
  0x23   : > { %227 = vst [vmem:[%s9722_s26 + $0x90] sm:$0xff] %v226_v18   ;;  %v382_v57 = vld [vmem:[%s9717_s25 + $0x390] sm:$0xff]   ;;  %v386_v58 = vld [vmem:[%s9717_s25 + $0x398] sm:$0xff]   ;;  %v390_v59 = vld [vmem:[%s9717_s25 + $0x3a0] sm:$0xff]  }
  0x24   : > { %231 = vst [vmem:[%s9722_s26 + $0x98] sm:$0xff] %v230_v19   ;;  %v394_v60 = vld [vmem:[%s9717_s25 + $0x3a8] sm:$0xff]   ;;  %v398_v61 = vld [vmem:[%s9717_s25 + $0x3b0] sm:$0xff]   ;;  %v402_v62 = vld [vmem:[%s9717_s25 + $0x3b8] sm:$0xff]  }
  0x25   : > { %235 = vst [vmem:[%s9722_s26 + $0xa0] sm:$0xff] %v234_v20   ;;  %v406_v63 = vld [vmem:[%s9717_s25 + $0x3c0] sm:$0xff]   ;;  %v410_v0 = vld [vmem:[%s9717_s25 + $0x3c8] sm:$0xff]   ;;  %v414_v1 = vld [vmem:[%s9717_s25 + $0x3d0] sm:$0xff]  }
  0x26   : > { %239 = vst [vmem:[%s9722_s26 + $0xa8] sm:$0xff] %v238_v21   ;;  %v418_v2 = vld [vmem:[%s9717_s25 + $0x3d8] sm:$0xff]   ;;  %v422_v3 = vld [vmem:[%s9717_s25 + $0x3e0] sm:$0xff]   ;;  %v426_v4 = vld [vmem:[%s9717_s25 + $0x3e8] sm:$0xff]  }
  0x27   : > { %243 = vst [vmem:[%s9722_s26 + $0xb0] sm:$0xff] %v242_v22   ;;  %v430_v5 = vld [vmem:[%s9717_s25 + $0x3f0] sm:$0xff]   ;;  %v434_v6 = vld [vmem:[%s9717_s25 + $0x3f8] sm:$0xff]   ;;  %v438_v7 = vld [vmem:[%s9717_s25 + $0x400] sm:$0xff]  }
  0x28   : > { %247 = vst [vmem:[%s9722_s26 + $0xb8] sm:$0xff] %v246_v23   ;;  %v442_v8 = vld [vmem:[%s9717_s25 + $0x408] sm:$0xff]   ;;  %v446_v9 = vld [vmem:[%s9717_s25 + $0x410] sm:$0xff]   ;;  %v450_v10 = vld [vmem:[%s9717_s25 + $0x418] sm:$0xff]  }
  0x29   : > { %251 = vst [vmem:[%s9722_s26 + $0xc0] sm:$0xff] %v250_v24   ;;  %v454_v11 = vld [vmem:[%s9717_s25 + $0x420] sm:$0xff]   ;;  %v458_v12 = vld [vmem:[%s9717_s25 + $0x428] sm:$0xff]   ;;  %v462_v13 = vld [vmem:[%s9717_s25 + $0x430] sm:$0xff]  }
  0x2a   : > { %255 = vst [vmem:[%s9722_s26 + $0xc8] sm:$0xff] %v254_v25   ;;  %v466_v14 = vld [vmem:[%s9717_s25 + $0x438] sm:$0xff]   ;;  %v470_v15 = vld [vmem:[%s9717_s25 + $0x440] sm:$0xff]   ;;  %v474_v16 = vld [vmem:[%s9717_s25 + $0x448] sm:$0xff]  }
  0x2b   : > { %259 = vst [vmem:[%s9722_s26 + $0xd0] sm:$0xff] %v258_v26   ;;  %v478_v17 = vld [vmem:[%s9717_s25 + $0x450] sm:$0xff]   ;;  %v482_v18 = vld [vmem:[%s9717_s25 + $0x458] sm:$0xff]   ;;  %v486_v19 = vld [vmem:[%s9717_s25 + $0x460] sm:$0xff]  }
  0x2c   : > { %263 = vst [vmem:[%s9722_s26 + $0xd8] sm:$0xff] %v262_v27   ;;  %v490_v20 = vld [vmem:[%s9717_s25 + $0x468] sm:$0xff]   ;;  %v494_v21 = vld [vmem:[%s9717_s25 + $0x470] sm:$0xff]   ;;  %v498_v22 = vld [vmem:[%s9717_s25 + $0x478] sm:$0xff]  }
  0x2d   : > { %267 = vst [vmem:[%s9722_s26 + $0xe0] sm:$0xff] %v266_v28   ;;  %v502_v23 = vld [vmem:[%s9717_s25 + $0x480] sm:$0xff]   ;;  %v506_v24 = vld [vmem:[%s9717_s25 + $0x488] sm:$0xff]   ;;  %v510_v25 = vld [vmem:[%s9717_s25 + $0x490] sm:$0xff]  }
  0x2e   : > { %271 = vst [vmem:[%s9722_s26 + $0xe8] sm:$0xff] %v270_v29   ;;  %v514_v26 = vld [vmem:[%s9717_s25 + $0x498] sm:$0xff]   ;;  %v518_v27 = vld [vmem:[%s9717_s25 + $0x4a0] sm:$0xff]   ;;  %v522_v28 = vld [vmem:[%s9717_s25 + $0x4a8] sm:$0xff]  }
  0x2f   : > { %275 = vst [vmem:[%s9722_s26 + $0xf0] sm:$0xff] %v274_v30   ;;  %v526_v29 = vld [vmem:[%s9717_s25 + $0x4b0] sm:$0xff]   ;;  %v530_v30 = vld [vmem:[%s9717_s25 + $0x4b8] sm:$0xff]  }
  0x30   : > { %279 = vst [vmem:[%s9722_s26 + $0xf8] sm:$0xff] %v278_v31   ;;  %v534_v31 = vld [vmem:[%s9717_s25 + $0x4c0] sm:$0xff]  }
  0x31   : > { %283 = vst [vmem:[%s9722_s26 + $0x100] sm:$0xff] %v282_v32   ;;  %v538_v32 = vld [vmem:[%s9717_s25 + $0x4c8] sm:$0xff]  }
  0x32   : > { %287 = vst [vmem:[%s9722_s26 + $0x108] sm:$0xff] %v286_v33   ;;  %v542_v33 = vld [vmem:[%s9717_s25 + $0x4d0] sm:$0xff]  }
  0x33   : > { %291 = vst [vmem:[%s9722_s26 + $0x110] sm:$0xff] %v290_v34   ;;  %v546_v34 = vld [vmem:[%s9717_s25 + $0x4d8] sm:$0xff]  }
  0x34   : > { %295 = vst [vmem:[%s9722_s26 + $0x118] sm:$0xff] %v294_v35   ;;  %v550_v35 = vld [vmem:[%s9717_s25 + $0x4e0] sm:$0xff]  }
  0x35   : > { %299 = vst [vmem:[%s9722_s26 + $0x120] sm:$0xff] %v298_v36   ;;  %v554_v36 = vld [vmem:[%s9717_s25 + $0x4e8] sm:$0xff]  }
  0x36   : > { %303 = vst [vmem:[%s9722_s26 + $0x128] sm:$0xff] %v302_v37   ;;  %v558_v37 = vld [vmem:[%s9717_s25 + $0x4f0] sm:$0xff]  }
  0x37   : > { %307 = vst [vmem:[%s9722_s26 + $0x130] sm:$0xff] %v306_v38   ;;  %v562_v38 = vld [vmem:[%s9717_s25 + $0x4f8] sm:$0xff]  }
  0x38   : > { %311 = vst [vmem:[%s9722_s26 + $0x138] sm:$0xff] %v310_v39   ;;  %v566_v39 = vld [vmem:[%s9717_s25 + $0x500] sm:$0xff]  }
  0x39   : > { %315 = vst [vmem:[%s9722_s26 + $0x140] sm:$0xff] %v314_v40   ;;  %v570_v40 = vld [vmem:[%s9717_s25 + $0x508] sm:$0xff]  }
  0x3a   : > { %319 = vst [vmem:[%s9722_s26 + $0x148] sm:$0xff] %v318_v41   ;;  %v574_v41 = vld [vmem:[%s9717_s25 + $0x510] sm:$0xff]  }
  0x3b   : > { %323 = vst [vmem:[%s9722_s26 + $0x150] sm:$0xff] %v322_v42   ;;  %v578_v42 = vld [vmem:[%s9717_s25 + $0x518] sm:$0xff]  }
  0x3c   : > { %327 = vst [vmem:[%s9722_s26 + $0x158] sm:$0xff] %v326_v43   ;;  %v582_v43 = vld [vmem:[%s9717_s25 + $0x520] sm:$0xff]  }
  0x3d   : > { %331 = vst [vmem:[%s9722_s26 + $0x160] sm:$0xff] %v330_v44   ;;  %v586_v44 = vld [vmem:[%s9717_s25 + $0x528] sm:$0xff]  }
  0x3e   : > { %335 = vst [vmem:[%s9722_s26 + $0x168] sm:$0xff] %v334_v45   ;;  %v590_v45 = vld [vmem:[%s9717_s25 + $0x530] sm:$0xff]  }
  0x3f   : > { %339 = vst [vmem:[%s9722_s26 + $0x170] sm:$0xff] %v338_v46   ;;  %v594_v46 = vld [vmem:[%s9717_s25 + $0x538] sm:$0xff]  }
  0x40   : > { %343 = vst [vmem:[%s9722_s26 + $0x178] sm:$0xff] %v342_v47   ;;  %v598_v47 = vld [vmem:[%s9717_s25 + $0x540] sm:$0xff]  }
  0x41   : > { %347 = vst [vmem:[%s9722_s26 + $0x180] sm:$0xff] %v346_v48   ;;  %v602_v48 = vld [vmem:[%s9717_s25 + $0x548] sm:$0xff]  }
  0x42   : > { %351 = vst [vmem:[%s9722_s26 + $0x188] sm:$0xff] %v350_v49   ;;  %v606_v49 = vld [vmem:[%s9717_s25 + $0x550] sm:$0xff]  }
  0x43   : > { %355 = vst [vmem:[%s9722_s26 + $0x190] sm:$0xff] %v354_v50   ;;  %v610_v50 = vld [vmem:[%s9717_s25 + $0x720] sm:$0xff]  }
  0x44   : > { %359 = vst [vmem:[%s9722_s26 + $0x198] sm:$0xff] %v358_v51   ;;  %v614_v51 = vld [vmem:[%s9717_s25 + $0x728] sm:$0xff]  }
  0x45   : > { %363 = vst [vmem:[%s9722_s26 + $0x1a0] sm:$0xff] %v362_v52   ;;  %v618_v52 = vld [vmem:[%s9717_s25 + $0x730] sm:$0xff]  }
  0x46   : > { %367 = vst [vmem:[%s9722_s26 + $0x1a8] sm:$0xff] %v366_v53   ;;  %v622_v53 = vld [vmem:[%s9717_s25 + $0x738] sm:$0xff]  }
  0x47   : > { %371 = vst [vmem:[%s9722_s26 + $0x1b0] sm:$0xff] %v370_v54   ;;  %v626_v54 = vld [vmem:[%s9717_s25 + $0x740] sm:$0xff]  }
  0x48   : > { %375 = vst [vmem:[%s9722_s26 + $0x1b8] sm:$0xff] %v374_v55   ;;  %v630_v55 = vld [vmem:[%s9717_s25 + $0x748] sm:$0xff]  }
  0x49   : > { %379 = vst [vmem:[%s9722_s26 + $0x1c0] sm:$0xff] %v378_v56   ;;  %v634_v56 = vld [vmem:[%s9717_s25 + $0x750] sm:$0xff]  }
  0x4a   : > { %383 = vst [vmem:[%s9722_s26 + $0x1c8] sm:$0xff] %v382_v57   ;;  %v638_v57 = vld [vmem:[%s9717_s25 + $0x758] sm:$0xff]  }
  0x4b   : > { %387 = vst [vmem:[%s9722_s26 + $0x1d0] sm:$0xff] %v386_v58   ;;  %v642_v58 = vld [vmem:[%s9717_s25 + $0x760] sm:$0xff]  }
  0x4c   : > { %391 = vst [vmem:[%s9722_s26 + $0x1d8] sm:$0xff] %v390_v59   ;;  %v646_v59 = vld [vmem:[%s9717_s25 + $0x768] sm:$0xff]  }
  0x4d   : > { %395 = vst [vmem:[%s9722_s26 + $0x1e0] sm:$0xff] %v394_v60   ;;  %v650_v60 = vld [vmem:[%s9717_s25 + $0x770] sm:$0xff]  }
  0x4e   : > { %399 = vst [vmem:[%s9722_s26 + $0x1e8] sm:$0xff] %v398_v61   ;;  %v654_v61 = vld [vmem:[%s9717_s25 + $0x778] sm:$0xff]  }
  0x4f   : > { %403 = vst [vmem:[%s9722_s26 + $0x1f0] sm:$0xff] %v402_v62   ;;  %v658_v62 = vld [vmem:[%s9717_s25 + $0x780] sm:$0xff]  }
  0x50   : > { %407 = vst [vmem:[%s9722_s26 + $0x1f8] sm:$0xff] %v406_v63   ;;  %v662_v63 = vld [vmem:[%s9717_s25 + $0x788] sm:$0xff]  }
  0x51   : > { %411 = vst [vmem:[%s9722_s26 + $0x200] sm:$0xff] %v410_v0   ;;  %v666_v0 = vld [vmem:[%s9717_s25 + $0x790] sm:$0xff]  }
  0x52   : > { %415 = vst [vmem:[%s9722_s26 + $0x208] sm:$0xff] %v414_v1   ;;  %v670_v1 = vld [vmem:[%s9717_s25 + $0x798] sm:$0xff]  }
  0x53   : > { %419 = vst [vmem:[%s9722_s26 + $0x210] sm:$0xff] %v418_v2   ;;  %v674_v2 = vld [vmem:[%s9717_s25 + $0x7a0] sm:$0xff]  }
  0x54   : > { %423 = vst [vmem:[%s9722_s26 + $0x218] sm:$0xff] %v422_v3   ;;  %v678_v3 = vld [vmem:[%s9717_s25 + $0x7a8] sm:$0xff]  }
  0x55   : > { %427 = vst [vmem:[%s9722_s26 + $0x220] sm:$0xff] %v426_v4   ;;  %v682_v4 = vld [vmem:[%s9717_s25 + $0x7b0] sm:$0xff]  }
  0x56   : > { %431 = vst [vmem:[%s9722_s26 + $0x228] sm:$0xff] %v430_v5   ;;  %v686_v5 = vld [vmem:[%s9717_s25 + $0x7b8] sm:$0xff]  }
  0x57   : > { %435 = vst [vmem:[%s9722_s26 + $0x230] sm:$0xff] %v434_v6   ;;  %v690_v6 = vld [vmem:[%s9717_s25 + $0x7c0] sm:$0xff]  }
  0x58   : > { %439 = vst [vmem:[%s9722_s26 + $0x238] sm:$0xff] %v438_v7   ;;  %v694_v7 = vld [vmem:[%s9717_s25 + $0x7c8] sm:$0xff]  }
  0x59   : > { %443 = vst [vmem:[%s9722_s26 + $0x240] sm:$0xff] %v442_v8   ;;  %v698_v8 = vld [vmem:[%s9717_s25 + $0x7d0] sm:$0xff]  }
  0x5a   : > { %447 = vst [vmem:[%s9722_s26 + $0x248] sm:$0xff] %v446_v9   ;;  %v702_v9 = vld [vmem:[%s9717_s25 + $0x7d8] sm:$0xff]  }
  0x5b   : > { %451 = vst [vmem:[%s9722_s26 + $0x250] sm:$0xff] %v450_v10   ;;  %v706_v10 = vld [vmem:[%s9717_s25 + $0x7e0] sm:$0xff]  }
  0x5c   : > { %455 = vst [vmem:[%s9722_s26 + $0x258] sm:$0xff] %v454_v11   ;;  %v710_v11 = vld [vmem:[%s9717_s25 + $0x7e8] sm:$0xff]  }
  0x5d   : > { %459 = vst [vmem:[%s9722_s26 + $0x260] sm:$0xff] %v458_v12   ;;  %v714_v12 = vld [vmem:[%s9717_s25 + $0x7f0] sm:$0xff]  }
  0x5e   : > { %463 = vst [vmem:[%s9722_s26 + $0x268] sm:$0xff] %v462_v13   ;;  %v718_v13 = vld [vmem:[%s9717_s25 + $0x7f8] sm:$0xff]  }
  0x5f   : > { %467 = vst [vmem:[%s9722_s26 + $0x270] sm:$0xff] %v466_v14   ;;  %v722_v14 = vld [vmem:[%s9717_s25 + $0x800] sm:$0xff]  }
  0x60   : > { %471 = vst [vmem:[%s9722_s26 + $0x278] sm:$0xff] %v470_v15   ;;  %v726_v15 = vld [vmem:[%s9717_s25 + $0x808] sm:$0xff]  }
  0x61   : > { %475 = vst [vmem:[%s9722_s26 + $0x280] sm:$0xff] %v474_v16   ;;  %v730_v16 = vld [vmem:[%s9717_s25 + $0x810] sm:$0xff]  }
  0x62   : > { %479 = vst [vmem:[%s9722_s26 + $0x288] sm:$0xff] %v478_v17   ;;  %v734_v17 = vld [vmem:[%s9717_s25 + $0x818] sm:$0xff]  }
  0x63   : > { %483 = vst [vmem:[%s9722_s26 + $0x290] sm:$0xff] %v482_v18   ;;  %v738_v18 = vld [vmem:[%s9717_s25 + $0x820] sm:$0xff]  }
  0x64   : > { %487 = vst [vmem:[%s9722_s26 + $0x298] sm:$0xff] %v486_v19   ;;  %v742_v19 = vld [vmem:[%s9717_s25 + $0x828] sm:$0xff]  }
  0x65   : > { %491 = vst [vmem:[%s9722_s26 + $0x2a0] sm:$0xff] %v490_v20   ;;  %v746_v20 = vld [vmem:[%s9717_s25 + $0x830] sm:$0xff]  }
  0x66   : > { %495 = vst [vmem:[%s9722_s26 + $0x2a8] sm:$0xff] %v494_v21   ;;  %v750_v21 = vld [vmem:[%s9717_s25 + $0x838] sm:$0xff]  }
  0x67   : > { %499 = vst [vmem:[%s9722_s26 + $0x2b0] sm:$0xff] %v498_v22   ;;  %v754_v22 = vld [vmem:[%s9717_s25 + $0x840] sm:$0xff]  }
  0x68   : > { %503 = vst [vmem:[%s9722_s26 + $0x2b8] sm:$0xff] %v502_v23   ;;  %v758_v23 = vld [vmem:[%s9717_s25 + $0x848] sm:$0xff]  }
  0x69   : > { %507 = vst [vmem:[%s9722_s26 + $0x2c0] sm:$0xff] %v506_v24   ;;  %v762_v24 = vld [vmem:[%s9717_s25 + $0x850] sm:$0xff]  }
  0x6a   : > { %511 = vst [vmem:[%s9722_s26 + $0x2c8] sm:$0xff] %v510_v25   ;;  %v766_v25 = vld [vmem:[%s9717_s25 + $0x858] sm:$0xff]  }
  0x6b   : > { %515 = vst [vmem:[%s9722_s26 + $0x2d0] sm:$0xff] %v514_v26   ;;  %v770_v26 = vld [vmem:[%s9717_s25 + $0x860] sm:$0xff]  }
  0x6c   : > { %519 = vst [vmem:[%s9722_s26 + $0x2d8] sm:$0xff] %v518_v27   ;;  %v774_v27 = vld [vmem:[%s9717_s25 + $0x868] sm:$0xff]  }
  0x6d   : > { %523 = vst [vmem:[%s9722_s26 + $0x2e0] sm:$0xff] %v522_v28   ;;  %v778_v28 = vld [vmem:[%s9717_s25 + $0x870] sm:$0xff]  }
  0x6e   : > { %527 = vst [vmem:[%s9722_s26 + $0x2e8] sm:$0xff] %v526_v29   ;;  %v782_v29 = vld [vmem:[%s9717_s25 + $0x878] sm:$0xff]  }
  0x6f   : > { %531 = vst [vmem:[%s9722_s26 + $0x2f0] sm:$0xff] %v530_v30   ;;  %v786_v30 = vld [vmem:[%s9717_s25 + $0x880] sm:$0xff]  }
  0x70   : > { %535 = vst [vmem:[%s9722_s26 + $0x2f8] sm:$0xff] %v534_v31   ;;  %v790_v31 = vld [vmem:[%s9717_s25 + $0x888] sm:$0xff]  }
  0x71   : > { %539 = vst [vmem:[%s9722_s26 + $0x300] sm:$0xff] %v538_v32   ;;  %v794_v32 = vld [vmem:[%s9717_s25 + $0x890] sm:$0xff]  }
  0x72   : > { %543 = vst [vmem:[%s9722_s26 + $0x308] sm:$0xff] %v542_v33   ;;  %v798_v33 = vld [vmem:[%s9717_s25 + $0x898] sm:$0xff]  }
  0x73   : > { %547 = vst [vmem:[%s9722_s26 + $0x310] sm:$0xff] %v546_v34   ;;  %v802_v34 = vld [vmem:[%s9717_s25 + $0x8a0] sm:$0xff]  }
  0x74   : > { %551 = vst [vmem:[%s9722_s26 + $0x318] sm:$0xff] %v550_v35   ;;  %v806_v35 = vld [vmem:[%s9717_s25 + $0x8a8] sm:$0xff]  }
  0x75   : > { %555 = vst [vmem:[%s9722_s26 + $0x320] sm:$0xff] %v554_v36   ;;  %v810_v36 = vld [vmem:[%s9717_s25 + $0x8b0] sm:$0xff]  }
  0x76   : > { %559 = vst [vmem:[%s9722_s26 + $0x328] sm:$0xff] %v558_v37   ;;  %v814_v37 = vld [vmem:[%s9717_s25 + $0x8b8] sm:$0xff]  }
  0x77   : > { %563 = vst [vmem:[%s9722_s26 + $0x330] sm:$0xff] %v562_v38   ;;  %v818_v38 = vld [vmem:[%s9717_s25 + $0x8c0] sm:$0xff]  }
  0x78   : > { %567 = vst [vmem:[%s9722_s26 + $0x338] sm:$0xff] %v566_v39   ;;  %v822_v39 = vld [vmem:[%s9717_s25 + $0x8c8] sm:$0xff]  }
  0x79   : > { %571 = vst [vmem:[%s9722_s26 + $0x340] sm:$0xff] %v570_v40   ;;  %v826_v40 = vld [vmem:[%s9717_s25 + $0x8d0] sm:$0xff]  }
  0x7a   : > { %575 = vst [vmem:[%s9722_s26 + $0x348] sm:$0xff] %v574_v41   ;;  %v830_v41 = vld [vmem:[%s9717_s25 + $0x8d8] sm:$0xff]  }
  0x7b   : > { %579 = vst [vmem:[%s9722_s26 + $0x350] sm:$0xff] %v578_v42   ;;  %v834_v42 = vld [vmem:[%s9717_s25 + $0x8e0] sm:$0xff]  }
  0x7c   : > { %583 = vst [vmem:[%s9722_s26 + $0x358] sm:$0xff] %v582_v43   ;;  %v838_v43 = vld [vmem:[%s9717_s25 + $0xab0] sm:$0xff]  }
  0x7d   : > { %587 = vst [vmem:[%s9722_s26 + $0x360] sm:$0xff] %v586_v44   ;;  %v842_v44 = vld [vmem:[%s9717_s25 + $0xab8] sm:$0xff]  }
  0x7e   : > { %591 = vst [vmem:[%s9722_s26 + $0x368] sm:$0xff] %v590_v45   ;;  %v846_v45 = vld [vmem:[%s9717_s25 + $0xac0] sm:$0xff]  }
  0x7f   : > { %595 = vst [vmem:[%s9722_s26 + $0x370] sm:$0xff] %v594_v46   ;;  %v850_v46 = vld [vmem:[%s9717_s25 + $0xac8] sm:$0xff]  }
  0x80   : > { %599 = vst [vmem:[%s9722_s26 + $0x378] sm:$0xff] %v598_v47   ;;  %v854_v47 = vld [vmem:[%s9717_s25 + $0xad0] sm:$0xff]  }
  0x81   : > { %603 = vst [vmem:[%s9722_s26 + $0x380] sm:$0xff] %v602_v48   ;;  %v858_v48 = vld [vmem:[%s9717_s25 + $0xad8] sm:$0xff]  }
  0x82   : > { %607 = vst [vmem:[%s9722_s26 + $0x388] sm:$0xff] %v606_v49   ;;  %v862_v49 = vld [vmem:[%s9717_s25 + $0xae0] sm:$0xff]  }
  0x83   : > { %611 = vst [vmem:[%s9722_s26 + $0x390] sm:$0xff] %v610_v50   ;;  %v866_v50 = vld [vmem:[%s9717_s25 + $0xae8] sm:$0xff]  }
  0x84   : > { %615 = vst [vmem:[%s9722_s26 + $0x398] sm:$0xff] %v614_v51   ;;  %v870_v51 = vld [vmem:[%s9717_s25 + $0xaf0] sm:$0xff]  }
  0x85   : > { %619 = vst [vmem:[%s9722_s26 + $0x3a0] sm:$0xff] %v618_v52   ;;  %v874_v52 = vld [vmem:[%s9717_s25 + $0xaf8] sm:$0xff]  }
  0x86   : > { %623 = vst [vmem:[%s9722_s26 + $0x3a8] sm:$0xff] %v622_v53   ;;  %v878_v53 = vld [vmem:[%s9717_s25 + $0xb00] sm:$0xff]  }
  0x87   : > { %627 = vst [vmem:[%s9722_s26 + $0x3b0] sm:$0xff] %v626_v54   ;;  %v882_v54 = vld [vmem:[%s9717_s25 + $0xb08] sm:$0xff]  }
  0x88   : > { %631 = vst [vmem:[%s9722_s26 + $0x3b8] sm:$0xff] %v630_v55   ;;  %v886_v55 = vld [vmem:[%s9717_s25 + $0xb10] sm:$0xff]  }
  0x89   : > { %635 = vst [vmem:[%s9722_s26 + $0x3c0] sm:$0xff] %v634_v56   ;;  %v890_v56 = vld [vmem:[%s9717_s25 + $0xb18] sm:$0xff]  }
  0x8a   : > { %639 = vst [vmem:[%s9722_s26 + $0x3c8] sm:$0xff] %v638_v57   ;;  %v894_v57 = vld [vmem:[%s9717_s25 + $0xb20] sm:$0xff]  }
  0x8b   : > { %643 = vst [vmem:[%s9722_s26 + $0x3d0] sm:$0xff] %v642_v58   ;;  %v898_v58 = vld [vmem:[%s9717_s25 + $0xb28] sm:$0xff]  }
  0x8c   : > { %647 = vst [vmem:[%s9722_s26 + $0x3d8] sm:$0xff] %v646_v59   ;;  %v902_v59 = vld [vmem:[%s9717_s25 + $0xb30] sm:$0xff]  }
  0x8d   : > { %651 = vst [vmem:[%s9722_s26 + $0x3e0] sm:$0xff] %v650_v60   ;;  %v906_v60 = vld [vmem:[%s9717_s25 + $0xb38] sm:$0xff]  }
  0x8e   : > { %655 = vst [vmem:[%s9722_s26 + $0x3e8] sm:$0xff] %v654_v61   ;;  %v910_v61 = vld [vmem:[%s9717_s25 + $0xb40] sm:$0xff]  }
  0x8f   : > { %659 = vst [vmem:[%s9722_s26 + $0x3f0] sm:$0xff] %v658_v62   ;;  %v914_v62 = vld [vmem:[%s9717_s25 + $0xb48] sm:$0xff]  }
  0x90   : > { %663 = vst [vmem:[%s9722_s26 + $0x3f8] sm:$0xff] %v662_v63   ;;  %v918_v63 = vld [vmem:[%s9717_s25 + $0xb50] sm:$0xff]  }
  0x91   : > { %667 = vst [vmem:[%s9722_s26 + $0x400] sm:$0xff] %v666_v0   ;;  %v922_v0 = vld [vmem:[%s9717_s25 + $0xb58] sm:$0xff]  }
  0x92   : > { %671 = vst [vmem:[%s9722_s26 + $0x408] sm:$0xff] %v670_v1   ;;  %v926_v1 = vld [vmem:[%s9717_s25 + $0xb60] sm:$0xff]  }
  0x93   : > { %675 = vst [vmem:[%s9722_s26 + $0x410] sm:$0xff] %v674_v2   ;;  %v930_v2 = vld [vmem:[%s9717_s25 + $0xb68] sm:$0xff]  }
  0x94   : > { %679 = vst [vmem:[%s9722_s26 + $0x418] sm:$0xff] %v678_v3   ;;  %v934_v3 = vld [vmem:[%s9717_s25 + $0xb70] sm:$0xff]  }
  0x95   : > { %683 = vst [vmem:[%s9722_s26 + $0x420] sm:$0xff] %v682_v4   ;;  %v938_v4 = vld [vmem:[%s9717_s25 + $0xb78] sm:$0xff]  }
  0x96   : > { %687 = vst [vmem:[%s9722_s26 + $0x428] sm:$0xff] %v686_v5   ;;  %v942_v5 = vld [vmem:[%s9717_s25 + $0xb80] sm:$0xff]  }
  0x97   : > { %691 = vst [vmem:[%s9722_s26 + $0x430] sm:$0xff] %v690_v6   ;;  %v946_v6 = vld [vmem:[%s9717_s25 + $0xb88] sm:$0xff]  }
  0x98   : > { %695 = vst [vmem:[%s9722_s26 + $0x438] sm:$0xff] %v694_v7   ;;  %v950_v7 = vld [vmem:[%s9717_s25 + $0xb90] sm:$0xff]  }
  0x99   : > { %699 = vst [vmem:[%s9722_s26 + $0x440] sm:$0xff] %v698_v8   ;;  %v954_v8 = vld [vmem:[%s9717_s25 + $0xb98] sm:$0xff]  }
  0x9a   : > { %703 = vst [vmem:[%s9722_s26 + $0x448] sm:$0xff] %v702_v9   ;;  %v958_v9 = vld [vmem:[%s9717_s25 + $0xba0] sm:$0xff]  }
  0x9b   : > { %707 = vst [vmem:[%s9722_s26 + $0x450] sm:$0xff] %v706_v10   ;;  %v962_v10 = vld [vmem:[%s9717_s25 + $0xba8] sm:$0xff]  }
  0x9c   : > { %711 = vst [vmem:[%s9722_s26 + $0x458] sm:$0xff] %v710_v11   ;;  %v966_v11 = vld [vmem:[%s9717_s25 + $0xbb0] sm:$0xff]  }
  0x9d   : > { %715 = vst [vmem:[%s9722_s26 + $0x460] sm:$0xff] %v714_v12   ;;  %v970_v12 = vld [vmem:[%s9717_s25 + $0xbb8] sm:$0xff]  }
  0x9e   : > { %719 = vst [vmem:[%s9722_s26 + $0x468] sm:$0xff] %v718_v13   ;;  %v974_v13 = vld [vmem:[%s9717_s25 + $0xbc0] sm:$0xff]  }
  0x9f   : > { %723 = vst [vmem:[%s9722_s26 + $0x470] sm:$0xff] %v722_v14   ;;  %v978_v14 = vld [vmem:[%s9717_s25 + $0xbc8] sm:$0xff]  }
  0xa0   : > { %727 = vst [vmem:[%s9722_s26 + $0x478] sm:$0xff] %v726_v15   ;;  %v982_v15 = vld [vmem:[%s9717_s25 + $0xbd0] sm:$0xff]  }
  0xa1   : > { %731 = vst [vmem:[%s9722_s26 + $0x480] sm:$0xff] %v730_v16   ;;  %v986_v16 = vld [vmem:[%s9717_s25 + $0xbd8] sm:$0xff]  }
  0xa2   : > { %735 = vst [vmem:[%s9722_s26 + $0x488] sm:$0xff] %v734_v17   ;;  %v990_v17 = vld [vmem:[%s9717_s25 + $0xbe0] sm:$0xff]  }
  0xa3   : > { %739 = vst [vmem:[%s9722_s26 + $0x490] sm:$0xff] %v738_v18   ;;  %v994_v18 = vld [vmem:[%s9717_s25 + $0xbe8] sm:$0xff]  }
  0xa4   : > { %743 = vst [vmem:[%s9722_s26 + $0x498] sm:$0xff] %v742_v19   ;;  %v998_v19 = vld [vmem:[%s9717_s25 + $0xbf0] sm:$0xff]  }
  0xa5   : > { %747 = vst [vmem:[%s9722_s26 + $0x4a0] sm:$0xff] %v746_v20   ;;  %v1002_v20 = vld [vmem:[%s9717_s25 + $0xbf8] sm:$0xff]  }
  0xa6   : > { %751 = vst [vmem:[%s9722_s26 + $0x4a8] sm:$0xff] %v750_v21   ;;  %v1006_v21 = vld [vmem:[%s9717_s25 + $0xc00] sm:$0xff]  }
  0xa7   : > { %755 = vst [vmem:[%s9722_s26 + $0x4b0] sm:$0xff] %v754_v22   ;;  %v1010_v22 = vld [vmem:[%s9717_s25 + $0xc08] sm:$0xff]  }
  0xa8   : > { %759 = vst [vmem:[%s9722_s26 + $0x4b8] sm:$0xff] %v758_v23   ;;  %v1014_v23 = vld [vmem:[%s9717_s25 + $0xc10] sm:$0xff]  }
  0xa9   : > { %763 = vst [vmem:[%s9722_s26 + $0x4c0] sm:$0xff] %v762_v24   ;;  %v1018_v24 = vld [vmem:[%s9717_s25 + $0xc18] sm:$0xff]  }
  0xaa   : > { %767 = vst [vmem:[%s9722_s26 + $0x4c8] sm:$0xff] %v766_v25   ;;  %v1022_v25 = vld [vmem:[%s9717_s25 + $0xc20] sm:$0xff]  }
  0xab   : > { %771 = vst [vmem:[%s9722_s26 + $0x4d0] sm:$0xff] %v770_v26   ;;  %v1026_v26 = vld [vmem:[%s9717_s25 + $0xc28] sm:$0xff]  }
  0xac   : > { %775 = vst [vmem:[%s9722_s26 + $0x4d8] sm:$0xff] %v774_v27   ;;  %v1030_v27 = vld [vmem:[%s9717_s25 + $0xc30] sm:$0xff]  }
  0xad   : > { %779 = vst [vmem:[%s9722_s26 + $0x4e0] sm:$0xff] %v778_v28   ;;  %v1034_v28 = vld [vmem:[%s9717_s25 + $0xc38] sm:$0xff]  }
  0xae   : > { %783 = vst [vmem:[%s9722_s26 + $0x4e8] sm:$0xff] %v782_v29   ;;  %v1038_v29 = vld [vmem:[%s9717_s25 + $0xc40] sm:$0xff]  }
  0xaf   : > { %787 = vst [vmem:[%s9722_s26 + $0x4f0] sm:$0xff] %v786_v30   ;;  %v1042_v30 = vld [vmem:[%s9717_s25 + $0xc48] sm:$0xff]  }
  0xb0   : > { %791 = vst [vmem:[%s9722_s26 + $0x4f8] sm:$0xff] %v790_v31   ;;  %v1046_v31 = vld [vmem:[%s9717_s25 + $0xc50] sm:$0xff]  }
  0xb1   : > { %795 = vst [vmem:[%s9722_s26 + $0x500] sm:$0xff] %v794_v32   ;;  %v1050_v32 = vld [vmem:[%s9717_s25 + $0xc58] sm:$0xff]  }
  0xb2   : > { %799 = vst [vmem:[%s9722_s26 + $0x508] sm:$0xff] %v798_v33   ;;  %v1054_v33 = vld [vmem:[%s9717_s25 + $0xc60] sm:$0xff]  }
  0xb3   : > { %803 = vst [vmem:[%s9722_s26 + $0x510] sm:$0xff] %v802_v34   ;;  %v1058_v34 = vld [vmem:[%s9717_s25 + $0xc68] sm:$0xff]  }
  0xb4   : > { %807 = vst [vmem:[%s9722_s26 + $0x518] sm:$0xff] %v806_v35   ;;  %v1062_v35 = vld [vmem:[%s9717_s25 + $0xc70] sm:$0xff]  }
  0xb5   : > { %811 = vst [vmem:[%s9722_s26 + $0x520] sm:$0xff] %v810_v36  }
  0xb6   : > { %815 = vst [vmem:[%s9722_s26 + $0x528] sm:$0xff] %v814_v37  }
  0xb7   : > { %819 = vst [vmem:[%s9722_s26 + $0x530] sm:$0xff] %v818_v38  }
  0xb8   : > { %823 = vst [vmem:[%s9722_s26 + $0x538] sm:$0xff] %v822_v39  }
  0xb9   : > { %827 = vst [vmem:[%s9722_s26 + $0x540] sm:$0xff] %v826_v40  }
  0xba   : > { %831 = vst [vmem:[%s9722_s26 + $0x548] sm:$0xff] %v830_v41  }
  0xbb   : > { %835 = vst [vmem:[%s9722_s26 + $0x550] sm:$0xff] %v834_v42  }
  0xbc   : > { %839 = vst [vmem:[%s9722_s26 + $0x558] sm:$0xff] %v838_v43  }
  0xbd   : > { %843 = vst [vmem:[%s9722_s26 + $0x560] sm:$0xff] %v842_v44  }
  0xbe   : > { %847 = vst [vmem:[%s9722_s26 + $0x568] sm:$0xff] %v846_v45  }
  0xbf   : > { %851 = vst [vmem:[%s9722_s26 + $0x570] sm:$0xff] %v850_v46  }
  0xc0   : > { %855 = vst [vmem:[%s9722_s26 + $0x578] sm:$0xff] %v854_v47  }
  0xc1   : > { %859 = vst [vmem:[%s9722_s26 + $0x580] sm:$0xff] %v858_v48  }
  0xc2   : > { %863 = vst [vmem:[%s9722_s26 + $0x588] sm:$0xff] %v862_v49  }
  0xc3   : > { %867 = vst [vmem:[%s9722_s26 + $0x590] sm:$0xff] %v866_v50  }
  0xc4   : > { %871 = vst [vmem:[%s9722_s26 + $0x598] sm:$0xff] %v870_v51  }
  0xc5   : > { %875 = vst [vmem:[%s9722_s26 + $0x5a0] sm:$0xff] %v874_v52  }
  0xc6   : > { %879 = vst [vmem:[%s9722_s26 + $0x5a8] sm:$0xff] %v878_v53  }
  0xc7   : > { %883 = vst [vmem:[%s9722_s26 + $0x5b0] sm:$0xff] %v882_v54  }
  0xc8   : > { %887 = vst [vmem:[%s9722_s26 + $0x5b8] sm:$0xff] %v886_v55  }
  0xc9   : > { %891 = vst [vmem:[%s9722_s26 + $0x5c0] sm:$0xff] %v890_v56  }
  0xca   : > { %895 = vst [vmem:[%s9722_s26 + $0x5c8] sm:$0xff] %v894_v57  }
  0xcb   : > { %899 = vst [vmem:[%s9722_s26 + $0x5d0] sm:$0xff] %v898_v58  }
  0xcc   : > { %903 = vst [vmem:[%s9722_s26 + $0x5d8] sm:$0xff] %v902_v59  }
  0xcd   : > { %907 = vst [vmem:[%s9722_s26 + $0x5e0] sm:$0xff] %v906_v60  }
  0xce   : > { %911 = vst [vmem:[%s9722_s26 + $0x5e8] sm:$0xff] %v910_v61  }
  0xcf   : > { %915 = vst [vmem:[%s9722_s26 + $0x5f0] sm:$0xff] %v914_v62  }
  0xd0   : > { %919 = vst [vmem:[%s9722_s26 + $0x5f8] sm:$0xff] %v918_v63  }
  0xd1   : > { %923 = vst [vmem:[%s9722_s26 + $0x600] sm:$0xff] %v922_v0  }
  0xd2   : > { %927 = vst [vmem:[%s9722_s26 + $0x608] sm:$0xff] %v926_v1  }
  0xd3   : > { %931 = vst [vmem:[%s9722_s26 + $0x610] sm:$0xff] %v930_v2  }
  0xd4   : > { %935 = vst [vmem:[%s9722_s26 + $0x618] sm:$0xff] %v934_v3  }
  0xd5   : > { %939 = vst [vmem:[%s9722_s26 + $0x620] sm:$0xff] %v938_v4  }
  0xd6   : > { %943 = vst [vmem:[%s9722_s26 + $0x628] sm:$0xff] %v942_v5  }
  0xd7   : > { %947 = vst [vmem:[%s9722_s26 + $0x630] sm:$0xff] %v946_v6  }
  0xd8   : > { %951 = vst [vmem:[%s9722_s26 + $0x638] sm:$0xff] %v950_v7  }
  0xd9   : > { %955 = vst [vmem:[%s9722_s26 + $0x640] sm:$0xff] %v954_v8  }
  0xda   : > { %959 = vst [vmem:[%s9722_s26 + $0x648] sm:$0xff] %v958_v9  }
  0xdb   : > { %963 = vst [vmem:[%s9722_s26 + $0x650] sm:$0xff] %v962_v10  }
  0xdc   : > { %967 = vst [vmem:[%s9722_s26 + $0x658] sm:$0xff] %v966_v11  }
  0xdd   : > { %971 = vst [vmem:[%s9722_s26 + $0x660] sm:$0xff] %v970_v12  }
  0xde   : > { %975 = vst [vmem:[%s9722_s26 + $0x668] sm:$0xff] %v974_v13  }
  0xdf   : > { %979 = vst [vmem:[%s9722_s26 + $0x670] sm:$0xff] %v978_v14  }
  0xe0   : > { %983 = vst [vmem:[%s9722_s26 + $0x678] sm:$0xff] %v982_v15  }
  0xe1   : > { %987 = vst [vmem:[%s9722_s26 + $0x680] sm:$0xff] %v986_v16  }
  0xe2   : > { %991 = vst [vmem:[%s9722_s26 + $0x688] sm:$0xff] %v990_v17  }
  0xe3   : > { %995 = vst [vmem:[%s9722_s26 + $0x690] sm:$0xff] %v994_v18  }
  0xe4   : > { %999 = vst [vmem:[%s9722_s26 + $0x698] sm:$0xff] %v998_v19  }
  0xe5   : > { %1003 = vst [vmem:[%s9722_s26 + $0x6a0] sm:$0xff] %v1002_v20  }
  0xe6   : > { %1007 = vst [vmem:[%s9722_s26 + $0x6a8] sm:$0xff] %v1006_v21  }
  0xe7   : > { %1011 = vst [vmem:[%s9722_s26 + $0x6b0] sm:$0xff] %v1010_v22  }
  0xe8   : > { %1015 = vst [vmem:[%s9722_s26 + $0x6b8] sm:$0xff] %v1014_v23  }
  0xe9   : > { %1019 = vst [vmem:[%s9722_s26 + $0x6c0] sm:$0xff] %v1018_v24  }
  0xea   : > { %1023 = vst [vmem:[%s9722_s26 + $0x6c8] sm:$0xff] %v1022_v25  }
  0xeb   : > { %1027 = vst [vmem:[%s9722_s26 + $0x6d0] sm:$0xff] %v1026_v26  }
  0xec   : > { %1031 = vst [vmem:[%s9722_s26 + $0x6d8] sm:$0xff] %v1030_v27  }
  0xed   : > { %1035 = vst [vmem:[%s9722_s26 + $0x6e0] sm:$0xff] %v1034_v28  }
  0xee   : > { %1039 = vst [vmem:[%s9722_s26 + $0x6e8] sm:$0xff] %v1038_v29  }
  0xef   : > { %1043 = vst [vmem:[%s9722_s26 + $0x6f0] sm:$0xff] %v1042_v30  }
  0xf0   : > { %1047 = vst [vmem:[%s9722_s26 + $0x6f8] sm:$0xff] %v1046_v31  }
  0xf1   : > { %1051 = vst [vmem:[%s9722_s26 + $0x700] sm:$0xff] %v1050_v32  }
  0xf2   : > { %1055 = vst [vmem:[%s9722_s26 + $0x708] sm:$0xff] %v1054_v33  }
  0xf3   : > { %1059 = vst [vmem:[%s9722_s26 + $0x710] sm:$0xff] %v1058_v34  }
  0xf4   : > { %1063 = vst [vmem:[%s9722_s26 + $0x718] sm:$0xff] %v1062_v35  }
  0xf5 PF: > { %p8218_p5 = scmp.ge.s32.totalorder %s9660_s14, 1  ;;  %p3850_p6 = scmp.lt.s32.totalorder %s9660_s14, 3 }
  0xf7   : > { %p3851_p7 = pnand %p8218_p5, %p3850_p6 }
  0xf8   : > { %s3857_s4 = sand.u32 (!%p3851_p7), 1, %s9652_s12   ;;  %s3881_s9 = smul.u32 (!%p3851_p7), 114, %s8213_s15 }
  0xf9   : > { %3854 = sbr.rel (%p3851_p7) target bundleno = 1315 (0x523), region = 80 }
  0xfa   : > { %s9608_s5 = smul.u32 (!%p3851_p7), 1824, %s3857_s4  ;;  %p3882_p8 = scmp.lt.s32.totalorder (!%p3851_p7), %s3881_s9, 227 }
  0xfc   : > { %s10189_s8 = scalar_lea.vmem (!%p3851_p7), [#allocation2], %s9608_s5 }
  0xfe   : > { %v9138_v36 = vld [vmem:[%s11027_s1 + $0x8] sm:$0xf]  ;;  %v9600_v37 = vld [vmem:[%s11027_s1 + $0x8] sm:$0x10]  ;;  %vm6184_vm0 = vcmask 1043456   ;;  %vm6185_vm1 = vcmask 1044480  }
  0xff   : > { %v9139_v38 = vor.u32 %v9600_v37, %v9138_v36  ;;  %v9662_v39 = vmov 65535   ;;  %v9599_v43 = vld [vmem:[%s11027_s1] sm:$0xff]  ;;  %v9428_v45 = vld [vmem:[%s10189_s8 + $0x1c8] sm:$0xff]  ;;  %vm5499_vm2 = vcmask 203776   ;;  %v9485_v46 = vld [vmem:[%s10189_s8 + $0x390] sm:$0xff]  ;;  %s11034_s9 = smov (!%p3882_p8, %s3881_s9), 227 }
 0x100   : > { %v6186_v40 = vsel %vm6184_vm0, 4294967295, %v9662_v39  ;;  %v9371_v44 = vld [vmem:[%s10189_s8] sm:$0xff]  ;;  %v9542_v47 = vld [vmem:[%s10189_s8 + $0x558] sm:$0xff]  ;;  %v9372_v48 = vld [vmem:[%s10189_s8 + $0x8] sm:$0xff]  ;;  %s8219_s12 = sshll.u32 %s11034_s9, 2  ;;  %vm8028_vm3 = vcmask 257024  }
 0x101   : > { %v6187_v41 = vsel %vm6185_vm1, %v6186_v40, 0  ;;  %v9429_v49 = vld [vmem:[%s10189_s8 + $0x1d0] sm:$0xff]  ;;  %v9486_v50 = vld [vmem:[%s10189_s8 + $0x398] sm:$0xff]  ;;  %v9543_v51 = vld [vmem:[%s10189_s8 + $0x560] sm:$0xff]  ;;  %s10274_s17 = scalar_lea.vmem %s11029_s3, %s8219_s12 }
 0x102   : > { %v6189_v42 = vand.u32 %v9139_v38, %v6187_v41  ;;  %v9373_v52 = vld [vmem:[%s10189_s8 + $0x10] sm:$0xff]  ;;  %v9430_v53 = vld [vmem:[%s10189_s8 + $0x1d8] sm:$0xff]  ;;  %v9487_v54 = vld [vmem:[%s10189_s8 + $0x3a0] sm:$0xff] }
 0x103   : > { %v9544_v55 = vld [vmem:[%s10189_s8 + $0x568] sm:$0xff]  ;;  %v9374_v56 = vld [vmem:[%s10189_s8 + $0x18] sm:$0xff]  ;;  %v9431_v57 = vld [vmem:[%s10189_s8 + $0x1e0] sm:$0xff] }
 0x104   : > { %6197 = vmatpush.bf16.msra.mxu0 %v6189_v42  ;;  %9601 = vmatpush.bf16.msra.mxu1 %v6189_v42  ;;  %v9488_v58 = vld [vmem:[%s10189_s8 + $0x3a8] sm:$0xff]  ;;  %v9545_v59 = vld [vmem:[%s10189_s8 + $0x570] sm:$0xff]  ;;  %v9375_v60 = vld [vmem:[%s10189_s8 + $0x20] sm:$0xff] }
 0x105   : > { %9602 = vmatpush.bf16.msra.mxu2 %v6189_v42  ;;  %9603 = vmatpush.bf16.msra.mxu3 %v6189_v42  ;;  %v9432_v61 = vld [vmem:[%s10189_s8 + $0x1e8] sm:$0xff]  ;;  %v9489_v62 = vld [vmem:[%s10189_s8 + $0x3b0] sm:$0xff]  ;;  %v9546_v63 = vld [vmem:[%s10189_s8 + $0x578] sm:$0xff] }
 0x106   : > { %v9376_v0 = vld [vmem:[%s10189_s8 + $0x28] sm:$0xff]  ;;  %v9433_v1 = vld [vmem:[%s10189_s8 + $0x1f0] sm:$0xff]  ;;  %v9490_v2 = vld [vmem:[%s10189_s8 + $0x3b8] sm:$0xff] }
 0x107   : > { %v9547_v3 = vld [vmem:[%s10189_s8 + $0x580] sm:$0xff]  ;;  %v9377_v4 = vld [vmem:[%s10189_s8 + $0x30] sm:$0xff]  ;;  %v9434_v5 = vld [vmem:[%s10189_s8 + $0x1f8] sm:$0xff] }
 0x108   : > { %6198 = vmatpush.bf16.msra.mxu0 %v9599_v43  ;;  %9604 = vmatpush.bf16.msra.mxu1 %v9599_v43  ;;  %v9491_v6 = vld [vmem:[%s10189_s8 + $0x3c0] sm:$0xff]  ;;  %v9548_v7 = vld [vmem:[%s10189_s8 + $0x588] sm:$0xff]  ;;  %v9378_v8 = vld [vmem:[%s10189_s8 + $0x38] sm:$0xff] }
 0x109   : > { %9605 = vmatpush.bf16.msra.mxu2 %v9599_v43  ;;  %9606 = vmatpush.bf16.msra.mxu3 %v9599_v43  ;;  %v9435_v9 = vld [vmem:[%s10189_s8 + $0x200] sm:$0xff]  ;;  %v9492_v10 = vld [vmem:[%s10189_s8 + $0x3c8] sm:$0xff]  ;;  %v9549_v11 = vld [vmem:[%s10189_s8 + $0x590] sm:$0xff] }
 0x10a   : > { %v9379_v12 = vld [vmem:[%s10189_s8 + $0x40] sm:$0xff]  ;;  %v9436_v13 = vld [vmem:[%s10189_s8 + $0x208] sm:$0xff]  ;;  %v9493_v16 = vld [vmem:[%s10189_s8 + $0x3d0] sm:$0xff] }
 0x10b   : > { %9140 = vmatmul.msk.bf16.vlgmr.msra.gmra.mxu0 %vm5499_vm2, %v9371_v44  ;;  %9197 = vmatmul.msk.bf16.vlgmr.msra.gmra.mxu1 %vm5499_vm2, %v9428_v45  ;;  %v9550_v17 = vld [vmem:[%s10189_s8 + $0x598] sm:$0xff]  ;;  %v10268_v22 = vld [vmem:[%s11028_s2] ss:$0 sm:$0xff]  ;;  %v9380_v30 = vld [vmem:[%s10189_s8 + $0x48] sm:$0xff] }
 0x10c   : > { %9254 = vmatmul.msk.bf16.vlgmr.msra.gmra.mxu2 %vm5499_vm2, %v9485_v46  ;;  %9311 = vmatmul.msk.bf16.vlgmr.msra.gmra.mxu3 %vm5499_vm2, %v9542_v47  ;;  %v9437_v31 = vld [vmem:[%s10189_s8 + $0x210] sm:$0xff]  ;;  %v9494_v37 = vld [vmem:[%s10189_s8 + $0x3d8] sm:$0xff]  ;;  %v9551_v38 = vld [vmem:[%s10189_s8 + $0x5a0] sm:$0xff] }
 0x11b   : > { %9141 = vmatmul.msk.bf16.gmra.mxu0 %vm5499_vm2, %v9372_v48  ;;  %9198 = vmatmul.msk.bf16.gmra.mxu1 %vm5499_vm2, %v9429_v49 }
 0x11c   : > { %9255 = vmatmul.msk.bf16.gmra.mxu2 %vm5499_vm2, %v9486_v50  ;;  %9312 = vmatmul.msk.bf16.gmra.mxu3 %vm5499_vm2, %v9543_v51 }
 0x12b   : > { %9142 = vmatmul.msk.bf16.gmra.mxu0 %vm5499_vm2, %v9373_v52  ;;  %9199 = vmatmul.msk.bf16.gmra.mxu1 %vm5499_vm2, %v9430_v53 }
 0x12c   : > { %9256 = vmatmul.msk.bf16.gmra.mxu2 %vm5499_vm2, %v9487_v54  ;;  %9313 = vmatmul.msk.bf16.gmra.mxu3 %vm5499_vm2, %v9544_v55  ;;  %v9381_v54 = vld [vmem:[%s10189_s8 + $0x50] sm:$0xff]  ;;  %v9438_v55 = vld [vmem:[%s10189_s8 + $0x218] sm:$0xff] }
 0x13b   : > { %9143 = vmatmul.msk.bf16.gmra.mxu0 %vm5499_vm2, %v9374_v56  ;;  %9200 = vmatmul.msk.bf16.gmra.mxu1 %vm5499_vm2, %v9431_v57 }
 0x13c   : > { %9257 = vmatmul.msk.bf16.gmra.mxu2 %vm5499_vm2, %v9488_v58  ;;  %9314 = vmatmul.msk.bf16.gmra.mxu3 %vm5499_vm2, %v9545_v59 }
 0x14b   : > { %9144 = vmatmul.msk.bf16.gmra.mxu0 %vm5499_vm2, %v9375_v60  ;;  %9201 = vmatmul.msk.bf16.gmra.mxu1 %vm5499_vm2, %v9432_v61  ;;  %v9495_v61 = vld [vmem:[%s10189_s8 + $0x3e0] sm:$0xff] }
 0x14c   : > { %9258 = vmatmul.msk.bf16.gmra.mxu2 %vm5499_vm2, %v9489_v62  ;;  %9315 = vmatmul.msk.bf16.gmra.mxu3 %vm5499_vm2, %v9546_v63  ;;  %v9552_v62 = vld [vmem:[%s10189_s8 + $0x5a8] sm:$0xff] }
 0x15b   : > { %9145 = vmatmul.msk.bf16.gmra.mxu0 %vm5499_vm2, %v9376_v0  ;;  %9202 = vmatmul.msk.bf16.gmra.mxu1 %vm5499_vm2, %v9433_v1 }
 0x15c   : > { %9259 = vmatmul.msk.bf16.gmra.mxu2 %vm5499_vm2, %v9490_v2  ;;  %9316 = vmatmul.msk.bf16.gmra.mxu3 %vm5499_vm2, %v9547_v3 }
 0x16b   : > { %9146 = vmatmul.msk.bf16.gmra.mxu0 %vm5499_vm2, %v9377_v4  ;;  %9203 = vmatmul.msk.bf16.gmra.mxu1 %vm5499_vm2, %v9434_v5 }
 0x16c   : > { %9260 = vmatmul.msk.bf16.gmra.mxu2 %vm5499_vm2, %v9491_v6  ;;  %9317 = vmatmul.msk.bf16.gmra.mxu3 %vm5499_vm2, %v9548_v7 }
 0x17b   : > { %9147 = vmatmul.msk.bf16.gmra.mxu0 %vm5499_vm2, %v9378_v8  ;;  %9204 = vmatmul.msk.bf16.gmra.mxu1 %vm5499_vm2, %v9435_v9 }
 0x17c   : > { %9261 = vmatmul.msk.bf16.gmra.mxu2 %vm5499_vm2, %v9492_v10  ;;  %9318 = vmatmul.msk.bf16.gmra.mxu3 %vm5499_vm2, %v9549_v11 }
 0x188   : > { %v6200_v14 = vpop.f32.mrf.mxu0  ;;  %v6485_v15 = vpop.f32.mrf.mxu1 }
 0x189   : > { %v7340_v18 = vmax.f32 %v6200_v14, %v6485_v15  ;;  %v9382_v14 = vld [vmem:[%s10189_s8 + $0x58] sm:$0xff]  ;;  %v9439_v15 = vld [vmem:[%s10189_s8 + $0x220] sm:$0xff] }
 0x18b   : > { %9148 = vmatmul.msk.bf16.gmra.mxu0 %vm5499_vm2, %v9379_v12  ;;  %9205 = vmatmul.msk.bf16.gmra.mxu1 %vm5499_vm2, %v9436_v13 }
 0x18c   : > { %9262 = vmatmul.msk.bf16.gmra.mxu2 %vm5499_vm2, %v9493_v16  ;;  %9319 = vmatmul.msk.bf16.gmra.mxu3 %vm5499_vm2, %v9550_v17 }
 0x18f   : > { %v6770_v19 = vpop.f32.mrf.mxu2  ;;  %v7055_v20 = vpop.f32.mrf.mxu3 }
 0x190   : > { %v7454_v21 = vmax.f32 %v6770_v19, %v7055_v20  ;;  %v6202_v23 = vpop.f32.mrf.mxu0  ;;  %v6487_v24 = vpop.f32.mrf.mxu1 }
 0x191   : > { %v7341_v33 = vmax.f32 %v6202_v23, %v6487_v24  ;;  %v9553_v23 = vld [vmem:[%s10189_s8 + $0x5b0] sm:$0xff] }
 0x192   : > { %v7568_v25 = vmax.f32 %v7340_v18, %v7454_v21  ;;  %v9496_v21 = vld [vmem:[%s10189_s8 + $0x3e8] sm:$0xff] }
 0x194   : > { %v7686_v26 = vadd.f32 %v10268_v22, %v7568_v25 }
 0x196   : > { %v7800_v27 = vmax.f32 %v7686_v26, 0.0 }
 0x197   : > { %v6772_v28 = vpop.f32.mrf.mxu2  ;;  %v7057_v29 = vpop.f32.mrf.mxu3 }
 0x198   : > { %v7914_v32 = vpack.c.bf16 %v7800_v27, %v7800_v27  ;;  %v7455_v34 = vmax.f32 %v6772_v28, %v7057_v29  ;;  %v6205_v35 = vpop.f32.mrf.mxu0  ;;  %v6490_v36 = vpop.f32.mrf.mxu1 }
 0x199   : > { %v7342_v42 = vmax.f32 %v6205_v35, %v6490_v36 }
 0x19a   : > { %8029 = vst.msk [vmem:[%s10274_s17] sm:$0xf] %vm8028_vm3, %v7914_v32  ;;  %v7569_v39 = vmax.f32 %v7341_v33, %v7455_v34 }
 0x19b   : > { %9149 = vmatmul.msk.bf16.gmra.mxu0 %vm5499_vm2, %v9380_v30  ;;  %9206 = vmatmul.msk.bf16.gmra.mxu1 %vm5499_vm2, %v9437_v31 }
 0x19c   : > { %v7687_v40 = vadd.f32 %v10268_v22, %v7569_v39  ;;  %9263 = vmatmul.msk.bf16.gmra.mxu2 %vm5499_vm2, %v9494_v37  ;;  %9320 = vmatmul.msk.bf16.gmra.mxu3 %vm5499_vm2, %v9551_v38  ;;  %v9383_v39 = vld [vmem:[%s10189_s8 + $0x60] sm:$0xff] }
 0x19e   : > { %v7801_v41 = vmax.f32 %v7687_v40, 0.0  ;;  %v9440_v40 = vld [vmem:[%s10189_s8 + $0x228] sm:$0xff] }
 0x19f   : > { %v6775_v43 = vpop.f32.mrf.mxu2  ;;  %v7060_v44 = vpop.f32.mrf.mxu3 }
 0x1a0   : > { %v7915_v45 = vpack.c.bf16 %v7801_v41, %v7801_v41  ;;  %v7456_v46 = vmax.f32 %v6775_v43, %v7060_v44  ;;  %v6207_v47 = vpop.f32.mrf.mxu0  ;;  %v6492_v48 = vpop.f32.mrf.mxu1 }
 0x1a1   : > { %v7343_v57 = vmax.f32 %v6207_v47, %v6492_v48  ;;  %v9554_v47 = vld [vmem:[%s10189_s8 + $0x5b8] sm:$0xff] }
 0x1a2   : > { %8030 = vst.msk [vmem:[%s10274_s17 + $0x4] sm:$0xf] %vm8028_vm3, %v7915_v45  ;;  %v7570_v49 = vmax.f32 %v7342_v42, %v7456_v46  ;;  %v9497_v46 = vld [vmem:[%s10189_s8 + $0x3f0] sm:$0xff] }
 0x1a4   : > { %v7688_v50 = vadd.f32 %v10268_v22, %v7570_v49 }
 0x1a6   : > { %v7802_v51 = vmax.f32 %v7688_v50, 0.0 }
 0x1a7   : > { %v6777_v52 = vpop.f32.mrf.mxu2  ;;  %v7062_v53 = vpop.f32.mrf.mxu3 }
 0x1a8   : > { %v7916_v56 = vpack.c.bf16 %v7802_v51, %v7802_v51  ;;  %v7457_v58 = vmax.f32 %v6777_v52, %v7062_v53  ;;  %v6210_v59 = vpop.f32.mrf.mxu0  ;;  %v6495_v60 = vpop.f32.mrf.mxu1 }
 0x1a9   : > { %v7344_v2 = vmax.f32 %v6210_v59, %v6495_v60 }
 0x1aa   : > { %8031 = vst.msk [vmem:[%s10274_s17 + $0x8] sm:$0xf] %vm8028_vm3, %v7916_v56  ;;  %v7571_v63 = vmax.f32 %v7343_v57, %v7457_v58 }
 0x1ab   : > { %9150 = vmatmul.msk.bf16.gmra.mxu0 %vm5499_vm2, %v9381_v54  ;;  %9207 = vmatmul.msk.bf16.gmra.mxu1 %vm5499_vm2, %v9438_v55 }
 0x1ac   : > { %v7689_v0 = vadd.f32 %v10268_v22, %v7571_v63  ;;  %9264 = vmatmul.msk.bf16.gmra.mxu2 %vm5499_vm2, %v9495_v61  ;;  %9321 = vmatmul.msk.bf16.gmra.mxu3 %vm5499_vm2, %v9552_v62  ;;  %v9384_v63 = vld [vmem:[%s10189_s8 + $0x68] sm:$0xff] }
 0x1ae   : > { %v7803_v1 = vmax.f32 %v7689_v0, 0.0  ;;  %v9441_v0 = vld [vmem:[%s10189_s8 + $0x230] sm:$0xff] }
 0x1af   : > { %v6780_v3 = vpop.f32.mrf.mxu2  ;;  %v7065_v4 = vpop.f32.mrf.mxu3 }
 0x1b0   : > { %v7917_v5 = vpack.c.bf16 %v7803_v1, %v7803_v1  ;;  %v7458_v6 = vmax.f32 %v6780_v3, %v7065_v4  ;;  %v6212_v7 = vpop.f32.mrf.mxu0  ;;  %v6497_v8 = vpop.f32.mrf.mxu1 }
 0x1b1   : > { %v7345_v17 = vmax.f32 %v6212_v7, %v6497_v8  ;;  %v9555_v7 = vld [vmem:[%s10189_s8 + $0x5c0] sm:$0xff] }
 0x1b2   : > { %8032 = vst.msk [vmem:[%s10274_s17 + $0xc] sm:$0xf] %vm8028_vm3, %v7917_v5  ;;  %v7572_v9 = vmax.f32 %v7344_v2, %v7458_v6  ;;  %v9498_v6 = vld [vmem:[%s10189_s8 + $0x3f8] sm:$0xff] }
 0x1b4   : > { %v7690_v10 = vadd.f32 %v10268_v22, %v7572_v9 }
 0x1b6   : > { %v7804_v11 = vmax.f32 %v7690_v10, 0.0 }
 0x1b7   : > { %v6782_v12 = vpop.f32.mrf.mxu2  ;;  %v7067_v13 = vpop.f32.mrf.mxu3 }
 0x1b8   : > { %v7918_v16 = vpack.c.bf16 %v7804_v11, %v7804_v11  ;;  %v7459_v18 = vmax.f32 %v6782_v12, %v7067_v13  ;;  %v6215_v19 = vpop.f32.mrf.mxu0  ;;  %v6500_v20 = vpop.f32.mrf.mxu1 }
 0x1b9   : > { %v7346_v27 = vmax.f32 %v6215_v19, %v6500_v20 }
 0x1ba   : > { %8033 = vst.msk [vmem:[%s10274_s17 + $0x10] sm:$0xf] %vm8028_vm3, %v7918_v16  ;;  %v7573_v24 = vmax.f32 %v7345_v17, %v7459_v18 }
 0x1bb   : > { %9151 = vmatmul.msk.bf16.gmra.mxu0 %vm5499_vm2, %v9382_v14  ;;  %9208 = vmatmul.msk.bf16.gmra.mxu1 %vm5499_vm2, %v9439_v15 }
 0x1bc   : > { %v7691_v25 = vadd.f32 %v10268_v22, %v7573_v24  ;;  %9265 = vmatmul.msk.bf16.gmra.mxu2 %vm5499_vm2, %v9496_v21  ;;  %9322 = vmatmul.msk.bf16.gmra.mxu3 %vm5499_vm2, %v9553_v23  ;;  %v9385_v24 = vld [vmem:[%s10189_s8 + $0x70] sm:$0xff] }
 0x1be   : > { %v7805_v26 = vmax.f32 %v7691_v25, 0.0  ;;  %v9442_v25 = vld [vmem:[%s10189_s8 + $0x238] sm:$0xff] }
 0x1bf   : > { %v6785_v28 = vpop.f32.mrf.mxu2  ;;  %v7070_v29 = vpop.f32.mrf.mxu3 }
 0x1c0   : > { %v7919_v30 = vpack.c.bf16 %v7805_v26, %v7805_v26  ;;  %v7460_v31 = vmax.f32 %v6785_v28, %v7070_v29  ;;  %v6217_v32 = vpop.f32.mrf.mxu0  ;;  %v6502_v33 = vpop.f32.mrf.mxu1 }
 0x1c1   : > { %v7347_v42 = vmax.f32 %v6217_v32, %v6502_v33  ;;  %v9556_v32 = vld [vmem:[%s10189_s8 + $0x5c8] sm:$0xff] }
 0x1c2   : > { %8034 = vst.msk [vmem:[%s10274_s17 + $0x14] sm:$0xf] %vm8028_vm3, %v7919_v30  ;;  %v7574_v34 = vmax.f32 %v7346_v27, %v7460_v31  ;;  %v9499_v31 = vld [vmem:[%s10189_s8 + $0x400] sm:$0xff] }
 0x1c4   : > { %v7692_v35 = vadd.f32 %v10268_v22, %v7574_v34 }
 0x1c6   : > { %v7806_v36 = vmax.f32 %v7692_v35, 0.0 }
 0x1c7   : > { %v6787_v37 = vpop.f32.mrf.mxu2  ;;  %v7072_v38 = vpop.f32.mrf.mxu3 }
 0x1c8   : > { %v7920_v41 = vpack.c.bf16 %v7806_v36, %v7806_v36  ;;  %v7461_v43 = vmax.f32 %v6787_v37, %v7072_v38  ;;  %v6220_v44 = vpop.f32.mrf.mxu0  ;;  %v6505_v45 = vpop.f32.mrf.mxu1 }
 0x1c9   : > { %v7348_v51 = vmax.f32 %v6220_v44, %v6505_v45 }
 0x1ca   : > { %8035 = vst.msk [vmem:[%s10274_s17 + $0x18] sm:$0xf] %vm8028_vm3, %v7920_v41  ;;  %v7575_v48 = vmax.f32 %v7347_v42, %v7461_v43 }
 0x1cb   : > { %9152 = vmatmul.msk.bf16.gmra.mxu0 %vm5499_vm2, %v9383_v39  ;;  %9209 = vmatmul.msk.bf16.gmra.mxu1 %vm5499_vm2, %v9440_v40 }
 0x1cc   : > { %v7693_v49 = vadd.f32 %v10268_v22, %v7575_v48  ;;  %9266 = vmatmul.msk.bf16.gmra.mxu2 %vm5499_vm2, %v9497_v46  ;;  %9323 = vmatmul.msk.bf16.gmra.mxu3 %vm5499_vm2, %v9554_v47  ;;  %v9386_v48 = vld [vmem:[%s10189_s8 + $0x78] sm:$0xff] }
 0x1ce   : > { %v7807_v50 = vmax.f32 %v7693_v49, 0.0  ;;  %v9443_v49 = vld [vmem:[%s10189_s8 + $0x240] sm:$0xff] }
 0x1cf   : > { %v6790_v52 = vpop.f32.mrf.mxu2  ;;  %v7075_v53 = vpop.f32.mrf.mxu3 }
 0x1d0   : > { %v7921_v54 = vpack.c.bf16 %v7807_v50, %v7807_v50  ;;  %v7462_v55 = vmax.f32 %v6790_v52, %v7075_v53  ;;  %v6222_v56 = vpop.f32.mrf.mxu0  ;;  %v6507_v57 = vpop.f32.mrf.mxu1 }
 0x1d1   : > { %v7349_v2 = vmax.f32 %v6222_v56, %v6507_v57  ;;  %v9557_v56 = vld [vmem:[%s10189_s8 + $0x5d0] sm:$0xff] }
 0x1d2   : > { %8036 = vst.msk [vmem:[%s10274_s17 + $0x1c] sm:$0xf] %vm8028_vm3, %v7921_v54  ;;  %v7576_v58 = vmax.f32 %v7348_v51, %v7462_v55  ;;  %v9500_v55 = vld [vmem:[%s10189_s8 + $0x408] sm:$0xff] }
 0x1d4   : > { %v7694_v59 = vadd.f32 %v10268_v22, %v7576_v58 }
 0x1d6   : > { %v7808_v60 = vmax.f32 %v7694_v59, 0.0 }
 0x1d7   : > { %v6792_v61 = vpop.f32.mrf.mxu2  ;;  %v7077_v62 = vpop.f32.mrf.mxu3 }
 0x1d8   : > { %v7922_v1 = vpack.c.bf16 %v7808_v60, %v7808_v60  ;;  %v7463_v3 = vmax.f32 %v6792_v61, %v7077_v62  ;;  %v6225_v4 = vpop.f32.mrf.mxu0  ;;  %v6510_v5 = vpop.f32.mrf.mxu1 }
 0x1d9   : > { %v7350_v11 = vmax.f32 %v6225_v4, %v6510_v5 }
 0x1da   : > { %8037 = vst.msk [vmem:[%s10274_s17 + $0x20] sm:$0xf] %vm8028_vm3, %v7922_v1  ;;  %v7577_v8 = vmax.f32 %v7349_v2, %v7463_v3 }
 0x1db   : > { %9153 = vmatmul.msk.bf16.gmra.mxu0 %vm5499_vm2, %v9384_v63  ;;  %9210 = vmatmul.msk.bf16.gmra.mxu1 %vm5499_vm2, %v9441_v0 }
 0x1dc   : > { %v7695_v9 = vadd.f32 %v10268_v22, %v7577_v8  ;;  %9267 = vmatmul.msk.bf16.gmra.mxu2 %vm5499_vm2, %v9498_v6  ;;  %9324 = vmatmul.msk.bf16.gmra.mxu3 %vm5499_vm2, %v9555_v7  ;;  %v9387_v8 = vld [vmem:[%s10189_s8 + $0x80] sm:$0xff] }
 0x1de   : > { %v7809_v10 = vmax.f32 %v7695_v9, 0.0  ;;  %v9444_v9 = vld [vmem:[%s10189_s8 + $0x248] sm:$0xff] }
 0x1df   : > { %v6795_v12 = vpop.f32.mrf.mxu2  ;;  %v7080_v13 = vpop.f32.mrf.mxu3 }
 0x1e0   : > { %v7923_v14 = vpack.c.bf16 %v7809_v10, %v7809_v10  ;;  %v7464_v15 = vmax.f32 %v6795_v12, %v7080_v13  ;;  %v6227_v16 = vpop.f32.mrf.mxu0  ;;  %v6512_v17 = vpop.f32.mrf.mxu1 }
 0x1e1   : > { %v7351_v27 = vmax.f32 %v6227_v16, %v6512_v17  ;;  %v9558_v16 = vld [vmem:[%s10189_s8 + $0x5d8] sm:$0xff] }
 0x1e2   : > { %8038 = vst.msk [vmem:[%s10274_s17 + $0x24] sm:$0xf] %vm8028_vm3, %v7923_v14  ;;  %v7578_v18 = vmax.f32 %v7350_v11, %v7464_v15  ;;  %v9501_v15 = vld [vmem:[%s10189_s8 + $0x410] sm:$0xff] }
 0x1e4   : > { %v7696_v19 = vadd.f32 %v10268_v22, %v7578_v18 }
 0x1e6   : > { %v7810_v20 = vmax.f32 %v7696_v19, 0.0 }
 0x1e7   : > { %v6797_v21 = vpop.f32.mrf.mxu2  ;;  %v7082_v23 = vpop.f32.mrf.mxu3 }
 0x1e8   : > { %v7924_v26 = vpack.c.bf16 %v7810_v20, %v7810_v20  ;;  %v7465_v28 = vmax.f32 %v6797_v21, %v7082_v23  ;;  %v6230_v29 = vpop.f32.mrf.mxu0  ;;  %v6515_v30 = vpop.f32.mrf.mxu1 }
 0x1e9   : > { %v7352_v36 = vmax.f32 %v6230_v29, %v6515_v30 }
 0x1ea   : > { %8039 = vst.msk [vmem:[%s10274_s17 + $0x28] sm:$0xf] %vm8028_vm3, %v7924_v26  ;;  %v7579_v33 = vmax.f32 %v7351_v27, %v7465_v28 }
 0x1eb   : > { %9154 = vmatmul.msk.bf16.gmra.mxu0 %vm5499_vm2, %v9385_v24  ;;  %9211 = vmatmul.msk.bf16.gmra.mxu1 %vm5499_vm2, %v9442_v25 }
 0x1ec   : > { %v7697_v34 = vadd.f32 %v10268_v22, %v7579_v33  ;;  %9268 = vmatmul.msk.bf16.gmra.mxu2 %vm5499_vm2, %v9499_v31  ;;  %9325 = vmatmul.msk.bf16.gmra.mxu3 %vm5499_vm2, %v9556_v32  ;;  %v9388_v33 = vld [vmem:[%s10189_s8 + $0x88] sm:$0xff] }
 0x1ee   : > { %v7811_v35 = vmax.f32 %v7697_v34, 0.0  ;;  %v9445_v34 = vld [vmem:[%s10189_s8 + $0x250] sm:$0xff] }
 0x1ef   : > { %v6800_v37 = vpop.f32.mrf.mxu2  ;;  %v7085_v38 = vpop.f32.mrf.mxu3 }
 0x1f0   : > { %v7925_v39 = vpack.c.bf16 %v7811_v35, %v7811_v35  ;;  %v7466_v40 = vmax.f32 %v6800_v37, %v7085_v38  ;;  %v6232_v41 = vpop.f32.mrf.mxu0  ;;  %v6517_v42 = vpop.f32.mrf.mxu1 }
 0x1f1   : > { %v7353_v51 = vmax.f32 %v6232_v41, %v6517_v42  ;;  %v9559_v41 = vld [vmem:[%s10189_s8 + $0x5e0] sm:$0xff] }
 0x1f2   : > { %8040 = vst.msk [vmem:[%s10274_s17 + $0x2c] sm:$0xf] %vm8028_vm3, %v7925_v39  ;;  %v7580_v43 = vmax.f32 %v7352_v36, %v7466_v40  ;;  %v9502_v40 = vld [vmem:[%s10189_s8 + $0x418] sm:$0xff] }
 0x1f4   : > { %v7698_v44 = vadd.f32 %v10268_v22, %v7580_v43 }
 0x1f6   : > { %v7812_v45 = vmax.f32 %v7698_v44, 0.0 }
 0x1f7   : > { %v6802_v46 = vpop.f32.mrf.mxu2  ;;  %v7087_v47 = vpop.f32.mrf.mxu3 }
 0x1f8   : > { %v7926_v50 = vpack.c.bf16 %v7812_v45, %v7812_v45  ;;  %v7467_v52 = vmax.f32 %v6802_v46, %v7087_v47  ;;  %v6235_v53 = vpop.f32.mrf.mxu0  ;;  %v6520_v54 = vpop.f32.mrf.mxu1 }
 0x1f9   : > { %v7354_v60 = vmax.f32 %v6235_v53, %v6520_v54 }
 0x1fa   : > { %8041 = vst.msk [vmem:[%s10274_s17 + $0x30] sm:$0xf] %vm8028_vm3, %v7926_v50  ;;  %v7581_v57 = vmax.f32 %v7353_v51, %v7467_v52 }
 0x1fb   : > { %9155 = vmatmul.msk.bf16.gmra.mxu0 %vm5499_vm2, %v9386_v48  ;;  %9212 = vmatmul.msk.bf16.gmra.mxu1 %vm5499_vm2, %v9443_v49 }
 0x1fc   : > { %v7699_v58 = vadd.f32 %v10268_v22, %v7581_v57  ;;  %9269 = vmatmul.msk.bf16.gmra.mxu2 %vm5499_vm2, %v9500_v55  ;;  %9326 = vmatmul.msk.bf16.gmra.mxu3 %vm5499_vm2, %v9557_v56  ;;  %v9389_v57 = vld [vmem:[%s10189_s8 + $0x90] sm:$0xff] }
 0x1fe   : > { %v7813_v59 = vmax.f32 %v7699_v58, 0.0  ;;  %v9446_v58 = vld [vmem:[%s10189_s8 + $0x258] sm:$0xff] }
 0x1ff   : > { %v6805_v61 = vpop.f32.mrf.mxu2  ;;  %v7090_v62 = vpop.f32.mrf.mxu3 }
 0x200   : > { %v7927_v63 = vpack.c.bf16 %v7813_v59, %v7813_v59  ;;  %v7468_v0 = vmax.f32 %v6805_v61, %v7090_v62  ;;  %v6237_v1 = vpop.f32.mrf.mxu0  ;;  %v6522_v2 = vpop.f32.mrf.mxu1 }
 0x201   : > { %v7355_v11 = vmax.f32 %v6237_v1, %v6522_v2  ;;  %v9560_v1 = vld [vmem:[%s10189_s8 + $0x5e8] sm:$0xff] }
 0x202   : > { %8042 = vst.msk [vmem:[%s10274_s17 + $0x34] sm:$0xf] %vm8028_vm3, %v7927_v63  ;;  %v7582_v3 = vmax.f32 %v7354_v60, %v7468_v0  ;;  %v9503_v0 = vld [vmem:[%s10189_s8 + $0x420] sm:$0xff] }
 0x204   : > { %v7700_v4 = vadd.f32 %v10268_v22, %v7582_v3 }
 0x206   : > { %v7814_v5 = vmax.f32 %v7700_v4, 0.0 }
 0x207   : > { %v6807_v6 = vpop.f32.mrf.mxu2  ;;  %v7092_v7 = vpop.f32.mrf.mxu3 }
 0x208   : > { %v7928_v10 = vpack.c.bf16 %v7814_v5, %v7814_v5  ;;  %v7469_v12 = vmax.f32 %v6807_v6, %v7092_v7  ;;  %v6240_v13 = vpop.f32.mrf.mxu0  ;;  %v6525_v14 = vpop.f32.mrf.mxu1 }
 0x209   : > { %v7356_v20 = vmax.f32 %v6240_v13, %v6525_v14 }
 0x20a   : > { %8043 = vst.msk [vmem:[%s10274_s17 + $0x38] sm:$0xf] %vm8028_vm3, %v7928_v10  ;;  %v7583_v17 = vmax.f32 %v7355_v11, %v7469_v12 }
 0x20b   : > { %9156 = vmatmul.msk.bf16.gmra.mxu0 %vm5499_vm2, %v9387_v8  ;;  %9213 = vmatmul.msk.bf16.gmra.mxu1 %vm5499_vm2, %v9444_v9 }
 0x20c   : > { %v7701_v18 = vadd.f32 %v10268_v22, %v7583_v17  ;;  %9270 = vmatmul.msk.bf16.gmra.mxu2 %vm5499_vm2, %v9501_v15  ;;  %9327 = vmatmul.msk.bf16.gmra.mxu3 %vm5499_vm2, %v9558_v16  ;;  %v9390_v17 = vld [vmem:[%s10189_s8 + $0x98] sm:$0xff] }
 0x20e   : > { %v7815_v19 = vmax.f32 %v7701_v18, 0.0  ;;  %v9447_v18 = vld [vmem:[%s10189_s8 + $0x260] sm:$0xff] }
 0x20f   : > { %v6810_v21 = vpop.f32.mrf.mxu2  ;;  %v7095_v23 = vpop.f32.mrf.mxu3 }
 0x210   : > { %v7929_v24 = vpack.c.bf16 %v7815_v19, %v7815_v19  ;;  %v7470_v25 = vmax.f32 %v6810_v21, %v7095_v23  ;;  %v6242_v26 = vpop.f32.mrf.mxu0  ;;  %v6527_v27 = vpop.f32.mrf.mxu1 }
 0x211   : > { %v7357_v36 = vmax.f32 %v6242_v26, %v6527_v27  ;;  %v9561_v26 = vld [vmem:[%s10189_s8 + $0x5f0] sm:$0xff] }
 0x212   : > { %8044 = vst.msk [vmem:[%s10274_s17 + $0x3c] sm:$0xf] %vm8028_vm3, %v7929_v24  ;;  %v7584_v28 = vmax.f32 %v7356_v20, %v7470_v25  ;;  %v9504_v25 = vld [vmem:[%s10189_s8 + $0x428] sm:$0xff] }
 0x214   : > { %v7702_v29 = vadd.f32 %v10268_v22, %v7584_v28 }
 0x216   : > { %v7816_v30 = vmax.f32 %v7702_v29, 0.0 }
 0x217   : > { %v6812_v31 = vpop.f32.mrf.mxu2  ;;  %v7097_v32 = vpop.f32.mrf.mxu3 }
 0x218   : > { %v7930_v35 = vpack.c.bf16 %v7816_v30, %v7816_v30  ;;  %v7471_v37 = vmax.f32 %v6812_v31, %v7097_v32  ;;  %v6245_v38 = vpop.f32.mrf.mxu0  ;;  %v6530_v39 = vpop.f32.mrf.mxu1 }
 0x219   : > { %v7358_v45 = vmax.f32 %v6245_v38, %v6530_v39 }
 0x21a   : > { %8045 = vst.msk [vmem:[%s10274_s17 + $0x40] sm:$0xf] %vm8028_vm3, %v7930_v35  ;;  %v7585_v42 = vmax.f32 %v7357_v36, %v7471_v37 }
 0x21b   : > { %9157 = vmatmul.msk.bf16.gmra.mxu0 %vm5499_vm2, %v9388_v33  ;;  %9214 = vmatmul.msk.bf16.gmra.mxu1 %vm5499_vm2, %v9445_v34 }
 0x21c   : > { %v7703_v43 = vadd.f32 %v10268_v22, %v7585_v42  ;;  %9271 = vmatmul.msk.bf16.gmra.mxu2 %vm5499_vm2, %v9502_v40  ;;  %9328 = vmatmul.msk.bf16.gmra.mxu3 %vm5499_vm2, %v9559_v41  ;;  %v9391_v42 = vld [vmem:[%s10189_s8 + $0xa0] sm:$0xff] }
 0x21e   : > { %v7817_v44 = vmax.f32 %v7703_v43, 0.0  ;;  %v9448_v43 = vld [vmem:[%s10189_s8 + $0x268] sm:$0xff] }
 0x21f   : > { %v6815_v46 = vpop.f32.mrf.mxu2  ;;  %v7100_v47 = vpop.f32.mrf.mxu3 }
 0x220   : > { %v7931_v48 = vpack.c.bf16 %v7817_v44, %v7817_v44  ;;  %v7472_v49 = vmax.f32 %v6815_v46, %v7100_v47  ;;  %v6247_v50 = vpop.f32.mrf.mxu0  ;;  %v6532_v51 = vpop.f32.mrf.mxu1 }
 0x221   : > { %v7359_v60 = vmax.f32 %v6247_v50, %v6532_v51  ;;  %v9562_v50 = vld [vmem:[%s10189_s8 + $0x5f8] sm:$0xff] }
 0x222   : > { %8046 = vst.msk [vmem:[%s10274_s17 + $0x44] sm:$0xf] %vm8028_vm3, %v7931_v48  ;;  %v7586_v52 = vmax.f32 %v7358_v45, %v7472_v49  ;;  %v9505_v49 = vld [vmem:[%s10189_s8 + $0x430] sm:$0xff] }
 0x224   : > { %v7704_v53 = vadd.f32 %v10268_v22, %v7586_v52 }
 0x226   : > { %v7818_v54 = vmax.f32 %v7704_v53, 0.0 }
 0x227   : > { %v6817_v55 = vpop.f32.mrf.mxu2  ;;  %v7102_v56 = vpop.f32.mrf.mxu3 }
 0x228   : > { %v7932_v59 = vpack.c.bf16 %v7818_v54, %v7818_v54  ;;  %v7473_v61 = vmax.f32 %v6817_v55, %v7102_v56  ;;  %v6250_v62 = vpop.f32.mrf.mxu0  ;;  %v6535_v63 = vpop.f32.mrf.mxu1 }
 0x229   : > { %v7360_v5 = vmax.f32 %v6250_v62, %v6535_v63 }
 0x22a   : > { %8047 = vst.msk [vmem:[%s10274_s17 + $0x48] sm:$0xf] %vm8028_vm3, %v7932_v59  ;;  %v7587_v2 = vmax.f32 %v7359_v60, %v7473_v61 }
 0x22b   : > { %9158 = vmatmul.msk.bf16.gmra.mxu0 %vm5499_vm2, %v9389_v57  ;;  %9215 = vmatmul.msk.bf16.gmra.mxu1 %vm5499_vm2, %v9446_v58 }
 0x22c   : > { %v7705_v3 = vadd.f32 %v10268_v22, %v7587_v2  ;;  %9272 = vmatmul.msk.bf16.gmra.mxu2 %vm5499_vm2, %v9503_v0  ;;  %9329 = vmatmul.msk.bf16.gmra.mxu3 %vm5499_vm2, %v9560_v1  ;;  %v9392_v2 = vld [vmem:[%s10189_s8 + $0xa8] sm:$0xff] }
 0x22e   : > { %v7819_v4 = vmax.f32 %v7705_v3, 0.0  ;;  %v9449_v3 = vld [vmem:[%s10189_s8 + $0x270] sm:$0xff] }
 0x22f   : > { %v6820_v6 = vpop.f32.mrf.mxu2  ;;  %v7105_v7 = vpop.f32.mrf.mxu3 }
 0x230   : > { %v7933_v8 = vpack.c.bf16 %v7819_v4, %v7819_v4  ;;  %v7474_v9 = vmax.f32 %v6820_v6, %v7105_v7  ;;  %v6252_v10 = vpop.f32.mrf.mxu0  ;;  %v6537_v11 = vpop.f32.mrf.mxu1 }
 0x231   : > { %v7361_v20 = vmax.f32 %v6252_v10, %v6537_v11  ;;  %v9563_v10 = vld [vmem:[%s10189_s8 + $0x600] sm:$0xff] }
 0x232   : > { %8048 = vst.msk [vmem:[%s10274_s17 + $0x4c] sm:$0xf] %vm8028_vm3, %v7933_v8  ;;  %v7588_v12 = vmax.f32 %v7360_v5, %v7474_v9  ;;  %v9506_v9 = vld [vmem:[%s10189_s8 + $0x438] sm:$0xff] }
 0x234   : > { %v7706_v13 = vadd.f32 %v10268_v22, %v7588_v12 }
 0x236   : > { %v7820_v14 = vmax.f32 %v7706_v13, 0.0 }
 0x237   : > { %v6822_v15 = vpop.f32.mrf.mxu2  ;;  %v7107_v16 = vpop.f32.mrf.mxu3 }
 0x238   : > { %v7934_v19 = vpack.c.bf16 %v7820_v14, %v7820_v14  ;;  %v7475_v21 = vmax.f32 %v6822_v15, %v7107_v16  ;;  %v6255_v23 = vpop.f32.mrf.mxu0  ;;  %v6540_v24 = vpop.f32.mrf.mxu1 }
 0x239   : > { %v7362_v30 = vmax.f32 %v6255_v23, %v6540_v24 }
 0x23a   : > { %8049 = vst.msk [vmem:[%s10274_s17 + $0x50] sm:$0xf] %vm8028_vm3, %v7934_v19  ;;  %v7589_v27 = vmax.f32 %v7361_v20, %v7475_v21 }
 0x23b   : > { %9159 = vmatmul.msk.bf16.gmra.mxu0 %vm5499_vm2, %v9390_v17  ;;  %9216 = vmatmul.msk.bf16.gmra.mxu1 %vm5499_vm2, %v9447_v18 }
 0x23c   : > { %v7707_v28 = vadd.f32 %v10268_v22, %v7589_v27  ;;  %9273 = vmatmul.msk.bf16.gmra.mxu2 %vm5499_vm2, %v9504_v25  ;;  %9330 = vmatmul.msk.bf16.gmra.mxu3 %vm5499_vm2, %v9561_v26  ;;  %v9393_v27 = vld [vmem:[%s10189_s8 + $0xb0] sm:$0xff] }
 0x23e   : > { %v7821_v29 = vmax.f32 %v7707_v28, 0.0  ;;  %v9450_v28 = vld [vmem:[%s10189_s8 + $0x278] sm:$0xff] }
 0x23f   : > { %v6825_v31 = vpop.f32.mrf.mxu2  ;;  %v7110_v32 = vpop.f32.mrf.mxu3 }
 0x240   : > { %v7935_v33 = vpack.c.bf16 %v7821_v29, %v7821_v29  ;;  %v7476_v34 = vmax.f32 %v6825_v31, %v7110_v32  ;;  %v6257_v35 = vpop.f32.mrf.mxu0  ;;  %v6542_v36 = vpop.f32.mrf.mxu1 }
 0x241   : > { %v7363_v45 = vmax.f32 %v6257_v35, %v6542_v36  ;;  %v9564_v35 = vld [vmem:[%s10189_s8 + $0x608] sm:$0xff] }
 0x242   : > { %8050 = vst.msk [vmem:[%s10274_s17 + $0x54] sm:$0xf] %vm8028_vm3, %v7935_v33  ;;  %v7590_v37 = vmax.f32 %v7362_v30, %v7476_v34  ;;  %v9507_v34 = vld [vmem:[%s10189_s8 + $0x440] sm:$0xff] }
 0x244   : > { %v7708_v38 = vadd.f32 %v10268_v22, %v7590_v37 }
 0x246   : > { %v7822_v39 = vmax.f32 %v7708_v38, 0.0 }
 0x247   : > { %v6827_v40 = vpop.f32.mrf.mxu2  ;;  %v7112_v41 = vpop.f32.mrf.mxu3 }
 0x248   : > { %v7936_v44 = vpack.c.bf16 %v7822_v39, %v7822_v39  ;;  %v7477_v46 = vmax.f32 %v6827_v40, %v7112_v41  ;;  %v6260_v47 = vpop.f32.mrf.mxu0  ;;  %v6545_v48 = vpop.f32.mrf.mxu1 }
 0x249   : > { %v7364_v54 = vmax.f32 %v6260_v47, %v6545_v48 }
 0x24a   : > { %8051 = vst.msk [vmem:[%s10274_s17 + $0x58] sm:$0xf] %vm8028_vm3, %v7936_v44  ;;  %v7591_v51 = vmax.f32 %v7363_v45, %v7477_v46 }
 0x24b   : > { %9160 = vmatmul.msk.bf16.gmra.mxu0 %vm5499_vm2, %v9391_v42  ;;  %9217 = vmatmul.msk.bf16.gmra.mxu1 %vm5499_vm2, %v9448_v43 }
 0x24c   : > { %v7709_v52 = vadd.f32 %v10268_v22, %v7591_v51  ;;  %9274 = vmatmul.msk.bf16.gmra.mxu2 %vm5499_vm2, %v9505_v49  ;;  %9331 = vmatmul.msk.bf16.gmra.mxu3 %vm5499_vm2, %v9562_v50  ;;  %v9394_v51 = vld [vmem:[%s10189_s8 + $0xb8] sm:$0xff] }
 0x24e   : > { %v7823_v53 = vmax.f32 %v7709_v52, 0.0  ;;  %v9451_v52 = vld [vmem:[%s10189_s8 + $0x280] sm:$0xff] }
 0x24f   : > { %v6830_v55 = vpop.f32.mrf.mxu2  ;;  %v7115_v56 = vpop.f32.mrf.mxu3 }
 0x250   : > { %v7937_v57 = vpack.c.bf16 %v7823_v53, %v7823_v53  ;;  %v7478_v58 = vmax.f32 %v6830_v55, %v7115_v56  ;;  %v6262_v59 = vpop.f32.mrf.mxu0  ;;  %v6547_v60 = vpop.f32.mrf.mxu1 }
 0x251   : > { %v7365_v5 = vmax.f32 %v6262_v59, %v6547_v60  ;;  %v9565_v59 = vld [vmem:[%s10189_s8 + $0x610] sm:$0xff] }
 0x252   : > { %8052 = vst.msk [vmem:[%s10274_s17 + $0x5c] sm:$0xf] %vm8028_vm3, %v7937_v57  ;;  %v7592_v61 = vmax.f32 %v7364_v54, %v7478_v58  ;;  %v9508_v58 = vld [vmem:[%s10189_s8 + $0x448] sm:$0xff] }
 0x254   : > { %v7710_v62 = vadd.f32 %v10268_v22, %v7592_v61 }
 0x256   : > { %v7824_v63 = vmax.f32 %v7710_v62, 0.0 }
 0x257   : > { %v6832_v0 = vpop.f32.mrf.mxu2  ;;  %v7117_v1 = vpop.f32.mrf.mxu3 }
 0x258   : > { %v7938_v4 = vpack.c.bf16 %v7824_v63, %v7824_v63  ;;  %v7479_v6 = vmax.f32 %v6832_v0, %v7117_v1  ;;  %v6265_v7 = vpop.f32.mrf.mxu0  ;;  %v6550_v8 = vpop.f32.mrf.mxu1 }
 0x259   : > { %v7366_v14 = vmax.f32 %v6265_v7, %v6550_v8 }
 0x25a   : > { %8053 = vst.msk [vmem:[%s10274_s17 + $0x60] sm:$0xf] %vm8028_vm3, %v7938_v4  ;;  %v7593_v11 = vmax.f32 %v7365_v5, %v7479_v6 }
 0x25b   : > { %9161 = vmatmul.msk.bf16.gmra.mxu0 %vm5499_vm2, %v9392_v2  ;;  %9218 = vmatmul.msk.bf16.gmra.mxu1 %vm5499_vm2, %v9449_v3 }
 0x25c   : > { %v7711_v12 = vadd.f32 %v10268_v22, %v7593_v11  ;;  %9275 = vmatmul.msk.bf16.gmra.mxu2 %vm5499_vm2, %v9506_v9  ;;  %9332 = vmatmul.msk.bf16.gmra.mxu3 %vm5499_vm2, %v9563_v10  ;;  %v9395_v11 = vld [vmem:[%s10189_s8 + $0xc0] sm:$0xff] }
 0x25e   : > { %v7825_v13 = vmax.f32 %v7711_v12, 0.0  ;;  %v9452_v12 = vld [vmem:[%s10189_s8 + $0x288] sm:$0xff] }
 0x25f   : > { %v6835_v15 = vpop.f32.mrf.mxu2  ;;  %v7120_v16 = vpop.f32.mrf.mxu3 }
 0x260   : > { %v7939_v17 = vpack.c.bf16 %v7825_v13, %v7825_v13  ;;  %v7480_v18 = vmax.f32 %v6835_v15, %v7120_v16  ;;  %v6267_v19 = vpop.f32.mrf.mxu0  ;;  %v6552_v20 = vpop.f32.mrf.mxu1 }
 0x261   : > { %v7367_v30 = vmax.f32 %v6267_v19, %v6552_v20  ;;  %v9566_v19 = vld [vmem:[%s10189_s8 + $0x618] sm:$0xff] }
 0x262   : > { %8054 = vst.msk [vmem:[%s10274_s17 + $0x64] sm:$0xf] %vm8028_vm3, %v7939_v17  ;;  %v7594_v21 = vmax.f32 %v7366_v14, %v7480_v18  ;;  %v9509_v18 = vld [vmem:[%s10189_s8 + $0x450] sm:$0xff] }
 0x264   : > { %v7712_v23 = vadd.f32 %v10268_v22, %v7594_v21 }
 0x266   : > { %v7826_v24 = vmax.f32 %v7712_v23, 0.0 }
 0x267   : > { %v6837_v25 = vpop.f32.mrf.mxu2  ;;  %v7122_v26 = vpop.f32.mrf.mxu3 }
 0x268   : > { %v7940_v29 = vpack.c.bf16 %v7826_v24, %v7826_v24  ;;  %v7481_v31 = vmax.f32 %v6837_v25, %v7122_v26  ;;  %v6270_v32 = vpop.f32.mrf.mxu0  ;;  %v6555_v33 = vpop.f32.mrf.mxu1 }
 0x269   : > { %v7368_v39 = vmax.f32 %v6270_v32, %v6555_v33 }
 0x26a   : > { %8055 = vst.msk [vmem:[%s10274_s17 + $0x68] sm:$0xf] %vm8028_vm3, %v7940_v29  ;;  %v7595_v36 = vmax.f32 %v7367_v30, %v7481_v31 }
 0x26b   : > { %9162 = vmatmul.msk.bf16.gmra.mxu0 %vm5499_vm2, %v9393_v27  ;;  %9219 = vmatmul.msk.bf16.gmra.mxu1 %vm5499_vm2, %v9450_v28 }
 0x26c   : > { %v7713_v37 = vadd.f32 %v10268_v22, %v7595_v36  ;;  %9276 = vmatmul.msk.bf16.gmra.mxu2 %vm5499_vm2, %v9507_v34  ;;  %9333 = vmatmul.msk.bf16.gmra.mxu3 %vm5499_vm2, %v9564_v35  ;;  %v9396_v36 = vld [vmem:[%s10189_s8 + $0xc8] sm:$0xff] }
 0x26e   : > { %v7827_v38 = vmax.f32 %v7713_v37, 0.0  ;;  %v9453_v37 = vld [vmem:[%s10189_s8 + $0x290] sm:$0xff] }
 0x26f   : > { %v6840_v40 = vpop.f32.mrf.mxu2  ;;  %v7125_v41 = vpop.f32.mrf.mxu3 }
 0x270   : > { %v7941_v42 = vpack.c.bf16 %v7827_v38, %v7827_v38  ;;  %v7482_v43 = vmax.f32 %v6840_v40, %v7125_v41  ;;  %v6272_v44 = vpop.f32.mrf.mxu0  ;;  %v6557_v45 = vpop.f32.mrf.mxu1 }
 0x271   : > { %v7369_v54 = vmax.f32 %v6272_v44, %v6557_v45  ;;  %v9567_v44 = vld [vmem:[%s10189_s8 + $0x620] sm:$0xff] }
 0x272   : > { %8056 = vst.msk [vmem:[%s10274_s17 + $0x6c] sm:$0xf] %vm8028_vm3, %v7941_v42  ;;  %v7596_v46 = vmax.f32 %v7368_v39, %v7482_v43  ;;  %v9510_v43 = vld [vmem:[%s10189_s8 + $0x458] sm:$0xff] }
 0x274   : > { %v7714_v47 = vadd.f32 %v10268_v22, %v7596_v46 }
 0x276   : > { %v7828_v48 = vmax.f32 %v7714_v47, 0.0 }
 0x277   : > { %v6842_v49 = vpop.f32.mrf.mxu2  ;;  %v7127_v50 = vpop.f32.mrf.mxu3 }
 0x278   : > { %v7942_v53 = vpack.c.bf16 %v7828_v48, %v7828_v48  ;;  %v7483_v55 = vmax.f32 %v6842_v49, %v7127_v50  ;;  %v6275_v56 = vpop.f32.mrf.mxu0  ;;  %v6560_v57 = vpop.f32.mrf.mxu1 }
 0x279   : > { %v7370_v63 = vmax.f32 %v6275_v56, %v6560_v57 }
 0x27a   : > { %8057 = vst.msk [vmem:[%s10274_s17 + $0x70] sm:$0xf] %vm8028_vm3, %v7942_v53  ;;  %v7597_v60 = vmax.f32 %v7369_v54, %v7483_v55  ;;  %v10516_v55 = vld [vmem:[%s11028_s2] ss:$0 sm:$0xff] }
 0x27b   : > { %9163 = vmatmul.msk.bf16.gmra.mxu0 %vm5499_vm2, %v9394_v51  ;;  %9220 = vmatmul.msk.bf16.gmra.mxu1 %vm5499_vm2, %v9451_v52 }
 0x27c   : > { %v7715_v61 = vadd.f32 %v10268_v22, %v7597_v60  ;;  %9277 = vmatmul.msk.bf16.gmra.mxu2 %vm5499_vm2, %v9508_v58  ;;  %9334 = vmatmul.msk.bf16.gmra.mxu3 %vm5499_vm2, %v9565_v59  ;;  %v9397_v60 = vld [vmem:[%s10189_s8 + $0xd0] sm:$0xff] }
 0x27e   : > { %v7829_v62 = vmax.f32 %v7715_v61, 0.0  ;;  %v9454_v61 = vld [vmem:[%s10189_s8 + $0x298] sm:$0xff] }
 0x27f   : > { %v6845_v0 = vpop.f32.mrf.mxu2  ;;  %v7130_v1 = vpop.f32.mrf.mxu3 }
 0x280   : > { %v7943_v2 = vpack.c.bf16 %v7829_v62, %v7829_v62  ;;  %v7484_v3 = vmax.f32 %v6845_v0, %v7130_v1  ;;  %v6277_v4 = vpop.f32.mrf.mxu0  ;;  %v6562_v5 = vpop.f32.mrf.mxu1 }
 0x281   : > { %v7371_v14 = vmax.f32 %v6277_v4, %v6562_v5  ;;  %v9568_v4 = vld [vmem:[%s10189_s8 + $0x628] sm:$0xff] }
 0x282   : > { %8058 = vst.msk [vmem:[%s10274_s17 + $0x74] sm:$0xf] %vm8028_vm3, %v7943_v2  ;;  %v7598_v6 = vmax.f32 %v7370_v63, %v7484_v3  ;;  %v9511_v3 = vld [vmem:[%s10189_s8 + $0x460] sm:$0xff] }
 0x284   : > { %v7716_v7 = vadd.f32 %v10268_v22, %v7598_v6 }
 0x286   : > { %v7830_v8 = vmax.f32 %v7716_v7, 0.0 }
 0x287   : > { %v6847_v9 = vpop.f32.mrf.mxu2  ;;  %v7132_v10 = vpop.f32.mrf.mxu3 }
 0x288   : > { %v7944_v13 = vpack.c.bf16 %v7830_v8, %v7830_v8  ;;  %v7485_v15 = vmax.f32 %v6847_v9, %v7132_v10  ;;  %v6280_v16 = vpop.f32.mrf.mxu0  ;;  %v6565_v17 = vpop.f32.mrf.mxu1 }
 0x289   : > { %v7372_v24 = vmax.f32 %v6280_v16, %v6565_v17 }
 0x28a   : > { %8059 = vst.msk [vmem:[%s10274_s17 + $0x78] sm:$0xf] %vm8028_vm3, %v7944_v13  ;;  %v7599_v20 = vmax.f32 %v7371_v14, %v7485_v15 }
 0x28b   : > { %9164 = vmatmul.msk.bf16.gmra.mxu0 %vm5499_vm2, %v9395_v11  ;;  %9221 = vmatmul.msk.bf16.gmra.mxu1 %vm5499_vm2, %v9452_v12 }
 0x28c   : > { %v7717_v21 = vadd.f32 %v10268_v22, %v7599_v20  ;;  %9278 = vmatmul.msk.bf16.gmra.mxu2 %vm5499_vm2, %v9509_v18  ;;  %9335 = vmatmul.msk.bf16.gmra.mxu3 %vm5499_vm2, %v9566_v19  ;;  %v9398_v20 = vld [vmem:[%s10189_s8 + $0xd8] sm:$0xff] }
 0x28e   : > { %v7831_v23 = vmax.f32 %v7717_v21, 0.0  ;;  %v9455_v21 = vld [vmem:[%s10189_s8 + $0x2a0] sm:$0xff] }
 0x28f   : > { %v6850_v25 = vpop.f32.mrf.mxu2  ;;  %v7135_v26 = vpop.f32.mrf.mxu3 }
 0x290   : > { %v7945_v27 = vpack.c.bf16 %v7831_v23, %v7831_v23  ;;  %v7486_v28 = vmax.f32 %v6850_v25, %v7135_v26  ;;  %v6282_v29 = vpop.f32.mrf.mxu0  ;;  %v6567_v30 = vpop.f32.mrf.mxu1 }
 0x291   : > { %v7373_v39 = vmax.f32 %v6282_v29, %v6567_v30  ;;  %v9569_v29 = vld [vmem:[%s10189_s8 + $0x630] sm:$0xff] }
 0x292   : > { %8060 = vst.msk [vmem:[%s10274_s17 + $0x7c] sm:$0xf] %vm8028_vm3, %v7945_v27  ;;  %v7600_v31 = vmax.f32 %v7372_v24, %v7486_v28  ;;  %v9512_v28 = vld [vmem:[%s10189_s8 + $0x468] sm:$0xff] }
 0x294   : > { %v7718_v32 = vadd.f32 %v10268_v22, %v7600_v31 }
 0x296   : > { %v7832_v33 = vmax.f32 %v7718_v32, 0.0 }
 0x297   : > { %v6852_v34 = vpop.f32.mrf.mxu2  ;;  %v7137_v35 = vpop.f32.mrf.mxu3 }
 0x298   : > { %v7946_v38 = vpack.c.bf16 %v7832_v33, %v7832_v33  ;;  %v7487_v40 = vmax.f32 %v6852_v34, %v7137_v35  ;;  %v6285_v41 = vpop.f32.mrf.mxu0  ;;  %v6570_v42 = vpop.f32.mrf.mxu1 }
 0x299   : > { %v7374_v48 = vmax.f32 %v6285_v41, %v6570_v42 }
 0x29a   : > { %8061 = vst.msk [vmem:[%s10274_s17 + $0x80] sm:$0xf] %vm8028_vm3, %v7946_v38  ;;  %v7601_v45 = vmax.f32 %v7373_v39, %v7487_v40 }
 0x29b   : > { %9165 = vmatmul.msk.bf16.gmra.mxu0 %vm5499_vm2, %v9396_v36  ;;  %9222 = vmatmul.msk.bf16.gmra.mxu1 %vm5499_vm2, %v9453_v37 }
 0x29c   : > { %v7719_v46 = vadd.f32 %v10268_v22, %v7601_v45  ;;  %9279 = vmatmul.msk.bf16.gmra.mxu2 %vm5499_vm2, %v9510_v43  ;;  %9336 = vmatmul.msk.bf16.gmra.mxu3 %vm5499_vm2, %v9567_v44  ;;  %v9399_v45 = vld [vmem:[%s10189_s8 + $0xe0] sm:$0xff] }
 0x29e   : > { %v7833_v47 = vmax.f32 %v7719_v46, 0.0  ;;  %v9456_v46 = vld [vmem:[%s10189_s8 + $0x2a8] sm:$0xff] }
 0x29f   : > { %v6855_v49 = vpop.f32.mrf.mxu2  ;;  %v7140_v50 = vpop.f32.mrf.mxu3 }
 0x2a0   : > { %v7947_v51 = vpack.c.bf16 %v7833_v47, %v7833_v47  ;;  %v7488_v52 = vmax.f32 %v6855_v49, %v7140_v50  ;;  %v6287_v53 = vpop.f32.mrf.mxu0  ;;  %v6572_v54 = vpop.f32.mrf.mxu1 }
 0x2a1   : > { %v7375_v63 = vmax.f32 %v6287_v53, %v6572_v54  ;;  %v9570_v53 = vld [vmem:[%s10189_s8 + $0x638] sm:$0xff] }
 0x2a2   : > { %8062 = vst.msk [vmem:[%s10274_s17 + $0x84] sm:$0xf] %vm8028_vm3, %v7947_v51  ;;  %v7602_v22 = vmax.f32 %v7374_v48, %v7488_v52  ;;  %v9513_v52 = vld [vmem:[%s10189_s8 + $0x470] sm:$0xff] }
 0x2a4   : > { %v7720_v56 = vadd.f32 %v10516_v55, %v7602_v22 }
 0x2a6   : > { %v7834_v57 = vmax.f32 %v7720_v56, 0.0 }
 0x2a7   : > { %v6857_v58 = vpop.f32.mrf.mxu2  ;;  %v7142_v59 = vpop.f32.mrf.mxu3 }
 0x2a8   : > { %v7948_v62 = vpack.c.bf16 %v7834_v57, %v7834_v57  ;;  %v7489_v0 = vmax.f32 %v6857_v58, %v7142_v59  ;;  %v6290_v1 = vpop.f32.mrf.mxu0  ;;  %v6575_v2 = vpop.f32.mrf.mxu1 }
 0x2a9   : > { %v7376_v8 = vmax.f32 %v6290_v1, %v6575_v2 }
 0x2aa   : > { %8063 = vst.msk [vmem:[%s10274_s17 + $0x88] sm:$0xf] %vm8028_vm3, %v7948_v62  ;;  %v7603_v5 = vmax.f32 %v7375_v63, %v7489_v0 }
 0x2ab   : > { %9166 = vmatmul.msk.bf16.gmra.mxu0 %vm5499_vm2, %v9397_v60  ;;  %9223 = vmatmul.msk.bf16.gmra.mxu1 %vm5499_vm2, %v9454_v61 }
 0x2ac   : > { %v7721_v6 = vadd.f32 %v10516_v55, %v7603_v5  ;;  %9280 = vmatmul.msk.bf16.gmra.mxu2 %vm5499_vm2, %v9511_v3  ;;  %9337 = vmatmul.msk.bf16.gmra.mxu3 %vm5499_vm2, %v9568_v4  ;;  %v9400_v5 = vld [vmem:[%s10189_s8 + $0xe8] sm:$0xff] }
 0x2ae   : > { %v7835_v7 = vmax.f32 %v7721_v6, 0.0  ;;  %v9457_v6 = vld [vmem:[%s10189_s8 + $0x2b0] sm:$0xff] }
 0x2af   : > { %v6860_v9 = vpop.f32.mrf.mxu2  ;;  %v7145_v10 = vpop.f32.mrf.mxu3 }
 0x2b0   : > { %v7949_v11 = vpack.c.bf16 %v7835_v7, %v7835_v7  ;;  %v7490_v12 = vmax.f32 %v6860_v9, %v7145_v10  ;;  %v6292_v13 = vpop.f32.mrf.mxu0  ;;  %v6577_v14 = vpop.f32.mrf.mxu1 }
 0x2b1   : > { %v7377_v24 = vmax.f32 %v6292_v13, %v6577_v14  ;;  %v9571_v13 = vld [vmem:[%s10189_s8 + $0x640] sm:$0xff] }
 0x2b2   : > { %8064 = vst.msk [vmem:[%s10274_s17 + $0x8c] sm:$0xf] %vm8028_vm3, %v7949_v11  ;;  %v7604_v15 = vmax.f32 %v7376_v8, %v7490_v12  ;;  %v9514_v12 = vld [vmem:[%s10189_s8 + $0x478] sm:$0xff] }
 0x2b4   : > { %v7722_v16 = vadd.f32 %v10516_v55, %v7604_v15 }
 0x2b6   : > { %v7836_v17 = vmax.f32 %v7722_v16, 0.0 }
 0x2b7   : > { %v6862_v18 = vpop.f32.mrf.mxu2  ;;  %v7147_v19 = vpop.f32.mrf.mxu3 }
 0x2b8   : > { %v7950_v23 = vpack.c.bf16 %v7836_v17, %v7836_v17  ;;  %v7491_v25 = vmax.f32 %v6862_v18, %v7147_v19  ;;  %v6295_v26 = vpop.f32.mrf.mxu0  ;;  %v6580_v27 = vpop.f32.mrf.mxu1 }
 0x2b9   : > { %v7378_v33 = vmax.f32 %v6295_v26, %v6580_v27 }
 0x2ba   : > { %8065 = vst.msk [vmem:[%s10274_s17 + $0x90] sm:$0xf] %vm8028_vm3, %v7950_v23  ;;  %v7605_v30 = vmax.f32 %v7377_v24, %v7491_v25 }
 0x2bb   : > { %9167 = vmatmul.msk.bf16.gmra.mxu0 %vm5499_vm2, %v9398_v20  ;;  %9224 = vmatmul.msk.bf16.gmra.mxu1 %vm5499_vm2, %v9455_v21 }
 0x2bc   : > { %v7723_v31 = vadd.f32 %v10516_v55, %v7605_v30  ;;  %9281 = vmatmul.msk.bf16.gmra.mxu2 %vm5499_vm2, %v9512_v28  ;;  %9338 = vmatmul.msk.bf16.gmra.mxu3 %vm5499_vm2, %v9569_v29  ;;  %v9401_v30 = vld [vmem:[%s10189_s8 + $0xf0] sm:$0xff] }
 0x2be   : > { %v7837_v32 = vmax.f32 %v7723_v31, 0.0  ;;  %v9458_v31 = vld [vmem:[%s10189_s8 + $0x2b8] sm:$0xff] }
 0x2bf   : > { %v6865_v34 = vpop.f32.mrf.mxu2  ;;  %v7150_v35 = vpop.f32.mrf.mxu3 }
 0x2c0   : > { %v7951_v36 = vpack.c.bf16 %v7837_v32, %v7837_v32  ;;  %v7492_v37 = vmax.f32 %v6865_v34, %v7150_v35  ;;  %v6297_v38 = vpop.f32.mrf.mxu0  ;;  %v6582_v39 = vpop.f32.mrf.mxu1 }
 0x2c1   : > { %v7379_v48 = vmax.f32 %v6297_v38, %v6582_v39  ;;  %v9572_v38 = vld [vmem:[%s10189_s8 + $0x648] sm:$0xff] }
 0x2c2   : > { %8066 = vst.msk [vmem:[%s10274_s17 + $0x94] sm:$0xf] %vm8028_vm3, %v7951_v36  ;;  %v7606_v40 = vmax.f32 %v7378_v33, %v7492_v37  ;;  %v9515_v37 = vld [vmem:[%s10189_s8 + $0x480] sm:$0xff] }
 0x2c4   : > { %v7724_v41 = vadd.f32 %v10516_v55, %v7606_v40 }
 0x2c6   : > { %v7838_v42 = vmax.f32 %v7724_v41, 0.0 }
 0x2c7   : > { %v6867_v43 = vpop.f32.mrf.mxu2  ;;  %v7152_v44 = vpop.f32.mrf.mxu3 }
 0x2c8   : > { %v7952_v47 = vpack.c.bf16 %v7838_v42, %v7838_v42  ;;  %v7493_v49 = vmax.f32 %v6867_v43, %v7152_v44  ;;  %v6300_v50 = vpop.f32.mrf.mxu0  ;;  %v6585_v51 = vpop.f32.mrf.mxu1 }
 0x2c9   : > { %v7380_v57 = vmax.f32 %v6300_v50, %v6585_v51 }
 0x2ca   : > { %8067 = vst.msk [vmem:[%s10274_s17 + $0x98] sm:$0xf] %vm8028_vm3, %v7952_v47  ;;  %v7607_v54 = vmax.f32 %v7379_v48, %v7493_v49 }
 0x2cb   : > { %9168 = vmatmul.msk.bf16.gmra.mxu0 %vm5499_vm2, %v9399_v45  ;;  %9225 = vmatmul.msk.bf16.gmra.mxu1 %vm5499_vm2, %v9456_v46 }
 0x2cc   : > { %v7725_v22 = vadd.f32 %v10516_v55, %v7607_v54  ;;  %9282 = vmatmul.msk.bf16.gmra.mxu2 %vm5499_vm2, %v9513_v52  ;;  %9339 = vmatmul.msk.bf16.gmra.mxu3 %vm5499_vm2, %v9570_v53  ;;  %v9402_v54 = vld [vmem:[%s10189_s8 + $0xf8] sm:$0xff] }
 0x2ce   : > { %v7839_v56 = vmax.f32 %v7725_v22, 0.0  ;;  %v9459_v22 = vld [vmem:[%s10189_s8 + $0x2c0] sm:$0xff] }
 0x2cf   : > { %v6870_v58 = vpop.f32.mrf.mxu2  ;;  %v7155_v59 = vpop.f32.mrf.mxu3 }
 0x2d0   : > { %v7953_v60 = vpack.c.bf16 %v7839_v56, %v7839_v56  ;;  %v7494_v61 = vmax.f32 %v6870_v58, %v7155_v59  ;;  %v6302_v62 = vpop.f32.mrf.mxu0  ;;  %v6587_v63 = vpop.f32.mrf.mxu1 }
 0x2d1   : > { %v7381_v8 = vmax.f32 %v6302_v62, %v6587_v63  ;;  %v9573_v62 = vld [vmem:[%s10189_s8 + $0x650] sm:$0xff] }
 0x2d2   : > { %8068 = vst.msk [vmem:[%s10274_s17 + $0x9c] sm:$0xf] %vm8028_vm3, %v7953_v60  ;;  %v7608_v0 = vmax.f32 %v7380_v57, %v7494_v61  ;;  %v9516_v61 = vld [vmem:[%s10189_s8 + $0x488] sm:$0xff] }
 0x2d4   : > { %v7726_v1 = vadd.f32 %v10516_v55, %v7608_v0 }
 0x2d6   : > { %v7840_v2 = vmax.f32 %v7726_v1, 0.0 }
 0x2d7   : > { %v6872_v3 = vpop.f32.mrf.mxu2  ;;  %v7157_v4 = vpop.f32.mrf.mxu3 }
 0x2d8   : > { %v7954_v7 = vpack.c.bf16 %v7840_v2, %v7840_v2  ;;  %v7495_v9 = vmax.f32 %v6872_v3, %v7157_v4  ;;  %v6305_v10 = vpop.f32.mrf.mxu0  ;;  %v6590_v11 = vpop.f32.mrf.mxu1 }
 0x2d9   : > { %v7382_v17 = vmax.f32 %v6305_v10, %v6590_v11 }
 0x2da   : > { %8069 = vst.msk [vmem:[%s10274_s17 + $0xa0] sm:$0xf] %vm8028_vm3, %v7954_v7  ;;  %v7609_v14 = vmax.f32 %v7381_v8, %v7495_v9 }
 0x2db   : > { %9169 = vmatmul.msk.bf16.gmra.mxu0 %vm5499_vm2, %v9400_v5  ;;  %9226 = vmatmul.msk.bf16.gmra.mxu1 %vm5499_vm2, %v9457_v6 }
 0x2dc   : > { %v7727_v15 = vadd.f32 %v10516_v55, %v7609_v14  ;;  %9283 = vmatmul.msk.bf16.gmra.mxu2 %vm5499_vm2, %v9514_v12  ;;  %9340 = vmatmul.msk.bf16.gmra.mxu3 %vm5499_vm2, %v9571_v13  ;;  %v9403_v14 = vld [vmem:[%s10189_s8 + $0x100] sm:$0xff] }
 0x2de   : > { %v7841_v16 = vmax.f32 %v7727_v15, 0.0  ;;  %v9460_v15 = vld [vmem:[%s10189_s8 + $0x2c8] sm:$0xff] }
 0x2df   : > { %v6875_v18 = vpop.f32.mrf.mxu2  ;;  %v7160_v19 = vpop.f32.mrf.mxu3 }
 0x2e0   : > { %v7955_v20 = vpack.c.bf16 %v7841_v16, %v7841_v16  ;;  %v7496_v21 = vmax.f32 %v6875_v18, %v7160_v19  ;;  %v6307_v23 = vpop.f32.mrf.mxu0  ;;  %v6592_v24 = vpop.f32.mrf.mxu1 }
 0x2e1   : > { %v7383_v33 = vmax.f32 %v6307_v23, %v6592_v24  ;;  %v9574_v23 = vld [vmem:[%s10189_s8 + $0x658] sm:$0xff] }
 0x2e2   : > { %8070 = vst.msk [vmem:[%s10274_s17 + $0xa4] sm:$0xf] %vm8028_vm3, %v7955_v20  ;;  %v7610_v25 = vmax.f32 %v7382_v17, %v7496_v21  ;;  %v9517_v21 = vld [vmem:[%s10189_s8 + $0x490] sm:$0xff] }
 0x2e4   : > { %v7728_v26 = vadd.f32 %v10516_v55, %v7610_v25 }
 0x2e6   : > { %v7842_v27 = vmax.f32 %v7728_v26, 0.0 }
 0x2e7   : > { %v6877_v28 = vpop.f32.mrf.mxu2  ;;  %v7162_v29 = vpop.f32.mrf.mxu3 }
 0x2e8   : > { %v7956_v32 = vpack.c.bf16 %v7842_v27, %v7842_v27  ;;  %v7497_v34 = vmax.f32 %v6877_v28, %v7162_v29  ;;  %v6310_v35 = vpop.f32.mrf.mxu0  ;;  %v6595_v36 = vpop.f32.mrf.mxu1 }
 0x2e9   : > { %v7384_v42 = vmax.f32 %v6310_v35, %v6595_v36 }
 0x2ea   : > { %8071 = vst.msk [vmem:[%s10274_s17 + $0xa8] sm:$0xf] %vm8028_vm3, %v7956_v32  ;;  %v7611_v39 = vmax.f32 %v7383_v33, %v7497_v34 }
 0x2eb   : > { %9170 = vmatmul.msk.bf16.gmra.mxu0 %vm5499_vm2, %v9401_v30  ;;  %9227 = vmatmul.msk.bf16.gmra.mxu1 %vm5499_vm2, %v9458_v31 }
 0x2ec   : > { %v7729_v40 = vadd.f32 %v10516_v55, %v7611_v39  ;;  %9284 = vmatmul.msk.bf16.gmra.mxu2 %vm5499_vm2, %v9515_v37  ;;  %9341 = vmatmul.msk.bf16.gmra.mxu3 %vm5499_vm2, %v9572_v38  ;;  %v9404_v39 = vld [vmem:[%s10189_s8 + $0x108] sm:$0xff] }
 0x2ee   : > { %v7843_v41 = vmax.f32 %v7729_v40, 0.0  ;;  %v9461_v40 = vld [vmem:[%s10189_s8 + $0x2d0] sm:$0xff] }
 0x2ef   : > { %v6880_v43 = vpop.f32.mrf.mxu2  ;;  %v7165_v44 = vpop.f32.mrf.mxu3 }
 0x2f0   : > { %v7957_v45 = vpack.c.bf16 %v7843_v41, %v7843_v41  ;;  %v7498_v46 = vmax.f32 %v6880_v43, %v7165_v44  ;;  %v6312_v47 = vpop.f32.mrf.mxu0  ;;  %v6597_v48 = vpop.f32.mrf.mxu1 }
 0x2f1   : > { %v7385_v57 = vmax.f32 %v6312_v47, %v6597_v48  ;;  %v9575_v47 = vld [vmem:[%s10189_s8 + $0x660] sm:$0xff] }
 0x2f2   : > { %8072 = vst.msk [vmem:[%s10274_s17 + $0xac] sm:$0xf] %vm8028_vm3, %v7957_v45  ;;  %v7612_v49 = vmax.f32 %v7384_v42, %v7498_v46  ;;  %v9518_v46 = vld [vmem:[%s10189_s8 + $0x498] sm:$0xff] }
 0x2f4   : > { %v7730_v50 = vadd.f32 %v10516_v55, %v7612_v49 }
 0x2f6   : > { %v7844_v51 = vmax.f32 %v7730_v50, 0.0 }
 0x2f7   : > { %v6882_v52 = vpop.f32.mrf.mxu2  ;;  %v7167_v53 = vpop.f32.mrf.mxu3 }
 0x2f8   : > { %v7958_v56 = vpack.c.bf16 %v7844_v51, %v7844_v51  ;;  %v7499_v58 = vmax.f32 %v6882_v52, %v7167_v53  ;;  %v6315_v59 = vpop.f32.mrf.mxu0  ;;  %v6600_v60 = vpop.f32.mrf.mxu1 }
 0x2f9   : > { %v7386_v2 = vmax.f32 %v6315_v59, %v6600_v60 }
 0x2fa   : > { %8073 = vst.msk [vmem:[%s10274_s17 + $0xb0] sm:$0xf] %vm8028_vm3, %v7958_v56  ;;  %v7613_v63 = vmax.f32 %v7385_v57, %v7499_v58 }
 0x2fb   : > { %9171 = vmatmul.msk.bf16.gmra.mxu0 %vm5499_vm2, %v9402_v54  ;;  %9228 = vmatmul.msk.bf16.gmra.mxu1 %vm5499_vm2, %v9459_v22 }
 0x2fc   : > { %v7731_v0 = vadd.f32 %v10516_v55, %v7613_v63  ;;  %9285 = vmatmul.msk.bf16.gmra.mxu2 %vm5499_vm2, %v9516_v61  ;;  %9342 = vmatmul.msk.bf16.gmra.mxu3 %vm5499_vm2, %v9573_v62  ;;  %v9405_v63 = vld [vmem:[%s10189_s8 + $0x110] sm:$0xff] }
 0x2fe   : > { %v7845_v1 = vmax.f32 %v7731_v0, 0.0  ;;  %v9462_v0 = vld [vmem:[%s10189_s8 + $0x2d8] sm:$0xff] }
 0x2ff   : > { %v6885_v3 = vpop.f32.mrf.mxu2  ;;  %v7170_v4 = vpop.f32.mrf.mxu3 }
 0x300   : > { %v7959_v5 = vpack.c.bf16 %v7845_v1, %v7845_v1  ;;  %v7500_v6 = vmax.f32 %v6885_v3, %v7170_v4  ;;  %v6317_v7 = vpop.f32.mrf.mxu0  ;;  %v6602_v8 = vpop.f32.mrf.mxu1 }
 0x301   : > { %v7387_v17 = vmax.f32 %v6317_v7, %v6602_v8  ;;  %v9576_v7 = vld [vmem:[%s10189_s8 + $0x668] sm:$0xff] }
 0x302   : > { %8074 = vst.msk [vmem:[%s10274_s17 + $0xb4] sm:$0xf] %vm8028_vm3, %v7959_v5  ;;  %v7614_v9 = vmax.f32 %v7386_v2, %v7500_v6  ;;  %v9519_v6 = vld [vmem:[%s10189_s8 + $0x4a0] sm:$0xff] }
 0x304   : > { %v7732_v10 = vadd.f32 %v10516_v55, %v7614_v9 }
 0x306   : > { %v7846_v11 = vmax.f32 %v7732_v10, 0.0 }
 0x307   : > { %v6887_v12 = vpop.f32.mrf.mxu2  ;;  %v7172_v13 = vpop.f32.mrf.mxu3 }
 0x308   : > { %v7960_v16 = vpack.c.bf16 %v7846_v11, %v7846_v11  ;;  %v7501_v18 = vmax.f32 %v6887_v12, %v7172_v13  ;;  %v6320_v19 = vpop.f32.mrf.mxu0  ;;  %v6605_v20 = vpop.f32.mrf.mxu1 }
 0x309   : > { %v7388_v27 = vmax.f32 %v6320_v19, %v6605_v20 }
 0x30a   : > { %8075 = vst.msk [vmem:[%s10274_s17 + $0xb8] sm:$0xf] %vm8028_vm3, %v7960_v16  ;;  %v7615_v24 = vmax.f32 %v7387_v17, %v7501_v18 }
 0x30b   : > { %9172 = vmatmul.msk.bf16.gmra.mxu0 %vm5499_vm2, %v9403_v14  ;;  %9229 = vmatmul.msk.bf16.gmra.mxu1 %vm5499_vm2, %v9460_v15 }
 0x30c   : > { %v7733_v25 = vadd.f32 %v10516_v55, %v7615_v24  ;;  %9286 = vmatmul.msk.bf16.gmra.mxu2 %vm5499_vm2, %v9517_v21  ;;  %9343 = vmatmul.msk.bf16.gmra.mxu3 %vm5499_vm2, %v9574_v23  ;;  %v9406_v24 = vld [vmem:[%s10189_s8 + $0x118] sm:$0xff] }
 0x30e   : > { %v7847_v26 = vmax.f32 %v7733_v25, 0.0  ;;  %v9463_v25 = vld [vmem:[%s10189_s8 + $0x2e0] sm:$0xff] }
 0x30f   : > { %v6890_v28 = vpop.f32.mrf.mxu2  ;;  %v7175_v29 = vpop.f32.mrf.mxu3 }
 0x310   : > { %v7961_v30 = vpack.c.bf16 %v7847_v26, %v7847_v26  ;;  %v7502_v31 = vmax.f32 %v6890_v28, %v7175_v29  ;;  %v6322_v32 = vpop.f32.mrf.mxu0  ;;  %v6607_v33 = vpop.f32.mrf.mxu1 }
 0x311   : > { %v7389_v42 = vmax.f32 %v6322_v32, %v6607_v33  ;;  %v9577_v32 = vld [vmem:[%s10189_s8 + $0x670] sm:$0xff] }
 0x312   : > { %8076 = vst.msk [vmem:[%s10274_s17 + $0xbc] sm:$0xf] %vm8028_vm3, %v7961_v30  ;;  %v7616_v34 = vmax.f32 %v7388_v27, %v7502_v31  ;;  %v9520_v31 = vld [vmem:[%s10189_s8 + $0x4a8] sm:$0xff] }
 0x314   : > { %v7734_v35 = vadd.f32 %v10516_v55, %v7616_v34 }
 0x316   : > { %v7848_v36 = vmax.f32 %v7734_v35, 0.0 }
 0x317   : > { %v6892_v37 = vpop.f32.mrf.mxu2  ;;  %v7177_v38 = vpop.f32.mrf.mxu3 }
 0x318   : > { %v7962_v41 = vpack.c.bf16 %v7848_v36, %v7848_v36  ;;  %v7503_v43 = vmax.f32 %v6892_v37, %v7177_v38  ;;  %v6325_v44 = vpop.f32.mrf.mxu0  ;;  %v6610_v45 = vpop.f32.mrf.mxu1 }
 0x319   : > { %v7390_v51 = vmax.f32 %v6325_v44, %v6610_v45 }
 0x31a   : > { %8077 = vst.msk [vmem:[%s10274_s17 + $0xc0] sm:$0xf] %vm8028_vm3, %v7962_v41  ;;  %v7617_v48 = vmax.f32 %v7389_v42, %v7503_v43 }
 0x31b   : > { %9173 = vmatmul.msk.bf16.gmra.mxu0 %vm5499_vm2, %v9404_v39  ;;  %9230 = vmatmul.msk.bf16.gmra.mxu1 %vm5499_vm2, %v9461_v40 }
 0x31c   : > { %v7735_v49 = vadd.f32 %v10516_v55, %v7617_v48  ;;  %9287 = vmatmul.msk.bf16.gmra.mxu2 %vm5499_vm2, %v9518_v46  ;;  %9344 = vmatmul.msk.bf16.gmra.mxu3 %vm5499_vm2, %v9575_v47  ;;  %v9407_v48 = vld [vmem:[%s10189_s8 + $0x120] sm:$0xff] }
 0x31e   : > { %v7849_v50 = vmax.f32 %v7735_v49, 0.0  ;;  %v9464_v49 = vld [vmem:[%s10189_s8 + $0x2e8] sm:$0xff] }
 0x31f   : > { %v6895_v52 = vpop.f32.mrf.mxu2  ;;  %v7180_v53 = vpop.f32.mrf.mxu3 }
 0x320   : > { %v7963_v54 = vpack.c.bf16 %v7849_v50, %v7849_v50  ;;  %v7504_v22 = vmax.f32 %v6895_v52, %v7180_v53  ;;  %v6327_v56 = vpop.f32.mrf.mxu0  ;;  %v6612_v57 = vpop.f32.mrf.mxu1 }
 0x321   : > { %v7391_v2 = vmax.f32 %v6327_v56, %v6612_v57  ;;  %v9578_v56 = vld [vmem:[%s10189_s8 + $0x678] sm:$0xff] }
 0x322   : > { %8078 = vst.msk [vmem:[%s10274_s17 + $0xc4] sm:$0xf] %vm8028_vm3, %v7963_v54  ;;  %v7618_v58 = vmax.f32 %v7390_v51, %v7504_v22  ;;  %v9521_v22 = vld [vmem:[%s10189_s8 + $0x4b0] sm:$0xff] }
 0x324   : > { %v7736_v59 = vadd.f32 %v10516_v55, %v7618_v58 }
 0x326   : > { %v7850_v60 = vmax.f32 %v7736_v59, 0.0 }
 0x327   : > { %v6897_v61 = vpop.f32.mrf.mxu2  ;;  %v7182_v62 = vpop.f32.mrf.mxu3 }
 0x328   : > { %v7964_v1 = vpack.c.bf16 %v7850_v60, %v7850_v60  ;;  %v7505_v3 = vmax.f32 %v6897_v61, %v7182_v62  ;;  %v6330_v4 = vpop.f32.mrf.mxu0  ;;  %v6615_v5 = vpop.f32.mrf.mxu1 }
 0x329   : > { %v7392_v11 = vmax.f32 %v6330_v4, %v6615_v5 }
 0x32a   : > { %8079 = vst.msk [vmem:[%s10274_s17 + $0xc8] sm:$0xf] %vm8028_vm3, %v7964_v1  ;;  %v7619_v8 = vmax.f32 %v7391_v2, %v7505_v3 }
 0x32b   : > { %9174 = vmatmul.msk.bf16.gmra.mxu0 %vm5499_vm2, %v9405_v63  ;;  %9231 = vmatmul.msk.bf16.gmra.mxu1 %vm5499_vm2, %v9462_v0 }
 0x32c   : > { %v7737_v9 = vadd.f32 %v10516_v55, %v7619_v8  ;;  %9288 = vmatmul.msk.bf16.gmra.mxu2 %vm5499_vm2, %v9519_v6  ;;  %9345 = vmatmul.msk.bf16.gmra.mxu3 %vm5499_vm2, %v9576_v7  ;;  %v9408_v8 = vld [vmem:[%s10189_s8 + $0x128] sm:$0xff] }
 0x32e   : > { %v7851_v10 = vmax.f32 %v7737_v9, 0.0  ;;  %v9465_v9 = vld [vmem:[%s10189_s8 + $0x2f0] sm:$0xff] }
 0x32f   : > { %v6900_v12 = vpop.f32.mrf.mxu2  ;;  %v7185_v13 = vpop.f32.mrf.mxu3 }
 0x330   : > { %v7965_v14 = vpack.c.bf16 %v7851_v10, %v7851_v10  ;;  %v7506_v15 = vmax.f32 %v6900_v12, %v7185_v13  ;;  %v6332_v16 = vpop.f32.mrf.mxu0  ;;  %v6617_v17 = vpop.f32.mrf.mxu1 }
 0x331   : > { %v7393_v27 = vmax.f32 %v6332_v16, %v6617_v17  ;;  %v9579_v16 = vld [vmem:[%s10189_s8 + $0x680] sm:$0xff] }
 0x332   : > { %8080 = vst.msk [vmem:[%s10274_s17 + $0xcc] sm:$0xf] %vm8028_vm3, %v7965_v14  ;;  %v7620_v18 = vmax.f32 %v7392_v11, %v7506_v15  ;;  %v9522_v15 = vld [vmem:[%s10189_s8 + $0x4b8] sm:$0xff] }
 0x334   : > { %v7738_v19 = vadd.f32 %v10516_v55, %v7620_v18 }
 0x336   : > { %v7852_v20 = vmax.f32 %v7738_v19, 0.0 }
 0x337   : > { %v6902_v21 = vpop.f32.mrf.mxu2  ;;  %v7187_v23 = vpop.f32.mrf.mxu3 }
 0x338   : > { %v7966_v26 = vpack.c.bf16 %v7852_v20, %v7852_v20  ;;  %v7507_v28 = vmax.f32 %v6902_v21, %v7187_v23  ;;  %v6335_v29 = vpop.f32.mrf.mxu0  ;;  %v6620_v30 = vpop.f32.mrf.mxu1 }
 0x339   : > { %v7394_v36 = vmax.f32 %v6335_v29, %v6620_v30 }
 0x33a   : > { %8081 = vst.msk [vmem:[%s10274_s17 + $0xd0] sm:$0xf] %vm8028_vm3, %v7966_v26  ;;  %v7621_v33 = vmax.f32 %v7393_v27, %v7507_v28 }
 0x33b   : > { %9175 = vmatmul.msk.bf16.gmra.mxu0 %vm5499_vm2, %v9406_v24  ;;  %9232 = vmatmul.msk.bf16.gmra.mxu1 %vm5499_vm2, %v9463_v25 }
 0x33c   : > { %v7739_v34 = vadd.f32 %v10516_v55, %v7621_v33  ;;  %9289 = vmatmul.msk.bf16.gmra.mxu2 %vm5499_vm2, %v9520_v31  ;;  %9346 = vmatmul.msk.bf16.gmra.mxu3 %vm5499_vm2, %v9577_v32  ;;  %v9409_v33 = vld [vmem:[%s10189_s8 + $0x130] sm:$0xff] }
 0x33e   : > { %v7853_v35 = vmax.f32 %v7739_v34, 0.0  ;;  %v9466_v34 = vld [vmem:[%s10189_s8 + $0x2f8] sm:$0xff] }
 0x33f   : > { %v6905_v37 = vpop.f32.mrf.mxu2  ;;  %v7190_v38 = vpop.f32.mrf.mxu3 }
 0x340   : > { %v7967_v39 = vpack.c.bf16 %v7853_v35, %v7853_v35  ;;  %v7508_v40 = vmax.f32 %v6905_v37, %v7190_v38  ;;  %v6337_v41 = vpop.f32.mrf.mxu0  ;;  %v6622_v42 = vpop.f32.mrf.mxu1 }
 0x341   : > { %v7395_v51 = vmax.f32 %v6337_v41, %v6622_v42  ;;  %v9580_v41 = vld [vmem:[%s10189_s8 + $0x688] sm:$0xff] }
 0x342   : > { %8082 = vst.msk [vmem:[%s10274_s17 + $0xd4] sm:$0xf] %vm8028_vm3, %v7967_v39  ;;  %v7622_v43 = vmax.f32 %v7394_v36, %v7508_v40  ;;  %v9523_v40 = vld [vmem:[%s10189_s8 + $0x4c0] sm:$0xff] }
 0x344   : > { %v7740_v44 = vadd.f32 %v10516_v55, %v7622_v43 }
 0x346   : > { %v7854_v45 = vmax.f32 %v7740_v44, 0.0 }
 0x347   : > { %v6907_v46 = vpop.f32.mrf.mxu2  ;;  %v7192_v47 = vpop.f32.mrf.mxu3 }
 0x348   : > { %v7968_v50 = vpack.c.bf16 %v7854_v45, %v7854_v45  ;;  %v7509_v52 = vmax.f32 %v6907_v46, %v7192_v47  ;;  %v6340_v53 = vpop.f32.mrf.mxu0  ;;  %v6625_v54 = vpop.f32.mrf.mxu1 }
 0x349   : > { %v7396_v60 = vmax.f32 %v6340_v53, %v6625_v54 }
 0x34a   : > { %8083 = vst.msk [vmem:[%s10274_s17 + $0xd8] sm:$0xf] %vm8028_vm3, %v7968_v50  ;;  %v7623_v57 = vmax.f32 %v7395_v51, %v7509_v52 }
 0x34b   : > { %9176 = vmatmul.msk.bf16.gmra.mxu0 %vm5499_vm2, %v9407_v48  ;;  %9233 = vmatmul.msk.bf16.gmra.mxu1 %vm5499_vm2, %v9464_v49 }
 0x34c   : > { %v7741_v58 = vadd.f32 %v10516_v55, %v7623_v57  ;;  %9290 = vmatmul.msk.bf16.gmra.mxu2 %vm5499_vm2, %v9521_v22  ;;  %9347 = vmatmul.msk.bf16.gmra.mxu3 %vm5499_vm2, %v9578_v56  ;;  %v9410_v57 = vld [vmem:[%s10189_s8 + $0x138] sm:$0xff] }
 0x34e   : > { %v7855_v59 = vmax.f32 %v7741_v58, 0.0  ;;  %v9467_v58 = vld [vmem:[%s10189_s8 + $0x300] sm:$0xff] }
 0x34f   : > { %v6910_v61 = vpop.f32.mrf.mxu2  ;;  %v7195_v62 = vpop.f32.mrf.mxu3 }
 0x350   : > { %v7969_v63 = vpack.c.bf16 %v7855_v59, %v7855_v59  ;;  %v7510_v0 = vmax.f32 %v6910_v61, %v7195_v62  ;;  %v6342_v1 = vpop.f32.mrf.mxu0  ;;  %v6627_v2 = vpop.f32.mrf.mxu1 }
 0x351   : > { %v7397_v11 = vmax.f32 %v6342_v1, %v6627_v2  ;;  %v9581_v1 = vld [vmem:[%s10189_s8 + $0x690] sm:$0xff] }
 0x352   : > { %8084 = vst.msk [vmem:[%s10274_s17 + $0xdc] sm:$0xf] %vm8028_vm3, %v7969_v63  ;;  %v7624_v3 = vmax.f32 %v7396_v60, %v7510_v0  ;;  %v9524_v0 = vld [vmem:[%s10189_s8 + $0x4c8] sm:$0xff] }
 0x354   : > { %v7742_v4 = vadd.f32 %v10516_v55, %v7624_v3 }
 0x356   : > { %v7856_v5 = vmax.f32 %v7742_v4, 0.0 }
 0x357   : > { %v6912_v6 = vpop.f32.mrf.mxu2  ;;  %v7197_v7 = vpop.f32.mrf.mxu3 }
 0x358   : > { %v7970_v10 = vpack.c.bf16 %v7856_v5, %v7856_v5  ;;  %v7511_v12 = vmax.f32 %v6912_v6, %v7197_v7  ;;  %v6345_v13 = vpop.f32.mrf.mxu0  ;;  %v6630_v14 = vpop.f32.mrf.mxu1 }
 0x359   : > { %v7398_v20 = vmax.f32 %v6345_v13, %v6630_v14 }
 0x35a   : > { %8085 = vst.msk [vmem:[%s10274_s17 + $0xe0] sm:$0xf] %vm8028_vm3, %v7970_v10  ;;  %v7625_v17 = vmax.f32 %v7397_v11, %v7511_v12 }
 0x35b   : > { %9177 = vmatmul.msk.bf16.gmra.mxu0 %vm5499_vm2, %v9408_v8  ;;  %9234 = vmatmul.msk.bf16.gmra.mxu1 %vm5499_vm2, %v9465_v9 }
 0x35c   : > { %v7743_v18 = vadd.f32 %v10516_v55, %v7625_v17  ;;  %9291 = vmatmul.msk.bf16.gmra.mxu2 %vm5499_vm2, %v9522_v15  ;;  %9348 = vmatmul.msk.bf16.gmra.mxu3 %vm5499_vm2, %v9579_v16  ;;  %v9411_v17 = vld [vmem:[%s10189_s8 + $0x140] sm:$0xff] }
 0x35e   : > { %v7857_v19 = vmax.f32 %v7743_v18, 0.0  ;;  %v9468_v18 = vld [vmem:[%s10189_s8 + $0x308] sm:$0xff] }
 0x35f   : > { %v6915_v21 = vpop.f32.mrf.mxu2  ;;  %v7200_v23 = vpop.f32.mrf.mxu3 }
 0x360   : > { %v7971_v24 = vpack.c.bf16 %v7857_v19, %v7857_v19  ;;  %v7512_v25 = vmax.f32 %v6915_v21, %v7200_v23  ;;  %v6347_v26 = vpop.f32.mrf.mxu0  ;;  %v6632_v27 = vpop.f32.mrf.mxu1 }
 0x361   : > { %v7399_v36 = vmax.f32 %v6347_v26, %v6632_v27  ;;  %v9582_v26 = vld [vmem:[%s10189_s8 + $0x698] sm:$0xff] }
 0x362   : > { %8086 = vst.msk [vmem:[%s10274_s17 + $0xe4] sm:$0xf] %vm8028_vm3, %v7971_v24  ;;  %v7626_v28 = vmax.f32 %v7398_v20, %v7512_v25  ;;  %v9525_v25 = vld [vmem:[%s10189_s8 + $0x4d0] sm:$0xff] }
 0x364   : > { %v7744_v29 = vadd.f32 %v10516_v55, %v7626_v28 }
 0x366   : > { %v7858_v30 = vmax.f32 %v7744_v29, 0.0 }
 0x367   : > { %v6917_v31 = vpop.f32.mrf.mxu2  ;;  %v7202_v32 = vpop.f32.mrf.mxu3 }
 0x368   : > { %v7972_v35 = vpack.c.bf16 %v7858_v30, %v7858_v30  ;;  %v7513_v37 = vmax.f32 %v6917_v31, %v7202_v32  ;;  %v6350_v38 = vpop.f32.mrf.mxu0  ;;  %v6635_v39 = vpop.f32.mrf.mxu1 }
 0x369   : > { %v7400_v45 = vmax.f32 %v6350_v38, %v6635_v39 }
 0x36a   : > { %8087 = vst.msk [vmem:[%s10274_s17 + $0xe8] sm:$0xf] %vm8028_vm3, %v7972_v35  ;;  %v7627_v42 = vmax.f32 %v7399_v36, %v7513_v37 }
 0x36b   : > { %9178 = vmatmul.msk.bf16.gmra.mxu0 %vm5499_vm2, %v9409_v33  ;;  %9235 = vmatmul.msk.bf16.gmra.mxu1 %vm5499_vm2, %v9466_v34 }
 0x36c   : > { %v7745_v43 = vadd.f32 %v10516_v55, %v7627_v42  ;;  %9292 = vmatmul.msk.bf16.gmra.mxu2 %vm5499_vm2, %v9523_v40  ;;  %9349 = vmatmul.msk.bf16.gmra.mxu3 %vm5499_vm2, %v9580_v41  ;;  %v9412_v42 = vld [vmem:[%s10189_s8 + $0x148] sm:$0xff] }
 0x36e   : > { %v7859_v44 = vmax.f32 %v7745_v43, 0.0  ;;  %v9469_v43 = vld [vmem:[%s10189_s8 + $0x310] sm:$0xff] }
 0x36f   : > { %v6920_v46 = vpop.f32.mrf.mxu2  ;;  %v7205_v47 = vpop.f32.mrf.mxu3 }
 0x370   : > { %v7973_v48 = vpack.c.bf16 %v7859_v44, %v7859_v44  ;;  %v7514_v49 = vmax.f32 %v6920_v46, %v7205_v47  ;;  %v6352_v50 = vpop.f32.mrf.mxu0  ;;  %v6637_v51 = vpop.f32.mrf.mxu1 }
 0x371   : > { %v7401_v60 = vmax.f32 %v6352_v50, %v6637_v51  ;;  %v9583_v50 = vld [vmem:[%s10189_s8 + $0x6a0] sm:$0xff] }
 0x372   : > { %8088 = vst.msk [vmem:[%s10274_s17 + $0xec] sm:$0xf] %vm8028_vm3, %v7973_v48  ;;  %v7628_v52 = vmax.f32 %v7400_v45, %v7514_v49  ;;  %v9526_v49 = vld [vmem:[%s10189_s8 + $0x4d8] sm:$0xff] }
 0x374   : > { %v7746_v53 = vadd.f32 %v10516_v55, %v7628_v52 }
 0x376   : > { %v7860_v54 = vmax.f32 %v7746_v53, 0.0 }
 0x377   : > { %v6922_v22 = vpop.f32.mrf.mxu2  ;;  %v7207_v56 = vpop.f32.mrf.mxu3 }
 0x378   : > { %v7974_v59 = vpack.c.bf16 %v7860_v54, %v7860_v54  ;;  %v7515_v61 = vmax.f32 %v6922_v22, %v7207_v56  ;;  %v6355_v62 = vpop.f32.mrf.mxu0  ;;  %v6640_v63 = vpop.f32.mrf.mxu1 }
 0x379   : > { %v7402_v5 = vmax.f32 %v6355_v62, %v6640_v63 }
 0x37a   : > { %8089 = vst.msk [vmem:[%s10274_s17 + $0xf0] sm:$0xf] %vm8028_vm3, %v7974_v59  ;;  %v7629_v2 = vmax.f32 %v7401_v60, %v7515_v61 }
 0x37b   : > { %9179 = vmatmul.msk.bf16.gmra.mxu0 %vm5499_vm2, %v9410_v57  ;;  %9236 = vmatmul.msk.bf16.gmra.mxu1 %vm5499_vm2, %v9467_v58 }
 0x37c   : > { %v7747_v3 = vadd.f32 %v10516_v55, %v7629_v2  ;;  %9293 = vmatmul.msk.bf16.gmra.mxu2 %vm5499_vm2, %v9524_v0  ;;  %9350 = vmatmul.msk.bf16.gmra.mxu3 %vm5499_vm2, %v9581_v1  ;;  %v9413_v2 = vld [vmem:[%s10189_s8 + $0x150] sm:$0xff] }
 0x37e   : > { %v7861_v4 = vmax.f32 %v7747_v3, 0.0  ;;  %v9470_v3 = vld [vmem:[%s10189_s8 + $0x318] sm:$0xff] }
 0x37f   : > { %v6925_v6 = vpop.f32.mrf.mxu2  ;;  %v7210_v7 = vpop.f32.mrf.mxu3 }
 0x380   : > { %v7975_v8 = vpack.c.bf16 %v7861_v4, %v7861_v4  ;;  %v7516_v9 = vmax.f32 %v6925_v6, %v7210_v7  ;;  %v6357_v10 = vpop.f32.mrf.mxu0  ;;  %v6642_v11 = vpop.f32.mrf.mxu1 }
 0x381   : > { %v7403_v20 = vmax.f32 %v6357_v10, %v6642_v11  ;;  %v9584_v10 = vld [vmem:[%s10189_s8 + $0x6a8] sm:$0xff] }
 0x382   : > { %8090 = vst.msk [vmem:[%s10274_s17 + $0xf4] sm:$0xf] %vm8028_vm3, %v7975_v8  ;;  %v7630_v12 = vmax.f32 %v7402_v5, %v7516_v9  ;;  %v9527_v9 = vld [vmem:[%s10189_s8 + $0x4e0] sm:$0xff] }
 0x384   : > { %v7748_v13 = vadd.f32 %v10516_v55, %v7630_v12 }
 0x386   : > { %v7862_v14 = vmax.f32 %v7748_v13, 0.0 }
 0x387   : > { %v6927_v15 = vpop.f32.mrf.mxu2  ;;  %v7212_v16 = vpop.f32.mrf.mxu3 }
 0x388   : > { %v7976_v19 = vpack.c.bf16 %v7862_v14, %v7862_v14  ;;  %v7517_v21 = vmax.f32 %v6927_v15, %v7212_v16  ;;  %v6360_v23 = vpop.f32.mrf.mxu0  ;;  %v6645_v24 = vpop.f32.mrf.mxu1 }
 0x389   : > { %v7404_v30 = vmax.f32 %v6360_v23, %v6645_v24 }
 0x38a   : > { %8091 = vst.msk [vmem:[%s10274_s17 + $0xf8] sm:$0xf] %vm8028_vm3, %v7976_v19  ;;  %v7631_v27 = vmax.f32 %v7403_v20, %v7517_v21 }
 0x38b   : > { %9180 = vmatmul.msk.bf16.gmra.mxu0 %vm5499_vm2, %v9411_v17  ;;  %9237 = vmatmul.msk.bf16.gmra.mxu1 %vm5499_vm2, %v9468_v18 }
 0x38c   : > { %v7749_v28 = vadd.f32 %v10516_v55, %v7631_v27  ;;  %9294 = vmatmul.msk.bf16.gmra.mxu2 %vm5499_vm2, %v9525_v25  ;;  %9351 = vmatmul.msk.bf16.gmra.mxu3 %vm5499_vm2, %v9582_v26  ;;  %v9414_v27 = vld [vmem:[%s10189_s8 + $0x158] sm:$0xff] }
 0x38e   : > { %v7863_v29 = vmax.f32 %v7749_v28, 0.0  ;;  %v9471_v28 = vld [vmem:[%s10189_s8 + $0x320] sm:$0xff] }
 0x38f   : > { %v6930_v31 = vpop.f32.mrf.mxu2  ;;  %v7215_v32 = vpop.f32.mrf.mxu3 }
 0x390   : > { %v7977_v33 = vpack.c.bf16 %v7863_v29, %v7863_v29  ;;  %v7518_v34 = vmax.f32 %v6930_v31, %v7215_v32  ;;  %v6362_v35 = vpop.f32.mrf.mxu0  ;;  %v6647_v36 = vpop.f32.mrf.mxu1 }
 0x391   : > { %v7405_v45 = vmax.f32 %v6362_v35, %v6647_v36  ;;  %v9585_v35 = vld [vmem:[%s10189_s8 + $0x6b0] sm:$0xff] }
 0x392   : > { %8092 = vst.msk [vmem:[%s10274_s17 + $0xfc] sm:$0xf] %vm8028_vm3, %v7977_v33  ;;  %v7632_v37 = vmax.f32 %v7404_v30, %v7518_v34  ;;  %v9528_v34 = vld [vmem:[%s10189_s8 + $0x4e8] sm:$0xff] }
 0x394   : > { %v7750_v38 = vadd.f32 %v10516_v55, %v7632_v37 }
 0x396   : > { %v7864_v39 = vmax.f32 %v7750_v38, 0.0 }
 0x397   : > { %v6932_v40 = vpop.f32.mrf.mxu2  ;;  %v7217_v41 = vpop.f32.mrf.mxu3 }
 0x398   : > { %v7978_v44 = vpack.c.bf16 %v7864_v39, %v7864_v39  ;;  %v7519_v46 = vmax.f32 %v6932_v40, %v7217_v41  ;;  %v6365_v47 = vpop.f32.mrf.mxu0  ;;  %v6650_v48 = vpop.f32.mrf.mxu1 }
 0x399   : > { %v7406_v54 = vmax.f32 %v6365_v47, %v6650_v48 }
 0x39a   : > { %8093 = vst.msk [vmem:[%s10274_s17 + $0x100] sm:$0xf] %vm8028_vm3, %v7978_v44  ;;  %v7633_v51 = vmax.f32 %v7405_v45, %v7519_v46 }
 0x39b   : > { %9181 = vmatmul.msk.bf16.gmra.mxu0 %vm5499_vm2, %v9412_v42  ;;  %9238 = vmatmul.msk.bf16.gmra.mxu1 %vm5499_vm2, %v9469_v43 }
 0x39c   : > { %v7751_v52 = vadd.f32 %v10516_v55, %v7633_v51  ;;  %9295 = vmatmul.msk.bf16.gmra.mxu2 %vm5499_vm2, %v9526_v49  ;;  %9352 = vmatmul.msk.bf16.gmra.mxu3 %vm5499_vm2, %v9583_v50  ;;  %v9415_v51 = vld [vmem:[%s10189_s8 + $0x160] sm:$0xff] }
 0x39e   : > { %v7865_v53 = vmax.f32 %v7751_v52, 0.0  ;;  %v9472_v52 = vld [vmem:[%s10189_s8 + $0x328] sm:$0xff] }
 0x39f   : > { %v6935_v22 = vpop.f32.mrf.mxu2  ;;  %v7220_v56 = vpop.f32.mrf.mxu3 }
 0x3a0   : > { %v7979_v57 = vpack.c.bf16 %v7865_v53, %v7865_v53  ;;  %v7520_v58 = vmax.f32 %v6935_v22, %v7220_v56  ;;  %v6367_v59 = vpop.f32.mrf.mxu0  ;;  %v6652_v60 = vpop.f32.mrf.mxu1 }
 0x3a1   : > { %v7407_v5 = vmax.f32 %v6367_v59, %v6652_v60  ;;  %v9586_v59 = vld [vmem:[%s10189_s8 + $0x6b8] sm:$0xff] }
 0x3a2   : > { %8094 = vst.msk [vmem:[%s10274_s17 + $0x104] sm:$0xf] %vm8028_vm3, %v7979_v57  ;;  %v7634_v61 = vmax.f32 %v7406_v54, %v7520_v58  ;;  %v9529_v58 = vld [vmem:[%s10189_s8 + $0x4f0] sm:$0xff] }
 0x3a4   : > { %v7752_v62 = vadd.f32 %v10516_v55, %v7634_v61 }
 0x3a6   : > { %v7866_v63 = vmax.f32 %v7752_v62, 0.0 }
 0x3a7   : > { %v6937_v0 = vpop.f32.mrf.mxu2  ;;  %v7222_v1 = vpop.f32.mrf.mxu3 }
 0x3a8   : > { %v7980_v4 = vpack.c.bf16 %v7866_v63, %v7866_v63  ;;  %v7521_v6 = vmax.f32 %v6937_v0, %v7222_v1  ;;  %v6370_v7 = vpop.f32.mrf.mxu0  ;;  %v6655_v8 = vpop.f32.mrf.mxu1 }
 0x3a9   : > { %v7408_v14 = vmax.f32 %v6370_v7, %v6655_v8 }
 0x3aa   : > { %8095 = vst.msk [vmem:[%s10274_s17 + $0x108] sm:$0xf] %vm8028_vm3, %v7980_v4  ;;  %v7635_v11 = vmax.f32 %v7407_v5, %v7521_v6 }
 0x3ab   : > { %9182 = vmatmul.msk.bf16.gmra.mxu0 %vm5499_vm2, %v9413_v2  ;;  %9239 = vmatmul.msk.bf16.gmra.mxu1 %vm5499_vm2, %v9470_v3 }
 0x3ac   : > { %v7753_v12 = vadd.f32 %v10516_v55, %v7635_v11  ;;  %9296 = vmatmul.msk.bf16.gmra.mxu2 %vm5499_vm2, %v9527_v9  ;;  %9353 = vmatmul.msk.bf16.gmra.mxu3 %vm5499_vm2, %v9584_v10  ;;  %v9416_v11 = vld [vmem:[%s10189_s8 + $0x168] sm:$0xff] }
 0x3ae   : > { %v7867_v13 = vmax.f32 %v7753_v12, 0.0  ;;  %v9473_v12 = vld [vmem:[%s10189_s8 + $0x330] sm:$0xff] }
 0x3af   : > { %v6940_v15 = vpop.f32.mrf.mxu2  ;;  %v7225_v16 = vpop.f32.mrf.mxu3 }
 0x3b0   : > { %v7981_v17 = vpack.c.bf16 %v7867_v13, %v7867_v13  ;;  %v7522_v18 = vmax.f32 %v6940_v15, %v7225_v16  ;;  %v6372_v19 = vpop.f32.mrf.mxu0  ;;  %v6657_v20 = vpop.f32.mrf.mxu1 }
 0x3b1   : > { %v7409_v30 = vmax.f32 %v6372_v19, %v6657_v20  ;;  %v9587_v19 = vld [vmem:[%s10189_s8 + $0x6c0] sm:$0xff] }
 0x3b2   : > { %8096 = vst.msk [vmem:[%s10274_s17 + $0x10c] sm:$0xf] %vm8028_vm3, %v7981_v17  ;;  %v7636_v21 = vmax.f32 %v7408_v14, %v7522_v18  ;;  %v9530_v18 = vld [vmem:[%s10189_s8 + $0x4f8] sm:$0xff] }
 0x3b4   : > { %v7754_v23 = vadd.f32 %v10516_v55, %v7636_v21  ;;  %v10768_v55 = vld [vmem:[%s11028_s2] ss:$0 sm:$0xff] }
 0x3b6   : > { %v7868_v24 = vmax.f32 %v7754_v23, 0.0 }
 0x3b7   : > { %v6942_v25 = vpop.f32.mrf.mxu2  ;;  %v7227_v26 = vpop.f32.mrf.mxu3 }
 0x3b8   : > { %v7982_v29 = vpack.c.bf16 %v7868_v24, %v7868_v24  ;;  %v7523_v31 = vmax.f32 %v6942_v25, %v7227_v26  ;;  %v6375_v32 = vpop.f32.mrf.mxu0  ;;  %v6660_v33 = vpop.f32.mrf.mxu1 }
 0x3b9   : > { %v7410_v39 = vmax.f32 %v6375_v32, %v6660_v33 }
 0x3ba   : > { %8097 = vst.msk [vmem:[%s10274_s17 + $0x110] sm:$0xf] %vm8028_vm3, %v7982_v29  ;;  %v7637_v36 = vmax.f32 %v7409_v30, %v7523_v31 }
 0x3bb   : > { %9183 = vmatmul.msk.bf16.gmra.mxu0 %vm5499_vm2, %v9414_v27  ;;  %9240 = vmatmul.msk.bf16.gmra.mxu1 %vm5499_vm2, %v9471_v28 }
 0x3bc   : > { %v7755_v37 = vadd.f32 %v10768_v55, %v7637_v36  ;;  %9297 = vmatmul.msk.bf16.gmra.mxu2 %vm5499_vm2, %v9528_v34  ;;  %9354 = vmatmul.msk.bf16.gmra.mxu3 %vm5499_vm2, %v9585_v35  ;;  %v9417_v36 = vld [vmem:[%s10189_s8 + $0x170] sm:$0xff] }
 0x3be   : > { %v7869_v38 = vmax.f32 %v7755_v37, 0.0  ;;  %v9474_v37 = vld [vmem:[%s10189_s8 + $0x338] sm:$0xff] }
 0x3bf   : > { %v6945_v40 = vpop.f32.mrf.mxu2  ;;  %v7230_v41 = vpop.f32.mrf.mxu3 }
 0x3c0   : > { %v7983_v42 = vpack.c.bf16 %v7869_v38, %v7869_v38  ;;  %v7524_v43 = vmax.f32 %v6945_v40, %v7230_v41  ;;  %v6377_v44 = vpop.f32.mrf.mxu0  ;;  %v6662_v45 = vpop.f32.mrf.mxu1 }
 0x3c1   : > { %v7411_v54 = vmax.f32 %v6377_v44, %v6662_v45  ;;  %v9588_v44 = vld [vmem:[%s10189_s8 + $0x6c8] sm:$0xff] }
 0x3c2   : > { %8098 = vst.msk [vmem:[%s10274_s17 + $0x114] sm:$0xf] %vm8028_vm3, %v7983_v42  ;;  %v7638_v46 = vmax.f32 %v7410_v39, %v7524_v43  ;;  %v9531_v43 = vld [vmem:[%s10189_s8 + $0x500] sm:$0xff] }
 0x3c4   : > { %v7756_v47 = vadd.f32 %v10768_v55, %v7638_v46 }
 0x3c6   : > { %v7870_v48 = vmax.f32 %v7756_v47, 0.0 }
 0x3c7   : > { %v6947_v49 = vpop.f32.mrf.mxu2  ;;  %v7232_v50 = vpop.f32.mrf.mxu3 }
 0x3c8   : > { %v7984_v53 = vpack.c.bf16 %v7870_v48, %v7870_v48  ;;  %v7525_v22 = vmax.f32 %v6947_v49, %v7232_v50  ;;  %v6380_v56 = vpop.f32.mrf.mxu0  ;;  %v6665_v57 = vpop.f32.mrf.mxu1 }
 0x3c9   : > { %v7412_v63 = vmax.f32 %v6380_v56, %v6665_v57 }
 0x3ca   : > { %8099 = vst.msk [vmem:[%s10274_s17 + $0x118] sm:$0xf] %vm8028_vm3, %v7984_v53  ;;  %v7639_v60 = vmax.f32 %v7411_v54, %v7525_v22 }
 0x3cb   : > { %9184 = vmatmul.msk.bf16.gmra.mxu0 %vm5499_vm2, %v9415_v51  ;;  %9241 = vmatmul.msk.bf16.gmra.mxu1 %vm5499_vm2, %v9472_v52 }
 0x3cc   : > { %v7757_v61 = vadd.f32 %v10768_v55, %v7639_v60  ;;  %9298 = vmatmul.msk.bf16.gmra.mxu2 %vm5499_vm2, %v9529_v58  ;;  %9355 = vmatmul.msk.bf16.gmra.mxu3 %vm5499_vm2, %v9586_v59  ;;  %v9418_v60 = vld [vmem:[%s10189_s8 + $0x178] sm:$0xff] }
 0x3ce   : > { %v7871_v62 = vmax.f32 %v7757_v61, 0.0  ;;  %v9475_v61 = vld [vmem:[%s10189_s8 + $0x340] sm:$0xff] }
 0x3cf   : > { %v6950_v0 = vpop.f32.mrf.mxu2  ;;  %v7235_v1 = vpop.f32.mrf.mxu3 }
 0x3d0   : > { %v7985_v2 = vpack.c.bf16 %v7871_v62, %v7871_v62  ;;  %v7526_v3 = vmax.f32 %v6950_v0, %v7235_v1  ;;  %v6382_v4 = vpop.f32.mrf.mxu0  ;;  %v6667_v5 = vpop.f32.mrf.mxu1 }
 0x3d1   : > { %v7413_v14 = vmax.f32 %v6382_v4, %v6667_v5  ;;  %v9589_v4 = vld [vmem:[%s10189_s8 + $0x6d0] sm:$0xff] }
 0x3d2   : > { %8100 = vst.msk [vmem:[%s10274_s17 + $0x11c] sm:$0xf] %vm8028_vm3, %v7985_v2  ;;  %v7640_v6 = vmax.f32 %v7412_v63, %v7526_v3  ;;  %v9532_v3 = vld [vmem:[%s10189_s8 + $0x508] sm:$0xff] }
 0x3d4   : > { %v7758_v7 = vadd.f32 %v10768_v55, %v7640_v6 }
 0x3d6   : > { %v7872_v8 = vmax.f32 %v7758_v7, 0.0 }
 0x3d7   : > { %v6952_v9 = vpop.f32.mrf.mxu2  ;;  %v7237_v10 = vpop.f32.mrf.mxu3 }
 0x3d8   : > { %v7986_v13 = vpack.c.bf16 %v7872_v8, %v7872_v8  ;;  %v7527_v15 = vmax.f32 %v6952_v9, %v7237_v10  ;;  %v6385_v16 = vpop.f32.mrf.mxu0  ;;  %v6670_v17 = vpop.f32.mrf.mxu1 }
 0x3d9   : > { %v7414_v24 = vmax.f32 %v6385_v16, %v6670_v17 }
 0x3da   : > { %8101 = vst.msk [vmem:[%s10274_s17 + $0x120] sm:$0xf] %vm8028_vm3, %v7986_v13  ;;  %v7641_v20 = vmax.f32 %v7413_v14, %v7527_v15 }
 0x3db   : > { %9185 = vmatmul.msk.bf16.gmra.mxu0 %vm5499_vm2, %v9416_v11  ;;  %9242 = vmatmul.msk.bf16.gmra.mxu1 %vm5499_vm2, %v9473_v12 }
 0x3dc   : > { %v7759_v21 = vadd.f32 %v10768_v55, %v7641_v20  ;;  %9299 = vmatmul.msk.bf16.gmra.mxu2 %vm5499_vm2, %v9530_v18  ;;  %9356 = vmatmul.msk.bf16.gmra.mxu3 %vm5499_vm2, %v9587_v19  ;;  %v9419_v20 = vld [vmem:[%s10189_s8 + $0x180] sm:$0xff] }
 0x3de   : > { %v7873_v23 = vmax.f32 %v7759_v21, 0.0  ;;  %v9476_v21 = vld [vmem:[%s10189_s8 + $0x348] sm:$0xff] }
 0x3df   : > { %v6955_v25 = vpop.f32.mrf.mxu2  ;;  %v7240_v26 = vpop.f32.mrf.mxu3 }
 0x3e0   : > { %v7987_v27 = vpack.c.bf16 %v7873_v23, %v7873_v23  ;;  %v7528_v28 = vmax.f32 %v6955_v25, %v7240_v26  ;;  %v6387_v29 = vpop.f32.mrf.mxu0  ;;  %v6672_v30 = vpop.f32.mrf.mxu1 }
 0x3e1   : > { %v7415_v39 = vmax.f32 %v6387_v29, %v6672_v30  ;;  %v9590_v29 = vld [vmem:[%s10189_s8 + $0x6d8] sm:$0xff] }
 0x3e2   : > { %8102 = vst.msk [vmem:[%s10274_s17 + $0x124] sm:$0xf] %vm8028_vm3, %v7987_v27  ;;  %v7642_v31 = vmax.f32 %v7414_v24, %v7528_v28  ;;  %v9533_v28 = vld [vmem:[%s10189_s8 + $0x510] sm:$0xff] }
 0x3e4   : > { %v7760_v32 = vadd.f32 %v10768_v55, %v7642_v31 }
 0x3e6   : > { %v7874_v33 = vmax.f32 %v7760_v32, 0.0 }
 0x3e7   : > { %v6957_v34 = vpop.f32.mrf.mxu2  ;;  %v7242_v35 = vpop.f32.mrf.mxu3 }
 0x3e8   : > { %v7988_v38 = vpack.c.bf16 %v7874_v33, %v7874_v33  ;;  %v7529_v40 = vmax.f32 %v6957_v34, %v7242_v35  ;;  %v6390_v41 = vpop.f32.mrf.mxu0  ;;  %v6675_v42 = vpop.f32.mrf.mxu1 }
 0x3e9   : > { %v7416_v48 = vmax.f32 %v6390_v41, %v6675_v42 }
 0x3ea   : > { %8103 = vst.msk [vmem:[%s10274_s17 + $0x128] sm:$0xf] %vm8028_vm3, %v7988_v38  ;;  %v7643_v45 = vmax.f32 %v7415_v39, %v7529_v40 }
 0x3eb   : > { %9186 = vmatmul.msk.bf16.gmra.mxu0 %vm5499_vm2, %v9417_v36  ;;  %9243 = vmatmul.msk.bf16.gmra.mxu1 %vm5499_vm2, %v9474_v37 }
 0x3ec   : > { %v7761_v46 = vadd.f32 %v10768_v55, %v7643_v45  ;;  %9300 = vmatmul.msk.bf16.gmra.mxu2 %vm5499_vm2, %v9531_v43  ;;  %9357 = vmatmul.msk.bf16.gmra.mxu3 %vm5499_vm2, %v9588_v44  ;;  %v9420_v45 = vld [vmem:[%s10189_s8 + $0x188] sm:$0xff] }
 0x3ee   : > { %v7875_v47 = vmax.f32 %v7761_v46, 0.0  ;;  %v9477_v46 = vld [vmem:[%s10189_s8 + $0x350] sm:$0xff] }
 0x3ef   : > { %v6960_v49 = vpop.f32.mrf.mxu2  ;;  %v7245_v50 = vpop.f32.mrf.mxu3 }
 0x3f0   : > { %v7989_v51 = vpack.c.bf16 %v7875_v47, %v7875_v47  ;;  %v7530_v52 = vmax.f32 %v6960_v49, %v7245_v50  ;;  %v6392_v53 = vpop.f32.mrf.mxu0  ;;  %v6677_v54 = vpop.f32.mrf.mxu1 }
 0x3f1   : > { %v7417_v63 = vmax.f32 %v6392_v53, %v6677_v54  ;;  %v9591_v53 = vld [vmem:[%s10189_s8 + $0x6e0] sm:$0xff] }
 0x3f2   : > { %8104 = vst.msk [vmem:[%s10274_s17 + $0x12c] sm:$0xf] %vm8028_vm3, %v7989_v51  ;;  %v7644_v22 = vmax.f32 %v7416_v48, %v7530_v52  ;;  %v9534_v52 = vld [vmem:[%s10189_s8 + $0x518] sm:$0xff] }
 0x3f4   : > { %v7762_v56 = vadd.f32 %v10768_v55, %v7644_v22 }
 0x3f6   : > { %v7876_v57 = vmax.f32 %v7762_v56, 0.0 }
 0x3f7   : > { %v6962_v58 = vpop.f32.mrf.mxu2  ;;  %v7247_v59 = vpop.f32.mrf.mxu3 }
 0x3f8   : > { %v7990_v62 = vpack.c.bf16 %v7876_v57, %v7876_v57  ;;  %v7531_v0 = vmax.f32 %v6962_v58, %v7247_v59  ;;  %v6395_v1 = vpop.f32.mrf.mxu0  ;;  %v6680_v2 = vpop.f32.mrf.mxu1 }
 0x3f9   : > { %v7418_v8 = vmax.f32 %v6395_v1, %v6680_v2 }
 0x3fa   : > { %8105 = vst.msk [vmem:[%s10274_s17 + $0x130] sm:$0xf] %vm8028_vm3, %v7990_v62  ;;  %v7645_v5 = vmax.f32 %v7417_v63, %v7531_v0 }
 0x3fb   : > { %9187 = vmatmul.msk.bf16.gmra.mxu0 %vm5499_vm2, %v9418_v60  ;;  %9244 = vmatmul.msk.bf16.gmra.mxu1 %vm5499_vm2, %v9475_v61 }
 0x3fc   : > { %v7763_v6 = vadd.f32 %v10768_v55, %v7645_v5  ;;  %9301 = vmatmul.msk.bf16.gmra.mxu2 %vm5499_vm2, %v9532_v3  ;;  %9358 = vmatmul.msk.bf16.gmra.mxu3 %vm5499_vm2, %v9589_v4  ;;  %v9421_v5 = vld [vmem:[%s10189_s8 + $0x190] sm:$0xff] }
 0x3fe   : > { %v7877_v7 = vmax.f32 %v7763_v6, 0.0  ;;  %v9478_v6 = vld [vmem:[%s10189_s8 + $0x358] sm:$0xff] }
 0x3ff   : > { %v6965_v9 = vpop.f32.mrf.mxu2  ;;  %v7250_v10 = vpop.f32.mrf.mxu3 }
 0x400   : > { %v7991_v11 = vpack.c.bf16 %v7877_v7, %v7877_v7  ;;  %v7532_v12 = vmax.f32 %v6965_v9, %v7250_v10  ;;  %v6397_v13 = vpop.f32.mrf.mxu0  ;;  %v6682_v14 = vpop.f32.mrf.mxu1 }
 0x401   : > { %v7419_v24 = vmax.f32 %v6397_v13, %v6682_v14  ;;  %v9592_v13 = vld [vmem:[%s10189_s8 + $0x6e8] sm:$0xff] }
 0x402   : > { %8106 = vst.msk [vmem:[%s10274_s17 + $0x134] sm:$0xf] %vm8028_vm3, %v7991_v11  ;;  %v7646_v15 = vmax.f32 %v7418_v8, %v7532_v12  ;;  %v9535_v12 = vld [vmem:[%s10189_s8 + $0x520] sm:$0xff] }
 0x404   : > { %v7764_v16 = vadd.f32 %v10768_v55, %v7646_v15 }
 0x406   : > { %v7878_v17 = vmax.f32 %v7764_v16, 0.0 }
 0x407   : > { %v6967_v18 = vpop.f32.mrf.mxu2  ;;  %v7252_v19 = vpop.f32.mrf.mxu3 }
 0x408   : > { %v7992_v23 = vpack.c.bf16 %v7878_v17, %v7878_v17  ;;  %v7533_v25 = vmax.f32 %v6967_v18, %v7252_v19  ;;  %v6400_v26 = vpop.f32.mrf.mxu0  ;;  %v6685_v27 = vpop.f32.mrf.mxu1 }
 0x409   : > { %v7420_v33 = vmax.f32 %v6400_v26, %v6685_v27 }
 0x40a   : > { %8107 = vst.msk [vmem:[%s10274_s17 + $0x138] sm:$0xf] %vm8028_vm3, %v7992_v23  ;;  %v7647_v30 = vmax.f32 %v7419_v24, %v7533_v25 }
 0x40b   : > { %9188 = vmatmul.msk.bf16.gmra.mxu0 %vm5499_vm2, %v9419_v20  ;;  %9245 = vmatmul.msk.bf16.gmra.mxu1 %vm5499_vm2, %v9476_v21 }
 0x40c   : > { %v7765_v31 = vadd.f32 %v10768_v55, %v7647_v30  ;;  %9302 = vmatmul.msk.bf16.gmra.mxu2 %vm5499_vm2, %v9533_v28  ;;  %9359 = vmatmul.msk.bf16.gmra.mxu3 %vm5499_vm2, %v9590_v29  ;;  %v9422_v30 = vld [vmem:[%s10189_s8 + $0x198] sm:$0xff] }
 0x40e   : > { %v7879_v32 = vmax.f32 %v7765_v31, 0.0  ;;  %v9479_v31 = vld [vmem:[%s10189_s8 + $0x360] sm:$0xff] }
 0x40f   : > { %v6970_v34 = vpop.f32.mrf.mxu2  ;;  %v7255_v35 = vpop.f32.mrf.mxu3 }
 0x410   : > { %v7993_v36 = vpack.c.bf16 %v7879_v32, %v7879_v32  ;;  %v7534_v37 = vmax.f32 %v6970_v34, %v7255_v35  ;;  %v6402_v38 = vpop.f32.mrf.mxu0  ;;  %v6687_v39 = vpop.f32.mrf.mxu1 }
 0x411   : > { %v7421_v48 = vmax.f32 %v6402_v38, %v6687_v39  ;;  %v9593_v38 = vld [vmem:[%s10189_s8 + $0x6f0] sm:$0xff] }
 0x412   : > { %8108 = vst.msk [vmem:[%s10274_s17 + $0x13c] sm:$0xf] %vm8028_vm3, %v7993_v36  ;;  %v7648_v40 = vmax.f32 %v7420_v33, %v7534_v37  ;;  %v9536_v37 = vld [vmem:[%s10189_s8 + $0x528] sm:$0xff] }
 0x414   : > { %v7766_v41 = vadd.f32 %v10768_v55, %v7648_v40 }
 0x416   : > { %v7880_v42 = vmax.f32 %v7766_v41, 0.0 }
 0x417   : > { %v6972_v43 = vpop.f32.mrf.mxu2  ;;  %v7257_v44 = vpop.f32.mrf.mxu3 }
 0x418   : > { %v7994_v47 = vpack.c.bf16 %v7880_v42, %v7880_v42  ;;  %v7535_v49 = vmax.f32 %v6972_v43, %v7257_v44  ;;  %v6405_v50 = vpop.f32.mrf.mxu0  ;;  %v6690_v51 = vpop.f32.mrf.mxu1 }
 0x419   : > { %v7422_v57 = vmax.f32 %v6405_v50, %v6690_v51 }
 0x41a   : > { %8109 = vst.msk [vmem:[%s10274_s17 + $0x140] sm:$0xf] %vm8028_vm3, %v7994_v47  ;;  %v7649_v54 = vmax.f32 %v7421_v48, %v7535_v49 }
 0x41b   : > { %9189 = vmatmul.msk.bf16.gmra.mxu0 %vm5499_vm2, %v9420_v45  ;;  %9246 = vmatmul.msk.bf16.gmra.mxu1 %vm5499_vm2, %v9477_v46 }
 0x41c   : > { %v7767_v22 = vadd.f32 %v10768_v55, %v7649_v54  ;;  %9303 = vmatmul.msk.bf16.gmra.mxu2 %vm5499_vm2, %v9534_v52  ;;  %9360 = vmatmul.msk.bf16.gmra.mxu3 %vm5499_vm2, %v9591_v53  ;;  %v9423_v54 = vld [vmem:[%s10189_s8 + $0x1a0] sm:$0xff] }
 0x41e   : > { %v7881_v56 = vmax.f32 %v7767_v22, 0.0  ;;  %v9480_v22 = vld [vmem:[%s10189_s8 + $0x368] sm:$0xff] }
 0x41f   : > { %v6975_v58 = vpop.f32.mrf.mxu2  ;;  %v7260_v59 = vpop.f32.mrf.mxu3 }
 0x420   : > { %v7995_v60 = vpack.c.bf16 %v7881_v56, %v7881_v56  ;;  %v7536_v61 = vmax.f32 %v6975_v58, %v7260_v59  ;;  %v6407_v62 = vpop.f32.mrf.mxu0  ;;  %v6692_v63 = vpop.f32.mrf.mxu1 }
 0x421   : > { %v7423_v8 = vmax.f32 %v6407_v62, %v6692_v63  ;;  %v9594_v62 = vld [vmem:[%s10189_s8 + $0x6f8] sm:$0xff] }
 0x422   : > { %8110 = vst.msk [vmem:[%s10274_s17 + $0x144] sm:$0xf] %vm8028_vm3, %v7995_v60  ;;  %v7650_v0 = vmax.f32 %v7422_v57, %v7536_v61  ;;  %v9537_v61 = vld [vmem:[%s10189_s8 + $0x530] sm:$0xff] }
 0x424   : > { %v7768_v1 = vadd.f32 %v10768_v55, %v7650_v0 }
 0x426   : > { %v7882_v2 = vmax.f32 %v7768_v1, 0.0 }
 0x427   : > { %v6977_v3 = vpop.f32.mrf.mxu2  ;;  %v7262_v4 = vpop.f32.mrf.mxu3 }
 0x428   : > { %v7996_v7 = vpack.c.bf16 %v7882_v2, %v7882_v2  ;;  %v7537_v9 = vmax.f32 %v6977_v3, %v7262_v4  ;;  %v6410_v10 = vpop.f32.mrf.mxu0  ;;  %v6695_v11 = vpop.f32.mrf.mxu1 }
 0x429   : > { %v7424_v17 = vmax.f32 %v6410_v10, %v6695_v11 }
 0x42a   : > { %8111 = vst.msk [vmem:[%s10274_s17 + $0x148] sm:$0xf] %vm8028_vm3, %v7996_v7  ;;  %v7651_v14 = vmax.f32 %v7423_v8, %v7537_v9 }
 0x42b   : > { %9190 = vmatmul.msk.bf16.gmra.mxu0 %vm5499_vm2, %v9421_v5  ;;  %9247 = vmatmul.msk.bf16.gmra.mxu1 %vm5499_vm2, %v9478_v6 }
 0x42c   : > { %v7769_v15 = vadd.f32 %v10768_v55, %v7651_v14  ;;  %9304 = vmatmul.msk.bf16.gmra.mxu2 %vm5499_vm2, %v9535_v12  ;;  %9361 = vmatmul.msk.bf16.gmra.mxu3 %vm5499_vm2, %v9592_v13  ;;  %v9424_v14 = vld [vmem:[%s10189_s8 + $0x1a8] sm:$0xff] }
 0x42e   : > { %v7883_v16 = vmax.f32 %v7769_v15, 0.0  ;;  %v9481_v15 = vld [vmem:[%s10189_s8 + $0x370] sm:$0xff] }
 0x42f   : > { %v6980_v18 = vpop.f32.mrf.mxu2  ;;  %v7265_v19 = vpop.f32.mrf.mxu3 }
 0x430   : > { %v7997_v20 = vpack.c.bf16 %v7883_v16, %v7883_v16  ;;  %v7538_v21 = vmax.f32 %v6980_v18, %v7265_v19  ;;  %v6412_v23 = vpop.f32.mrf.mxu0  ;;  %v6697_v24 = vpop.f32.mrf.mxu1 }
 0x431   : > { %v7425_v33 = vmax.f32 %v6412_v23, %v6697_v24  ;;  %v9595_v23 = vld [vmem:[%s10189_s8 + $0x700] sm:$0xff] }
 0x432   : > { %8112 = vst.msk [vmem:[%s10274_s17 + $0x14c] sm:$0xf] %vm8028_vm3, %v7997_v20  ;;  %v7652_v25 = vmax.f32 %v7424_v17, %v7538_v21  ;;  %v9538_v21 = vld [vmem:[%s10189_s8 + $0x538] sm:$0xff] }
 0x434   : > { %v7770_v26 = vadd.f32 %v10768_v55, %v7652_v25 }
 0x436   : > { %v7884_v27 = vmax.f32 %v7770_v26, 0.0 }
 0x437   : > { %v6982_v28 = vpop.f32.mrf.mxu2  ;;  %v7267_v29 = vpop.f32.mrf.mxu3 }
 0x438   : > { %v7998_v32 = vpack.c.bf16 %v7884_v27, %v7884_v27  ;;  %v7539_v34 = vmax.f32 %v6982_v28, %v7267_v29  ;;  %v6415_v35 = vpop.f32.mrf.mxu0  ;;  %v6700_v36 = vpop.f32.mrf.mxu1 }
 0x439   : > { %v7426_v42 = vmax.f32 %v6415_v35, %v6700_v36 }
 0x43a   : > { %8113 = vst.msk [vmem:[%s10274_s17 + $0x150] sm:$0xf] %vm8028_vm3, %v7998_v32  ;;  %v7653_v39 = vmax.f32 %v7425_v33, %v7539_v34 }
 0x43b   : > { %9191 = vmatmul.msk.bf16.gmra.mxu0 %vm5499_vm2, %v9422_v30  ;;  %9248 = vmatmul.msk.bf16.gmra.mxu1 %vm5499_vm2, %v9479_v31 }
 0x43c   : > { %v7771_v40 = vadd.f32 %v10768_v55, %v7653_v39  ;;  %9305 = vmatmul.msk.bf16.gmra.mxu2 %vm5499_vm2, %v9536_v37  ;;  %9362 = vmatmul.msk.bf16.gmra.mxu3 %vm5499_vm2, %v9593_v38  ;;  %v9425_v39 = vld [vmem:[%s10189_s8 + $0x1b0] sm:$0xff] }
 0x43e   : > { %v7885_v41 = vmax.f32 %v7771_v40, 0.0  ;;  %v9482_v40 = vld [vmem:[%s10189_s8 + $0x378] sm:$0xff] }
 0x43f   : > { %v6985_v43 = vpop.f32.mrf.mxu2  ;;  %v7270_v44 = vpop.f32.mrf.mxu3 }
 0x440   : > { %v7999_v45 = vpack.c.bf16 %v7885_v41, %v7885_v41  ;;  %v7540_v46 = vmax.f32 %v6985_v43, %v7270_v44  ;;  %v6417_v47 = vpop.f32.mrf.mxu0  ;;  %v6702_v48 = vpop.f32.mrf.mxu1 }
 0x441   : > { %v7427_v57 = vmax.f32 %v6417_v47, %v6702_v48  ;;  %v9596_v47 = vld [vmem:[%s10189_s8 + $0x708] sm:$0xff] }
 0x442   : > { %8114 = vst.msk [vmem:[%s10274_s17 + $0x154] sm:$0xf] %vm8028_vm3, %v7999_v45  ;;  %v7654_v49 = vmax.f32 %v7426_v42, %v7540_v46  ;;  %v9539_v46 = vld [vmem:[%s10189_s8 + $0x540] sm:$0xff] }
 0x444   : > { %v7772_v50 = vadd.f32 %v10768_v55, %v7654_v49 }
 0x446   : > { %v7886_v51 = vmax.f32 %v7772_v50, 0.0 }
 0x447   : > { %v6987_v52 = vpop.f32.mrf.mxu2  ;;  %v7272_v53 = vpop.f32.mrf.mxu3 }
 0x448   : > { %v8000_v56 = vpack.c.bf16 %v7886_v51, %v7886_v51  ;;  %v7541_v58 = vmax.f32 %v6987_v52, %v7272_v53  ;;  %v6420_v59 = vpop.f32.mrf.mxu0  ;;  %v6705_v60 = vpop.f32.mrf.mxu1 }
 0x449   : > { %v7428_v2 = vmax.f32 %v6420_v59, %v6705_v60 }
 0x44a   : > { %8115 = vst.msk [vmem:[%s10274_s17 + $0x158] sm:$0xf] %vm8028_vm3, %v8000_v56  ;;  %v7655_v63 = vmax.f32 %v7427_v57, %v7541_v58 }
 0x44b   : > { %9192 = vmatmul.msk.bf16.gmra.mxu0 %vm5499_vm2, %v9423_v54  ;;  %9249 = vmatmul.msk.bf16.gmra.mxu1 %vm5499_vm2, %v9480_v22 }
 0x44c   : > { %v7773_v0 = vadd.f32 %v10768_v55, %v7655_v63  ;;  %9306 = vmatmul.msk.bf16.gmra.mxu2 %vm5499_vm2, %v9537_v61  ;;  %9363 = vmatmul.msk.bf16.gmra.mxu3 %vm5499_vm2, %v9594_v62  ;;  %v9426_v63 = vld [vmem:[%s10189_s8 + $0x1b8] sm:$0xff] }
 0x44e   : > { %v7887_v1 = vmax.f32 %v7773_v0, 0.0  ;;  %v9483_v0 = vld [vmem:[%s10189_s8 + $0x380] sm:$0xff] }
 0x44f   : > { %v6990_v3 = vpop.f32.mrf.mxu2  ;;  %v7275_v4 = vpop.f32.mrf.mxu3 }
 0x450   : > { %v8001_v5 = vpack.c.bf16 %v7887_v1, %v7887_v1  ;;  %v7542_v6 = vmax.f32 %v6990_v3, %v7275_v4  ;;  %v6422_v7 = vpop.f32.mrf.mxu0  ;;  %v6707_v8 = vpop.f32.mrf.mxu1 }
 0x451   : > { %v7429_v17 = vmax.f32 %v6422_v7, %v6707_v8  ;;  %v9597_v7 = vld [vmem:[%s10189_s8 + $0x710] sm:$0xff] }
 0x452   : > { %8116 = vst.msk [vmem:[%s10274_s17 + $0x15c] sm:$0xf] %vm8028_vm3, %v8001_v5  ;;  %v7656_v9 = vmax.f32 %v7428_v2, %v7542_v6  ;;  %v9540_v6 = vld [vmem:[%s10189_s8 + $0x548] sm:$0xff] }
 0x454   : > { %v7774_v10 = vadd.f32 %v10768_v55, %v7656_v9 }
 0x456   : > { %v7888_v11 = vmax.f32 %v7774_v10, 0.0 }
 0x457   : > { %v6992_v12 = vpop.f32.mrf.mxu2  ;;  %v7277_v13 = vpop.f32.mrf.mxu3 }
 0x458   : > { %v8002_v16 = vpack.c.bf16 %v7888_v11, %v7888_v11  ;;  %v7543_v18 = vmax.f32 %v6992_v12, %v7277_v13  ;;  %v6425_v19 = vpop.f32.mrf.mxu0  ;;  %v6710_v20 = vpop.f32.mrf.mxu1 }
 0x459   : > { %v7430_v27 = vmax.f32 %v6425_v19, %v6710_v20 }
 0x45a   : > { %8117 = vst.msk [vmem:[%s10274_s17 + $0x160] sm:$0xf] %vm8028_vm3, %v8002_v16  ;;  %v7657_v24 = vmax.f32 %v7429_v17, %v7543_v18 }
 0x45b   : > { %9193 = vmatmul.msk.bf16.gmra.mxu0 %vm5499_vm2, %v9424_v14  ;;  %9250 = vmatmul.msk.bf16.gmra.mxu1 %vm5499_vm2, %v9481_v15 }
 0x45c   : > { %v7775_v25 = vadd.f32 %v10768_v55, %v7657_v24  ;;  %9307 = vmatmul.msk.bf16.gmra.mxu2 %vm5499_vm2, %v9538_v21  ;;  %9364 = vmatmul.msk.bf16.gmra.mxu3 %vm5499_vm2, %v9595_v23  ;;  %v9427_v24 = vld [vmem:[%s10189_s8 + $0x1c0] sm:$0xff] }
 0x45e   : > { %v7889_v26 = vmax.f32 %v7775_v25, 0.0  ;;  %v9484_v25 = vld [vmem:[%s10189_s8 + $0x388] sm:$0xff] }
 0x45f   : > { %v6995_v28 = vpop.f32.mrf.mxu2  ;;  %v7280_v29 = vpop.f32.mrf.mxu3 }
 0x460   : > { %v8003_v30 = vpack.c.bf16 %v7889_v26, %v7889_v26  ;;  %v7544_v31 = vmax.f32 %v6995_v28, %v7280_v29  ;;  %v6427_v32 = vpop.f32.mrf.mxu0  ;;  %v6712_v33 = vpop.f32.mrf.mxu1 }
 0x461   : > { %v7431_v42 = vmax.f32 %v6427_v32, %v6712_v33  ;;  %v9598_v32 = vld [vmem:[%s10189_s8 + $0x718] sm:$0xff] }
 0x462   : > { %8118 = vst.msk [vmem:[%s10274_s17 + $0x164] sm:$0xf] %vm8028_vm3, %v8003_v30  ;;  %v7658_v34 = vmax.f32 %v7430_v27, %v7544_v31  ;;  %v9541_v31 = vld [vmem:[%s10189_s8 + $0x550] sm:$0xff] }
 0x464   : > { %v7776_v35 = vadd.f32 %v10768_v55, %v7658_v34 }
 0x466   : > { %v7890_v36 = vmax.f32 %v7776_v35, 0.0 }
 0x467   : > { %v6997_v37 = vpop.f32.mrf.mxu2  ;;  %v7282_v38 = vpop.f32.mrf.mxu3 }
 0x468   : > { %v8004_v41 = vpack.c.bf16 %v7890_v36, %v7890_v36  ;;  %v7545_v43 = vmax.f32 %v6997_v37, %v7282_v38  ;;  %v6430_v44 = vpop.f32.mrf.mxu0  ;;  %v6715_v45 = vpop.f32.mrf.mxu1 }
 0x469   : > { %v7432_v51 = vmax.f32 %v6430_v44, %v6715_v45 }
 0x46a   : > { %8119 = vst.msk [vmem:[%s10274_s17 + $0x168] sm:$0xf] %vm8028_vm3, %v8004_v41  ;;  %v7659_v48 = vmax.f32 %v7431_v42, %v7545_v43 }
 0x46b   : > { %9194 = vmatmul.msk.bf16.gmra.mxu0 %vm5499_vm2, %v9425_v39  ;;  %9251 = vmatmul.msk.bf16.gmra.mxu1 %vm5499_vm2, %v9482_v40 }
 0x46c   : > { %v7777_v49 = vadd.f32 %v10768_v55, %v7659_v48  ;;  %9308 = vmatmul.msk.bf16.gmra.mxu2 %vm5499_vm2, %v9539_v46  ;;  %9365 = vmatmul.msk.bf16.gmra.mxu3 %vm5499_vm2, %v9596_v47 }
 0x46e   : > { %v7891_v50 = vmax.f32 %v7777_v49, 0.0 }
 0x46f   : > { %v7000_v52 = vpop.f32.mrf.mxu2  ;;  %v7285_v53 = vpop.f32.mrf.mxu3 }
 0x470   : > { %v8005_v54 = vpack.c.bf16 %v7891_v50, %v7891_v50  ;;  %v7546_v22 = vmax.f32 %v7000_v52, %v7285_v53  ;;  %v6432_v56 = vpop.f32.mrf.mxu0  ;;  %v6717_v57 = vpop.f32.mrf.mxu1 }
 0x471   : > { %v7433_v2 = vmax.f32 %v6432_v56, %v6717_v57 }
 0x472   : > { %8120 = vst.msk [vmem:[%s10274_s17 + $0x16c] sm:$0xf] %vm8028_vm3, %v8005_v54  ;;  %v7660_v58 = vmax.f32 %v7432_v51, %v7546_v22 }
 0x474   : > { %v7778_v59 = vadd.f32 %v10768_v55, %v7660_v58 }
 0x476   : > { %v7892_v60 = vmax.f32 %v7778_v59, 0.0 }
 0x477   : > { %v7002_v61 = vpop.f32.mrf.mxu2  ;;  %v7287_v62 = vpop.f32.mrf.mxu3 }
 0x478   : > { %v8006_v1 = vpack.c.bf16 %v7892_v60, %v7892_v60  ;;  %v7547_v3 = vmax.f32 %v7002_v61, %v7287_v62  ;;  %v6435_v4 = vpop.f32.mrf.mxu0  ;;  %v6720_v5 = vpop.f32.mrf.mxu1 }
 0x479   : > { %v7434_v11 = vmax.f32 %v6435_v4, %v6720_v5 }
 0x47a   : > { %8121 = vst.msk [vmem:[%s10274_s17 + $0x170] sm:$0xf] %vm8028_vm3, %v8006_v1  ;;  %v7661_v8 = vmax.f32 %v7433_v2, %v7547_v3 }
 0x47b   : > { %9195 = vmatmul.msk.bf16.gmra.mxu0 %vm5499_vm2, %v9426_v63  ;;  %9252 = vmatmul.msk.bf16.gmra.mxu1 %vm5499_vm2, %v9483_v0 }
 0x47c   : > { %v7779_v9 = vadd.f32 %v10768_v55, %v7661_v8  ;;  %9309 = vmatmul.msk.bf16.gmra.mxu2 %vm5499_vm2, %v9540_v6  ;;  %9366 = vmatmul.msk.bf16.gmra.mxu3 %vm5499_vm2, %v9597_v7 }
 0x47e   : > { %v7893_v10 = vmax.f32 %v7779_v9, 0.0 }
 0x47f   : > { %v7005_v12 = vpop.f32.mrf.mxu2  ;;  %v7290_v13 = vpop.f32.mrf.mxu3 }
 0x480   : > { %v8007_v14 = vpack.c.bf16 %v7893_v10, %v7893_v10  ;;  %v7548_v15 = vmax.f32 %v7005_v12, %v7290_v13  ;;  %v6437_v16 = vpop.f32.mrf.mxu0  ;;  %v6722_v17 = vpop.f32.mrf.mxu1 }
 0x481   : > { %v7435_v27 = vmax.f32 %v6437_v16, %v6722_v17 }
 0x482   : > { %8122 = vst.msk [vmem:[%s10274_s17 + $0x174] sm:$0xf] %vm8028_vm3, %v8007_v14  ;;  %v7662_v18 = vmax.f32 %v7434_v11, %v7548_v15 }
 0x484   : > { %v7780_v19 = vadd.f32 %v10768_v55, %v7662_v18 }
 0x486   : > { %v7894_v20 = vmax.f32 %v7780_v19, 0.0 }
 0x487   : > { %v7007_v21 = vpop.f32.mrf.mxu2  ;;  %v7292_v23 = vpop.f32.mrf.mxu3 }
 0x488   : > { %v8008_v26 = vpack.c.bf16 %v7894_v20, %v7894_v20  ;;  %v7549_v28 = vmax.f32 %v7007_v21, %v7292_v23  ;;  %v6440_v29 = vpop.f32.mrf.mxu0  ;;  %v6725_v30 = vpop.f32.mrf.mxu1 }
 0x489   : > { %v7436_v36 = vmax.f32 %v6440_v29, %v6725_v30 }
 0x48a   : > { %8123 = vst.msk [vmem:[%s10274_s17 + $0x178] sm:$0xf] %vm8028_vm3, %v8008_v26  ;;  %v7663_v33 = vmax.f32 %v7435_v27, %v7549_v28 }
 0x48b   : > { %9196 = vmatmul.msk.bf16.gmra.mxu0 %vm5499_vm2, %v9427_v24  ;;  %9253 = vmatmul.msk.bf16.gmra.mxu1 %vm5499_vm2, %v9484_v25 }
 0x48c   : > { %v7781_v34 = vadd.f32 %v10768_v55, %v7663_v33  ;;  %9310 = vmatmul.msk.bf16.gmra.mxu2 %vm5499_vm2, %v9541_v31  ;;  %9367 = vmatmul.msk.bf16.gmra.mxu3 %vm5499_vm2, %v9598_v32 }
 0x48e   : > { %v7895_v35 = vmax.f32 %v7781_v34, 0.0 }
 0x48f   : > { %v7010_v37 = vpop.f32.mrf.mxu2  ;;  %v7295_v38 = vpop.f32.mrf.mxu3 }
 0x490   : > { %v8009_v39 = vpack.c.bf16 %v7895_v35, %v7895_v35  ;;  %v7550_v40 = vmax.f32 %v7010_v37, %v7295_v38  ;;  %v6442_v41 = vpop.f32.mrf.mxu0  ;;  %v6727_v42 = vpop.f32.mrf.mxu1 }
 0x491   : > { %v7437_v49 = vmax.f32 %v6442_v41, %v6727_v42 }
 0x492   : > { %8124 = vst.msk [vmem:[%s10274_s17 + $0x17c] sm:$0xf] %vm8028_vm3, %v8009_v39  ;;  %v7664_v43 = vmax.f32 %v7436_v36, %v7550_v40 }
 0x494   : > { %v7782_v44 = vadd.f32 %v10768_v55, %v7664_v43 }
 0x496   : > { %v7896_v45 = vmax.f32 %v7782_v44, 0.0 }
 0x497   : > { %v7012_v46 = vpop.f32.mrf.mxu2  ;;  %v7297_v47 = vpop.f32.mrf.mxu3 }
 0x498   : > { %v8010_v48 = vpack.c.bf16 %v7896_v45, %v7896_v45  ;;  %v7551_v50 = vmax.f32 %v7012_v46, %v7297_v47  ;;  %v6445_v51 = vpop.f32.mrf.mxu0  ;;  %v6730_v52 = vpop.f32.mrf.mxu1 }
 0x499   : > { %v7438_v56 = vmax.f32 %v6445_v51, %v6730_v52 }
 0x49a   : > { %8125 = vst.msk [vmem:[%s10274_s17 + $0x180] sm:$0xf] %vm8028_vm3, %v8010_v48  ;;  %v7665_v53 = vmax.f32 %v7437_v49, %v7551_v50 }
 0x49c   : > { %v7783_v54 = vadd.f32 %v10768_v55, %v7665_v53 }
 0x49e   : > { %v7897_v22 = vmax.f32 %v7783_v54, 0.0 }
 0x49f   : > { %v7015_v57 = vpop.f32.mrf.mxu2  ;;  %v7300_v58 = vpop.f32.mrf.mxu3 }
 0x4a0   : > { %v8011_v59 = vpack.c.bf16 %v7897_v22, %v7897_v22  ;;  %v7552_v60 = vmax.f32 %v7015_v57, %v7300_v58  ;;  %v6447_v61 = vpop.f32.mrf.mxu0  ;;  %v6732_v62 = vpop.f32.mrf.mxu1 }
 0x4a1   : > { %v7439_v5 = vmax.f32 %v6447_v61, %v6732_v62 }
 0x4a2   : > { %8126 = vst.msk [vmem:[%s10274_s17 + $0x184] sm:$0xf] %vm8028_vm3, %v8011_v59  ;;  %v7666_v63 = vmax.f32 %v7438_v56, %v7552_v60 }
 0x4a4   : > { %v7784_v0 = vadd.f32 %v10768_v55, %v7666_v63 }
 0x4a6   : > { %v7898_v1 = vmax.f32 %v7784_v0, 0.0 }
 0x4a7   : > { %v7017_v2 = vpop.f32.mrf.mxu2  ;;  %v7302_v3 = vpop.f32.mrf.mxu3 }
 0x4a8   : > { %v8012_v4 = vpack.c.bf16 %v7898_v1, %v7898_v1  ;;  %v7553_v6 = vmax.f32 %v7017_v2, %v7302_v3  ;;  %v6450_v7 = vpop.f32.mrf.mxu0  ;;  %v6735_v8 = vpop.f32.mrf.mxu1 }
 0x4a9   : > { %v7440_v12 = vmax.f32 %v6450_v7, %v6735_v8 }
 0x4aa   : > { %8127 = vst.msk [vmem:[%s10274_s17 + $0x188] sm:$0xf] %vm8028_vm3, %v8012_v4  ;;  %v7667_v9 = vmax.f32 %v7439_v5, %v7553_v6 }
 0x4ac   : > { %v7785_v10 = vadd.f32 %v10768_v55, %v7667_v9 }
 0x4ae   : > { %v7899_v11 = vmax.f32 %v7785_v10, 0.0 }
 0x4af   : > { %v7020_v13 = vpop.f32.mrf.mxu2  ;;  %v7305_v14 = vpop.f32.mrf.mxu3 }
 0x4b0   : > { %v8013_v15 = vpack.c.bf16 %v7899_v11, %v7899_v11  ;;  %v7554_v16 = vmax.f32 %v7020_v13, %v7305_v14  ;;  %v6452_v17 = vpop.f32.mrf.mxu0  ;;  %v6737_v18 = vpop.f32.mrf.mxu1 }
 0x4b1   : > { %v7441_v26 = vmax.f32 %v6452_v17, %v6737_v18  ;;  %v10990_v17 = vld [vmem:[%s11028_s2] ss:$0 sm:$0xff] }
 0x4b2   : > { %8128 = vst.msk [vmem:[%s10274_s17 + $0x18c] sm:$0xf] %vm8028_vm3, %v8013_v15  ;;  %v7668_v19 = vmax.f32 %v7440_v12, %v7554_v16 }
 0x4b4   : > { %v7786_v20 = vadd.f32 %v10768_v55, %v7668_v19 }
 0x4b6   : > { %v7900_v21 = vmax.f32 %v7786_v20, 0.0 }
 0x4b7   : > { %v7022_v23 = vpop.f32.mrf.mxu2  ;;  %v7307_v24 = vpop.f32.mrf.mxu3 }
 0x4b8   : > { %v8014_v25 = vpack.c.bf16 %v7900_v21, %v7900_v21  ;;  %v7555_v27 = vmax.f32 %v7022_v23, %v7307_v24  ;;  %v6455_v28 = vpop.f32.mrf.mxu0  ;;  %v6740_v29 = vpop.f32.mrf.mxu1 }
 0x4b9   : > { %v7442_v33 = vmax.f32 %v6455_v28, %v6740_v29 }
 0x4ba   : > { %8129 = vst.msk [vmem:[%s10274_s17 + $0x190] sm:$0xf] %vm8028_vm3, %v8014_v25  ;;  %v7669_v30 = vmax.f32 %v7441_v26, %v7555_v27 }
 0x4bc   : > { %v7787_v31 = vadd.f32 %v10768_v55, %v7669_v30 }
 0x4be   : > { %v7901_v32 = vmax.f32 %v7787_v31, 0.0 }
 0x4bf   : > { %v7025_v34 = vpop.f32.mrf.mxu2  ;;  %v7310_v35 = vpop.f32.mrf.mxu3 }
 0x4c0   : > { %v8015_v36 = vpack.c.bf16 %v7901_v32, %v7901_v32  ;;  %v7556_v37 = vmax.f32 %v7025_v34, %v7310_v35  ;;  %v6457_v38 = vpop.f32.mrf.mxu0  ;;  %v6742_v39 = vpop.f32.mrf.mxu1 }
 0x4c1   : > { %v7443_v46 = vmax.f32 %v6457_v38, %v6742_v39 }
 0x4c2   : > { %8130 = vst.msk [vmem:[%s10274_s17 + $0x194] sm:$0xf] %vm8028_vm3, %v8015_v36  ;;  %v7670_v40 = vmax.f32 %v7442_v33, %v7556_v37 }
 0x4c4   : > { %v7788_v41 = vadd.f32 %v10768_v55, %v7670_v40 }
 0x4c6   : > { %v7902_v42 = vmax.f32 %v7788_v41, 0.0 }
 0x4c7   : > { %v7027_v43 = vpop.f32.mrf.mxu2  ;;  %v7312_v44 = vpop.f32.mrf.mxu3 }
 0x4c8   : > { %v8016_v45 = vpack.c.bf16 %v7902_v42, %v7902_v42  ;;  %v7557_v47 = vmax.f32 %v7027_v43, %v7312_v44  ;;  %v6460_v48 = vpop.f32.mrf.mxu0  ;;  %v6745_v49 = vpop.f32.mrf.mxu1 }
 0x4c9   : > { %v7444_v53 = vmax.f32 %v6460_v48, %v6745_v49 }
 0x4ca   : > { %8131 = vst.msk [vmem:[%s10274_s17 + $0x198] sm:$0xf] %vm8028_vm3, %v8016_v45  ;;  %v7671_v50 = vmax.f32 %v7443_v46, %v7557_v47 }
 0x4cc   : > { %v7789_v51 = vadd.f32 %v10768_v55, %v7671_v50 }
 0x4ce   : > { %v7903_v52 = vmax.f32 %v7789_v51, 0.0 }
 0x4cf   : > { %v7030_v54 = vpop.f32.mrf.mxu2  ;;  %v7315_v22 = vpop.f32.mrf.mxu3 }
 0x4d0   : > { %v8017_v56 = vpack.c.bf16 %v7903_v52, %v7903_v52  ;;  %v7558_v57 = vmax.f32 %v7030_v54, %v7315_v22  ;;  %v6462_v58 = vpop.f32.mrf.mxu0  ;;  %v6747_v59 = vpop.f32.mrf.mxu1 }
 0x4d1   : > { %v7445_v2 = vmax.f32 %v6462_v58, %v6747_v59 }
 0x4d2   : > { %8132 = vst.msk [vmem:[%s10274_s17 + $0x19c] sm:$0xf] %vm8028_vm3, %v8017_v56  ;;  %v7672_v60 = vmax.f32 %v7444_v53, %v7558_v57 }
 0x4d4   : > { %v7790_v61 = vadd.f32 %v10768_v55, %v7672_v60 }
 0x4d6   : > { %v7904_v62 = vmax.f32 %v7790_v61, 0.0 }
 0x4d7   : > { %v7032_v63 = vpop.f32.mrf.mxu2  ;;  %v7317_v0 = vpop.f32.mrf.mxu3 }
 0x4d8   : > { %v8018_v1 = vpack.c.bf16 %v7904_v62, %v7904_v62  ;;  %v7559_v3 = vmax.f32 %v7032_v63, %v7317_v0  ;;  %v6465_v4 = vpop.f32.mrf.mxu0  ;;  %v6750_v5 = vpop.f32.mrf.mxu1 }
 0x4d9   : > { %v7446_v9 = vmax.f32 %v6465_v4, %v6750_v5 }
 0x4da   : > { %8133 = vst.msk [vmem:[%s10274_s17 + $0x1a0] sm:$0xf] %vm8028_vm3, %v8018_v1  ;;  %v7673_v6 = vmax.f32 %v7445_v2, %v7559_v3 }
 0x4dc   : > { %v7791_v7 = vadd.f32 %v10768_v55, %v7673_v6 }
 0x4de   : > { %v7905_v8 = vmax.f32 %v7791_v7, 0.0 }
 0x4df   : > { %v7035_v10 = vpop.f32.mrf.mxu2  ;;  %v7320_v11 = vpop.f32.mrf.mxu3 }
 0x4e0   : > { %v8019_v12 = vpack.c.bf16 %v7905_v8, %v7905_v8  ;;  %v7560_v13 = vmax.f32 %v7035_v10, %v7320_v11  ;;  %v6467_v14 = vpop.f32.mrf.mxu0  ;;  %v6752_v15 = vpop.f32.mrf.mxu1 }
 0x4e1   : > { %v7447_v23 = vmax.f32 %v6467_v14, %v6752_v15 }
 0x4e2   : > { %8134 = vst.msk [vmem:[%s10274_s17 + $0x1a4] sm:$0xf] %vm8028_vm3, %v8019_v12  ;;  %v7674_v16 = vmax.f32 %v7446_v9, %v7560_v13 }
 0x4e4   : > { %v7792_v18 = vadd.f32 %v10990_v17, %v7674_v16 }
 0x4e6   : > { %v7906_v55 = vmax.f32 %v7792_v18, 0.0 }
 0x4e7   : > { %v7037_v19 = vpop.f32.mrf.mxu2  ;;  %v7322_v20 = vpop.f32.mrf.mxu3 }
 0x4e8   : > { %v8020_v21 = vpack.c.bf16 %v7906_v55, %v7906_v55  ;;  %v7561_v24 = vmax.f32 %v7037_v19, %v7322_v20  ;;  %v6470_v25 = vpop.f32.mrf.mxu0  ;;  %v6755_v26 = vpop.f32.mrf.mxu1 }
 0x4e9   : > { %v7448_v30 = vmax.f32 %v6470_v25, %v6755_v26 }
 0x4ea   : > { %8135 = vst.msk [vmem:[%s10274_s17 + $0x1a8] sm:$0xf] %vm8028_vm3, %v8020_v21  ;;  %v7675_v27 = vmax.f32 %v7447_v23, %v7561_v24 }
 0x4ec   : > { %v7793_v28 = vadd.f32 %v10990_v17, %v7675_v27 }
 0x4ee   : > { %v7907_v29 = vmax.f32 %v7793_v28, 0.0 }
 0x4ef   : > { %v7040_v31 = vpop.f32.mrf.mxu2  ;;  %v7325_v32 = vpop.f32.mrf.mxu3 }
 0x4f0   : > { %v8021_v33 = vpack.c.bf16 %v7907_v29, %v7907_v29  ;;  %v7562_v34 = vmax.f32 %v7040_v31, %v7325_v32  ;;  %v6472_v35 = vpop.f32.mrf.mxu0  ;;  %v6757_v36 = vpop.f32.mrf.mxu1 }
 0x4f1   : > { %v7449_v43 = vmax.f32 %v6472_v35, %v6757_v36 }
 0x4f2   : > { %8136 = vst.msk [vmem:[%s10274_s17 + $0x1ac] sm:$0xf] %vm8028_vm3, %v8021_v33  ;;  %v7676_v37 = vmax.f32 %v7448_v30, %v7562_v34 }
 0x4f4   : > { %v7794_v38 = vadd.f32 %v10990_v17, %v7676_v37 }
 0x4f6   : > { %v7908_v39 = vmax.f32 %v7794_v38, 0.0 }
 0x4f7   : > { %v7042_v40 = vpop.f32.mrf.mxu2  ;;  %v7327_v41 = vpop.f32.mrf.mxu3 }
 0x4f8   : > { %v8022_v42 = vpack.c.bf16 %v7908_v39, %v7908_v39  ;;  %v7563_v44 = vmax.f32 %v7042_v40, %v7327_v41  ;;  %v6475_v45 = vpop.f32.mrf.mxu0  ;;  %v6760_v46 = vpop.f32.mrf.mxu1 }
 0x4f9   : > { %v7450_v50 = vmax.f32 %v6475_v45, %v6760_v46 }
 0x4fa   : > { %8137 = vst.msk [vmem:[%s10274_s17 + $0x1b0] sm:$0xf] %vm8028_vm3, %v8022_v42  ;;  %v7677_v47 = vmax.f32 %v7449_v43, %v7563_v44 }
 0x4fc   : > { %v7795_v48 = vadd.f32 %v10990_v17, %v7677_v47 }
 0x4fe   : > { %v7909_v49 = vmax.f32 %v7795_v48, 0.0 }
 0x4ff   : > { %v7045_v51 = vpop.f32.mrf.mxu2  ;;  %v7330_v52 = vpop.f32.mrf.mxu3 }
 0x500   : > { %v8023_v53 = vpack.c.bf16 %v7909_v49, %v7909_v49  ;;  %v7564_v54 = vmax.f32 %v7045_v51, %v7330_v52  ;;  %v6477_v22 = vpop.f32.mrf.mxu0  ;;  %v6762_v56 = vpop.f32.mrf.mxu1 }
 0x501   : > { %v7451_v63 = vmax.f32 %v6477_v22, %v6762_v56 }
 0x502   : > { %8138 = vst.msk [vmem:[%s10274_s17 + $0x1b4] sm:$0xf] %vm8028_vm3, %v8023_v53  ;;  %v7678_v57 = vmax.f32 %v7450_v50, %v7564_v54 }
 0x504   : > { %v7796_v58 = vadd.f32 %v10990_v17, %v7678_v57 }
 0x506   : > { %v7910_v59 = vmax.f32 %v7796_v58, 0.0 }
 0x507   : > { %v7047_v60 = vpop.f32.mrf.mxu2  ;;  %v7332_v61 = vpop.f32.mrf.mxu3 }
 0x508   : > { %v8024_v62 = vpack.c.bf16 %v7910_v59, %v7910_v59  ;;  %v7565_v0 = vmax.f32 %v7047_v60, %v7332_v61  ;;  %v6480_v2 = vpop.f32.mrf.mxu0  ;;  %v6765_v3 = vpop.f32.mrf.mxu1 }
 0x509   : > { %v7452_v6 = vmax.f32 %v6480_v2, %v6765_v3 }
 0x50a   : > { %8139 = vst.msk [vmem:[%s10274_s17 + $0x1b8] sm:$0xf] %vm8028_vm3, %v8024_v62  ;;  %v7679_v1 = vmax.f32 %v7451_v63, %v7565_v0 }
 0x50c   : > { %v7797_v4 = vadd.f32 %v10990_v17, %v7679_v1 }
 0x50e   : > { %v7911_v5 = vmax.f32 %v7797_v4, 0.0 }
 0x50f   : > { %v7050_v7 = vpop.f32.mrf.mxu2  ;;  %v7335_v8 = vpop.f32.mrf.mxu3 }
 0x510   : > { %v8025_v9 = vpack.c.bf16 %v7911_v5, %v7911_v5  ;;  %v7566_v10 = vmax.f32 %v7050_v7, %v7335_v8  ;;  %v6482_v13 = vpop.f32.mrf.mxu0  ;;  %v6767_v14 = vpop.f32.mrf.mxu1 }
 0x511   : > { %v7453_v19 = vmax.f32 %v6482_v13, %v6767_v14 }
 0x512   : > { %8140 = vst.msk [vmem:[%s10274_s17 + $0x1bc] sm:$0xf] %vm8028_vm3, %v8025_v9  ;;  %v7680_v11 = vmax.f32 %v7452_v6, %v7566_v10 }
 0x514   : > { %v7798_v12 = vadd.f32 %v10990_v17, %v7680_v11 }
 0x516   : > { %v7912_v15 = vmax.f32 %v7798_v12, 0.0 }
 0x517   : > { %v7052_v16 = vpop.f32.mrf.mxu2  ;;  %v7337_v18 = vpop.f32.mrf.mxu3 }
 0x518   : > { %v8026_v55 = vpack.c.bf16 %v7912_v15, %v7912_v15  ;;  %v7567_v20 = vmax.f32 %v7052_v16, %v7337_v18 }
 0x51a   : > { %8141 = vst.msk [vmem:[%s10274_s17 + $0x1c0] sm:$0xf] %vm8028_vm3, %v8026_v55  ;;  %v7681_v21 = vmax.f32 %v7453_v19, %v7567_v20 }
 0x51c   : > { %v7799_v23 = vadd.f32 %v10990_v17, %v7681_v21 }
 0x51e   : > { %v7913_v24 = vmax.f32 %v7799_v23, 0.0 }
 0x520   : > { %v8027_v25 = vpack.c.bf16 %v7913_v24, %v7913_v24 }
 0x522   : > { %8142 = vst.msk [vmem:[%s10274_s17 + $0x1c4] sm:$0xf] %vm8028_vm3, %v8027_v25 }
 0x523 PF: > { %p10_p9 = scmp.ge.s32.totalorder %s9700_s16, 4   ;;  %s11030_s12 = smov %s9656_s13 }
 0x524   : > { %s11031_s13 = smov %s9709_s19  ;;  %s11032_s14 = smov %s9700_s16 }
 0x525   :  { %12 = sbr.rel (!%p10_p9) target bundleno = 2 (0x2), region = 123 }

// kernel: critic_forward.7
= control target key start
LH: loop header
LB: loop body
LE: loop exit
PB: predicated region body
PF: predicated region fallthrough
CT: control target
= control target key end

     0   :  { %s4198_s12 = smov 0   ;;  %s4200_s13 = smov 0   ;;  %s5604_s0 = inlined_call_operand.vmem [shape: bf16[4,416,288], index: 0, kind: input, shape index: {}]   ;;  %s5605_s1 = inlined_call_operand.vmem [shape: bf16[288,64], index: 1, kind: input, shape index: {}]   ;;  %s5606_s2 = inlined_call_operand.vmem [shape: f32[1,64], index: 2, kind: input, shape index: {}]   ;;  %s5607_s3 = inlined_call_operand.vmem [shape: bf16[416,64], index: 3, kind: output, shape index: {}]  }
   0x1   :  { %s4202_s14 = smov 0  }
   0x2 LB: > { %s2968_s15 = sadd.s32 4294967295, %s4176_s14   ;;  %s4215_s16 = sadd.s32 1, %s4176_s14   ;;  %s4176_s14 = sphi %s4202_s14, %s5811_s14   ;;  %s4172_s13 = sphi %s4200_s13, %s5810_s13   ;;  %s4168_s12 = sphi %s4198_s12, %s5809_s12  }
   0x3   : > { %s17_s17 = ssub.s32 %s4176_s14, %s4215_s16  ;;  %s20_s18 = sadd.s32 1, %s4172_s13 }
   0x4   : > { %p18_p0 = scmp.eq.s32.totalorder %s17_s17, 0  ;;  %p27_p1 = scmp.ne.s32.totalorder %s4172_s13, %s4168_s12 }
   0x5   : > { %p28_p2 = scmp.eq.s32.totalorder %s4176_s14, 0  ;;  %p2971_p4 = scmp.ge.s32.totalorder %s4176_s14, 2 }
   0x6   : > { %s4224_s19 = scalar_select %p18_p0, %s4172_s13, %s20_s18  }
   0x7   : > { %p29_p3 = por %p28_p2, %p27_p1  ;;  %127 = sbr.rel (%p2971_p4) target bundleno = 226 (0xe2), region = 24 }
   0xc   : > { %130 = sbr.rel (!%p29_p3) target bundleno = 226 (0xe2), region = 28  ;;  %s132_s20 = sand.u32 (%p29_p3), 1, %s4172_s13  }
   0xd   : > { %s4125_s21 = smul.u32 (%p29_p3), 1248, %s132_s20 }
   0xe   : > { %s4128_s22 = smul.u32 (%p29_p3), 312, %s4176_s14 }
   0xf   : > { %s4237_s26 = scalar_lea.vmem (%p29_p3), [#allocation2], %s4125_s21 }
  0x10   : > { %s4232_s25 = scalar_lea.vmem (%p29_p3), %s5604_s0, %s4128_s22 }
  0x11   : > { %v153_v0 = vld [vmem:[%s4232_s25] sm:$0xff]  ;;  %v155_v1 = vld [vmem:[%s4232_s25 + $0xc] sm:$0xff]  ;;  %v157_v2 = vld [vmem:[%s4232_s25 + $0x18] sm:$0xff] }
  0x12   : > { %154 = vst [vmem:[%s4237_s26] sm:$0xff] %v153_v0  ;;  %v159_v3 = vld [vmem:[%s4232_s25 + $0x24] sm:$0xff]  ;;  %v161_v4 = vld [vmem:[%s4232_s25 + $0x30] sm:$0xff]  ;;  %v163_v5 = vld [vmem:[%s4232_s25 + $0x3c] sm:$0xff] }
  0x13   : > { %156 = vst [vmem:[%s4237_s26 + $0xc] sm:$0xff] %v155_v1  ;;  %v165_v6 = vld [vmem:[%s4232_s25 + $0x48] sm:$0xff]  ;;  %v167_v7 = vld [vmem:[%s4232_s25 + $0x54] sm:$0xff]  ;;  %v169_v8 = vld [vmem:[%s4232_s25 + $0x60] sm:$0xff] }
  0x14   : > { %158 = vst [vmem:[%s4237_s26 + $0x18] sm:$0xff] %v157_v2  ;;  %v171_v9 = vld [vmem:[%s4232_s25 + $0x6c] sm:$0xff]  ;;  %v173_v10 = vld [vmem:[%s4232_s25 + $0x78] sm:$0xff]  ;;  %v175_v11 = vld [vmem:[%s4232_s25 + $0x84] sm:$0xff] }
  0x15   : > { %160 = vst [vmem:[%s4237_s26 + $0x24] sm:$0xff] %v159_v3  ;;  %v177_v12 = vld [vmem:[%s4232_s25 + $0x90] sm:$0xff]  ;;  %v179_v13 = vld [vmem:[%s4232_s25 + $0x9c] sm:$0xff]  ;;  %v181_v14 = vld [vmem:[%s4232_s25 + $0xa8] sm:$0xff] }
  0x16   : > { %162 = vst [vmem:[%s4237_s26 + $0x30] sm:$0xff] %v161_v4  ;;  %v183_v15 = vld [vmem:[%s4232_s25 + $0xb4] sm:$0xff]  ;;  %v185_v16 = vld [vmem:[%s4232_s25 + $0xc0] sm:$0xff]  ;;  %v187_v17 = vld [vmem:[%s4232_s25 + $0xcc] sm:$0xff] }
  0x17   : > { %164 = vst [vmem:[%s4237_s26 + $0x3c] sm:$0xff] %v163_v5  ;;  %v189_v18 = vld [vmem:[%s4232_s25 + $0xd8] sm:$0xff]  ;;  %v191_v19 = vld [vmem:[%s4232_s25 + $0xe4] sm:$0xff]  ;;  %v193_v20 = vld [vmem:[%s4232_s25 + $0xf0] sm:$0xff] }
  0x18   : > { %166 = vst [vmem:[%s4237_s26 + $0x48] sm:$0xff] %v165_v6  ;;  %v195_v21 = vld [vmem:[%s4232_s25 + $0xfc] sm:$0xff]  ;;  %v197_v22 = vld [vmem:[%s4232_s25 + $0x108] sm:$0xff]  ;;  %v199_v23 = vld [vmem:[%s4232_s25 + $0x114] sm:$0xff] }
  0x19   : > { %168 = vst [vmem:[%s4237_s26 + $0x54] sm:$0xff] %v167_v7  ;;  %v201_v24 = vld [vmem:[%s4232_s25 + $0x120] sm:$0xff]  ;;  %v203_v25 = vld [vmem:[%s4232_s25 + $0x12c] sm:$0xff]  ;;  %v211_v29 = vld [vmem:[%s4232_s25 + $0x294] sm:$0xff] }
  0x1a   : > { %170 = vst [vmem:[%s4237_s26 + $0x60] sm:$0xff] %v169_v8  ;;  %v205_v26 = vld [vmem:[%s4232_s25 + $0x270] sm:$0xff]  ;;  %v207_v27 = vld [vmem:[%s4232_s25 + $0x27c] sm:$0xff]  ;;  %v209_v28 = vld [vmem:[%s4232_s25 + $0x288] sm:$0xff] }
  0x1b   : > { %172 = vst [vmem:[%s4237_s26 + $0x6c] sm:$0xff] %v171_v9  ;;  %v213_v30 = vld [vmem:[%s4232_s25 + $0x2a0] sm:$0xff]  ;;  %v215_v31 = vld [vmem:[%s4232_s25 + $0x2ac] sm:$0xff]  ;;  %v217_v32 = vld [vmem:[%s4232_s25 + $0x2b8] sm:$0xff] }
  0x1c   : > { %174 = vst [vmem:[%s4237_s26 + $0x78] sm:$0xff] %v173_v10  ;;  %v219_v33 = vld [vmem:[%s4232_s25 + $0x2c4] sm:$0xff]  ;;  %v221_v34 = vld [vmem:[%s4232_s25 + $0x2d0] sm:$0xff]  ;;  %v223_v35 = vld [vmem:[%s4232_s25 + $0x2dc] sm:$0xff] }
  0x1d   : > { %176 = vst [vmem:[%s4237_s26 + $0x84] sm:$0xff] %v175_v11  ;;  %v225_v36 = vld [vmem:[%s4232_s25 + $0x2e8] sm:$0xff]  ;;  %v227_v37 = vld [vmem:[%s4232_s25 + $0x2f4] sm:$0xff]  ;;  %v229_v38 = vld [vmem:[%s4232_s25 + $0x300] sm:$0xff] }
  0x1e   : > { %178 = vst [vmem:[%s4237_s26 + $0x90] sm:$0xff] %v177_v12  ;;  %v231_v39 = vld [vmem:[%s4232_s25 + $0x30c] sm:$0xff]  ;;  %v233_v40 = vld [vmem:[%s4232_s25 + $0x318] sm:$0xff]  ;;  %v235_v41 = vld [vmem:[%s4232_s25 + $0x324] sm:$0xff] }
  0x1f   : > { %180 = vst [vmem:[%s4237_s26 + $0x9c] sm:$0xff] %v179_v13  ;;  %v237_v42 = vld [vmem:[%s4232_s25 + $0x330] sm:$0xff]  ;;  %v239_v43 = vld [vmem:[%s4232_s25 + $0x33c] sm:$0xff]  ;;  %v241_v44 = vld [vmem:[%s4232_s25 + $0x348] sm:$0xff] }
  0x20   : > { %182 = vst [vmem:[%s4237_s26 + $0xa8] sm:$0xff] %v181_v14  ;;  %v243_v45 = vld [vmem:[%s4232_s25 + $0x354] sm:$0xff]  ;;  %v245_v46 = vld [vmem:[%s4232_s25 + $0x360] sm:$0xff]  ;;  %v247_v47 = vld [vmem:[%s4232_s25 + $0x36c] sm:$0xff] }
  0x21   : > { %184 = vst [vmem:[%s4237_s26 + $0xb4] sm:$0xff] %v183_v15  ;;  %v249_v48 = vld [vmem:[%s4232_s25 + $0x378] sm:$0xff]  ;;  %v251_v49 = vld [vmem:[%s4232_s25 + $0x384] sm:$0xff]  ;;  %v253_v50 = vld [vmem:[%s4232_s25 + $0x390] sm:$0xff] }
  0x22   : > { %186 = vst [vmem:[%s4237_s26 + $0xc0] sm:$0xff] %v185_v16  ;;  %v255_v51 = vld [vmem:[%s4232_s25 + $0x39c] sm:$0xff]  ;;  %v259_v53 = vld [vmem:[%s4232_s25 + $0x4ec] sm:$0xff]  ;;  %v263_v55 = vld [vmem:[%s4232_s25 + $0x504] sm:$0xff] }
  0x23   : > { %188 = vst [vmem:[%s4237_s26 + $0xcc] sm:$0xff] %v187_v17  ;;  %v257_v52 = vld [vmem:[%s4232_s25 + $0x4e0] sm:$0xff]  ;;  %v261_v54 = vld [vmem:[%s4232_s25 + $0x4f8] sm:$0xff]  ;;  %v265_v56 = vld [vmem:[%s4232_s25 + $0x510] sm:$0xff] }
  0x24   : > { %190 = vst [vmem:[%s4237_s26 + $0xd8] sm:$0xff] %v189_v18  ;;  %v267_v57 = vld [vmem:[%s4232_s25 + $0x51c] sm:$0xff]  ;;  %v269_v58 = vld [vmem:[%s4232_s25 + $0x528] sm:$0xff]  ;;  %v271_v59 = vld [vmem:[%s4232_s25 + $0x534] sm:$0xff] }
  0x25   : > { %192 = vst [vmem:[%s4237_s26 + $0xe4] sm:$0xff] %v191_v19  ;;  %v273_v60 = vld [vmem:[%s4232_s25 + $0x540] sm:$0xff]  ;;  %v275_v61 = vld [vmem:[%s4232_s25 + $0x54c] sm:$0xff]  ;;  %v277_v62 = vld [vmem:[%s4232_s25 + $0x558] sm:$0xff] }
  0x26   : > { %194 = vst [vmem:[%s4237_s26 + $0xf0] sm:$0xff] %v193_v20  ;;  %v279_v63 = vld [vmem:[%s4232_s25 + $0x564] sm:$0xff]  ;;  %v281_v0 = vld [vmem:[%s4232_s25 + $0x570] sm:$0xff]  ;;  %v283_v1 = vld [vmem:[%s4232_s25 + $0x57c] sm:$0xff] }
  0x27   : > { %196 = vst [vmem:[%s4237_s26 + $0xfc] sm:$0xff] %v195_v21  ;;  %v285_v2 = vld [vmem:[%s4232_s25 + $0x588] sm:$0xff]  ;;  %v287_v3 = vld [vmem:[%s4232_s25 + $0x594] sm:$0xff]  ;;  %v289_v4 = vld [vmem:[%s4232_s25 + $0x5a0] sm:$0xff] }
  0x28   : > { %198 = vst [vmem:[%s4237_s26 + $0x108] sm:$0xff] %v197_v22  ;;  %v291_v5 = vld [vmem:[%s4232_s25 + $0x5ac] sm:$0xff]  ;;  %v293_v6 = vld [vmem:[%s4232_s25 + $0x5b8] sm:$0xff]  ;;  %v295_v7 = vld [vmem:[%s4232_s25 + $0x5c4] sm:$0xff] }
  0x29   : > { %200 = vst [vmem:[%s4237_s26 + $0x114] sm:$0xff] %v199_v23  ;;  %v297_v8 = vld [vmem:[%s4232_s25 + $0x5d0] sm:$0xff]  ;;  %v299_v9 = vld [vmem:[%s4232_s25 + $0x5dc] sm:$0xff]  ;;  %v301_v10 = vld [vmem:[%s4232_s25 + $0x5e8] sm:$0xff] }
  0x2a   : > { %202 = vst [vmem:[%s4237_s26 + $0x120] sm:$0xff] %v201_v24  ;;  %v303_v11 = vld [vmem:[%s4232_s25 + $0x5f4] sm:$0xff]  ;;  %v305_v12 = vld [vmem:[%s4232_s25 + $0x600] sm:$0xff]  ;;  %v307_v13 = vld [vmem:[%s4232_s25 + $0x60c] sm:$0xff] }
  0x2b   : > { %204 = vst [vmem:[%s4237_s26 + $0x12c] sm:$0xff] %v203_v25  ;;  %v309_v14 = vld [vmem:[%s4232_s25 + $0x750] sm:$0xff]  ;;  %v311_v15 = vld [vmem:[%s4232_s25 + $0x75c] sm:$0xff]  ;;  %v313_v16 = vld [vmem:[%s4232_s25 + $0x768] sm:$0xff] }
  0x2c   : > { %206 = vst [vmem:[%s4237_s26 + $0x138] sm:$0xff] %v205_v26  ;;  %v315_v17 = vld [vmem:[%s4232_s25 + $0x774] sm:$0xff]  ;;  %v317_v18 = vld [vmem:[%s4232_s25 + $0x780] sm:$0xff]  ;;  %v319_v19 = vld [vmem:[%s4232_s25 + $0x78c] sm:$0xff] }
  0x2d   : > { %208 = vst [vmem:[%s4237_s26 + $0x144] sm:$0xff] %v207_v27  ;;  %v321_v20 = vld [vmem:[%s4232_s25 + $0x798] sm:$0xff]  ;;  %v323_v21 = vld [vmem:[%s4232_s25 + $0x7a4] sm:$0xff]  ;;  %v325_v22 = vld [vmem:[%s4232_s25 + $0x7b0] sm:$0xff] }
  0x2e   : > { %210 = vst [vmem:[%s4237_s26 + $0x150] sm:$0xff] %v209_v28  ;;  %v327_v23 = vld [vmem:[%s4232_s25 + $0x7bc] sm:$0xff]  ;;  %v329_v24 = vld [vmem:[%s4232_s25 + $0x7c8] sm:$0xff]  ;;  %v331_v25 = vld [vmem:[%s4232_s25 + $0x7d4] sm:$0xff] }
  0x2f   : > { %212 = vst [vmem:[%s4237_s26 + $0x15c] sm:$0xff] %v211_v29  ;;  %v333_v26 = vld [vmem:[%s4232_s25 + $0x7e0] sm:$0xff]  ;;  %v335_v27 = vld [vmem:[%s4232_s25 + $0x7ec] sm:$0xff]  ;;  %v337_v28 = vld [vmem:[%s4232_s25 + $0x7f8] sm:$0xff] }
  0x30   : > { %214 = vst [vmem:[%s4237_s26 + $0x168] sm:$0xff] %v213_v30  ;;  %v339_v29 = vld [vmem:[%s4232_s25 + $0x804] sm:$0xff]  ;;  %v341_v30 = vld [vmem:[%s4232_s25 + $0x810] sm:$0xff] }
  0x31   : > { %216 = vst [vmem:[%s4237_s26 + $0x174] sm:$0xff] %v215_v31  ;;  %v343_v31 = vld [vmem:[%s4232_s25 + $0x81c] sm:$0xff] }
  0x32   : > { %218 = vst [vmem:[%s4237_s26 + $0x180] sm:$0xff] %v217_v32  ;;  %v345_v32 = vld [vmem:[%s4232_s25 + $0x828] sm:$0xff] }
  0x33   : > { %220 = vst [vmem:[%s4237_s26 + $0x18c] sm:$0xff] %v219_v33  ;;  %v347_v33 = vld [vmem:[%s4232_s25 + $0x834] sm:$0xff] }
  0x34   : > { %222 = vst [vmem:[%s4237_s26 + $0x198] sm:$0xff] %v221_v34  ;;  %v349_v34 = vld [vmem:[%s4232_s25 + $0x840] sm:$0xff] }
  0x35   : > { %224 = vst [vmem:[%s4237_s26 + $0x1a4] sm:$0xff] %v223_v35  ;;  %v351_v35 = vld [vmem:[%s4232_s25 + $0x84c] sm:$0xff] }
  0x36   : > { %226 = vst [vmem:[%s4237_s26 + $0x1b0] sm:$0xff] %v225_v36  ;;  %v353_v36 = vld [vmem:[%s4232_s25 + $0x858] sm:$0xff] }
  0x37   : > { %228 = vst [vmem:[%s4237_s26 + $0x1bc] sm:$0xff] %v227_v37  ;;  %v355_v37 = vld [vmem:[%s4232_s25 + $0x864] sm:$0xff] }
  0x38   : > { %230 = vst [vmem:[%s4237_s26 + $0x1c8] sm:$0xff] %v229_v38  ;;  %v357_v38 = vld [vmem:[%s4232_s25 + $0x870] sm:$0xff] }
  0x39   : > { %232 = vst [vmem:[%s4237_s26 + $0x1d4] sm:$0xff] %v231_v39  ;;  %v359_v39 = vld [vmem:[%s4232_s25 + $0x87c] sm:$0xff] }
  0x3a   : > { %234 = vst [vmem:[%s4237_s26 + $0x1e0] sm:$0xff] %v233_v40  ;;  %v2973_v40 = vld [vmem:[%s4232_s25 + $0x8] sm:$0xf] }
  0x3b   : > { %236 = vst [vmem:[%s4237_s26 + $0x1ec] sm:$0xff] %v235_v41  ;;  %v2975_v41 = vld [vmem:[%s4232_s25 + $0x14] sm:$0xf] }
  0x3c   : > { %238 = vst [vmem:[%s4237_s26 + $0x1f8] sm:$0xff] %v237_v42  ;;  %v2977_v42 = vld [vmem:[%s4232_s25 + $0x20] sm:$0xf] }
  0x3d   : > { %240 = vst [vmem:[%s4237_s26 + $0x204] sm:$0xff] %v239_v43  ;;  %v2979_v43 = vld [vmem:[%s4232_s25 + $0x2c] sm:$0xf] }
  0x3e   : > { %242 = vst [vmem:[%s4237_s26 + $0x210] sm:$0xff] %v241_v44  ;;  %v2981_v44 = vld [vmem:[%s4232_s25 + $0x38] sm:$0xf] }
  0x3f   : > { %244 = vst [vmem:[%s4237_s26 + $0x21c] sm:$0xff] %v243_v45  ;;  %v2983_v45 = vld [vmem:[%s4232_s25 + $0x44] sm:$0xf] }
  0x40   : > { %246 = vst [vmem:[%s4237_s26 + $0x228] sm:$0xff] %v245_v46  ;;  %v2985_v46 = vld [vmem:[%s4232_s25 + $0x50] sm:$0xf] }
  0x41   : > { %248 = vst [vmem:[%s4237_s26 + $0x234] sm:$0xff] %v247_v47  ;;  %v2987_v47 = vld [vmem:[%s4232_s25 + $0x5c] sm:$0xf] }
  0x42   : > { %250 = vst [vmem:[%s4237_s26 + $0x240] sm:$0xff] %v249_v48  ;;  %v2989_v48 = vld [vmem:[%s4232_s25 + $0x68] sm:$0xf] }
  0x43   : > { %252 = vst [vmem:[%s4237_s26 + $0x24c] sm:$0xff] %v251_v49  ;;  %v2991_v49 = vld [vmem:[%s4232_s25 + $0x74] sm:$0xf] }
  0x44   : > { %254 = vst [vmem:[%s4237_s26 + $0x258] sm:$0xff] %v253_v50  ;;  %v2993_v50 = vld [vmem:[%s4232_s25 + $0x80] sm:$0xf] }
  0x45   : > { %256 = vst [vmem:[%s4237_s26 + $0x264] sm:$0xff] %v255_v51  ;;  %v2995_v51 = vld [vmem:[%s4232_s25 + $0x8c] sm:$0xf] }
  0x46   : > { %258 = vst [vmem:[%s4237_s26 + $0x270] sm:$0xff] %v257_v52  ;;  %v2997_v52 = vld [vmem:[%s4232_s25 + $0x98] sm:$0xf] }
  0x47   : > { %260 = vst [vmem:[%s4237_s26 + $0x27c] sm:$0xff] %v259_v53  ;;  %v2999_v53 = vld [vmem:[%s4232_s25 + $0xa4] sm:$0xf] }
  0x48   : > { %262 = vst [vmem:[%s4237_s26 + $0x288] sm:$0xff] %v261_v54  ;;  %v3001_v54 = vld [vmem:[%s4232_s25 + $0xb0] sm:$0xf] }
  0x49   : > { %264 = vst [vmem:[%s4237_s26 + $0x294] sm:$0xff] %v263_v55  ;;  %v3003_v55 = vld [vmem:[%s4232_s25 + $0xbc] sm:$0xf] }
  0x4a   : > { %266 = vst [vmem:[%s4237_s26 + $0x2a0] sm:$0xff] %v265_v56  ;;  %v3005_v56 = vld [vmem:[%s4232_s25 + $0xc8] sm:$0xf] }
  0x4b   : > { %268 = vst [vmem:[%s4237_s26 + $0x2ac] sm:$0xff] %v267_v57  ;;  %v3007_v57 = vld [vmem:[%s4232_s25 + $0xd4] sm:$0xf] }
  0x4c   : > { %270 = vst [vmem:[%s4237_s26 + $0x2b8] sm:$0xff] %v269_v58  ;;  %v3009_v58 = vld [vmem:[%s4232_s25 + $0xe0] sm:$0xf] }
  0x4d   : > { %272 = vst [vmem:[%s4237_s26 + $0x2c4] sm:$0xff] %v271_v59  ;;  %v3011_v59 = vld [vmem:[%s4232_s25 + $0xec] sm:$0xf] }
  0x4e   : > { %274 = vst [vmem:[%s4237_s26 + $0x2d0] sm:$0xff] %v273_v60  ;;  %v3013_v60 = vld [vmem:[%s4232_s25 + $0xf8] sm:$0xf] }
  0x4f   : > { %276 = vst [vmem:[%s4237_s26 + $0x2dc] sm:$0xff] %v275_v61  ;;  %v3015_v61 = vld [vmem:[%s4232_s25 + $0x104] sm:$0xf] }
  0x50   : > { %278 = vst [vmem:[%s4237_s26 + $0x2e8] sm:$0xff] %v277_v62  ;;  %v3017_v62 = vld [vmem:[%s4232_s25 + $0x110] sm:$0xf] }
  0x51   : > { %280 = vst [vmem:[%s4237_s26 + $0x2f4] sm:$0xff] %v279_v63  ;;  %v3019_v63 = vld [vmem:[%s4232_s25 + $0x11c] sm:$0xf] }
  0x52   : > { %282 = vst [vmem:[%s4237_s26 + $0x300] sm:$0xff] %v281_v0  ;;  %v3021_v0 = vld [vmem:[%s4232_s25 + $0x128] sm:$0xf] }
  0x53   : > { %284 = vst [vmem:[%s4237_s26 + $0x30c] sm:$0xff] %v283_v1  ;;  %v3023_v1 = vld [vmem:[%s4232_s25 + $0x134] sm:$0xf] }
  0x54   : > { %286 = vst [vmem:[%s4237_s26 + $0x318] sm:$0xff] %v285_v2  ;;  %v3025_v2 = vld [vmem:[%s4232_s25 + $0x278] sm:$0xf] }
  0x55   : > { %288 = vst [vmem:[%s4237_s26 + $0x324] sm:$0xff] %v287_v3  ;;  %v3027_v3 = vld [vmem:[%s4232_s25 + $0x284] sm:$0xf] }
  0x56   : > { %290 = vst [vmem:[%s4237_s26 + $0x330] sm:$0xff] %v289_v4  ;;  %v3029_v4 = vld [vmem:[%s4232_s25 + $0x290] sm:$0xf] }
  0x57   : > { %292 = vst [vmem:[%s4237_s26 + $0x33c] sm:$0xff] %v291_v5  ;;  %v3031_v5 = vld [vmem:[%s4232_s25 + $0x29c] sm:$0xf] }
  0x58   : > { %294 = vst [vmem:[%s4237_s26 + $0x348] sm:$0xff] %v293_v6  ;;  %v3033_v6 = vld [vmem:[%s4232_s25 + $0x2a8] sm:$0xf] }
  0x59   : > { %296 = vst [vmem:[%s4237_s26 + $0x354] sm:$0xff] %v295_v7  ;;  %v3035_v7 = vld [vmem:[%s4232_s25 + $0x2b4] sm:$0xf] }
  0x5a   : > { %298 = vst [vmem:[%s4237_s26 + $0x360] sm:$0xff] %v297_v8  ;;  %v3037_v8 = vld [vmem:[%s4232_s25 + $0x2c0] sm:$0xf] }
  0x5b   : > { %300 = vst [vmem:[%s4237_s26 + $0x36c] sm:$0xff] %v299_v9  ;;  %v3039_v9 = vld [vmem:[%s4232_s25 + $0x2cc] sm:$0xf] }
  0x5c   : > { %302 = vst [vmem:[%s4237_s26 + $0x378] sm:$0xff] %v301_v10  ;;  %v3041_v10 = vld [vmem:[%s4232_s25 + $0x2d8] sm:$0xf] }
  0x5d   : > { %304 = vst [vmem:[%s4237_s26 + $0x384] sm:$0xff] %v303_v11  ;;  %v3043_v11 = vld [vmem:[%s4232_s25 + $0x2e4] sm:$0xf] }
  0x5e   : > { %306 = vst [vmem:[%s4237_s26 + $0x390] sm:$0xff] %v305_v12  ;;  %v3045_v12 = vld [vmem:[%s4232_s25 + $0x2f0] sm:$0xf] }
  0x5f   : > { %308 = vst [vmem:[%s4237_s26 + $0x39c] sm:$0xff] %v307_v13  ;;  %v3047_v13 = vld [vmem:[%s4232_s25 + $0x2fc] sm:$0xf] }
  0x60   : > { %310 = vst [vmem:[%s4237_s26 + $0x3a8] sm:$0xff] %v309_v14  ;;  %v3049_v14 = vld [vmem:[%s4232_s25 + $0x308] sm:$0xf] }
  0x61   : > { %312 = vst [vmem:[%s4237_s26 + $0x3b4] sm:$0xff] %v311_v15  ;;  %v3051_v15 = vld [vmem:[%s4232_s25 + $0x314] sm:$0xf] }
  0x62   : > { %314 = vst [vmem:[%s4237_s26 + $0x3c0] sm:$0xff] %v313_v16  ;;  %v3053_v16 = vld [vmem:[%s4232_s25 + $0x320] sm:$0xf] }
  0x63   : > { %316 = vst [vmem:[%s4237_s26 + $0x3cc] sm:$0xff] %v315_v17  ;;  %v3055_v17 = vld [vmem:[%s4232_s25 + $0x32c] sm:$0xf] }
  0x64   : > { %318 = vst [vmem:[%s4237_s26 + $0x3d8] sm:$0xff] %v317_v18  ;;  %v3057_v18 = vld [vmem:[%s4232_s25 + $0x338] sm:$0xf] }
  0x65   : > { %320 = vst [vmem:[%s4237_s26 + $0x3e4] sm:$0xff] %v319_v19  ;;  %v3059_v19 = vld [vmem:[%s4232_s25 + $0x344] sm:$0xf] }
  0x66   : > { %322 = vst [vmem:[%s4237_s26 + $0x3f0] sm:$0xff] %v321_v20  ;;  %v3061_v20 = vld [vmem:[%s4232_s25 + $0x350] sm:$0xf] }
  0x67   : > { %324 = vst [vmem:[%s4237_s26 + $0x3fc] sm:$0xff] %v323_v21  ;;  %v3063_v21 = vld [vmem:[%s4232_s25 + $0x35c] sm:$0xf] }
  0x68   : > { %326 = vst [vmem:[%s4237_s26 + $0x408] sm:$0xff] %v325_v22  ;;  %v3065_v22 = vld [vmem:[%s4232_s25 + $0x368] sm:$0xf] }
  0x69   : > { %328 = vst [vmem:[%s4237_s26 + $0x414] sm:$0xff] %v327_v23  ;;  %v3067_v23 = vld [vmem:[%s4232_s25 + $0x374] sm:$0xf] }
  0x6a   : > { %330 = vst [vmem:[%s4237_s26 + $0x420] sm:$0xff] %v329_v24  ;;  %v3069_v24 = vld [vmem:[%s4232_s25 + $0x380] sm:$0xf] }
  0x6b   : > { %332 = vst [vmem:[%s4237_s26 + $0x42c] sm:$0xff] %v331_v25  ;;  %v3071_v25 = vld [vmem:[%s4232_s25 + $0x38c] sm:$0xf] }
  0x6c   : > { %334 = vst [vmem:[%s4237_s26 + $0x438] sm:$0xff] %v333_v26  ;;  %v3073_v26 = vld [vmem:[%s4232_s25 + $0x398] sm:$0xf] }
  0x6d   : > { %336 = vst [vmem:[%s4237_s26 + $0x444] sm:$0xff] %v335_v27  ;;  %v3075_v27 = vld [vmem:[%s4232_s25 + $0x3a4] sm:$0xf] }
  0x6e   : > { %338 = vst [vmem:[%s4237_s26 + $0x450] sm:$0xff] %v337_v28  ;;  %v3077_v28 = vld [vmem:[%s4232_s25 + $0x4e8] sm:$0xf] }
  0x6f   : > { %340 = vst [vmem:[%s4237_s26 + $0x45c] sm:$0xff] %v339_v29  ;;  %v3079_v29 = vld [vmem:[%s4232_s25 + $0x4f4] sm:$0xf] }
  0x70   : > { %342 = vst [vmem:[%s4237_s26 + $0x468] sm:$0xff] %v341_v30  ;;  %v3081_v30 = vld [vmem:[%s4232_s25 + $0x500] sm:$0xf] }
  0x71   : > { %344 = vst [vmem:[%s4237_s26 + $0x474] sm:$0xff] %v343_v31  ;;  %v3083_v31 = vld [vmem:[%s4232_s25 + $0x50c] sm:$0xf] }
  0x72   : > { %346 = vst [vmem:[%s4237_s26 + $0x480] sm:$0xff] %v345_v32  ;;  %v3085_v32 = vld [vmem:[%s4232_s25 + $0x518] sm:$0xf] }
  0x73   : > { %348 = vst [vmem:[%s4237_s26 + $0x48c] sm:$0xff] %v347_v33  ;;  %v3087_v33 = vld [vmem:[%s4232_s25 + $0x524] sm:$0xf] }
  0x74   : > { %350 = vst [vmem:[%s4237_s26 + $0x498] sm:$0xff] %v349_v34  ;;  %v3089_v34 = vld [vmem:[%s4232_s25 + $0x530] sm:$0xf] }
  0x75   : > { %352 = vst [vmem:[%s4237_s26 + $0x4a4] sm:$0xff] %v351_v35  ;;  %v3091_v35 = vld [vmem:[%s4232_s25 + $0x53c] sm:$0xf] }
  0x76   : > { %354 = vst [vmem:[%s4237_s26 + $0x4b0] sm:$0xff] %v353_v36  ;;  %v3093_v36 = vld [vmem:[%s4232_s25 + $0x548] sm:$0xf] }
  0x77   : > { %356 = vst [vmem:[%s4237_s26 + $0x4bc] sm:$0xff] %v355_v37  ;;  %v3095_v37 = vld [vmem:[%s4232_s25 + $0x554] sm:$0xf] }
  0x78   : > { %358 = vst [vmem:[%s4237_s26 + $0x4c8] sm:$0xff] %v357_v38  ;;  %v3097_v38 = vld [vmem:[%s4232_s25 + $0x560] sm:$0xf] }
  0x79   : > { %360 = vst [vmem:[%s4237_s26 + $0x4d4] sm:$0xff] %v359_v39  ;;  %v3099_v39 = vld [vmem:[%s4232_s25 + $0x56c] sm:$0xf] }
  0x7a   : > { %2974 = vst [vmem:[%s4237_s26 + $0x8] sm:$0xf] %v2973_v40  ;;  %v3101_v40 = vld [vmem:[%s4232_s25 + $0x578] sm:$0xf] }
  0x7b   : > { %2976 = vst [vmem:[%s4237_s26 + $0x14] sm:$0xf] %v2975_v41  ;;  %v3103_v41 = vld [vmem:[%s4232_s25 + $0x584] sm:$0xf] }
  0x7c   : > { %2978 = vst [vmem:[%s4237_s26 + $0x20] sm:$0xf] %v2977_v42  ;;  %v3105_v42 = vld [vmem:[%s4232_s25 + $0x590] sm:$0xf] }
  0x7d   : > { %2980 = vst [vmem:[%s4237_s26 + $0x2c] sm:$0xf] %v2979_v43  ;;  %v3107_v43 = vld [vmem:[%s4232_s25 + $0x59c] sm:$0xf] }
  0x7e   : > { %2982 = vst [vmem:[%s4237_s26 + $0x38] sm:$0xf] %v2981_v44  ;;  %v3109_v44 = vld [vmem:[%s4232_s25 + $0x5a8] sm:$0xf] }
  0x7f   : > { %2984 = vst [vmem:[%s4237_s26 + $0x44] sm:$0xf] %v2983_v45  ;;  %v3111_v45 = vld [vmem:[%s4232_s25 + $0x5b4] sm:$0xf] }
  0x80   : > { %2986 = vst [vmem:[%s4237_s26 + $0x50] sm:$0xf] %v2985_v46  ;;  %v3113_v46 = vld [vmem:[%s4232_s25 + $0x5c0] sm:$0xf] }
  0x81   : > { %2988 = vst [vmem:[%s4237_s26 + $0x5c] sm:$0xf] %v2987_v47  ;;  %v3115_v47 = vld [vmem:[%s4232_s25 + $0x5cc] sm:$0xf] }
  0x82   : > { %2990 = vst [vmem:[%s4237_s26 + $0x68] sm:$0xf] %v2989_v48  ;;  %v3117_v48 = vld [vmem:[%s4232_s25 + $0x5d8] sm:$0xf] }
  0x83   : > { %2992 = vst [vmem:[%s4237_s26 + $0x74] sm:$0xf] %v2991_v49  ;;  %v3119_v49 = vld [vmem:[%s4232_s25 + $0x5e4] sm:$0xf] }
  0x84   : > { %2994 = vst [vmem:[%s4237_s26 + $0x80] sm:$0xf] %v2993_v50  ;;  %v3121_v50 = vld [vmem:[%s4232_s25 + $0x5f0] sm:$0xf] }
  0x85   : > { %2996 = vst [vmem:[%s4237_s26 + $0x8c] sm:$0xf] %v2995_v51  ;;  %v3123_v51 = vld [vmem:[%s4232_s25 + $0x5fc] sm:$0xf] }
  0x86   : > { %2998 = vst [vmem:[%s4237_s26 + $0x98] sm:$0xf] %v2997_v52  ;;  %v3125_v52 = vld [vmem:[%s4232_s25 + $0x608] sm:$0xf] }
  0x87   : > { %3000 = vst [vmem:[%s4237_s26 + $0xa4] sm:$0xf] %v2999_v53  ;;  %v3127_v53 = vld [vmem:[%s4232_s25 + $0x614] sm:$0xf] }
  0x88   : > { %3002 = vst [vmem:[%s4237_s26 + $0xb0] sm:$0xf] %v3001_v54  ;;  %v3129_v54 = vld [vmem:[%s4232_s25 + $0x758] sm:$0xf] }
  0x89   : > { %3004 = vst [vmem:[%s4237_s26 + $0xbc] sm:$0xf] %v3003_v55  ;;  %v3131_v55 = vld [vmem:[%s4232_s25 + $0x764] sm:$0xf] }
  0x8a   : > { %3006 = vst [vmem:[%s4237_s26 + $0xc8] sm:$0xf] %v3005_v56  ;;  %v3133_v56 = vld [vmem:[%s4232_s25 + $0x770] sm:$0xf] }
  0x8b   : > { %3008 = vst [vmem:[%s4237_s26 + $0xd4] sm:$0xf] %v3007_v57  ;;  %v3135_v57 = vld [vmem:[%s4232_s25 + $0x77c] sm:$0xf] }
  0x8c   : > { %3010 = vst [vmem:[%s4237_s26 + $0xe0] sm:$0xf] %v3009_v58  ;;  %v3137_v58 = vld [vmem:[%s4232_s25 + $0x788] sm:$0xf] }
  0x8d   : > { %3012 = vst [vmem:[%s4237_s26 + $0xec] sm:$0xf] %v3011_v59  ;;  %v3139_v59 = vld [vmem:[%s4232_s25 + $0x794] sm:$0xf] }
  0x8e   : > { %3014 = vst [vmem:[%s4237_s26 + $0xf8] sm:$0xf] %v3013_v60  ;;  %v3141_v60 = vld [vmem:[%s4232_s25 + $0x7a0] sm:$0xf] }
  0x8f   : > { %3016 = vst [vmem:[%s4237_s26 + $0x104] sm:$0xf] %v3015_v61  ;;  %v3143_v61 = vld [vmem:[%s4232_s25 + $0x7ac] sm:$0xf] }
  0x90   : > { %3018 = vst [vmem:[%s4237_s26 + $0x110] sm:$0xf] %v3017_v62  ;;  %v3145_v62 = vld [vmem:[%s4232_s25 + $0x7b8] sm:$0xf] }
  0x91   : > { %3020 = vst [vmem:[%s4237_s26 + $0x11c] sm:$0xf] %v3019_v63  ;;  %v3147_v63 = vld [vmem:[%s4232_s25 + $0x7c4] sm:$0xf] }
  0x92   : > { %3022 = vst [vmem:[%s4237_s26 + $0x128] sm:$0xf] %v3021_v0  ;;  %v3149_v0 = vld [vmem:[%s4232_s25 + $0x7d0] sm:$0xf] }
  0x93   : > { %3024 = vst [vmem:[%s4237_s26 + $0x134] sm:$0xf] %v3023_v1  ;;  %v3151_v1 = vld [vmem:[%s4232_s25 + $0x7dc] sm:$0xf] }
  0x94   : > { %3026 = vst [vmem:[%s4237_s26 + $0x140] sm:$0xf] %v3025_v2  ;;  %v3153_v2 = vld [vmem:[%s4232_s25 + $0x7e8] sm:$0xf] }
  0x95   : > { %3028 = vst [vmem:[%s4237_s26 + $0x14c] sm:$0xf] %v3027_v3  ;;  %v3155_v3 = vld [vmem:[%s4232_s25 + $0x7f4] sm:$0xf] }
  0x96   : > { %3030 = vst [vmem:[%s4237_s26 + $0x158] sm:$0xf] %v3029_v4  ;;  %v3157_v4 = vld [vmem:[%s4232_s25 + $0x800] sm:$0xf] }
  0x97   : > { %3032 = vst [vmem:[%s4237_s26 + $0x164] sm:$0xf] %v3031_v5  ;;  %v3159_v5 = vld [vmem:[%s4232_s25 + $0x80c] sm:$0xf] }
  0x98   : > { %3034 = vst [vmem:[%s4237_s26 + $0x170] sm:$0xf] %v3033_v6  ;;  %v3161_v6 = vld [vmem:[%s4232_s25 + $0x818] sm:$0xf] }
  0x99   : > { %3036 = vst [vmem:[%s4237_s26 + $0x17c] sm:$0xf] %v3035_v7  ;;  %v3163_v7 = vld [vmem:[%s4232_s25 + $0x824] sm:$0xf] }
  0x9a   : > { %3038 = vst [vmem:[%s4237_s26 + $0x188] sm:$0xf] %v3037_v8  ;;  %v3165_v8 = vld [vmem:[%s4232_s25 + $0x830] sm:$0xf] }
  0x9b   : > { %3040 = vst [vmem:[%s4237_s26 + $0x194] sm:$0xf] %v3039_v9  ;;  %v3167_v9 = vld [vmem:[%s4232_s25 + $0x83c] sm:$0xf] }
  0x9c   : > { %3042 = vst [vmem:[%s4237_s26 + $0x1a0] sm:$0xf] %v3041_v10  ;;  %v3169_v10 = vld [vmem:[%s4232_s25 + $0x848] sm:$0xf] }
  0x9d   : > { %3044 = vst [vmem:[%s4237_s26 + $0x1ac] sm:$0xf] %v3043_v11  ;;  %v3171_v11 = vld [vmem:[%s4232_s25 + $0x854] sm:$0xf] }
  0x9e   : > { %3046 = vst [vmem:[%s4237_s26 + $0x1b8] sm:$0xf] %v3045_v12  ;;  %v3173_v12 = vld [vmem:[%s4232_s25 + $0x860] sm:$0xf] }
  0x9f   : > { %3048 = vst [vmem:[%s4237_s26 + $0x1c4] sm:$0xf] %v3047_v13  ;;  %v3175_v13 = vld [vmem:[%s4232_s25 + $0x86c] sm:$0xf] }
  0xa0   : > { %3050 = vst [vmem:[%s4237_s26 + $0x1d0] sm:$0xf] %v3049_v14  ;;  %v3177_v14 = vld [vmem:[%s4232_s25 + $0x878] sm:$0xf] }
  0xa1   : > { %3052 = vst [vmem:[%s4237_s26 + $0x1dc] sm:$0xf] %v3051_v15  ;;  %v3179_v15 = vld [vmem:[%s4232_s25 + $0x884] sm:$0xf] }
  0xa2   : > { %3054 = vst [vmem:[%s4237_s26 + $0x1e8] sm:$0xf] %v3053_v16 }
  0xa3   : > { %3056 = vst [vmem:[%s4237_s26 + $0x1f4] sm:$0xf] %v3055_v17 }
  0xa4   : > { %3058 = vst [vmem:[%s4237_s26 + $0x200] sm:$0xf] %v3057_v18 }
  0xa5   : > { %3060 = vst [vmem:[%s4237_s26 + $0x20c] sm:$0xf] %v3059_v19 }
  0xa6   : > { %3062 = vst [vmem:[%s4237_s26 + $0x218] sm:$0xf] %v3061_v20 }
  0xa7   : > { %3064 = vst [vmem:[%s4237_s26 + $0x224] sm:$0xf] %v3063_v21 }
  0xa8   : > { %3066 = vst [vmem:[%s4237_s26 + $0x230] sm:$0xf] %v3065_v22 }
  0xa9   : > { %3068 = vst [vmem:[%s4237_s26 + $0x23c] sm:$0xf] %v3067_v23 }
  0xaa   : > { %3070 = vst [vmem:[%s4237_s26 + $0x248] sm:$0xf] %v3069_v24 }
  0xab   : > { %3072 = vst [vmem:[%s4237_s26 + $0x254] sm:$0xf] %v3071_v25 }
  0xac   : > { %3074 = vst [vmem:[%s4237_s26 + $0x260] sm:$0xf] %v3073_v26 }
  0xad   : > { %3076 = vst [vmem:[%s4237_s26 + $0x26c] sm:$0xf] %v3075_v27 }
  0xae   : > { %3078 = vst [vmem:[%s4237_s26 + $0x278] sm:$0xf] %v3077_v28 }
  0xaf   : > { %3080 = vst [vmem:[%s4237_s26 + $0x284] sm:$0xf] %v3079_v29 }
  0xb0   : > { %3082 = vst [vmem:[%s4237_s26 + $0x290] sm:$0xf] %v3081_v30 }
  0xb1   : > { %3084 = vst [vmem:[%s4237_s26 + $0x29c] sm:$0xf] %v3083_v31 }
  0xb2   : > { %3086 = vst [vmem:[%s4237_s26 + $0x2a8] sm:$0xf] %v3085_v32 }
  0xb3   : > { %3088 = vst [vmem:[%s4237_s26 + $0x2b4] sm:$0xf] %v3087_v33 }
  0xb4   : > { %3090 = vst [vmem:[%s4237_s26 + $0x2c0] sm:$0xf] %v3089_v34 }
  0xb5   : > { %3092 = vst [vmem:[%s4237_s26 + $0x2cc] sm:$0xf] %v3091_v35 }
  0xb6   : > { %3094 = vst [vmem:[%s4237_s26 + $0x2d8] sm:$0xf] %v3093_v36 }
  0xb7   : > { %3096 = vst [vmem:[%s4237_s26 + $0x2e4] sm:$0xf] %v3095_v37 }
  0xb8   : > { %3098 = vst [vmem:[%s4237_s26 + $0x2f0] sm:$0xf] %v3097_v38 }
  0xb9   : > { %3100 = vst [vmem:[%s4237_s26 + $0x2fc] sm:$0xf] %v3099_v39 }
  0xba   : > { %3102 = vst [vmem:[%s4237_s26 + $0x308] sm:$0xf] %v3101_v40 }
  0xbb   : > { %3104 = vst [vmem:[%s4237_s26 + $0x314] sm:$0xf] %v3103_v41 }
  0xbc   : > { %3106 = vst [vmem:[%s4237_s26 + $0x320] sm:$0xf] %v3105_v42 }
  0xbd   : > { %3108 = vst [vmem:[%s4237_s26 + $0x32c] sm:$0xf] %v3107_v43 }
  0xbe   : > { %3110 = vst [vmem:[%s4237_s26 + $0x338] sm:$0xf] %v3109_v44 }
  0xbf   : > { %3112 = vst [vmem:[%s4237_s26 + $0x344] sm:$0xf] %v3111_v45 }
  0xc0   : > { %3114 = vst [vmem:[%s4237_s26 + $0x350] sm:$0xf] %v3113_v46 }
  0xc1   : > { %3116 = vst [vmem:[%s4237_s26 + $0x35c] sm:$0xf] %v3115_v47 }
  0xc2   : > { %3118 = vst [vmem:[%s4237_s26 + $0x368] sm:$0xf] %v3117_v48 }
  0xc3   : > { %3120 = vst [vmem:[%s4237_s26 + $0x374] sm:$0xf] %v3119_v49 }
  0xc4   : > { %3122 = vst [vmem:[%s4237_s26 + $0x380] sm:$0xf] %v3121_v50 }
  0xc5   : > { %3124 = vst [vmem:[%s4237_s26 + $0x38c] sm:$0xf] %v3123_v51 }
  0xc6   : > { %3126 = vst [vmem:[%s4237_s26 + $0x398] sm:$0xf] %v3125_v52 }
  0xc7   : > { %3128 = vst [vmem:[%s4237_s26 + $0x3a4] sm:$0xf] %v3127_v53 }
  0xc8   : > { %3130 = vst [vmem:[%s4237_s26 + $0x3b0] sm:$0xf] %v3129_v54 }
  0xc9   : > { %3132 = vst [vmem:[%s4237_s26 + $0x3bc] sm:$0xf] %v3131_v55 }
  0xca   : > { %3134 = vst [vmem:[%s4237_s26 + $0x3c8] sm:$0xf] %v3133_v56 }
  0xcb   : > { %3136 = vst [vmem:[%s4237_s26 + $0x3d4] sm:$0xf] %v3135_v57 }
  0xcc   : > { %3138 = vst [vmem:[%s4237_s26 + $0x3e0] sm:$0xf] %v3137_v58 }
  0xcd   : > { %3140 = vst [vmem:[%s4237_s26 + $0x3ec] sm:$0xf] %v3139_v59 }
  0xce   : > { %3142 = vst [vmem:[%s4237_s26 + $0x3f8] sm:$0xf] %v3141_v60 }
  0xcf   : > { %3144 = vst [vmem:[%s4237_s26 + $0x404] sm:$0xf] %v3143_v61 }
  0xd0   : > { %3146 = vst [vmem:[%s4237_s26 + $0x410] sm:$0xf] %v3145_v62 }
  0xd1   : > { %3148 = vst [vmem:[%s4237_s26 + $0x41c] sm:$0xf] %v3147_v63 }
  0xd2   : > { %3150 = vst [vmem:[%s4237_s26 + $0x428] sm:$0xf] %v3149_v0 }
  0xd3   : > { %3152 = vst [vmem:[%s4237_s26 + $0x434] sm:$0xf] %v3151_v1 }
  0xd4   : > { %3154 = vst [vmem:[%s4237_s26 + $0x440] sm:$0xf] %v3153_v2 }
  0xd5   : > { %3156 = vst [vmem:[%s4237_s26 + $0x44c] sm:$0xf] %v3155_v3 }
  0xd6   : > { %3158 = vst [vmem:[%s4237_s26 + $0x458] sm:$0xf] %v3157_v4 }
  0xd7   : > { %3160 = vst [vmem:[%s4237_s26 + $0x464] sm:$0xf] %v3159_v5 }
  0xd8   : > { %3162 = vst [vmem:[%s4237_s26 + $0x470] sm:$0xf] %v3161_v6 }
  0xd9   : > { %3164 = vst [vmem:[%s4237_s26 + $0x47c] sm:$0xf] %v3163_v7 }
  0xda   : > { %3166 = vst [vmem:[%s4237_s26 + $0x488] sm:$0xf] %v3165_v8 }
  0xdb   : > { %3168 = vst [vmem:[%s4237_s26 + $0x494] sm:$0xf] %v3167_v9 }
  0xdc   : > { %3170 = vst [vmem:[%s4237_s26 + $0x4a0] sm:$0xf] %v3169_v10 }
  0xdd   : > { %3172 = vst [vmem:[%s4237_s26 + $0x4ac] sm:$0xf] %v3171_v11 }
  0xde   : > { %3174 = vst [vmem:[%s4237_s26 + $0x4b8] sm:$0xf] %v3173_v12 }
  0xdf   : > { %3176 = vst [vmem:[%s4237_s26 + $0x4c4] sm:$0xf] %v3175_v13 }
  0xe0   : > { %3178 = vst [vmem:[%s4237_s26 + $0x4d0] sm:$0xf] %v3177_v14 }
  0xe1   : > { %3180 = vst [vmem:[%s4237_s26 + $0x4dc] sm:$0xf] %v3179_v15 }
  0xe2 PF: > { %p3181_p5 = scmp.ge.s32.totalorder %s4176_s14, 1  ;;  %p581_p6 = scmp.lt.s32.totalorder %s4176_s14, 3 }
  0xe4   : > { %p582_p7 = pnand %p3181_p5, %p581_p6 }
  0xe6   : > { %585 = sbr.rel (%p582_p7) target bundleno = 1037 (0x40d), region = 54 }
  0xeb   : > { %v4096_v16 = vld [vmem:[%s5605_s1 + $0x38] sm:$0xff]  ;;  %v4665_v18 = vld [vmem:[%s5605_s1 + $0x88] sm:$0xff]  ;;  %s588_s6 = sand.u32 1, %s4168_s12   ;;  %v4095_v19 = vld [vmem:[%s5605_s1 + $0x30] sm:$0xff]  ;;  %vm1751_vm0 = vcmask 261120   ;;  %s612_s23 = smul.u32 26, %s2968_s15 }
  0xec   : > { %v4660_v17 = vld [vmem:[%s5605_s1 + $0x78] sm:$0xff]  ;;  %s4127_s7 = smul.u32 1248, %s588_s6  ;;  %1908 = vmatpush.bf16.msra.mxu0 %v4096_v16  ;;  %4107 = vmatpush.bf16.msra.mxu3 %v4096_v16  ;;  %v4103_v20 = vld [vmem:[%s5605_s1 + $0x70] sm:$0xff]  ;;  %v4679_v21 = vld [vmem:[%s5605_s1 + $0x80] sm:$0xff]  ;;  %vm2875_vm1 = vcmask 519168  }
  0xed   : > { %2177 = vmatpush.bf16.msra.mxu1 %v4660_v17  ;;  %2452 = vmatpush.bf16.msra.mxu2 %v4665_v18  ;;  %v4094_v25 = vld [vmem:[%s5605_s1 + $0x28] sm:$0xff]  ;;  %v4093_v27 = vld [vmem:[%s5605_s1 + $0x20] sm:$0xff]  ;;  %v4092_v29 = vld [vmem:[%s5605_s1 + $0x18] sm:$0xff]  ;;  %p613_p8 = scmp.lt.s32.totalorder %s612_s23, 51 }
  0xee   : > { %s4681_s12 = scalar_lea.vmem [#allocation2], %s4127_s7  ;;  %v4102_v26 = vld [vmem:[%s5605_s1 + $0x68] sm:$0xff]  ;;  %v4101_v28 = vld [vmem:[%s5605_s1 + $0x60] sm:$0xff]  ;;  %v4100_v30 = vld [vmem:[%s5605_s1 + $0x58] sm:$0xff] }
  0xef   : > { %v3193_v22 = vld [vmem:[%s4681_s12 + $0x8] sm:$0xf]  ;;  %v3935_v23 = vld [vmem:[%s4681_s12 + $0x10] sm:$0xf0]  ;;  %v3205_v33 = vld [vmem:[%s4681_s12 + $0x20] sm:$0xf] }
  0xf0   : > { %1909 = vmatpush.bf16.msra.mxu0 %v4095_v19  ;;  %4108 = vmatpush.bf16.msra.mxu3 %v4095_v19  ;;  %v3194_v24 = vor.u32 %v3935_v23, %v3193_v22  ;;  %v4091_v31 = vld [vmem:[%s5605_s1 + $0x10] sm:$0xff]  ;;  %v3938_v34 = vld [vmem:[%s4681_s12 + $0x28] sm:$0xf0]  ;;  %v4089_v38 = vld [vmem:[%s5605_s1] sm:$0xff]  ;;  %s5813_s23 = smov (!%p613_p8, %s612_s23), 51 }
  0xf1   : > { %2178 = vmatpush.bf16.msra.mxu1 %v4103_v20  ;;  %2453 = vmatpush.bf16.msra.mxu2 %v4679_v21  ;;  %v4099_v32 = vld [vmem:[%s5605_s1 + $0x50] sm:$0xff]  ;;  %v3206_v35 = vor.u32 %v3938_v34, %v3205_v33  ;;  %v4090_v36 = vld [vmem:[%s5605_s1 + $0x8] sm:$0xff]  ;;  %v4097_v39 = vld [vmem:[%s5605_s1 + $0x40] sm:$0xff]  ;;  %s3182_s24 = sshll.u32 %s5813_s23, 2 }
  0xf2   : > { %v4098_v37 = vld [vmem:[%s5605_s1 + $0x48] sm:$0xff]  ;;  %v3185_v40 = vld [vmem:[%s4681_s12] sm:$0xf]  ;;  %v4051_v43 = vld [vmem:[%s4681_s12 + $0x3b0] sm:$0xf0]  ;;  %s5367_s27 = scalar_lea.vmem %s5607_s3, %s3182_s24 }
  0xf3   : > { %v3934_v41 = vld [vmem:[%s4681_s12 + $0x8] sm:$0xf0]  ;;  %v3653_v42 = vld [vmem:[%s4681_s12 + $0x3a8] sm:$0xf]  ;;  %v3933_v44 = vld [vmem:[%s4681_s12 + $0x4] sm:$0xf] }
  0xf4   : > { %3879 = vmatmul.msk.bf16.vlgmr.msra.gmra.mxu2 %vm1751_vm0, %v3194_v24  ;;  %1910 = vmatpush.bf16.msra.mxu0 %v4094_v25  ;;  %v3187_v45 = vld [vmem:[%s4681_s12 + $0xc] sm:$0xf0]  ;;  %v3186_v46 = vor.u32 %v3934_v41, %v3185_v40  ;;  %v3654_v47 = vor.u32 %v4051_v43, %v3653_v42  ;;  %v3217_v49 = vld [vmem:[%s4681_s12 + $0x38] sm:$0xf]  ;;  %v3941_v50 = vld [vmem:[%s4681_s12 + $0x40] sm:$0xf0] }
  0xf5   : > { %4109 = vmatpush.bf16.msra.mxu3 %v4094_v25  ;;  %2179 = vmatpush.bf16.msra.mxu1 %v4102_v26  ;;  %v3190_v48 = vor.u32 %v3933_v44, %v3187_v45  ;;  %v3218_v51 = vor.u32 %v3941_v50, %v3217_v49  ;;  %v3197_v52 = vld [vmem:[%s4681_s12 + $0x18] sm:$0xf]  ;;  %v3937_v53 = vld [vmem:[%s4681_s12 + $0x20] sm:$0xf0]  ;;  %v3665_v54 = vld [vmem:[%s4681_s12 + $0x3c0] sm:$0xf] }
  0xf6   : > { %v4054_v55 = vld [vmem:[%s4681_s12 + $0x3c8] sm:$0xf0]  ;;  %v3936_v56 = vld [vmem:[%s4681_s12 + $0x1c] sm:$0xf]  ;;  %v3199_v57 = vld [vmem:[%s4681_s12 + $0x24] sm:$0xf0]  ;;  %v3198_v58 = vor.u32 %v3937_v53, %v3197_v52 }
  0xf7   : > { %v3666_v59 = vor.u32 %v4054_v55, %v3665_v54  ;;  %v3202_v60 = vor.u32 %v3936_v56, %v3199_v57  ;;  %v3229_v61 = vld [vmem:[%s4681_s12 + $0x50] sm:$0xf]  ;;  %v3944_v62 = vld [vmem:[%s4681_s12 + $0x58] sm:$0xf0]  ;;  %v3677_v2 = vld [vmem:[%s4681_s12 + $0x3d8] sm:$0xf] }
  0xf8   : > { %1911 = vmatpush.bf16.msra.mxu0 %v4093_v27  ;;  %v3230_v63 = vor.u32 %v3944_v62, %v3229_v61  ;;  %v3209_v0 = vld [vmem:[%s4681_s12 + $0x30] sm:$0xf]  ;;  %v3940_v1 = vld [vmem:[%s4681_s12 + $0x38] sm:$0xf0]  ;;  %v4057_v3 = vld [vmem:[%s4681_s12 + $0x3e0] sm:$0xf0] }
  0xf9   : > { %4110 = vmatpush.bf16.msra.mxu3 %v4093_v27  ;;  %2180 = vmatpush.bf16.msra.mxu1 %v4101_v28  ;;  %v3939_v4 = vld [vmem:[%s4681_s12 + $0x34] sm:$0xf]  ;;  %v3211_v5 = vld [vmem:[%s4681_s12 + $0x3c] sm:$0xf0]  ;;  %v3210_v6 = vor.u32 %v3940_v1, %v3209_v0  ;;  %v3678_v7 = vor.u32 %v4057_v3, %v3677_v2  ;;  %v3241_v9 = vld [vmem:[%s4681_s12 + $0x68] sm:$0xf] }
  0xfa   : > { %v3214_v8 = vor.u32 %v3939_v4, %v3211_v5  ;;  %v3947_v10 = vld [vmem:[%s4681_s12 + $0x70] sm:$0xf0]  ;;  %v3221_v12 = vld [vmem:[%s4681_s12 + $0x48] sm:$0xf]  ;;  %v3689_v14 = vld [vmem:[%s4681_s12 + $0x3f0] sm:$0xf] }
  0xfb   : > { %v3242_v11 = vor.u32 %v3947_v10, %v3241_v9  ;;  %v3943_v13 = vld [vmem:[%s4681_s12 + $0x50] sm:$0xf0]  ;;  %v4060_v15 = vld [vmem:[%s4681_s12 + $0x3f8] sm:$0xf0]  ;;  %v3942_v16 = vld [vmem:[%s4681_s12 + $0x4c] sm:$0xf] }
  0xfc   : > { %1912 = vmatpush.bf16.msra.mxu0 %v4092_v29  ;;  %v3690_v19 = vor.u32 %v4060_v15, %v3689_v14  ;;  %v3950_v22 = vld [vmem:[%s4681_s12 + $0x88] sm:$0xf0]  ;;  %v3233_v24 = vld [vmem:[%s4681_s12 + $0x60] sm:$0xf]  ;;  %v4063_v27 = vld [vmem:[%s4681_s12 + $0x410] sm:$0xf0] }
  0xfd   : > { %4111 = vmatpush.bf16.msra.mxu3 %v4092_v29  ;;  %2181 = vmatpush.bf16.msra.mxu1 %v4100_v30  ;;  %v3946_v25 = vld [vmem:[%s4681_s12 + $0x68] sm:$0xf0]  ;;  %v3235_v29 = vld [vmem:[%s4681_s12 + $0x6c] sm:$0xf0]  ;;  %v3265_v33 = vld [vmem:[%s4681_s12 + $0x98] sm:$0xf] }
  0xfe   : > { %v3953_v34 = vld [vmem:[%s4681_s12 + $0xa0] sm:$0xf0]  ;;  %v3948_v40 = vld [vmem:[%s4681_s12 + $0x7c] sm:$0xf]  ;;  %v3247_v41 = vld [vmem:[%s4681_s12 + $0x84] sm:$0xf0] }
  0xff   : > { %v3250_v44 = vor.u32 %v3948_v40, %v3247_v41  ;;  %v3277_v45 = vld [vmem:[%s4681_s12 + $0xb0] sm:$0xf]  ;;  %v3952_v49 = vld [vmem:[%s4681_s12 + $0x98] sm:$0xf0]  ;;  %v3725_v50 = vld [vmem:[%s4681_s12 + $0x438] sm:$0xf] }
 0x100   : > { %1913 = vmatpush.bf16.msra.mxu0 %v4091_v31  ;;  %v3951_v52 = vld [vmem:[%s4681_s12 + $0x94] sm:$0xf]  ;;  %v3259_v53 = vld [vmem:[%s4681_s12 + $0x9c] sm:$0xf0]  ;;  %v3289_v57 = vld [vmem:[%s4681_s12 + $0xc8] sm:$0xf] }
 0x101   : > { %4112 = vmatpush.bf16.msra.mxu3 %v4091_v31  ;;  %2182 = vmatpush.bf16.msra.mxu1 %v4099_v32  ;;  %v3262_v56 = vor.u32 %v3951_v52, %v3259_v53  ;;  %v3955_v61 = vld [vmem:[%s4681_s12 + $0xb0] sm:$0xf0]  ;;  %v3737_v62 = vld [vmem:[%s4681_s12 + $0x450] sm:$0xf]  ;;  %v3954_v0 = vld [vmem:[%s4681_s12 + $0xac] sm:$0xf] }
 0x102   : > { %v3271_v1 = vld [vmem:[%s4681_s12 + $0xb4] sm:$0xf0]  ;;  %v3281_v10 = vld [vmem:[%s4681_s12 + $0xc0] sm:$0xf]  ;;  %v3957_v14 = vld [vmem:[%s4681_s12 + $0xc4] sm:$0xf] }
 0x103   : > { %v3274_v5 = vor.u32 %v3954_v0, %v3271_v1  ;;  %v3283_v15 = vld [vmem:[%s4681_s12 + $0xcc] sm:$0xf0] }
 0x104   : > { %3880 = vmatmul.msk.bf16.gmra.mxu2 %vm1751_vm0, %v3206_v35  ;;  %1914 = vmatpush.bf16.msra.mxu0 %v4090_v36  ;;  %v3266_v35 = vor.u32 %v3953_v34, %v3265_v33  ;;  %v3293_v33 = vld [vmem:[%s4681_s12 + $0xd8] sm:$0xf]  ;;  %v3961_v34 = vld [vmem:[%s4681_s12 + $0xe0] sm:$0xf0] }
 0x105   : > { %4113 = vmatpush.bf16.msra.mxu3 %v4090_v36  ;;  %2183 = vmatpush.bf16.msra.mxu1 %v4098_v37  ;;  %v3245_v36 = vld [vmem:[%s4681_s12 + $0x78] sm:$0xf]  ;;  %v3294_v41 = vor.u32 %v3961_v34, %v3293_v33 }
 0x108   : > { %1915 = vmatpush.bf16.msra.mxu0 %v4089_v38 }
 0x109   : > { %4114 = vmatpush.bf16.msra.mxu3 %v4089_v38  ;;  %2184 = vmatpush.bf16.msra.mxu1 %v4097_v39  ;;  %v3713_v38 = vld [vmem:[%s4681_s12 + $0x420] sm:$0xf] }
 0x10b   : > { %1916 = vmatmul.bf16.vlgmr.msra.gmra.mxu0 %v3186_v46  ;;  %v3956_v46 = vld [vmem:[%s4681_s12 + $0xb8] sm:$0xf0] }
 0x10c   : > { %2111 = vmatmul.bf16.vlgmr.msra.gmra.mxu3 %v3654_v47  ;;  %2185 = vmatmul.bf16.vlgmr.msra.gmra.mxu1 %v3190_v48  ;;  %v3278_v47 = vor.u32 %v3956_v46, %v3277_v45  ;;  %v3257_v48 = vld [vmem:[%s4681_s12 + $0x90] sm:$0xf] }
 0x10d   : > { %4115 = vmatpush.bf16.msrb.mxu3 %v4660_v17  ;;  %v3223_v17 = vld [vmem:[%s4681_s12 + $0x54] sm:$0xf0]  ;;  %v3258_v54 = vor.u32 %v3952_v49, %v3257_v48  ;;  %v3325_v48 = vld [vmem:[%s4681_s12 + $0x110] sm:$0xf]  ;;  %v3968_v49 = vld [vmem:[%s4681_s12 + $0x118] sm:$0xf0] }
 0x10e   : > { %v3326_v53 = vor.u32 %v3968_v49, %v3325_v48  ;;  %v3797_v48 = vld [vmem:[%s4681_s12 + $0x4c8] sm:$0xf]  ;;  %v4087_v49 = vld [vmem:[%s4681_s12 + $0x4d0] sm:$0xf0] }
 0x111   : > { %4116 = vmatpush.bf16.msrb.mxu3 %v4103_v20  ;;  %v3226_v20 = vor.u32 %v3942_v16, %v3223_v17 }
 0x114   : > { %3881 = vmatmul.msk.bf16.gmra.mxu2 %vm1751_vm0, %v3218_v51  ;;  %v4069_v51 = vld [vmem:[%s4681_s12 + $0x440] sm:$0xf0] }
 0x115   : > { %4117 = vmatpush.bf16.msrb.mxu3 %v4102_v26  ;;  %v3701_v26 = vld [vmem:[%s4681_s12 + $0x408] sm:$0xf]  ;;  %v3726_v55 = vor.u32 %v4069_v51, %v3725_v50 }
 0x116   : > { %v3702_v31 = vor.u32 %v4063_v27, %v3701_v26 }
 0x119   : > { %4118 = vmatpush.bf16.msrb.mxu3 %v4101_v28  ;;  %v3945_v28 = vld [vmem:[%s4681_s12 + $0x64] sm:$0xf] }
 0x11b   : > { %1921 = vmatmul.bf16.gmra.mxu0 %v3198_v58  ;;  %v3959_v58 = vld [vmem:[%s4681_s12 + $0xd0] sm:$0xf0] }
 0x11c   : > { %2116 = vmatmul.bf16.gmra.mxu3 %v3666_v59  ;;  %2190 = vmatmul.bf16.gmra.mxu1 %v3202_v60  ;;  %v3290_v59 = vor.u32 %v3959_v58, %v3289_v57  ;;  %v3269_v60 = vld [vmem:[%s4681_s12 + $0xa8] sm:$0xf]  ;;  %v3305_v57 = vld [vmem:[%s4681_s12 + $0xf0] sm:$0xf]  ;;  %v3964_v58 = vld [vmem:[%s4681_s12 + $0xf8] sm:$0xf0] }
 0x11d   : > { %4119 = vmatpush.bf16.msrb.mxu3 %v4100_v30  ;;  %v3234_v30 = vor.u32 %v3946_v25, %v3233_v24  ;;  %v3270_v3 = vor.u32 %v3955_v61, %v3269_v60  ;;  %v3313_v24 = vld [vmem:[%s4681_s12 + $0xf8] sm:$0xf]  ;;  %v3965_v25 = vld [vmem:[%s4681_s12 + $0x100] sm:$0xf0]  ;;  %v3963_v61 = vld [vmem:[%s4681_s12 + $0xf4] sm:$0xf]  ;;  %v3306_v1 = vor.u32 %v3964_v58, %v3305_v57  ;;  %v3798_v58 = vor.u32 %v4087_v49, %v3797_v48 }
 0x11e   : > { %v4081_v60 = vld [vmem:[%s4681_s12 + $0x4a0] sm:$0xf0]  ;;  %v3355_v48 = vld [vmem:[%s4681_s12 + $0x15c] sm:$0xf0] }
 0x11f   : > { %v4053_v49 = vld [vmem:[%s4681_s12 + $0x3c4] sm:$0xf] }
 0x121   : > { %4120 = vmatpush.bf16.msrb.mxu3 %v4099_v32  ;;  %v3238_v32 = vor.u32 %v3945_v28, %v3235_v29  ;;  %v3314_v29 = vor.u32 %v3965_v25, %v3313_v24 }
 0x124   : > { %3882 = vmatmul.msk.bf16.gmra.mxu2 %vm1751_vm0, %v3230_v63  ;;  %v4072_v63 = vld [vmem:[%s4681_s12 + $0x458] sm:$0xf0] }
 0x125   : > { %4121 = vmatpush.bf16.msrb.mxu3 %v4098_v37  ;;  %v3949_v37 = vld [vmem:[%s4681_s12 + $0x80] sm:$0xf0]  ;;  %v3738_v4 = vor.u32 %v4072_v63, %v3737_v62  ;;  %v3307_v62 = vld [vmem:[%s4681_s12 + $0xfc] sm:$0xf0] }
 0x126   : > { %v3246_v42 = vor.u32 %v3949_v37, %v3245_v36  ;;  %v4078_v36 = vld [vmem:[%s4681_s12 + $0x488] sm:$0xf0]  ;;  %v3960_v37 = vld [vmem:[%s4681_s12 + $0xdc] sm:$0xf] }
 0x129   : > { %4122 = vmatpush.bf16.msrb.mxu3 %v4097_v39  ;;  %v4066_v39 = vld [vmem:[%s4681_s12 + $0x428] sm:$0xf0] }
 0x12a   : > { %v3714_v43 = vor.u32 %v4066_v39, %v3713_v38  ;;  %v3295_v38 = vld [vmem:[%s4681_s12 + $0xe4] sm:$0xf0] }
 0x12b   : > { %1926 = vmatmul.bf16.gmra.mxu0 %v3210_v6  ;;  %v3301_v6 = vld [vmem:[%s4681_s12 + $0xe0] sm:$0xf] }
 0x12c   : > { %2121 = vmatmul.bf16.gmra.mxu3 %v3678_v7  ;;  %2195 = vmatmul.bf16.gmra.mxu1 %v3214_v8  ;;  %v3962_v7 = vld [vmem:[%s4681_s12 + $0xe8] sm:$0xf0] }
 0x12d   : > { %4123 = vmatpush.bf16.msra.mxu3 %v4665_v18  ;;  %v3222_v18 = vor.u32 %v3943_v13, %v3221_v12  ;;  %v3302_v9 = vor.u32 %v3962_v7, %v3301_v6  ;;  %v3749_v12 = vld [vmem:[%s4681_s12 + $0x468] sm:$0xf]  ;;  %v4075_v13 = vld [vmem:[%s4681_s12 + $0x470] sm:$0xf0] }
 0x131   : > { %4124 = vmatpush.bf16.msra.mxu3 %v4679_v21  ;;  %v3253_v21 = vld [vmem:[%s4681_s12 + $0x80] sm:$0xf] }
 0x132   : > { %v3254_v23 = vor.u32 %v3950_v22, %v3253_v21 }
 0x134   : > { %3883 = vmatmul.msk.bf16.gmra.mxu2 %vm1751_vm0, %v3242_v11  ;;  %v3958_v11 = vld [vmem:[%s4681_s12 + $0xc8] sm:$0xf0] }
 0x135   : > { %v3282_v17 = vor.u32 %v3958_v11, %v3281_v10 }
 0x13b   : > { %1931 = vmatmul.bf16.gmra.mxu0 %v3222_v18 }
 0x13c   : > { %2126 = vmatmul.bf16.gmra.mxu3 %v3690_v19  ;;  %2200 = vmatmul.bf16.gmra.mxu1 %v3226_v20  ;;  %v3750_v19 = vor.u32 %v4075_v13, %v3749_v12  ;;  %v3286_v20 = vor.u32 %v3957_v14, %v3283_v15 }
 0x144   : > { %3884 = vmatmul.msk.bf16.gmra.mxu2 %vm1751_vm0, %v3254_v23 }
 0x14b   : > { %1936 = vmatmul.bf16.gmra.mxu0 %v3234_v30 }
 0x14c   : > { %2131 = vmatmul.bf16.gmra.mxu3 %v3702_v31  ;;  %2205 = vmatmul.bf16.gmra.mxu1 %v3238_v32 }
 0x154   : > { %3885 = vmatmul.msk.bf16.gmra.mxu2 %vm1751_vm0, %v3266_v35  ;;  %v3761_v35 = vld [vmem:[%s4681_s12 + $0x480] sm:$0xf] }
 0x15b   : > { %1941 = vmatmul.bf16.gmra.mxu0 %v3246_v42 }
 0x15c   : > { %2136 = vmatmul.bf16.gmra.mxu3 %v3714_v43  ;;  %2210 = vmatmul.bf16.gmra.mxu1 %v3250_v44  ;;  %v3762_v43 = vor.u32 %v4078_v36, %v3761_v35  ;;  %v3298_v44 = vor.u32 %v3960_v37, %v3295_v38  ;;  %v3349_v35 = vld [vmem:[%s4681_s12 + $0x140] sm:$0xf]  ;;  %v3974_v36 = vld [vmem:[%s4681_s12 + $0x148] sm:$0xf0] }
 0x164   : > { %3886 = vmatmul.msk.bf16.gmra.mxu2 %vm1751_vm0, %v3278_v47 }
 0x16b   : > { %1946 = vmatmul.bf16.gmra.mxu0 %v3258_v54 }
 0x16c   : > { %2141 = vmatmul.bf16.gmra.mxu3 %v3726_v55  ;;  %2215 = vmatmul.bf16.gmra.mxu1 %v3262_v56 }
 0x174   : > { %3887 = vmatmul.msk.bf16.gmra.mxu2 %vm1751_vm0, %v3290_v59  ;;  %v3773_v59 = vld [vmem:[%s4681_s12 + $0x498] sm:$0xf] }
 0x177   : > { %v2455_v2 = vpop.f32.mrf.mxu2 }
 0x17b   : > { %1951 = vmatmul.bf16.gmra.mxu0 %v3270_v3  ;;  %v3774_v3 = vor.u32 %v4081_v60, %v3773_v59 }
 0x17c   : > { %2146 = vmatmul.bf16.gmra.mxu3 %v3738_v4  ;;  %2220 = vmatmul.bf16.gmra.mxu1 %v3274_v5  ;;  %v3310_v4 = vor.u32 %v3963_v61, %v3307_v62 }
 0x17f   : > { %v2457_v8 = vpop.f32.mrf.mxu2 }
 0x184   : > { %3888 = vmatmul.msk.bf16.gmra.mxu2 %vm1751_vm0, %v3302_v9  ;;  %v3971_v9 = vld [vmem:[%s4681_s12 + $0x130] sm:$0xf0] }
 0x187   : > { %v2460_v16 = vpop.f32.mrf.mxu2 }
 0x188   : > { %v1917_v18 = vpop.f32.mrf.mxu0 }
 0x189   : > { %v2186_v21 = vpop.f32.mrf.mxu1 }
 0x18a   : > { %v2187_v22 = vadd.f32 %v2186_v21, %v1917_v18  ;;  %v3967_v18 = vld [vmem:[%s4681_s12 + $0x110] sm:$0xf0]  ;;  %v3966_v21 = vld [vmem:[%s4681_s12 + $0x10c] sm:$0xf] }
 0x18b   : > { %1956 = vmatmul.bf16.gmra.mxu0 %v3282_v17  ;;  %v3317_v17 = vld [vmem:[%s4681_s12 + $0x108] sm:$0xf] }
 0x18c   : > { %v4807_v23 = vadd.f32 %v2455_v2, %v2187_v22  ;;  %2151 = vmatmul.bf16.gmra.mxu3 %v3750_v19  ;;  %2225 = vmatmul.bf16.gmra.mxu1 %v3286_v20  ;;  %v3785_v19 = vld [vmem:[%s4681_s12 + $0x4b0] sm:$0xf]  ;;  %v4084_v20 = vld [vmem:[%s4681_s12 + $0x4b8] sm:$0xf0]  ;;  %v3319_v22 = vld [vmem:[%s4681_s12 + $0x114] sm:$0xf0] }
 0x18e   : > { %5645 = vst [vmem:[#allocation3_spill] sm:$0xff] %v4807_v23 }
 0x18f   : > { %v4811_v26 = vpop.f32.mrf.mxu3  ;;  %v2462_v27 = vpop.f32.mrf.mxu2 }
 0x190   : > { %5646 = vst [vmem:[#allocation4_spill] sm:$0xff] %v4811_v26  ;;  %v1919_v28 = vpop.f32.mrf.mxu0 }
 0x191   : > { %v2188_v30 = vpop.f32.mrf.mxu1 }
 0x192   : > { %v2189_v31 = vadd.f32 %v2188_v30, %v1919_v28  ;;  %v3322_v30 = vor.u32 %v3966_v21, %v3319_v22 }
 0x194   : > { %v4813_v32 = vadd.f32 %v2457_v8, %v2189_v31  ;;  %3889 = vmatmul.msk.bf16.gmra.mxu2 %vm1751_vm0, %v3314_v29  ;;  %v3337_v8 = vld [vmem:[%s4681_s12 + $0x128] sm:$0xf]  ;;  %v3786_v29 = vor.u32 %v4084_v20, %v3785_v19 }
 0x195   : > { %v3338_v13 = vor.u32 %v3971_v9, %v3337_v8 }
 0x196   : > { %5647 = vst [vmem:[#allocation5_spill] sm:$0xff] %v4813_v32  ;;  %v3775_v32 = vld [vmem:[%s4681_s12 + $0x4a4] sm:$0xf0] }
 0x197   : > { %v4822_v39 = vpop.f32.mrf.mxu3  ;;  %v2465_v40 = vpop.f32.mrf.mxu2 }
 0x198   : > { %5648 = vst [vmem:[#allocation6_spill] sm:$0xff] %v4822_v39  ;;  %v1922_v42 = vpop.f32.mrf.mxu0 }
 0x199   : > { %v2191_v45 = vpop.f32.mrf.mxu1 }
 0x19a   : > { %v2192_v46 = vadd.f32 %v2191_v45, %v1922_v42  ;;  %v3329_v45 = vld [vmem:[%s4681_s12 + $0x120] sm:$0xf] }
 0x19b   : > { %1961 = vmatmul.bf16.gmra.mxu0 %v3294_v41  ;;  %v3350_v41 = vor.u32 %v3974_v36, %v3349_v35 }
 0x19c   : > { %v4824_v47 = vadd.f32 %v2460_v16, %v2192_v46  ;;  %2156 = vmatmul.bf16.gmra.mxu3 %v3762_v43  ;;  %2230 = vmatmul.bf16.gmra.mxu1 %v3298_v44  ;;  %v3970_v46 = vld [vmem:[%s4681_s12 + $0x128] sm:$0xf0] }
 0x19e   : > { %5649 = vst [vmem:[#allocation7_spill] sm:$0xff] %v4824_v47 }
 0x19f   : > { %v4828_v50 = vpop.f32.mrf.mxu3  ;;  %v2467_v51 = vpop.f32.mrf.mxu2 }
 0x1a0   : > { %5650 = vst [vmem:[#allocation8_spill] sm:$0xff] %v4828_v50  ;;  %v1924_v52 = vpop.f32.mrf.mxu0 }
 0x1a1   : > { %v2193_v54 = vpop.f32.mrf.mxu1 }
 0x1a2   : > { %v2194_v55 = vadd.f32 %v2193_v54, %v1924_v52  ;;  %v3331_v52 = vld [vmem:[%s4681_s12 + $0x12c] sm:$0xf0] }
 0x1a4   : > { %v4830_v56 = vadd.f32 %v2462_v27, %v2194_v55  ;;  %3890 = vmatmul.msk.bf16.gmra.mxu2 %vm1751_vm0, %v3326_v53  ;;  %v3318_v27 = vor.u32 %v3967_v18, %v3317_v17  ;;  %v3330_v55 = vor.u32 %v3970_v46, %v3329_v45  ;;  %v3655_v17 = vld [vmem:[%s4681_s12 + $0x3b4] sm:$0xf0]  ;;  %v3976_v45 = vld [vmem:[%s4681_s12 + $0x158] sm:$0xf0]  ;;  %v3975_v46 = vld [vmem:[%s4681_s12 + $0x154] sm:$0xf] }
 0x1a6   : > { %5651 = vst [vmem:[#allocation9_spill] sm:$0xff] %v4830_v56  ;;  %v3787_v56 = vld [vmem:[%s4681_s12 + $0x4bc] sm:$0xf0] }
 0x1a7   : > { %v4839_v63 = vpop.f32.mrf.mxu3  ;;  %v2470_v0 = vpop.f32.mrf.mxu2 }
 0x1a8   : > { %5652 = vst [vmem:[#allocation10_spill] sm:$0xff] %v4839_v63  ;;  %v1927_v2 = vpop.f32.mrf.mxu0 }
 0x1a9   : > { %v2196_v5 = vpop.f32.mrf.mxu1 }
 0x1aa   : > { %v2197_v6 = vadd.f32 %v2196_v5, %v1927_v2 }
 0x1ab   : > { %1966 = vmatmul.bf16.gmra.mxu0 %v3306_v1  ;;  %v3977_v1 = vld [vmem:[%s4681_s12 + $0x160] sm:$0xf0] }
 0x1ac   : > { %v4841_v7 = vadd.f32 %v2465_v40, %v2197_v6  ;;  %2161 = vmatmul.bf16.gmra.mxu3 %v3774_v3  ;;  %2235 = vmatmul.bf16.gmra.mxu1 %v3310_v4 }
 0x1af   : > { %v4845_v10 = vpop.f32.mrf.mxu3  ;;  %v2472_v11 = vpop.f32.mrf.mxu2 }
 0x1b0   : > { %v1929_v12 = vpop.f32.mrf.mxu0 }
 0x1b1   : > { %v2198_v14 = vpop.f32.mrf.mxu1 }
 0x1b2   : > { %v2199_v15 = vadd.f32 %v2198_v14, %v1929_v12  ;;  %v3973_v12 = vld [vmem:[%s4681_s12 + $0x140] sm:$0xf0]  ;;  %v3343_v14 = vld [vmem:[%s4681_s12 + $0x144] sm:$0xf0] }
 0x1b4   : > { %v4847_v16 = vadd.f32 %v2467_v51, %v2199_v15  ;;  %3891 = vmatmul.msk.bf16.gmra.mxu2 %vm1751_vm0, %v3338_v13  ;;  %v3969_v51 = vld [vmem:[%s4681_s12 + $0x124] sm:$0xf]  ;;  %v3972_v13 = vld [vmem:[%s4681_s12 + $0x13c] sm:$0xf]  ;;  %v4050_v15 = vld [vmem:[%s4681_s12 + $0x3ac] sm:$0xf] }
 0x1b5   : > { %v3334_v59 = vor.u32 %v3969_v51, %v3331_v52  ;;  %v3346_v22 = vor.u32 %v3972_v13, %v3343_v14  ;;  %v3667_v51 = vld [vmem:[%s4681_s12 + $0x3cc] sm:$0xf0]  ;;  %v3365_v14 = vld [vmem:[%s4681_s12 + $0x168] sm:$0xf] }
 0x1b7   : > { %v4856_v24 = vpop.f32.mrf.mxu3  ;;  %v2475_v25 = vpop.f32.mrf.mxu2 }
 0x1b8   : > { %v1932_v28 = vpop.f32.mrf.mxu0 }
 0x1b9   : > { %v2201_v31 = vpop.f32.mrf.mxu1 }
 0x1ba   : > { %v2202_v33 = vadd.f32 %v2201_v31, %v1932_v28  ;;  %v3980_v31 = vld [vmem:[%s4681_s12 + $0x178] sm:$0xf0] }
 0x1bb   : > { %1971 = vmatmul.bf16.gmra.mxu0 %v3318_v27 }
 0x1bc   : > { %v4858_v34 = vadd.f32 %v2470_v0, %v2202_v33  ;;  %2166 = vmatmul.bf16.gmra.mxu3 %v3786_v29  ;;  %2240 = vmatmul.bf16.gmra.mxu1 %v3322_v30  ;;  %v3361_v0 = vld [vmem:[%s4681_s12 + $0x158] sm:$0xf]  ;;  %v3373_v30 = vld [vmem:[%s4681_s12 + $0x170] sm:$0xf] }
 0x1bd   : > { %v3362_v5 = vor.u32 %v3977_v1, %v3361_v0  ;;  %v3385_v1 = vld [vmem:[%s4681_s12 + $0x188] sm:$0xf] }
 0x1bf   : > { %v4862_v37 = vpop.f32.mrf.mxu3  ;;  %v2477_v38 = vpop.f32.mrf.mxu2 }
 0x1c0   : > { %v1934_v40 = vpop.f32.mrf.mxu0 }
 0x1c1   : > { %v2203_v42 = vpop.f32.mrf.mxu1 }
 0x1c2   : > { %v2204_v43 = vadd.f32 %v2203_v42, %v1934_v40 }
 0x1c4   : > { %v4864_v44 = vadd.f32 %v2472_v11, %v2204_v43  ;;  %3892 = vmatmul.msk.bf16.gmra.mxu2 %vm1751_vm0, %v3350_v41  ;;  %v3341_v11 = vld [vmem:[%s4681_s12 + $0x138] sm:$0xf]  ;;  %v3353_v43 = vld [vmem:[%s4681_s12 + $0x150] sm:$0xf] }
 0x1c5   : > { %v3342_v20 = vor.u32 %v3973_v12, %v3341_v11 }
 0x1c7   : > { %v4873_v53 = vpop.f32.mrf.mxu3  ;;  %v2480_v54 = vpop.f32.mrf.mxu2 }
 0x1c8   : > { %v1937_v57 = vpop.f32.mrf.mxu0 }
 0x1c9   : > { %v2206_v60 = vpop.f32.mrf.mxu1 }
 0x1ca   : > { %v2207_v61 = vadd.f32 %v2206_v60, %v1937_v57 }
 0x1cb   : > { %1976 = vmatmul.bf16.gmra.mxu0 %v3330_v55  ;;  %v3354_v55 = vor.u32 %v3976_v45, %v3353_v43 }
 0x1cc   : > { %v4875_v62 = vadd.f32 %v2475_v25, %v2207_v61  ;;  %2171 = vmatmul.bf16.gmra.mxu3 %v3798_v58  ;;  %2245 = vmatmul.bf16.gmra.mxu1 %v3334_v59  ;;  %v3658_v25 = vor.u32 %v4050_v15, %v3655_v17  ;;  %v3358_v58 = vor.u32 %v3975_v46, %v3355_v48  ;;  %v3979_v15 = vld [vmem:[%s4681_s12 + $0x170] sm:$0xf0]  ;;  %v3978_v17 = vld [vmem:[%s4681_s12 + $0x16c] sm:$0xf] }
 0x1cd   : > { %v3670_v59 = vor.u32 %v4053_v49, %v3667_v51 }
 0x1cf   : > { %v4879_v2 = vpop.f32.mrf.mxu3  ;;  %v2482_v3 = vpop.f32.mrf.mxu2 }
 0x1d0   : > { %v1939_v4 = vpop.f32.mrf.mxu0 }
 0x1d1   : > { %v2208_v6 = vpop.f32.mrf.mxu1 }
 0x1d2   : > { %v2209_v8 = vadd.f32 %v2208_v6, %v1939_v4 }
 0x1d4   : > { %v4881_v9 = vadd.f32 %v2477_v38, %v2209_v8  ;;  %3893 = vmatmul.msk.bf16.gmra.mxu2 %vm1751_vm0, %v3362_v5  ;;  %v3374_v38 = vor.u32 %v3980_v31, %v3373_v30 }
 0x1d7   : > { %v4890_v18 = vpop.f32.mrf.mxu3  ;;  %v2485_v19 = vpop.f32.mrf.mxu2 }
 0x1d8   : > { %v1942_v21 = vpop.f32.mrf.mxu0 }
 0x1d9   : > { %v2211_v27 = vpop.f32.mrf.mxu1 }
 0x1da   : > { %v2212_v28 = vadd.f32 %v2211_v27, %v1942_v21  ;;  %v3679_v21 = vld [vmem:[%s4681_s12 + $0x3e4] sm:$0xf0]  ;;  %v3366_v27 = vor.u32 %v3979_v15, %v3365_v14 }
 0x1db   : > { %1981 = vmatmul.bf16.gmra.mxu0 %v3342_v20  ;;  %v4056_v20 = vld [vmem:[%s4681_s12 + $0x3dc] sm:$0xf] }
 0x1dc   : > { %v4892_v29 = vadd.f32 %v2480_v54, %v2212_v28  ;;  %2250 = vmatmul.bf16.gmra.mxu1 %v3346_v22  ;;  %2380 = vmatmul.bf16.vlgmr.msrb.gmra.mxu3 %v3658_v25  ;;  %v3682_v31 = vor.u32 %v4056_v20, %v3679_v21 }
 0x1df   : > { %v4896_v33 = vpop.f32.mrf.mxu3  ;;  %v2487_v35 = vpop.f32.mrf.mxu2 }
 0x1e0   : > { %v1944_v36 = vpop.f32.mrf.mxu0 }
 0x1e1   : > { %v2213_v40 = vpop.f32.mrf.mxu1 }
 0x1e2   : > { %v2214_v41 = vadd.f32 %v2213_v40, %v1944_v36  ;;  %v3397_v40 = vld [vmem:[%s4681_s12 + $0x1a0] sm:$0xf] }
 0x1e4   : > { %v4898_v42 = vadd.f32 %v2482_v3, %v2214_v41  ;;  %3894 = vmatmul.msk.bf16.gmra.mxu2 %vm1751_vm0, %v3374_v38  ;;  %v3983_v3 = vld [vmem:[%s4681_s12 + $0x190] sm:$0xf0]  ;;  %v3986_v41 = vld [vmem:[%s4681_s12 + $0x1a8] sm:$0xf0] }
 0x1e5   : > { %v3386_v8 = vor.u32 %v3983_v3, %v3385_v1  ;;  %v3398_v48 = vor.u32 %v3986_v41, %v3397_v40  ;;  %v3984_v40 = vld [vmem:[%s4681_s12 + $0x19c] sm:$0xf]  ;;  %v3391_v41 = vld [vmem:[%s4681_s12 + $0x1a4] sm:$0xf0] }
 0x1e7   : > { %v4907_v52 = vpop.f32.mrf.mxu3  ;;  %v2490_v54 = vpop.f32.mrf.mxu2 }
 0x1e8   : > { %v1947_v57 = vpop.f32.mrf.mxu0 }
 0x1e9   : > { %v2216_v60 = vpop.f32.mrf.mxu1 }
 0x1ea   : > { %v2217_v61 = vadd.f32 %v2216_v60, %v1947_v57  ;;  %v3982_v57 = vld [vmem:[%s4681_s12 + $0x188] sm:$0xf0]  ;;  %v4059_v60 = vld [vmem:[%s4681_s12 + $0x3f4] sm:$0xf] }
 0x1eb   : > { %1986 = vmatmul.bf16.gmra.mxu0 %v3354_v55 }
 0x1ec   : > { %v4909_v0 = vadd.f32 %v2485_v19, %v2217_v61  ;;  %2255 = vmatmul.bf16.gmra.mxu1 %v3358_v58  ;;  %2385 = vmatmul.bf16.gmra.mxu3 %v3670_v59  ;;  %v3367_v19 = vld [vmem:[%s4681_s12 + $0x174] sm:$0xf0]  ;;  %v3981_v58 = vld [vmem:[%s4681_s12 + $0x184] sm:$0xf]  ;;  %v3379_v59 = vld [vmem:[%s4681_s12 + $0x18c] sm:$0xf0] }
 0x1ed   : > { %v3370_v30 = vor.u32 %v3978_v17, %v3367_v19  ;;  %v3691_v61 = vld [vmem:[%s4681_s12 + $0x3fc] sm:$0xf0]  ;;  %v3409_v17 = vld [vmem:[%s4681_s12 + $0x1b8] sm:$0xf]  ;;  %v3989_v19 = vld [vmem:[%s4681_s12 + $0x1c0] sm:$0xf0] }
 0x1ee   : > { %5653 = vst [vmem:[#allocation11_spill] sm:$0xff] %v4909_v0 }
 0x1ef   : > { %v4913_v4 = vpop.f32.mrf.mxu3  ;;  %v2492_v5 = vpop.f32.mrf.mxu2 }
 0x1f0   : > { %5654 = vst [vmem:[#allocation12_spill] sm:$0xff] %v4913_v4  ;;  %v1949_v6 = vpop.f32.mrf.mxu0  ;;  %v4022_v4 = vld [vmem:[%s4681_s12 + $0x2c8] sm:$0xf0] }
 0x1f1   : > { %v2218_v11 = vpop.f32.mrf.mxu1 }
 0x1f2   : > { %v2219_v12 = vadd.f32 %v2218_v11, %v1949_v6  ;;  %v3382_v11 = vor.u32 %v3981_v58, %v3379_v59  ;;  %v3394_v58 = vor.u32 %v3984_v40, %v3391_v41 }
 0x1f4   : > { %v4915_v13 = vadd.f32 %v2487_v35, %v2219_v12  ;;  %3895 = vmatmul.msk.bf16.gmra.mxu2 %vm1751_vm0, %v3386_v8  ;;  %v3694_v12 = vor.u32 %v4059_v60, %v3691_v61 }
 0x1f6   : > { %5655 = vst [vmem:[#allocation13_spill] sm:$0xff] %v4915_v13  ;;  %v4067_v13 = vld [vmem:[%s4681_s12 + $0x430] sm:$0xf0] }
 0x1f7   : > { %v4924_v22 = vpop.f32.mrf.mxu3  ;;  %v2495_v25 = vpop.f32.mrf.mxu2 }
 0x1f8   : > { %5656 = vst [vmem:[#allocation14_spill] sm:$0xff] %v4924_v22  ;;  %v1952_v28 = vpop.f32.mrf.mxu0 }
 0x1f9   : > { %v2221_v36 = vpop.f32.mrf.mxu1 }
 0x1fa   : > { %v2222_v35 = vadd.f32 %v2221_v36, %v1952_v28  ;;  %v3410_v28 = vor.u32 %v3989_v19, %v3409_v17 }
 0x1fb   : > { %1991 = vmatmul.bf16.gmra.mxu0 %v3366_v27 }
 0x1fc   : > { %v4926_v38 = vadd.f32 %v2490_v54, %v2222_v35  ;;  %2260 = vmatmul.bf16.gmra.mxu1 %v3370_v30  ;;  %2390 = vmatmul.bf16.gmra.mxu3 %v3682_v31  ;;  %v3377_v54 = vld [vmem:[%s4681_s12 + $0x180] sm:$0xf]  ;;  %v3985_v35 = vld [vmem:[%s4681_s12 + $0x1a0] sm:$0xf0] }
 0x1fd   : > { %v3378_v6 = vor.u32 %v3982_v57, %v3377_v54 }
 0x1fe   : > { %5657 = vst [vmem:[#allocation15_spill] sm:$0xff] %v4926_v38 }
 0x1ff   : > { %v4930_v43 = vpop.f32.mrf.mxu3  ;;  %v2497_v45 = vpop.f32.mrf.mxu2 }
 0x200   : > { %5658 = vst [vmem:[#allocation16_spill] sm:$0xff] %v4930_v43  ;;  %v1954_v46 = vpop.f32.mrf.mxu0 }
 0x201   : > { %v2223_v49 = vpop.f32.mrf.mxu1 }
 0x202   : > { %v2224_v51 = vadd.f32 %v2223_v49, %v1954_v46  ;;  %v4062_v46 = vld [vmem:[%s4681_s12 + $0x40c] sm:$0xf] }
 0x204   : > { %v4932_v55 = vadd.f32 %v2492_v5, %v2224_v51  ;;  %3896 = vmatmul.msk.bf16.gmra.mxu2 %vm1751_vm0, %v3398_v48  ;;  %v3703_v48 = vld [vmem:[%s4681_s12 + $0x414] sm:$0xf0] }
 0x205   : > { %v3706_v59 = vor.u32 %v4062_v46, %v3703_v48 }
 0x206   : > { %5659 = vst [vmem:[#allocation17_spill] sm:$0xff] %v4932_v55  ;;  %v4070_v55 = vld [vmem:[%s4681_s12 + $0x448] sm:$0xf0] }
 0x207   : > { %v4941_v1 = vpop.f32.mrf.mxu3  ;;  %v2500_v3 = vpop.f32.mrf.mxu2 }
 0x208   : > { %5660 = vst [vmem:[#allocation18_spill] sm:$0xff] %v4941_v1  ;;  %v1957_v8 = vpop.f32.mrf.mxu0  ;;  %v4061_v1 = vld [vmem:[%s4681_s12 + $0x400] sm:$0xf0] }
 0x209   : > { %v2226_v14 = vpop.f32.mrf.mxu1 }
 0x20a   : > { %v2227_v5 = vadd.f32 %v2226_v14, %v1957_v8  ;;  %v3992_v8 = vld [vmem:[%s4681_s12 + $0x1d8] sm:$0xf0] }
 0x20b   : > { %1996 = vmatmul.bf16.gmra.mxu0 %v3378_v6  ;;  %v3421_v6 = vld [vmem:[%s4681_s12 + $0x1d0] sm:$0xf] }
 0x20c   : > { %v4943_v15 = vadd.f32 %v2495_v25, %v2227_v5  ;;  %2265 = vmatmul.bf16.gmra.mxu1 %v3382_v11  ;;  %2395 = vmatmul.bf16.gmra.mxu3 %v3694_v12  ;;  %v3389_v25 = vld [vmem:[%s4681_s12 + $0x198] sm:$0xf]  ;;  %v3422_v5 = vor.u32 %v3992_v8, %v3421_v6 }
 0x20d   : > { %v3390_v54 = vor.u32 %v3985_v35, %v3389_v25  ;;  %v4065_v25 = vld [vmem:[%s4681_s12 + $0x424] sm:$0xf]  ;;  %v3715_v35 = vld [vmem:[%s4681_s12 + $0x42c] sm:$0xf0] }
 0x20e   : > { %5661 = vst [vmem:[#allocation19_spill] sm:$0xff] %v4943_v15 }
 0x20f   : > { %v4947_v20 = vpop.f32.mrf.mxu3  ;;  %v2502_v21 = vpop.f32.mrf.mxu2 }
 0x210   : > { %5662 = vst [vmem:[#allocation20_spill] sm:$0xff] %v4947_v20  ;;  %v1959_v27 = vpop.f32.mrf.mxu0  ;;  %v4019_v20 = vld [vmem:[%s4681_s12 + $0x2b0] sm:$0xf0] }
 0x211   : > { %v2228_v30 = vpop.f32.mrf.mxu1 }
 0x212   : > { %v2229_v31 = vadd.f32 %v2228_v30, %v1959_v27  ;;  %v3987_v30 = vld [vmem:[%s4681_s12 + $0x1b4] sm:$0xf] }
 0x214   : > { %v4949_v36 = vadd.f32 %v2497_v45, %v2229_v31  ;;  %3897 = vmatmul.msk.bf16.gmra.mxu2 %vm1751_vm0, %v3410_v28  ;;  %v3988_v28 = vld [vmem:[%s4681_s12 + $0x1b8] sm:$0xf0]  ;;  %v3403_v31 = vld [vmem:[%s4681_s12 + $0x1bc] sm:$0xf0] }
 0x216   : > { %5663 = vst [vmem:[#allocation21_spill] sm:$0xff] %v4949_v36  ;;  %v4073_v36 = vld [vmem:[%s4681_s12 + $0x460] sm:$0xf0] }
 0x217   : > { %v4958_v49 = vpop.f32.mrf.mxu3  ;;  %v2505_v51 = vpop.f32.mrf.mxu2 }
 0x218   : > { %5664 = vst [vmem:[#allocation22_spill] sm:$0xff] %v4958_v49  ;;  %v1962_v57 = vpop.f32.mrf.mxu0 }
 0x219   : > { %v2231_v60 = vpop.f32.mrf.mxu1 }
 0x21a   : > { %v2232_v45 = vadd.f32 %v2231_v60, %v1962_v57  ;;  %v3718_v57 = vor.u32 %v4065_v25, %v3715_v35  ;;  %v3433_v60 = vld [vmem:[%s4681_s12 + $0x1e8] sm:$0xf]  ;;  %v4068_v25 = vld [vmem:[%s4681_s12 + $0x43c] sm:$0xf] }
 0x21b   : > { %2001 = vmatmul.bf16.gmra.mxu0 %v3390_v54  ;;  %v3406_v54 = vor.u32 %v3987_v30, %v3403_v31  ;;  %v3990_v30 = vld [vmem:[%s4681_s12 + $0x1cc] sm:$0xf]  ;;  %v3415_v31 = vld [vmem:[%s4681_s12 + $0x1d4] sm:$0xf0]  ;;  %v3727_v35 = vld [vmem:[%s4681_s12 + $0x444] sm:$0xf0] }
 0x21c   : > { %v4960_v61 = vadd.f32 %v2500_v3, %v2232_v45  ;;  %2270 = vmatmul.bf16.gmra.mxu1 %v3394_v58  ;;  %2400 = vmatmul.bf16.gmra.mxu3 %v3706_v59  ;;  %v3401_v3 = vld [vmem:[%s4681_s12 + $0x1b0] sm:$0xf]  ;;  %v3995_v45 = vld [vmem:[%s4681_s12 + $0x1f0] sm:$0xf0] }
 0x21d   : > { %v3402_v46 = vor.u32 %v3988_v28, %v3401_v3  ;;  %v3991_v28 = vld [vmem:[%s4681_s12 + $0x1d0] sm:$0xf0] }
 0x21e   : > { %5665 = vst [vmem:[#allocation23_spill] sm:$0xff] %v4960_v61 }
 0x21f   : > { %v4964_v11 = vpop.f32.mrf.mxu3  ;;  %v2507_v12 = vpop.f32.mrf.mxu2 }
 0x220   : > { %5666 = vst [vmem:[#allocation24_spill] sm:$0xff] %v4964_v11  ;;  %v1964_v14 = vpop.f32.mrf.mxu0 }
 0x221   : > { %v2233_v17 = vpop.f32.mrf.mxu1 }
 0x222   : > { %v2234_v19 = vadd.f32 %v2233_v17, %v1964_v14 }
 0x224   : > { %v4966_v27 = vadd.f32 %v2502_v21, %v2234_v19  ;;  %3898 = vmatmul.msk.bf16.gmra.mxu2 %vm1751_vm0, %v3422_v5  ;;  %v3434_v5 = vor.u32 %v3995_v45, %v3433_v60 }
 0x226   : > { %5667 = vst [vmem:[#allocation25_spill] sm:$0xff] %v4966_v27  ;;  %v4076_v27 = vld [vmem:[%s4681_s12 + $0x478] sm:$0xf0] }
 0x227   : > { %v4975_v40 = vpop.f32.mrf.mxu3  ;;  %v2510_v41 = vpop.f32.mrf.mxu2 }
 0x228   : > { %5668 = vst [vmem:[#allocation26_spill] sm:$0xff] %v4975_v40  ;;  %v1967_v48 = vpop.f32.mrf.mxu0  ;;  %v4058_v40 = vld [vmem:[%s4681_s12 + $0x3e8] sm:$0xf0] }
 0x229   : > { %v2236_v58 = vpop.f32.mrf.mxu1 }
 0x22a   : > { %v2237_v21 = vadd.f32 %v2236_v58, %v1967_v48  ;;  %v3418_v58 = vor.u32 %v3990_v30, %v3415_v31 }
 0x22b   : > { %2006 = vmatmul.bf16.gmra.mxu0 %v3402_v46 }
 0x22c   : > { %v4977_v59 = vadd.f32 %v2505_v51, %v2237_v21  ;;  %2275 = vmatmul.bf16.gmra.mxu1 %v3406_v54  ;;  %2405 = vmatmul.bf16.gmra.mxu3 %v3718_v57  ;;  %v3413_v51 = vld [vmem:[%s4681_s12 + $0x1c8] sm:$0xf]  ;;  %v3730_v21 = vor.u32 %v4068_v25, %v3727_v35  ;;  %v3994_v35 = vld [vmem:[%s4681_s12 + $0x1e8] sm:$0xf0] }
 0x22d   : > { %v3414_v54 = vor.u32 %v3991_v28, %v3413_v51 }
 0x22e   : > { %5669 = vst [vmem:[#allocation27_spill] sm:$0xff] %v4977_v59 }
 0x22f   : > { %v4981_v6 = vpop.f32.mrf.mxu3  ;;  %v2512_v8 = vpop.f32.mrf.mxu2 }
 0x230   : > { %5670 = vst [vmem:[#allocation28_spill] sm:$0xff] %v4981_v6  ;;  %v1969_v14 = vpop.f32.mrf.mxu0  ;;  %v4016_v6 = vld [vmem:[%s4681_s12 + $0x298] sm:$0xf0] }
 0x231   : > { %v2238_v17 = vpop.f32.mrf.mxu1 }
 0x232   : > { %v2239_v19 = vadd.f32 %v2238_v17, %v1969_v14  ;;  %v3445_v14 = vld [vmem:[%s4681_s12 + $0x200] sm:$0xf] }
 0x234   : > { %v4983_v3 = vadd.f32 %v2507_v12, %v2239_v19  ;;  %3899 = vmatmul.msk.bf16.gmra.mxu2 %vm1751_vm0, %v3434_v5  ;;  %v3998_v5 = vld [vmem:[%s4681_s12 + $0x208] sm:$0xf0] }
 0x235   : > { %v3446_v28 = vor.u32 %v3998_v5, %v3445_v14 }
 0x236   : > { %5671 = vst [vmem:[#allocation29_spill] sm:$0xff] %v4983_v3  ;;  %v4079_v3 = vld [vmem:[%s4681_s12 + $0x490] sm:$0xf0] }
 0x237   : > { %v4992_v46 = vpop.f32.mrf.mxu3  ;;  %v2515_v48 = vpop.f32.mrf.mxu2 }
 0x238   : > { %5672 = vst [vmem:[#allocation30_spill] sm:$0xff] %v4992_v46  ;;  %v1972_v57 = vpop.f32.mrf.mxu0 }
 0x239   : > { %v2241_v60 = vpop.f32.mrf.mxu1 }
 0x23a   : > { %v2242_v12 = vadd.f32 %v2241_v60, %v1972_v57  ;;  %v3427_v57 = vld [vmem:[%s4681_s12 + $0x1ec] sm:$0xf0] }
 0x23b   : > { %2011 = vmatmul.bf16.gmra.mxu0 %v3414_v54  ;;  %v3993_v54 = vld [vmem:[%s4681_s12 + $0x1e4] sm:$0xf] }
 0x23c   : > { %v4994_v45 = vadd.f32 %v2510_v41, %v2242_v12  ;;  %2280 = vmatmul.bf16.gmra.mxu1 %v3418_v58  ;;  %2410 = vmatmul.bf16.gmra.mxu3 %v3730_v21  ;;  %v3425_v41 = vld [vmem:[%s4681_s12 + $0x1e0] sm:$0xf]  ;;  %v4071_v58 = vld [vmem:[%s4681_s12 + $0x454] sm:$0xf]  ;;  %v3430_v14 = vor.u32 %v3993_v54, %v3427_v57 }
 0x23d   : > { %v3739_v21 = vld [vmem:[%s4681_s12 + $0x45c] sm:$0xf0]  ;;  %v3426_v63 = vor.u32 %v3994_v35, %v3425_v41 }
 0x23e   : > { %5673 = vst [vmem:[#allocation31_spill] sm:$0xff] %v4994_v45  ;;  %v3742_v5 = vor.u32 %v4071_v58, %v3739_v21  ;;  %v3996_v21 = vld [vmem:[%s4681_s12 + $0x1fc] sm:$0xf] }
 0x23f   : > { %v4998_v17 = vpop.f32.mrf.mxu3  ;;  %v2517_v19 = vpop.f32.mrf.mxu2 }
 0x240   : > { %5674 = vst [vmem:[#allocation32_spill] sm:$0xff] %v4998_v17  ;;  %v1974_v51 = vpop.f32.mrf.mxu0 }
 0x241   : > { %v2243_v30 = vpop.f32.mrf.mxu1 }
 0x242   : > { %v2244_v31 = vadd.f32 %v2243_v30, %v1974_v51  ;;  %v3457_v30 = vld [vmem:[%s4681_s12 + $0x218] sm:$0xf] }
 0x244   : > { %v5000_v25 = vadd.f32 %v2512_v8, %v2244_v31  ;;  %3900 = vmatmul.msk.bf16.gmra.mxu2 %vm1751_vm0, %v3446_v28  ;;  %v4001_v31 = vld [vmem:[%s4681_s12 + $0x220] sm:$0xf0] }
 0x245   : > { %v3458_v54 = vor.u32 %v4001_v31, %v3457_v30 }
 0x246   : > { %5675 = vst [vmem:[#allocation33_spill] sm:$0xff] %v5000_v25  ;;  %v4082_v25 = vld [vmem:[%s4681_s12 + $0x4a8] sm:$0xf0] }
 0x247   : > { %v5009_v60 = vpop.f32.mrf.mxu3  ;;  %v2520_v12 = vpop.f32.mrf.mxu2 }
 0x248   : > { %5676 = vst [vmem:[#allocation34_spill] sm:$0xff] %v5009_v60  ;;  %v1977_v50 = vpop.f32.mrf.mxu0 }
 0x249   : > { %v2246_v51 = vpop.f32.mrf.mxu1 }
 0x24a   : > { %v2247_v8 = vadd.f32 %v2246_v51, %v1977_v50  ;;  %v3751_v51 = vld [vmem:[%s4681_s12 + $0x474] sm:$0xf0] }
 0x24b   : > { %2016 = vmatmul.bf16.gmra.mxu0 %v3426_v63  ;;  %v3437_v63 = vld [vmem:[%s4681_s12 + $0x1f8] sm:$0xf] }
 0x24c   : > { %v5011_v28 = vadd.f32 %v2515_v48, %v2247_v8  ;;  %2285 = vmatmul.bf16.gmra.mxu1 %v3430_v14  ;;  %2415 = vmatmul.bf16.gmra.mxu3 %v3742_v5  ;;  %v3997_v48 = vld [vmem:[%s4681_s12 + $0x200] sm:$0xf0]  ;;  %v3439_v14 = vld [vmem:[%s4681_s12 + $0x204] sm:$0xf0]  ;;  %v4074_v5 = vld [vmem:[%s4681_s12 + $0x46c] sm:$0xf] }
 0x24d   : > { %v3438_v26 = vor.u32 %v3997_v48, %v3437_v63  ;;  %v3442_v30 = vor.u32 %v3996_v21, %v3439_v14  ;;  %v3754_v31 = vor.u32 %v4074_v5, %v3751_v51  ;;  %v3449_v51 = vld [vmem:[%s4681_s12 + $0x210] sm:$0xf]  ;;  %v3481_v63 = vld [vmem:[%s4681_s12 + $0x248] sm:$0xf] }
 0x24e   : > { %5677 = vst [vmem:[#allocation35_spill] sm:$0xff] %v5011_v28 }
 0x24f   : > { %v5015_v39 = vpop.f32.mrf.mxu3  ;;  %v2522_v41 = vpop.f32.mrf.mxu2 }
 0x250   : > { %5678 = vst [vmem:[#allocation36_spill] sm:$0xff] %v5015_v39  ;;  %v1979_v35 = vpop.f32.mrf.mxu0 }
 0x251   : > { %v2248_v57 = vpop.f32.mrf.mxu1 }
 0x252   : > { %v2249_v58 = vadd.f32 %v2248_v57, %v1979_v35  ;;  %v3469_v57 = vld [vmem:[%s4681_s12 + $0x230] sm:$0xf] }
 0x254   : > { %v5017_v50 = vadd.f32 %v2517_v19, %v2249_v58  ;;  %3901 = vmatmul.msk.bf16.gmra.mxu2 %vm1751_vm0, %v3458_v54  ;;  %v4004_v58 = vld [vmem:[%s4681_s12 + $0x238] sm:$0xf0] }
 0x255   : > { %v3470_v14 = vor.u32 %v4004_v58, %v3469_v57 }
 0x256   : > { %5679 = vst [vmem:[#allocation37_spill] sm:$0xff] %v5017_v50 }
 0x257   : > { %v5026_v8 = vpop.f32.mrf.mxu3  ;;  %v2525_v39 = vpop.f32.mrf.mxu2 }
 0x258   : > { %5680 = vst [vmem:[#allocation38_spill] sm:$0xff] %v5026_v8  ;;  %v1982_v60 = vpop.f32.mrf.mxu0  ;;  %v3763_v8 = vld [vmem:[%s4681_s12 + $0x48c] sm:$0xf0] }
 0x259   : > { %v2251_v35 = vpop.f32.mrf.mxu1 }
 0x25a   : > { %v2252_v19 = vadd.f32 %v2251_v35, %v1982_v60  ;;  %v3451_v35 = vld [vmem:[%s4681_s12 + $0x21c] sm:$0xf0] }
 0x25b   : > { %2021 = vmatmul.bf16.gmra.mxu0 %v3438_v26 }
 0x25c   : > { %v5028_v54 = vadd.f32 %v2520_v12, %v2252_v19  ;;  %2290 = vmatmul.bf16.gmra.mxu1 %v3442_v30  ;;  %2420 = vmatmul.bf16.gmra.mxu3 %v3754_v31  ;;  %v4000_v30 = vld [vmem:[%s4681_s12 + $0x218] sm:$0xf0]  ;;  %v3999_v31 = vld [vmem:[%s4681_s12 + $0x214] sm:$0xf]  ;;  %v4077_v19 = vld [vmem:[%s4681_s12 + $0x484] sm:$0xf] }
 0x25d   : > { %v3450_v58 = vor.u32 %v4000_v30, %v3449_v51  ;;  %v3493_v51 = vld [vmem:[%s4681_s12 + $0x260] sm:$0xf] }
 0x25e   : > { %5681 = vst [vmem:[#allocation39_spill] sm:$0xff] %v5028_v54 }
 0x25f   : > { %v5034_v48 = vpop.f32.mrf.mxu3  ;;  %v2527_v21 = vpop.f32.mrf.mxu2 }
 0x260   : > { %5682 = vst [vmem:[#allocation40_spill] sm:$0xff] %v5034_v48  ;;  %v1984_v60 = vpop.f32.mrf.mxu0  ;;  %v3799_v48 = vld [vmem:[%s4681_s12 + $0x4d4] sm:$0xf0] }
 0x261   : > { %v2253_v26 = vpop.f32.mrf.mxu1 }
 0x262   : > { %v2254_v5 = vadd.f32 %v2253_v26, %v1984_v60  ;;  %v3766_v26 = vor.u32 %v4077_v19, %v3763_v8 }
 0x264   : > { %v5036_v12 = vadd.f32 %v2522_v41, %v2254_v5  ;;  %3902 = vmatmul.msk.bf16.gmra.mxu2 %vm1751_vm0, %v3470_v14  ;;  %v3454_v41 = vor.u32 %v3999_v31, %v3451_v35 }
 0x266   : > { %5683 = vst [vmem:[#allocation41_spill] sm:$0xff] %v5036_v12  ;;  %v4007_v12 = vld [vmem:[%s4681_s12 + $0x250] sm:$0xf0] }
 0x267   : > { %v5047_v54 = vpop.f32.mrf.mxu3  ;;  %v2530_v57 = vpop.f32.mrf.mxu2  ;;  %v3482_v35 = vor.u32 %v4007_v12, %v3481_v63 }
 0x268   : > { %5684 = vst [vmem:[#allocation42_spill] sm:$0xff] %v5047_v54  ;;  %v1987_v60 = vpop.f32.mrf.mxu0  ;;  %v4013_v54 = vld [vmem:[%s4681_s12 + $0x280] sm:$0xf0] }
 0x269   : > { %v2256_v5 = vpop.f32.mrf.mxu1 }
 0x26a   : > { %v2257_v14 = vadd.f32 %v2256_v5, %v1987_v60  ;;  %v3461_v60 = vld [vmem:[%s4681_s12 + $0x228] sm:$0xf]  ;;  %v3463_v5 = vld [vmem:[%s4681_s12 + $0x234] sm:$0xf0] }
 0x26b   : > { %2026 = vmatmul.bf16.gmra.mxu0 %v3450_v58 }
 0x26c   : > { %v5049_v23 = vadd.f32 %v2525_v39, %v2257_v14  ;;  %2295 = vmatmul.bf16.gmra.mxu1 %v3454_v41  ;;  %2425 = vmatmul.bf16.gmra.mxu3 %v3766_v26  ;;  %v4003_v41 = vld [vmem:[%s4681_s12 + $0x230] sm:$0xf0]  ;;  %v4002_v26 = vld [vmem:[%s4681_s12 + $0x22c] sm:$0xf]  ;;  %v4080_v14 = vld [vmem:[%s4681_s12 + $0x49c] sm:$0xf] }
 0x26d   : > { %v3462_v12 = vor.u32 %v4003_v41, %v3461_v60  ;;  %v3505_v60 = vld [vmem:[%s4681_s12 + $0x278] sm:$0xf] }
 0x26e   : > { %5685 = vst [vmem:[#allocation43_spill] sm:$0xff] %v5049_v23 }
 0x26f   : > { %v5055_v30 = vpop.f32.mrf.mxu3  ;;  %v2532_v8 = vpop.f32.mrf.mxu2 }
 0x270   : > { %5686 = vst [vmem:[#allocation44_spill] sm:$0xff] %v5055_v30  ;;  %v1989_v31 = vpop.f32.mrf.mxu0 }
 0x271   : > { %v2258_v19 = vpop.f32.mrf.mxu1 }
 0x272   : > { %v2259_v58 = vadd.f32 %v2258_v19, %v1989_v31  ;;  %v3778_v19 = vor.u32 %v4080_v14, %v3775_v32 }
 0x274   : > { %v5057_v39 = vadd.f32 %v2527_v21, %v2259_v58  ;;  %3903 = vmatmul.msk.bf16.gmra.mxu2 %vm1751_vm0, %v3482_v35  ;;  %v3466_v21 = vor.u32 %v4002_v26, %v3463_v5 }
 0x276   : > { %5687 = vst [vmem:[#allocation45_spill] sm:$0xff] %v5057_v39  ;;  %v4010_v39 = vld [vmem:[%s4681_s12 + $0x268] sm:$0xf0] }
 0x277   : > { %v5068_v23 = vpop.f32.mrf.mxu3  ;;  %v2535_v63 = vpop.f32.mrf.mxu2  ;;  %v3494_v5 = vor.u32 %v4010_v39, %v3493_v51 }
 0x278   : > { %5688 = vst [vmem:[#allocation46_spill] sm:$0xff] %v5068_v23  ;;  %v1992_v31 = vpop.f32.mrf.mxu0 }
 0x279   : > { %v2261_v58 = vpop.f32.mrf.mxu1 }
 0x27a   : > { %v2262_v35 = vadd.f32 %v2261_v58, %v1992_v31  ;;  %v3473_v31 = vld [vmem:[%s4681_s12 + $0x240] sm:$0xf]  ;;  %v3475_v58 = vld [vmem:[%s4681_s12 + $0x24c] sm:$0xf0] }
 0x27b   : > { %2031 = vmatmul.bf16.gmra.mxu0 %v3462_v12 }
 0x27c   : > { %v5070_v47 = vadd.f32 %v2530_v57, %v2262_v35  ;;  %2300 = vmatmul.bf16.gmra.mxu1 %v3466_v21  ;;  %2430 = vmatmul.bf16.gmra.mxu3 %v3778_v19  ;;  %v4006_v21 = vld [vmem:[%s4681_s12 + $0x248] sm:$0xf0]  ;;  %v4005_v19 = vld [vmem:[%s4681_s12 + $0x244] sm:$0xf]  ;;  %v4083_v35 = vld [vmem:[%s4681_s12 + $0x4b4] sm:$0xf] }
 0x27d   : > { %v3474_v39 = vor.u32 %v4006_v21, %v3473_v31  ;;  %v3517_v31 = vld [vmem:[%s4681_s12 + $0x290] sm:$0xf] }
 0x27f   : > { %v5076_v41 = vpop.f32.mrf.mxu3  ;;  %v2537_v32 = vpop.f32.mrf.mxu2 }
 0x280   : > { %v1994_v26 = vpop.f32.mrf.mxu0 }
 0x281   : > { %v2263_v14 = vpop.f32.mrf.mxu1 }
 0x282   : > { %v2264_v12 = vadd.f32 %v2263_v14, %v1994_v26  ;;  %v3790_v14 = vor.u32 %v4083_v35, %v3787_v56 }
 0x284   : > { %v5078_v57 = vadd.f32 %v2532_v8, %v2264_v12  ;;  %3904 = vmatmul.msk.bf16.gmra.mxu2 %vm1751_vm0, %v3494_v5  ;;  %v3478_v8 = vor.u32 %v4005_v19, %v3475_v58  ;;  %v3506_v58 = vor.u32 %v4013_v54, %v3505_v60 }
 0x287   : > { %v5089_v23 = vpop.f32.mrf.mxu3  ;;  %v2540_v51 = vpop.f32.mrf.mxu2 }
 0x288   : > { %v1997_v26 = vpop.f32.mrf.mxu0 }
 0x289   : > { %v2266_v12 = vpop.f32.mrf.mxu1 }
 0x28a   : > { %v2267_v5 = vadd.f32 %v2266_v12, %v1997_v26  ;;  %v3485_v26 = vld [vmem:[%s4681_s12 + $0x258] sm:$0xf]  ;;  %v3487_v12 = vld [vmem:[%s4681_s12 + $0x264] sm:$0xf0] }
 0x28b   : > { %2036 = vmatmul.bf16.gmra.mxu0 %v3474_v39 }
 0x28c   : > { %v5091_v30 = vadd.f32 %v2535_v63, %v2267_v5  ;;  %2305 = vmatmul.bf16.gmra.mxu1 %v3478_v8  ;;  %2435 = vmatmul.bf16.gmra.mxu3 %v3790_v14  ;;  %v4009_v8 = vld [vmem:[%s4681_s12 + $0x260] sm:$0xf0]  ;;  %v4008_v14 = vld [vmem:[%s4681_s12 + $0x25c] sm:$0xf]  ;;  %v4086_v5 = vld [vmem:[%s4681_s12 + $0x4cc] sm:$0xf] }
 0x28d   : > { %v3486_v60 = vor.u32 %v4009_v8, %v3485_v26  ;;  %v3529_v26 = vld [vmem:[%s4681_s12 + $0x2a8] sm:$0xf] }
 0x28f   : > { %v5097_v21 = vpop.f32.mrf.mxu3  ;;  %v2542_v56 = vpop.f32.mrf.mxu2 }
 0x290   : > { %v1999_v19 = vpop.f32.mrf.mxu0 }
 0x291   : > { %v2268_v35 = vpop.f32.mrf.mxu1 }
 0x292   : > { %v2269_v39 = vadd.f32 %v2268_v35, %v1999_v19  ;;  %v3802_v35 = vor.u32 %v4086_v5, %v3799_v48 }
 0x294   : > { %v5099_v63 = vadd.f32 %v2537_v32, %v2269_v39  ;;  %3905 = vmatmul.msk.bf16.gmra.mxu2 %vm1751_vm0, %v3506_v58  ;;  %v3490_v32 = vor.u32 %v4008_v14, %v3487_v12  ;;  %v3518_v12 = vor.u32 %v4016_v6, %v3517_v31 }
 0x297   : > { %v5110_v17 = vpop.f32.mrf.mxu3  ;;  %v2545_v54 = vpop.f32.mrf.mxu2 }
 0x298   : > { %v2002_v19 = vpop.f32.mrf.mxu0 }
 0x299   : > { %v2271_v39 = vpop.f32.mrf.mxu1 }
 0x29a   : > { %v2272_v58 = vadd.f32 %v2271_v39, %v2002_v19  ;;  %v3497_v19 = vld [vmem:[%s4681_s12 + $0x270] sm:$0xf]  ;;  %v3499_v39 = vld [vmem:[%s4681_s12 + $0x27c] sm:$0xf0] }
 0x29b   : > { %2041 = vmatmul.bf16.gmra.mxu0 %v3486_v60 }
 0x29c   : > { %v5112_v46 = vadd.f32 %v2540_v51, %v2272_v58  ;;  %2310 = vmatmul.bf16.gmra.mxu1 %v3490_v32  ;;  %2440 = vmatmul.bf16.gmra.mxu3 %v3802_v35  ;;  %v4012_v32 = vld [vmem:[%s4681_s12 + $0x278] sm:$0xf0]  ;;  %v4011_v35 = vld [vmem:[%s4681_s12 + $0x274] sm:$0xf]  ;;  %v3685_v58 = vld [vmem:[%s4681_s12 + $0x3e0] sm:$0xf] }
 0x29d   : > { %v3498_v31 = vor.u32 %v4012_v32, %v3497_v19  ;;  %v3541_v19 = vld [vmem:[%s4681_s12 + $0x2c0] sm:$0xf] }
 0x29f   : > { %v5118_v8 = vpop.f32.mrf.mxu3  ;;  %v2547_v48 = vpop.f32.mrf.mxu2 }
 0x2a0   : > { %v2004_v14 = vpop.f32.mrf.mxu0 }
 0x2a1   : > { %v2273_v5 = vpop.f32.mrf.mxu1 }
 0x2a2   : > { %v2274_v60 = vadd.f32 %v2273_v5, %v2004_v14  ;;  %v3686_v5 = vor.u32 %v4058_v40, %v3685_v58 }
 0x2a4   : > { %v5120_v51 = vadd.f32 %v2542_v56, %v2274_v60  ;;  %3906 = vmatmul.msk.bf16.gmra.mxu2 %vm1751_vm0, %v3518_v12  ;;  %v3502_v56 = vor.u32 %v4011_v35, %v3499_v39  ;;  %v3530_v39 = vor.u32 %v4019_v20, %v3529_v26 }
 0x2a7   : > { %v5131_v11 = vpop.f32.mrf.mxu3  ;;  %v2550_v6 = vpop.f32.mrf.mxu2 }
 0x2a8   : > { %v2007_v14 = vpop.f32.mrf.mxu0 }
 0x2a9   : > { %v2276_v60 = vpop.f32.mrf.mxu1 }
 0x2aa   : > { %v2277_v12 = vadd.f32 %v2276_v60, %v2007_v14  ;;  %v3509_v14 = vld [vmem:[%s4681_s12 + $0x288] sm:$0xf]  ;;  %v3511_v60 = vld [vmem:[%s4681_s12 + $0x294] sm:$0xf0] }
 0x2ab   : > { %2046 = vmatmul.bf16.gmra.mxu0 %v3498_v31 }
 0x2ac   : > { %v5133_v49 = vadd.f32 %v2545_v54, %v2277_v12  ;;  %2315 = vmatmul.bf16.gmra.mxu1 %v3502_v56  ;;  %3920 = vmatmul.msk.bf16.vlgmr.msra.gmra.mxu3 %vm1751_vm0, %v3686_v5  ;;  %v4015_v56 = vld [vmem:[%s4681_s12 + $0x290] sm:$0xf0]  ;;  %v4014_v5 = vld [vmem:[%s4681_s12 + $0x28c] sm:$0xf]  ;;  %v3697_v12 = vld [vmem:[%s4681_s12 + $0x3f8] sm:$0xf] }
 0x2ad   : > { %v3510_v26 = vor.u32 %v4015_v56, %v3509_v14  ;;  %v3553_v14 = vld [vmem:[%s4681_s12 + $0x2d8] sm:$0xf] }
 0x2af   : > { %v5140_v40 = vpop.f32.mrf.mxu3  ;;  %v2552_v32 = vpop.f32.mrf.mxu2 }
 0x2b0   : > { %v2009_v35 = vpop.f32.mrf.mxu0 }
 0x2b1   : > { %v2278_v58 = vpop.f32.mrf.mxu1 }
 0x2b2   : > { %v2279_v54 = vadd.f32 %v2278_v58, %v2009_v35  ;;  %v3698_v58 = vor.u32 %v4061_v1, %v3697_v12 }
 0x2b4   : > { %v5142_v31 = vadd.f32 %v2547_v48, %v2279_v54  ;;  %3907 = vmatmul.msk.bf16.gmra.mxu2 %vm1751_vm0, %v3530_v39  ;;  %v3514_v48 = vor.u32 %v4014_v5, %v3511_v60  ;;  %v3542_v60 = vor.u32 %v4022_v4, %v3541_v19 }
 0x2b6   : > { %5689 = vst [vmem:[#allocation47_spill] sm:$0xff] %v5142_v31  ;;  %v4064_v31 = vld [vmem:[%s4681_s12 + $0x418] sm:$0xf0] }
 0x2b7   : > { %v5153_v43 = vpop.f32.mrf.mxu3  ;;  %v2555_v20 = vpop.f32.mrf.mxu2 }
 0x2b8   : > { %v2012_v35 = vpop.f32.mrf.mxu0 }
 0x2b9   : > { %v2281_v54 = vpop.f32.mrf.mxu1 }
 0x2ba   : > { %v2282_v39 = vadd.f32 %v2281_v54, %v2012_v35  ;;  %v3521_v35 = vld [vmem:[%s4681_s12 + $0x2a0] sm:$0xf]  ;;  %v3523_v54 = vld [vmem:[%s4681_s12 + $0x2ac] sm:$0xf0] }
 0x2bb   : > { %2051 = vmatmul.bf16.gmra.mxu0 %v3510_v26 }
 0x2bc   : > { %v5155_v22 = vadd.f32 %v2550_v6, %v2282_v39  ;;  %2320 = vmatmul.bf16.gmra.mxu1 %v3514_v48  ;;  %3921 = vmatmul.msk.bf16.gmra.mxu3 %vm1751_vm0, %v3698_v58  ;;  %v4018_v48 = vld [vmem:[%s4681_s12 + $0x2a8] sm:$0xf0]  ;;  %v4017_v58 = vld [vmem:[%s4681_s12 + $0x2a4] sm:$0xf]  ;;  %v3709_v39 = vld [vmem:[%s4681_s12 + $0x410] sm:$0xf] }
 0x2bd   : > { %v3522_v19 = vor.u32 %v4018_v48, %v3521_v35  ;;  %v3565_v35 = vld [vmem:[%s4681_s12 + $0x2f0] sm:$0xf] }
 0x2be   : > { %5690 = vst [vmem:[#allocation48_spill] sm:$0xff] %v5155_v22 }
 0x2bf   : > { %v5162_v1 = vpop.f32.mrf.mxu3  ;;  %v2557_v56 = vpop.f32.mrf.mxu2 }
 0x2c0   : > { %v2014_v5 = vpop.f32.mrf.mxu0 }
 0x2c1   : > { %v2283_v12 = vpop.f32.mrf.mxu1 }
 0x2c2   : > { %v2284_v6 = vadd.f32 %v2283_v12, %v2014_v5  ;;  %v3710_v12 = vor.u32 %v4064_v31, %v3709_v39 }
 0x2c4   : > { %v5164_v26 = vadd.f32 %v2552_v32, %v2284_v6  ;;  %3908 = vmatmul.msk.bf16.gmra.mxu2 %vm1751_vm0, %v3542_v60  ;;  %v3526_v32 = vor.u32 %v4017_v58, %v3523_v54 }
 0x2c6   : > { %5691 = vst [vmem:[#allocation49_spill] sm:$0xff] %v5164_v26  ;;  %v4025_v26 = vld [vmem:[%s4681_s12 + $0x2e0] sm:$0xf0] }
 0x2c7   : > { %v5175_v22 = vpop.f32.mrf.mxu3  ;;  %v2560_v4 = vpop.f32.mrf.mxu2  ;;  %v3554_v54 = vor.u32 %v4025_v26, %v3553_v14 }
 0x2c8   : > { %v2017_v5 = vpop.f32.mrf.mxu0 }
 0x2c9   : > { %v2286_v6 = vpop.f32.mrf.mxu1 }
 0x2ca   : > { %v2287_v60 = vadd.f32 %v2286_v6, %v2017_v5  ;;  %v3533_v5 = vld [vmem:[%s4681_s12 + $0x2b8] sm:$0xf]  ;;  %v3535_v6 = vld [vmem:[%s4681_s12 + $0x2c4] sm:$0xf0] }
 0x2cb   : > { %2056 = vmatmul.bf16.gmra.mxu0 %v3522_v19 }
 0x2cc   : > { %v5177_v0 = vadd.f32 %v2555_v20, %v2287_v60  ;;  %2325 = vmatmul.bf16.gmra.mxu1 %v3526_v32  ;;  %3922 = vmatmul.msk.bf16.gmra.mxu3 %vm1751_vm0, %v3710_v12  ;;  %v4021_v32 = vld [vmem:[%s4681_s12 + $0x2c0] sm:$0xf0]  ;;  %v4020_v12 = vld [vmem:[%s4681_s12 + $0x2bc] sm:$0xf]  ;;  %v3721_v60 = vld [vmem:[%s4681_s12 + $0x428] sm:$0xf] }
 0x2cd   : > { %v3534_v26 = vor.u32 %v4021_v32, %v3533_v5  ;;  %v3577_v5 = vld [vmem:[%s4681_s12 + $0x308] sm:$0xf] }
 0x2ce   : > { %5692 = vst [vmem:[#allocation50_spill] sm:$0xff] %v5177_v0 }
 0x2cf   : > { %v5184_v31 = vpop.f32.mrf.mxu3  ;;  %v2562_v48 = vpop.f32.mrf.mxu2 }
 0x2d0   : > { %v2019_v58 = vpop.f32.mrf.mxu0 }
 0x2d1   : > { %v2288_v39 = vpop.f32.mrf.mxu1 }
 0x2d2   : > { %v2289_v20 = vadd.f32 %v2288_v39, %v2019_v58  ;;  %v3722_v39 = vor.u32 %v4067_v13, %v3721_v60 }
 0x2d4   : > { %v5186_v19 = vadd.f32 %v2557_v56, %v2289_v20  ;;  %3909 = vmatmul.msk.bf16.gmra.mxu2 %vm1751_vm0, %v3554_v54  ;;  %v3538_v56 = vor.u32 %v4020_v12, %v3535_v6 }
 0x2d6   : > { %5693 = vst [vmem:[#allocation51_spill] sm:$0xff] %v5186_v19  ;;  %v4028_v19 = vld [vmem:[%s4681_s12 + $0x2f8] sm:$0xf0] }
 0x2d7   : > { %v5197_v0 = vpop.f32.mrf.mxu3  ;;  %v2565_v14 = vpop.f32.mrf.mxu2  ;;  %v3566_v6 = vor.u32 %v4028_v19, %v3565_v35 }
 0x2d8   : > { %v2022_v58 = vpop.f32.mrf.mxu0 }
 0x2d9   : > { %v2291_v20 = vpop.f32.mrf.mxu1 }
 0x2da   : > { %v2292_v54 = vadd.f32 %v2291_v20, %v2022_v58  ;;  %v3545_v58 = vld [vmem:[%s4681_s12 + $0x2d0] sm:$0xf]  ;;  %v3547_v20 = vld [vmem:[%s4681_s12 + $0x2dc] sm:$0xf0] }
 0x2db   : > { %2061 = vmatmul.bf16.gmra.mxu0 %v3534_v26 }
 0x2dc   : > { %v5199_v38 = vadd.f32 %v2560_v4, %v2292_v54  ;;  %2330 = vmatmul.bf16.gmra.mxu1 %v3538_v56  ;;  %3923 = vmatmul.msk.bf16.gmra.mxu3 %vm1751_vm0, %v3722_v39  ;;  %v4024_v56 = vld [vmem:[%s4681_s12 + $0x2d8] sm:$0xf0]  ;;  %v4023_v39 = vld [vmem:[%s4681_s12 + $0x2d4] sm:$0xf]  ;;  %v3733_v54 = vld [vmem:[%s4681_s12 + $0x440] sm:$0xf] }
 0x2dd   : > { %v3546_v19 = vor.u32 %v4024_v56, %v3545_v58  ;;  %v3589_v58 = vld [vmem:[%s4681_s12 + $0x320] sm:$0xf] }
 0x2de   : > { %5694 = vst [vmem:[#allocation52_spill] sm:$0xff] %v5199_v38 }
 0x2df   : > { %v5206_v13 = vpop.f32.mrf.mxu3  ;;  %v2567_v32 = vpop.f32.mrf.mxu2 }
 0x2e0   : > { %v2024_v12 = vpop.f32.mrf.mxu0 }
 0x2e1   : > { %v2293_v60 = vpop.f32.mrf.mxu1 }
 0x2e2   : > { %v2294_v4 = vadd.f32 %v2293_v60, %v2024_v12  ;;  %v3734_v60 = vor.u32 %v4070_v55, %v3733_v54 }
 0x2e4   : > { %v5208_v26 = vadd.f32 %v2562_v48, %v2294_v4  ;;  %3910 = vmatmul.msk.bf16.gmra.mxu2 %vm1751_vm0, %v3566_v6  ;;  %v3550_v48 = vor.u32 %v4023_v39, %v3547_v20 }
 0x2e6   : > { %5695 = vst [vmem:[#allocation53_spill] sm:$0xff] %v5208_v26  ;;  %v4031_v26 = vld [vmem:[%s4681_s12 + $0x310] sm:$0xf0] }
 0x2e7   : > { %v5219_v38 = vpop.f32.mrf.mxu3  ;;  %v2570_v35 = vpop.f32.mrf.mxu2  ;;  %v3578_v20 = vor.u32 %v4031_v26, %v3577_v5 }
 0x2e8   : > { %v2027_v12 = vpop.f32.mrf.mxu0 }
 0x2e9   : > { %v2296_v4 = vpop.f32.mrf.mxu1 }
 0x2ea   : > { %v2297_v6 = vadd.f32 %v2296_v4, %v2027_v12  ;;  %v3557_v12 = vld [vmem:[%s4681_s12 + $0x2e8] sm:$0xf]  ;;  %v3559_v4 = vld [vmem:[%s4681_s12 + $0x2f4] sm:$0xf0] }
 0x2eb   : > { %2066 = vmatmul.bf16.gmra.mxu0 %v3546_v19 }
 0x2ec   : > { %v5221_v15 = vadd.f32 %v2565_v14, %v2297_v6  ;;  %2335 = vmatmul.bf16.gmra.mxu1 %v3550_v48  ;;  %3924 = vmatmul.msk.bf16.gmra.mxu3 %vm1751_vm0, %v3734_v60  ;;  %v4027_v48 = vld [vmem:[%s4681_s12 + $0x2f0] sm:$0xf0]  ;;  %v4026_v60 = vld [vmem:[%s4681_s12 + $0x2ec] sm:$0xf]  ;;  %v3745_v6 = vld [vmem:[%s4681_s12 + $0x458] sm:$0xf] }
 0x2ed   : > { %v3558_v26 = vor.u32 %v4027_v48, %v3557_v12  ;;  %v3601_v12 = vld [vmem:[%s4681_s12 + $0x338] sm:$0xf] }
 0x2ee   : > { %5696 = vst [vmem:[#allocation54_spill] sm:$0xff] %v5221_v15 }
 0x2ef   : > { %v5228_v55 = vpop.f32.mrf.mxu3  ;;  %v2572_v56 = vpop.f32.mrf.mxu2 }
 0x2f0   : > { %v2029_v39 = vpop.f32.mrf.mxu0 }
 0x2f1   : > { %v2298_v54 = vpop.f32.mrf.mxu1 }
 0x2f2   : > { %v2299_v14 = vadd.f32 %v2298_v54, %v2029_v39  ;;  %v3746_v54 = vor.u32 %v4073_v36, %v3745_v6 }
 0x2f4   : > { %v5230_v19 = vadd.f32 %v2567_v32, %v2299_v14  ;;  %3911 = vmatmul.msk.bf16.gmra.mxu2 %vm1751_vm0, %v3578_v20  ;;  %v3562_v32 = vor.u32 %v4026_v60, %v3559_v4 }
 0x2f6   : > { %5697 = vst [vmem:[#allocation55_spill] sm:$0xff] %v5230_v19  ;;  %v4034_v19 = vld [vmem:[%s4681_s12 + $0x328] sm:$0xf0] }
 0x2f7   : > { %v5241_v15 = vpop.f32.mrf.mxu3  ;;  %v2575_v5 = vpop.f32.mrf.mxu2  ;;  %v3590_v4 = vor.u32 %v4034_v19, %v3589_v58 }
 0x2f8   : > { %v2032_v39 = vpop.f32.mrf.mxu0 }
 0x2f9   : > { %v2301_v14 = vpop.f32.mrf.mxu1 }
 0x2fa   : > { %v2302_v20 = vadd.f32 %v2301_v14, %v2032_v39  ;;  %v3569_v39 = vld [vmem:[%s4681_s12 + $0x300] sm:$0xf]  ;;  %v3571_v14 = vld [vmem:[%s4681_s12 + $0x30c] sm:$0xf0] }
 0x2fb   : > { %2071 = vmatmul.bf16.gmra.mxu0 %v3558_v26 }
 0x2fc   : > { %v5243_v61 = vadd.f32 %v2570_v35, %v2302_v20  ;;  %2340 = vmatmul.bf16.gmra.mxu1 %v3562_v32  ;;  %3925 = vmatmul.msk.bf16.gmra.mxu3 %vm1751_vm0, %v3746_v54  ;;  %v4030_v32 = vld [vmem:[%s4681_s12 + $0x308] sm:$0xf0]  ;;  %v4029_v54 = vld [vmem:[%s4681_s12 + $0x304] sm:$0xf]  ;;  %v3757_v20 = vld [vmem:[%s4681_s12 + $0x470] sm:$0xf] }
 0x2fd   : > { %v3570_v19 = vor.u32 %v4030_v32, %v3569_v39  ;;  %v3613_v39 = vld [vmem:[%s4681_s12 + $0x350] sm:$0xf] }
 0x2fe   : > { %5698 = vst [vmem:[#allocation56_spill] sm:$0xff] %v5243_v61 }
 0x2ff   : > { %v5250_v36 = vpop.f32.mrf.mxu3  ;;  %v2577_v48 = vpop.f32.mrf.mxu2 }
 0x300   : > { %5699 = vst [vmem:[#allocation57_spill] sm:$0xff] %v5250_v36  ;;  %v2034_v60 = vpop.f32.mrf.mxu0 }
 0x301   : > { %v2303_v6 = vpop.f32.mrf.mxu1 }
 0x302   : > { %v2304_v35 = vadd.f32 %v2303_v6, %v2034_v60  ;;  %v3758_v6 = vor.u32 %v4076_v27, %v3757_v20 }
 0x304   : > { %v5252_v26 = vadd.f32 %v2572_v56, %v2304_v35  ;;  %3912 = vmatmul.msk.bf16.gmra.mxu2 %vm1751_vm0, %v3590_v4  ;;  %v3574_v56 = vor.u32 %v4029_v54, %v3571_v14 }
 0x306   : > { %5700 = vst [vmem:[#allocation58_spill] sm:$0xff] %v5252_v26  ;;  %v4037_v26 = vld [vmem:[%s4681_s12 + $0x340] sm:$0xf0] }
 0x307   : > { %v5263_v61 = vpop.f32.mrf.mxu3  ;;  %v2580_v58 = vpop.f32.mrf.mxu2  ;;  %v3602_v14 = vor.u32 %v4037_v26, %v3601_v12 }
 0x308   : > { %5701 = vst [vmem:[#allocation59_spill] sm:$0xff] %v5263_v61  ;;  %v2037_v60 = vpop.f32.mrf.mxu0  ;;  %v4049_v61 = vld [vmem:[%s4681_s12 + $0x3a0] sm:$0xf0] }
 0x309   : > { %v2306_v35 = vpop.f32.mrf.mxu1 }
 0x30a   : > { %v2307_v4 = vadd.f32 %v2306_v35, %v2037_v60  ;;  %v3581_v60 = vld [vmem:[%s4681_s12 + $0x318] sm:$0xf]  ;;  %v3583_v35 = vld [vmem:[%s4681_s12 + $0x324] sm:$0xf0] }
 0x30b   : > { %2076 = vmatmul.bf16.gmra.mxu0 %v3570_v19 }
 0x30c   : > { %v5265_v59 = vadd.f32 %v2575_v5, %v2307_v4  ;;  %2345 = vmatmul.bf16.gmra.mxu1 %v3574_v56  ;;  %3926 = vmatmul.msk.bf16.gmra.mxu3 %vm1751_vm0, %v3758_v6  ;;  %v4033_v56 = vld [vmem:[%s4681_s12 + $0x320] sm:$0xf0]  ;;  %v4032_v6 = vld [vmem:[%s4681_s12 + $0x31c] sm:$0xf]  ;;  %v3769_v4 = vld [vmem:[%s4681_s12 + $0x488] sm:$0xf] }
 0x30d   : > { %v3582_v26 = vor.u32 %v4033_v56, %v3581_v60  ;;  %v3625_v60 = vld [vmem:[%s4681_s12 + $0x368] sm:$0xf] }
 0x30e   : > { %5702 = vst [vmem:[#allocation60_spill] sm:$0xff] %v5265_v59 }
 0x30f   : > { %v5272_v27 = vpop.f32.mrf.mxu3  ;;  %v2582_v32 = vpop.f32.mrf.mxu2 }
 0x310   : > { %5703 = vst [vmem:[#allocation61_spill] sm:$0xff] %v5272_v27  ;;  %v2039_v54 = vpop.f32.mrf.mxu0  ;;  %v3649_v27 = vld [vmem:[%s4681_s12 + $0x398] sm:$0xf] }
 0x311   : > { %v2308_v20 = vpop.f32.mrf.mxu1 }
 0x312   : > { %v2309_v5 = vadd.f32 %v2308_v20, %v2039_v54  ;;  %v3770_v20 = vor.u32 %v4079_v3, %v3769_v4 }
 0x314   : > { %v5274_v19 = vadd.f32 %v2577_v48, %v2309_v5  ;;  %3913 = vmatmul.msk.bf16.gmra.mxu2 %vm1751_vm0, %v3602_v14  ;;  %v3586_v48 = vor.u32 %v4032_v6, %v3583_v35 }
 0x316   : > { %5704 = vst [vmem:[#allocation62_spill] sm:$0xff] %v5274_v19  ;;  %v4040_v19 = vld [vmem:[%s4681_s12 + $0x358] sm:$0xf0] }
 0x317   : > { %v5285_v59 = vpop.f32.mrf.mxu3  ;;  %v2585_v12 = vpop.f32.mrf.mxu2  ;;  %v3614_v35 = vor.u32 %v4040_v19, %v3613_v39 }
 0x318   : > { %5705 = vst [vmem:[#allocation63_spill] sm:$0xff] %v5285_v59  ;;  %v2042_v54 = vpop.f32.mrf.mxu0 }
 0x319   : > { %v2311_v5 = vpop.f32.mrf.mxu1 }
 0x31a   : > { %v2312_v14 = vadd.f32 %v2311_v5, %v2042_v54  ;;  %v3593_v54 = vld [vmem:[%s4681_s12 + $0x330] sm:$0xf]  ;;  %v3595_v5 = vld [vmem:[%s4681_s12 + $0x33c] sm:$0xf0] }
 0x31b   : > { %2081 = vmatmul.bf16.gmra.mxu0 %v3582_v26 }
 0x31c   : > { %v5287_v45 = vadd.f32 %v2580_v58, %v2312_v14  ;;  %2350 = vmatmul.bf16.gmra.mxu1 %v3586_v48  ;;  %3927 = vmatmul.msk.bf16.gmra.mxu3 %vm1751_vm0, %v3770_v20  ;;  %v4036_v48 = vld [vmem:[%s4681_s12 + $0x338] sm:$0xf0]  ;;  %v4035_v20 = vld [vmem:[%s4681_s12 + $0x334] sm:$0xf]  ;;  %v3781_v14 = vld [vmem:[%s4681_s12 + $0x4a0] sm:$0xf] }
 0x31d   : > { %v3594_v19 = vor.u32 %v4036_v48, %v3593_v54 }
 0x31e   : > { %5706 = vst [vmem:[#allocation64_spill] sm:$0xff] %v5287_v45 }
 0x31f   : > { %v5294_v3 = vpop.f32.mrf.mxu3  ;;  %v2587_v56 = vpop.f32.mrf.mxu2 }
 0x320   : > { %5707 = vst [vmem:[#allocation65_spill] sm:$0xff] %v5294_v3  ;;  %v2044_v6 = vpop.f32.mrf.mxu0 }
 0x321   : > { %v2313_v4 = vpop.f32.mrf.mxu1 }
 0x322   : > { %v2314_v58 = vadd.f32 %v2313_v4, %v2044_v6  ;;  %v3782_v4 = vor.u32 %v4082_v25, %v3781_v14 }
 0x324   : > { %v5296_v26 = vadd.f32 %v2582_v32, %v2314_v58  ;;  %3914 = vmatmul.msk.bf16.gmra.mxu2 %vm1751_vm0, %v3614_v35  ;;  %v3598_v32 = vor.u32 %v4035_v20, %v3595_v5 }
 0x326   : > { %5708 = vst [vmem:[#allocation66_spill] sm:$0xff] %v5296_v26  ;;  %v4043_v26 = vld [vmem:[%s4681_s12 + $0x370] sm:$0xf0] }
 0x327   : > { %v5307_v45 = vpop.f32.mrf.mxu3  ;;  %v2590_v39 = vpop.f32.mrf.mxu2  ;;  %v3626_v25 = vor.u32 %v4043_v26, %v3625_v60 }
 0x328   : > { %5709 = vst [vmem:[#allocation67_spill] sm:$0xff] %v5307_v45  ;;  %v2047_v6 = vpop.f32.mrf.mxu0 }
 0x329   : > { %v2316_v58 = vpop.f32.mrf.mxu1 }
 0x32a   : > { %v2317_v35 = vadd.f32 %v2316_v58, %v2047_v6  ;;  %v4038_v58 = vld [vmem:[%s4681_s12 + $0x34c] sm:$0xf] }
 0x32b   : > { %2086 = vmatmul.bf16.gmra.mxu0 %v3594_v19  ;;  %v4039_v19 = vld [vmem:[%s4681_s12 + $0x350] sm:$0xf0] }
 0x32c   : > { %v5309_v28 = vadd.f32 %v2585_v12, %v2317_v35  ;;  %2355 = vmatmul.bf16.gmra.mxu1 %v3598_v32  ;;  %3928 = vmatmul.msk.bf16.gmra.mxu3 %vm1751_vm0, %v3782_v4  ;;  %v3605_v12 = vld [vmem:[%s4681_s12 + $0x348] sm:$0xf]  ;;  %v3607_v32 = vld [vmem:[%s4681_s12 + $0x354] sm:$0xf0]  ;;  %v4085_v35 = vld [vmem:[%s4681_s12 + $0x4c0] sm:$0xf0] }
 0x32d   : > { %v3793_v4 = vld [vmem:[%s4681_s12 + $0x4b8] sm:$0xf]  ;;  %v3610_v59 = vor.u32 %v4038_v58, %v3607_v32 }
 0x32e   : > { %5710 = vst [vmem:[#allocation68_spill] sm:$0xff] %v5309_v28  ;;  %v3606_v28 = vor.u32 %v4039_v19, %v3605_v12  ;;  %v3794_v60 = vor.u32 %v4085_v35, %v3793_v4  ;;  %v4041_v4 = vld [vmem:[%s4681_s12 + $0x364] sm:$0xf]  ;;  %v3619_v35 = vld [vmem:[%s4681_s12 + $0x36c] sm:$0xf0] }
 0x32f   : > { %v2592_v54 = vpop.f32.mrf.mxu2  ;;  %v2660_v48 = vpop.f32.mrf.mxu3 }
 0x330   : > { %v2049_v20 = vpop.f32.mrf.mxu0 }
 0x331   : > { %v2318_v5 = vpop.f32.mrf.mxu1 }
 0x332   : > { %v2319_v14 = vadd.f32 %v2318_v5, %v2049_v20  ;;  %v4046_v5 = vld [vmem:[%s4681_s12 + $0x388] sm:$0xf0] }
 0x334   : > { %v5314_v6 = vadd.f32 %v2587_v56, %v2319_v14  ;;  %3915 = vmatmul.msk.bf16.gmra.mxu2 %vm1751_vm0, %v3626_v25  ;;  %v3637_v25 = vld [vmem:[%s4681_s12 + $0x380] sm:$0xf] }
 0x335   : > { %v3638_v58 = vor.u32 %v4046_v5, %v3637_v25 }
 0x336   : > { %5711 = vst [vmem:[#allocation69_spill] sm:$0xff] %v5314_v6 }
 0x337   : > { %v2595_v50 = vpop.f32.mrf.mxu2  ;;  %v2662_v45 = vpop.f32.mrf.mxu3 }
 0x338   : > { %v2052_v3 = vpop.f32.mrf.mxu0 }
 0x339   : > { %v2321_v26 = vpop.f32.mrf.mxu1 }
 0x33a   : > { %v2322_v56 = vadd.f32 %v2321_v26, %v2052_v3  ;;  %v4088_v26 = vld [vmem:[%s4681_s12 + $0x4d8] sm:$0xf0] }
 0x33b   : > { %2091 = vmatmul.bf16.gmra.mxu0 %v3606_v28 }
 0x33c   : > { %v5323_v20 = vadd.f32 %v2590_v39, %v2322_v56  ;;  %2360 = vmatmul.bf16.gmra.mxu1 %v3610_v59  ;;  %3929 = vmatmul.msk.bf16.gmra.mxu3 %vm1751_vm0, %v3794_v60  ;;  %v3617_v39 = vld [vmem:[%s4681_s12 + $0x360] sm:$0xf]  ;;  %v4042_v59 = vld [vmem:[%s4681_s12 + $0x368] sm:$0xf0]  ;;  %v3805_v60 = vld [vmem:[%s4681_s12 + $0x4d0] sm:$0xf] }
 0x33d   : > { %v3618_v25 = vor.u32 %v4042_v59, %v3617_v39  ;;  %v5351_v39 = vld [vmem:[%s5606_s2] ss:$0 sm:$0xff] }
 0x33e   : > { %5712 = vst [vmem:[#allocation70_spill] sm:$0xff] %v5323_v20 }
 0x33f   : > { %v2597_v14 = vpop.f32.mrf.mxu2  ;;  %v5328_v12 = vpop.f32.mrf.mxu3 }
 0x340   : > { %v2054_v19 = vpop.f32.mrf.mxu0 }
 0x341   : > { %v2323_v3 = vpop.f32.mrf.mxu1 }
 0x342   : > { %v2324_v32 = vadd.f32 %v2323_v3, %v2054_v19  ;;  %v3622_v19 = vor.u32 %v4041_v4, %v3619_v35  ;;  %v3650_v4 = vor.u32 %v4049_v61, %v3649_v27 }
 0x344   : > { %v5330_v28 = vadd.f32 %v2592_v54, %v2324_v32  ;;  %3916 = vmatmul.msk.bf16.gmra.mxu2 %vm1751_vm0, %v3638_v58  ;;  %v3806_v54 = vor.u32 %v4088_v26, %v3805_v60  ;;  %v2392_v58 = vadd.f32 %v5076_v41, %v4845_v10 }
 0x346   : > { %5713 = vst [vmem:[#allocation71_spill] sm:$0xff] %v5330_v28  ;;  %v2661_v28 = vadd.f32 %v2660_v48, %v2392_v58 }
 0x347   : > { %v2600_v56 = vpop.f32.mrf.mxu2  ;;  %v5341_v20 = vpop.f32.mrf.mxu3 }
 0x348   : > { %v2057_v5 = vpop.f32.mrf.mxu0 }
 0x349   : > { %v2326_v3 = vpop.f32.mrf.mxu1 }
 0x34a   : > { %v2327_v32 = vadd.f32 %v2326_v3, %v2057_v5 }
 0x34b   : > { %2096 = vmatmul.bf16.gmra.mxu0 %v3618_v25 }
 0x34c   : > { %v2596_v6 = vadd.f32 %v2595_v50, %v2327_v32  ;;  %2365 = vmatmul.bf16.gmra.mxu1 %v3622_v19  ;;  %3930 = vmatmul.msk.bf16.gmra.mxu3 %vm1751_vm0, %v3806_v54  ;;  %v5714_v50 = vmax.f32 %v4841_v7, %v5070_v47  ;;  %v3629_v19 = vld [vmem:[%s4681_s12 + $0x378] sm:$0xf]  ;;  %v4045_v47 = vld [vmem:[%s4681_s12 + $0x380] sm:$0xf0]  ;;  %v4044_v7 = vld [vmem:[%s4681_s12 + $0x37c] sm:$0xf] }
 0x34d   : > { %v3630_v27 = vor.u32 %v4045_v47, %v3629_v19  ;;  %v2399_v19 = vadd.f32 %v5110_v17, %v4873_v53  ;;  %v5717_v17 = vmax.f32 %v4864_v44, %v5099_v63 }
 0x34e   : > { %v2745_v36 = vmax.f32 %v2596_v6, %v2661_v28  ;;  %v2394_v6 = vadd.f32 %v5089_v23, %v4856_v24  ;;  %v3631_v23 = vld [vmem:[%s4681_s12 + $0x384] sm:$0xf0] }
 0x34f   : > { %v2602_v10 = vpop.f32.mrf.mxu2  ;;  %v5353_v41 = vpop.f32.mrf.mxu3  ;;  %v3634_v58 = vor.u32 %v4044_v7, %v3631_v23  ;;  %v2668_v23 = vadd.f32 %v5341_v20, %v2399_v19 }
 0x350   : > { %v2771_v48 = vmax.f32 %v5714_v50, %v2745_v36  ;;  %v2059_v59 = vpop.f32.mrf.mxu0  ;;  %v2663_v26 = vadd.f32 %v2662_v45, %v2394_v6  ;;  %v2397_v50 = vadd.f32 %v5097_v21, %v4862_v37  ;;  %v5716_v37 = vmax.f32 %v4858_v34, %v5091_v30  ;;  %v4047_v34 = vld [vmem:[%s4681_s12 + $0x394] sm:$0xf]  ;;  %v3643_v30 = vld [vmem:[%s4681_s12 + $0x39c] sm:$0xf0] }
 0x351   : > { %v2328_v35 = vpop.f32.mrf.mxu1 }
 0x352   : > { %v2801_v28 = vadd.f32 %v5351_v39, %v2771_v48  ;;  %v2329_v60 = vadd.f32 %v2328_v35, %v2059_v59 }
 0x354   : > { %v2827_v25 = vmax.f32 %v2801_v28, 0.0  ;;  %v2598_v5 = vadd.f32 %v2597_v14, %v2329_v60  ;;  %3917 = vmatmul.msk.bf16.gmra.mxu2 %vm1751_vm0, %v3650_v4  ;;  %v5715_v14 = vmax.f32 %v4847_v16, %v5078_v57  ;;  %v2666_v4 = vadd.f32 %v5328_v12, %v2397_v50  ;;  %v3661_v28 = vld [vmem:[%s4681_s12 + $0x3b0] sm:$0xf]  ;;  %v4052_v60 = vld [vmem:[%s4681_s12 + $0x3b8] sm:$0xf0] }
 0x355   : > { %v3646_v50 = vor.u32 %v4047_v34, %v3643_v30 }
 0x356   : > { %v2853_v24 = vpack.c.bf16 %v2827_v25, %v2827_v25  ;;  %v2746_v61 = vmax.f32 %v2598_v5, %v2663_v26 }
 0x357   : > { %v2605_v36 = vpop.f32.mrf.mxu2  ;;  %v5371_v45 = vpop.f32.mrf.mxu3 }
 0x358   : > { %2880 = vst.msk [vmem:[%s5367_s27 + $0x10] sm:$0xf] %vm2875_vm1, %v2853_v24  ;;  %v2772_v54 = vmax.f32 %v5715_v14, %v2746_v61  ;;  %v2062_v3 = vpop.f32.mrf.mxu0  ;;  %v4048_v14 = vld [vmem:[%s4681_s12 + $0x398] sm:$0xf0] }
 0x359   : > { %v2331_v32 = vpop.f32.mrf.mxu1 }
 0x35a   : > { %v2802_v48 = vadd.f32 %v5351_v39, %v2772_v54  ;;  %v2332_v59 = vadd.f32 %v2331_v32, %v2062_v3 }
 0x35b   : > { %2101 = vmatmul.bf16.gmra.mxu0 %v3630_v27  ;;  %v3641_v27 = vld [vmem:[%s4681_s12 + $0x390] sm:$0xf] }
 0x35c   : > { %v2828_v35 = vmax.f32 %v2802_v48, 0.0  ;;  %v2601_v6 = vadd.f32 %v2600_v56, %v2332_v59  ;;  %2370 = vmatmul.bf16.gmra.mxu1 %v3634_v58  ;;  %v3662_v56 = vor.u32 %v4052_v60, %v3661_v28  ;;  %v3642_v53 = vor.u32 %v4048_v14, %v3641_v27 }
 0x35d   : > { %v2402_v59 = vadd.f32 %v5118_v8, %v4879_v2  ;;  %v5718_v2 = vmax.f32 %v4875_v62, %v5112_v46  ;;  %v5719_v46 = vmax.f32 %v4881_v9, %v5120_v51  ;;  %v5720_v9 = vmax.f32 %v4892_v29, %v5133_v49  ;;  %v5721_v29 = vld [vmem:[#allocation47_spill] sm:$0xff] }
 0x35e   : > { %v2854_v16 = vpack.c.bf16 %v2828_v35, %v2828_v35  ;;  %v2747_v57 = vmax.f32 %v2601_v6, %v2666_v4  ;;  %v5722_v49 = vmax.f32 %v4898_v42, %v5721_v29  ;;  %v5724_v42 = vld [vmem:[#allocation11_spill] sm:$0xff] }
 0x35f   : > { %v2607_v26 = vpop.f32.mrf.mxu2  ;;  %v5384_v25 = vpop.f32.mrf.mxu3  ;;  %v2671_v6 = vadd.f32 %v5353_v41, %v2402_v59  ;;  %v2404_v41 = vadd.f32 %v5131_v11, %v4890_v18 }
 0x360   : > { %2881 = vst.msk [vmem:[%s5367_s27 + $0x14] sm:$0xf] %vm2875_vm1, %v2854_v16  ;;  %v2773_v21 = vmax.f32 %v5716_v37, %v2747_v57  ;;  %v2064_v12 = vpop.f32.mrf.mxu0  ;;  %v3673_v16 = vld [vmem:[%s4681_s12 + $0x3c8] sm:$0xf]  ;;  %v4055_v57 = vld [vmem:[%s4681_s12 + $0x3d0] sm:$0xf0] }
 0x361   : > { %v2333_v5 = vpop.f32.mrf.mxu1 }
 0x362   : > { %v2803_v47 = vadd.f32 %v5351_v39, %v2773_v21  ;;  %v2334_v7 = vadd.f32 %v2333_v5, %v2064_v12 }
 0x364   : > { %v2829_v24 = vmax.f32 %v2803_v47, 0.0  ;;  %v2603_v61 = vadd.f32 %v2602_v10, %v2334_v7  ;;  %3918 = vmatmul.msk.bf16.gmra.mxu2 %vm1751_vm0, %v3662_v56  ;;  %v3674_v56 = vor.u32 %v4055_v57, %v3673_v16  ;;  %v2673_v47 = vadd.f32 %v5371_v45, %v2404_v41  ;;  %v5725_v41 = vld [vmem:[#allocation48_spill] sm:$0xff] }
 0x365   : > { %v2407_v45 = vadd.f32 %v5140_v40, %v4896_v33  ;;  %v2409_v33 = vadd.f32 %v5153_v43, %v4907_v52  ;;  %v5723_v52 = vld [vmem:[#allocation12_spill] sm:$0xff] }
 0x366   : > { %v2855_v54 = vpack.c.bf16 %v2829_v24, %v2829_v24  ;;  %v2748_v3 = vmax.f32 %v2603_v61, %v2668_v23  ;;  %v2412_v43 = vadd.f32 %v5162_v1, %v5723_v52  ;;  %v5727_v1 = vld [vmem:[#allocation14_spill] sm:$0xff] }
 0x367   : > { %v2610_v58 = vpop.f32.mrf.mxu2  ;;  %v2677_v32 = vpop.f32.mrf.mxu3  ;;  %v2676_v30 = vadd.f32 %v5384_v25, %v2407_v45 }
 0x368   : > { %2882 = vst.msk [vmem:[%s5367_s27 + $0x18] sm:$0xf] %vm2875_vm1, %v2855_v54  ;;  %v2774_v20 = vmax.f32 %v5717_v17, %v2748_v3  ;;  %v2067_v10 = vpop.f32.mrf.mxu0 }
 0x369   : > { %v2336_v48 = vpop.f32.mrf.mxu1 }
 0x36a   : > { %v2804_v4 = vadd.f32 %v5351_v39, %v2774_v20  ;;  %v2337_v35 = vadd.f32 %v2336_v48, %v2067_v10 }
 0x36b   : > { %2106 = vmatmul.bf16.gmra.mxu0 %v3642_v53 }
 0x36c   : > { %v2830_v28 = vmax.f32 %v2804_v4, 0.0  ;;  %v2606_v60 = vadd.f32 %v2605_v36, %v2337_v35  ;;  %2375 = vmatmul.bf16.gmra.mxu1 %v3646_v50 }
 0x36e   : > { %v2856_v44 = vpack.c.bf16 %v2830_v28, %v2830_v28  ;;  %v2749_v63 = vmax.f32 %v2606_v60, %v2671_v6 }
 0x36f   : > { %v2612_v37 = vpop.f32.mrf.mxu2  ;;  %v2680_v21 = vpop.f32.mrf.mxu3 }
 0x370   : > { %2883 = vst.msk [vmem:[%s5367_s27 + $0x1c] sm:$0xf] %vm2875_vm1, %v2856_v44  ;;  %v2775_v8 = vmax.f32 %v5718_v2, %v2749_v63  ;;  %v2069_v12 = vpop.f32.mrf.mxu0  ;;  %v2681_v63 = vadd.f32 %v2680_v21, %v2412_v43 }
 0x371   : > { %v2338_v5 = vpop.f32.mrf.mxu1 }
 0x372   : > { %v2805_v36 = vadd.f32 %v5351_v39, %v2775_v8  ;;  %v2339_v19 = vadd.f32 %v2338_v5, %v2069_v12 }
 0x374   : > { %v2831_v7 = vmax.f32 %v2805_v36, 0.0  ;;  %v2608_v23 = vadd.f32 %v2607_v26, %v2339_v19  ;;  %3919 = vmatmul.msk.bf16.gmra.mxu2 %vm1751_vm0, %v3674_v56  ;;  %v5726_v36 = vmax.f32 %v5724_v42, %v5725_v41  ;;  %v5739_v42 = vld [vmem:[#allocation20_spill] sm:$0xff] }
 0x376   : > { %v2857_v24 = vpack.c.bf16 %v2831_v7, %v2831_v7  ;;  %v2750_v61 = vmax.f32 %v2608_v23, %v2673_v47  ;;  %v2414_v23 = vadd.f32 %v5175_v22, %v5727_v1  ;;  %v5731_v22 = vld [vmem:[#allocation16_spill] sm:$0xff] }
 0x377   : > { %v2615_v62 = vpop.f32.mrf.mxu2  ;;  %v2682_v11 = vpop.f32.mrf.mxu3 }
 0x378   : > { %2884 = vst.msk [vmem:[%s5367_s27 + $0x20] sm:$0xf] %vm2875_vm1, %v2857_v24  ;;  %v2776_v27 = vmax.f32 %v5719_v46, %v2750_v61  ;;  %v2072_v18 = vpop.f32.mrf.mxu0  ;;  %v2683_v61 = vadd.f32 %v2682_v11, %v2414_v23 }
 0x379   : > { %v2341_v14 = vpop.f32.mrf.mxu1 }
 0x37a   : > { %v2806_v26 = vadd.f32 %v5351_v39, %v2776_v27  ;;  %v2342_v34 = vadd.f32 %v2341_v14, %v2072_v18 }
 0x37c   : > { %v2832_v54 = vmax.f32 %v2806_v26, 0.0  ;;  %v2611_v3 = vadd.f32 %v2610_v58, %v2342_v34  ;;  %v2678_v58 = vadd.f32 %v2677_v32, %v2409_v33  ;;  %v5728_v26 = vld [vmem:[#allocation13_spill] sm:$0xff] }
 0x37d   : > { %v5729_v34 = vld [vmem:[#allocation49_spill] sm:$0xff] }
 0x37e   : > { %v2858_v53 = vpack.c.bf16 %v2832_v54, %v2832_v54  ;;  %v2751_v17 = vmax.f32 %v2611_v3, %v2676_v30  ;;  %v5730_v30 = vmax.f32 %v5728_v26, %v5729_v34 }
 0x37f   : > { %v2617_v20 = vpop.f32.mrf.mxu2  ;;  %v2685_v48 = vpop.f32.mrf.mxu3 }
 0x380   : > { %2885 = vst.msk [vmem:[%s5367_s27 + $0x24] sm:$0xf] %vm2875_vm1, %v2858_v53  ;;  %v2777_v51 = vmax.f32 %v5720_v9, %v2751_v17  ;;  %v2074_v10 = vpop.f32.mrf.mxu0  ;;  %v2417_v17 = vadd.f32 %v5184_v31, %v5731_v22  ;;  %v5735_v31 = vld [vmem:[#allocation18_spill] sm:$0xff] }
 0x381   : > { %v2343_v50 = vpop.f32.mrf.mxu1 }
 0x382   : > { %v2807_v40 = vadd.f32 %v5351_v39, %v2777_v51  ;;  %v2344_v25 = vadd.f32 %v2343_v50, %v2074_v10 }
 0x384   : > { %v2833_v59 = vmax.f32 %v2807_v40, 0.0  ;;  %v2613_v4 = vadd.f32 %v2612_v37, %v2344_v25  ;;  %v5732_v25 = vld [vmem:[#allocation15_spill] sm:$0xff] }
 0x386   : > { %v2859_v35 = vpack.c.bf16 %v2833_v59, %v2833_v59  ;;  %v2752_v6 = vmax.f32 %v2613_v4, %v2678_v58  ;;  %v5733_v58 = vld [vmem:[#allocation50_spill] sm:$0xff] }
 0x387   : > { %v2620_v28 = vpop.f32.mrf.mxu2  ;;  %v2687_v8 = vpop.f32.mrf.mxu3  ;;  %v5734_v59 = vmax.f32 %v5732_v25, %v5733_v58 }
 0x388   : > { %2886 = vst.msk [vmem:[%s5367_s27 + $0x28] sm:$0xf] %vm2875_vm1, %v2859_v35  ;;  %v2778_v60 = vmax.f32 %v5722_v49, %v2752_v6  ;;  %v2077_v16 = vpop.f32.mrf.mxu0  ;;  %v2419_v49 = vadd.f32 %v5197_v0, %v5735_v31  ;;  %v2422_v0 = vadd.f32 %v5206_v13, %v5739_v42  ;;  %v5743_v13 = vld [vmem:[#allocation22_spill] sm:$0xff]  ;;  %v5748_v31 = vld [vmem:[#allocation23_spill] sm:$0xff] }
 0x389   : > { %v2346_v57 = vpop.f32.mrf.mxu1  ;;  %v5753_v42 = vld [vmem:[#allocation55_spill] sm:$0xff] }
 0x38a   : > { %v2808_v44 = vadd.f32 %v5351_v39, %v2778_v60  ;;  %v2347_v32 = vadd.f32 %v2346_v57, %v2077_v16 }
 0x38c   : > { %v2834_v37 = vmax.f32 %v2808_v44, 0.0  ;;  %v2616_v2 = vadd.f32 %v2615_v62, %v2347_v32  ;;  %v5736_v32 = vld [vmem:[#allocation17_spill] sm:$0xff] }
 0x38e   : > { %v2860_v12 = vpack.c.bf16 %v2834_v37, %v2834_v37  ;;  %v2753_v56 = vmax.f32 %v2616_v2, %v2681_v63  ;;  %v5737_v63 = vld [vmem:[#allocation51_spill] sm:$0xff] }
 0x38f   : > { %v2622_v5 = vpop.f32.mrf.mxu2  ;;  %v2690_v14 = vpop.f32.mrf.mxu3  ;;  %v5738_v37 = vmax.f32 %v5736_v32, %v5737_v63 }
 0x390   : > { %2887 = vst.msk [vmem:[%s5367_s27 + $0x2c] sm:$0xf] %vm2875_vm1, %v2860_v12  ;;  %v2779_v19 = vmax.f32 %v5726_v36, %v2753_v56  ;;  %v2079_v47 = vpop.f32.mrf.mxu0 }
 0x391   : > { %v2348_v7 = vpop.f32.mrf.mxu1 }
 0x392   : > { %v2809_v21 = vadd.f32 %v5351_v39, %v2779_v19  ;;  %v2349_v24 = vadd.f32 %v2348_v7, %v2079_v47 }
 0x394   : > { %v2835_v62 = vmax.f32 %v2809_v21, 0.0  ;;  %v2618_v46 = vadd.f32 %v2617_v20, %v2349_v24  ;;  %v2686_v20 = vadd.f32 %v2685_v48, %v2417_v17  ;;  %v5740_v21 = vld [vmem:[#allocation19_spill] sm:$0xff]  ;;  %v5741_v24 = vld [vmem:[#allocation52_spill] sm:$0xff]  ;;  %v5744_v17 = vld [vmem:[#allocation21_spill] sm:$0xff] }
 0x396   : > { %v2861_v27 = vpack.c.bf16 %v2835_v62, %v2835_v62  ;;  %v2754_v18 = vmax.f32 %v2618_v46, %v2683_v61  ;;  %v5742_v61 = vmax.f32 %v5740_v21, %v5741_v24 }
 0x397   : > { %v2625_v45 = vpop.f32.mrf.mxu2  ;;  %v2692_v6 = vpop.f32.mrf.mxu3 }
 0x398   : > { %2888 = vst.msk [vmem:[%s5367_s27 + $0x30] sm:$0xf] %vm2875_vm1, %v2861_v27  ;;  %v2780_v54 = vmax.f32 %v5730_v30, %v2754_v18  ;;  %v2082_v3 = vpop.f32.mrf.mxu0  ;;  %v2424_v18 = vadd.f32 %v5219_v38, %v5743_v13  ;;  %v5747_v38 = vld [vmem:[#allocation24_spill] sm:$0xff] }
 0x399   : > { %v2351_v53 = vpop.f32.mrf.mxu1  ;;  %v5758_v13 = vld [vmem:[#allocation56_spill] sm:$0xff] }
 0x39a   : > { %v2810_v11 = vadd.f32 %v5351_v39, %v2780_v54  ;;  %v2352_v9 = vadd.f32 %v2351_v53, %v2082_v3  ;;  %v2693_v34 = vadd.f32 %v2692_v6, %v2424_v18 }
 0x39c   : > { %v2836_v51 = vmax.f32 %v2810_v11, 0.0  ;;  %v2621_v10 = vadd.f32 %v2620_v28, %v2352_v9  ;;  %v2688_v28 = vadd.f32 %v2687_v8, %v2419_v49  ;;  %v5745_v11 = vld [vmem:[#allocation53_spill] sm:$0xff]  ;;  %v5749_v49 = vld [vmem:[#allocation54_spill] sm:$0xff] }
 0x39d   : > { %v5746_v9 = vmax.f32 %v5744_v17, %v5745_v11 }
 0x39e   : > { %v2862_v50 = vpack.c.bf16 %v2836_v51, %v2836_v51  ;;  %v2755_v33 = vmax.f32 %v2621_v10, %v2686_v20 }
 0x39f   : > { %v2627_v40 = vpop.f32.mrf.mxu2  ;;  %v2695_v36 = vpop.f32.mrf.mxu3 }
 0x3a0   : > { %2889 = vst.msk [vmem:[%s5367_s27 + $0x34] sm:$0xf] %vm2875_vm1, %v2862_v50  ;;  %v2781_v4 = vmax.f32 %v5734_v59, %v2755_v33  ;;  %v2084_v35 = vpop.f32.mrf.mxu0  ;;  %v2427_v50 = vadd.f32 %v5228_v55, %v5747_v38  ;;  %v5751_v55 = vld [vmem:[#allocation26_spill] sm:$0xff]  ;;  %v5762_v38 = vld [vmem:[#allocation29_spill] sm:$0xff] }
 0x3a1   : > { %v2353_v29 = vpop.f32.mrf.mxu1 }
 0x3a2   : > { %v2811_v48 = vadd.f32 %v5351_v39, %v2781_v4  ;;  %v2354_v60 = vadd.f32 %v2353_v29, %v2084_v35 }
 0x3a4   : > { %v2837_v16 = vmax.f32 %v2811_v48, 0.0  ;;  %v2623_v57 = vadd.f32 %v2622_v5, %v2354_v60  ;;  %v2691_v5 = vadd.f32 %v2690_v14, %v2422_v0  ;;  %v5750_v48 = vmax.f32 %v5748_v31, %v5749_v49 }
 0x3a6   : > { %v2863_v52 = vpack.c.bf16 %v2837_v16, %v2837_v16  ;;  %v2756_v43 = vmax.f32 %v2623_v57, %v2688_v28  ;;  %v2429_v57 = vadd.f32 %v5241_v15, %v5751_v55  ;;  %v5755_v15 = vld [vmem:[#allocation28_spill] sm:$0xff] }
 0x3a7   : > { %v2630_v44 = vpop.f32.mrf.mxu2  ;;  %v2697_v54 = vpop.f32.mrf.mxu3 }
 0x3a8   : > { %2890 = vst.msk [vmem:[%s5367_s27 + $0x38] sm:$0xf] %vm2875_vm1, %v2863_v52  ;;  %v2782_v2 = vmax.f32 %v5738_v37, %v2756_v43  ;;  %v2087_v12 = vpop.f32.mrf.mxu0 }
 0x3a9   : > { %v2356_v56 = vpop.f32.mrf.mxu1 }
 0x3aa   : > { %v2812_v41 = vadd.f32 %v5351_v39, %v2782_v2  ;;  %v2357_v8 = vadd.f32 %v2356_v56, %v2087_v12  ;;  %v5752_v56 = vld [vmem:[#allocation25_spill] sm:$0xff] }
 0x3ab   : > { %v5754_v0 = vmax.f32 %v5752_v56, %v5753_v42 }
 0x3ac   : > { %v2838_v19 = vmax.f32 %v2812_v41, 0.0  ;;  %v2626_v47 = vadd.f32 %v2625_v45, %v2357_v8 }
 0x3ae   : > { %v2864_v7 = vpack.c.bf16 %v2838_v19, %v2838_v19  ;;  %v2757_v1 = vmax.f32 %v2626_v47, %v2691_v5  ;;  %v5756_v19 = vld [vmem:[#allocation57_spill] sm:$0xff] }
 0x3af   : > { %v2632_v23 = vpop.f32.mrf.mxu2  ;;  %v2700_v6 = vpop.f32.mrf.mxu3  ;;  %v2432_v47 = vadd.f32 %v5756_v19, %v5755_v15 }
 0x3b0   : > { %2891 = vst.msk [vmem:[%s5367_s27 + $0x3c] sm:$0xf] %vm2875_vm1, %v2864_v7  ;;  %v2783_v62 = vmax.f32 %v5742_v61, %v2757_v1  ;;  %v2089_v46 = vpop.f32.mrf.mxu0 }
 0x3b1   : > { %v2358_v27 = vpop.f32.mrf.mxu1 }
 0x3b2   : > { %v2813_v26 = vadd.f32 %v5351_v39, %v2783_v62  ;;  %v2359_v14 = vadd.f32 %v2358_v27, %v2089_v46  ;;  %v5757_v27 = vld [vmem:[#allocation27_spill] sm:$0xff] }
 0x3b3   : > { %v5759_v18 = vmax.f32 %v5757_v27, %v5758_v13 }
 0x3b4   : > { %v2839_v45 = vmax.f32 %v2813_v26, 0.0  ;;  %v2628_v30 = vadd.f32 %v2627_v40, %v2359_v14  ;;  %v2696_v40 = vadd.f32 %v2695_v36, %v2427_v50  ;;  %v5763_v50 = vld [vmem:[#allocation58_spill] sm:$0xff] }
 0x3b6   : > { %v2865_v3 = vpack.c.bf16 %v2839_v45, %v2839_v45  ;;  %v2758_v53 = vmax.f32 %v2628_v30, %v2693_v34  ;;  %v5760_v45 = vld [vmem:[#allocation30_spill] sm:$0xff]  ;;  %v5761_v30 = vld [vmem:[#allocation59_spill] sm:$0xff] }
 0x3b7   : > { %v2635_v22 = vpop.f32.mrf.mxu2  ;;  %v2702_v36 = vpop.f32.mrf.mxu3 }
 0x3b8   : > { %2892 = vst.msk [vmem:[%s5367_s27 + $0x40] sm:$0xf] %vm2875_vm1, %v2865_v3  ;;  %v2784_v20 = vmax.f32 %v5746_v9, %v2758_v53  ;;  %v2092_v51 = vpop.f32.mrf.mxu0 }
 0x3b9   : > { %v2361_v10 = vpop.f32.mrf.mxu1 }
 0x3ba   : > { %v2814_v33 = vadd.f32 %v5351_v39, %v2784_v20  ;;  %v2362_v25 = vadd.f32 %v2361_v10, %v2092_v51 }
 0x3bc   : > { %v2840_v58 = vmax.f32 %v2814_v33, 0.0  ;;  %v2631_v59 = vadd.f32 %v2630_v44, %v2362_v25  ;;  %v2698_v44 = vadd.f32 %v2697_v54, %v2429_v57  ;;  %v2434_v54 = vadd.f32 %v5761_v30, %v5760_v45  ;;  %v5767_v57 = vld [vmem:[#allocation31_spill] sm:$0xff] }
 0x3bd   : > { %v5764_v33 = vmax.f32 %v5762_v38, %v5763_v50 }
 0x3be   : > { %v2866_v4 = vpack.c.bf16 %v2840_v58, %v2840_v58  ;;  %v2759_v35 = vmax.f32 %v2631_v59, %v2696_v40  ;;  %v5765_v59 = vld [vmem:[#allocation32_spill] sm:$0xff] }
 0x3bf   : > { %v2637_v29 = vpop.f32.mrf.mxu2  ;;  %v2705_v17 = vpop.f32.mrf.mxu3 }
 0x3c0   : > { %2893 = vst.msk [vmem:[%s5367_s27 + $0x44] sm:$0xf] %vm2875_vm1, %v2866_v4  ;;  %v2785_v60 = vmax.f32 %v5750_v48, %v2759_v35  ;;  %v2094_v28 = vpop.f32.mrf.mxu0  ;;  %v5766_v4 = vld [vmem:[#allocation61_spill] sm:$0xff] }
 0x3c1   : > { %v2363_v16 = vpop.f32.mrf.mxu1  ;;  %v2437_v35 = vadd.f32 %v5766_v4, %v5765_v59  ;;  %v5785_v59 = vld [vmem:[#allocation35_spill] sm:$0xff]  ;;  %v5786_v4 = vld [vmem:[#allocation64_spill] sm:$0xff] }
 0x3c2   : > { %v2815_v52 = vadd.f32 %v5351_v39, %v2785_v60  ;;  %v2364_v43 = vadd.f32 %v2363_v16, %v2094_v28 }
 0x3c3   : > { %v2706_v49 = vadd.f32 %v2705_v17, %v2437_v35  ;;  %v5781_v17 = vld [vmem:[#allocation39_spill] sm:$0xff]  ;;  %v5787_v35 = vmax.f32 %v5785_v59, %v5786_v4 }
 0x3c4   : > { %v2841_v32 = vmax.f32 %v2815_v52, 0.0  ;;  %v2633_v63 = vadd.f32 %v2632_v23, %v2364_v43  ;;  %v2701_v23 = vadd.f32 %v2700_v6, %v2432_v47  ;;  %v5768_v52 = vld [vmem:[#allocation60_spill] sm:$0xff] }
 0x3c5   : > { %v5769_v43 = vmax.f32 %v5767_v57, %v5768_v52  ;;  %v5790_v52 = vld [vmem:[#allocation69_spill] sm:$0xff] }
 0x3c6   : > { %v2867_v37 = vpack.c.bf16 %v2841_v32, %v2841_v32  ;;  %v2760_v2 = vmax.f32 %v2633_v63, %v2698_v44 }
 0x3c7   : > { %v2640_v12 = vpop.f32.mrf.mxu2  ;;  %v2707_v60 = vpop.f32.mrf.mxu3 }
 0x3c8   : > { %2894 = vst.msk [vmem:[%s5367_s27 + $0x48] sm:$0xf] %vm2875_vm1, %v2867_v37  ;;  %v2786_v41 = vmax.f32 %v5754_v0, %v2760_v2  ;;  %v2097_v8 = vpop.f32.mrf.mxu0  ;;  %v5770_v37 = vld [vmem:[#allocation34_spill] sm:$0xff]  ;;  %v5771_v2 = vld [vmem:[#allocation63_spill] sm:$0xff] }
 0x3c9   : > { %v2366_v5 = vpop.f32.mrf.mxu1  ;;  %v2439_v56 = vadd.f32 %v5771_v2, %v5770_v37  ;;  %v5791_v37 = vld [vmem:[#allocation5_spill] sm:$0xff] }
 0x3ca   : > { %v2816_v7 = vadd.f32 %v5351_v39, %v2786_v41  ;;  %v2367_v1 = vadd.f32 %v2366_v5, %v2097_v8  ;;  %v5773_v5 = vld [vmem:[#allocation40_spill] sm:$0xff]  ;;  %v5792_v2 = vld [vmem:[#allocation41_spill] sm:$0xff] }
 0x3cc   : > { %v2842_v21 = vmax.f32 %v2816_v7, 0.0  ;;  %v2636_v24 = vadd.f32 %v2635_v22, %v2367_v1  ;;  %v2703_v22 = vadd.f32 %v2702_v36, %v2434_v54  ;;  %v5772_v36 = vld [vmem:[#allocation4_spill] sm:$0xff] }
 0x3cd   : > { %v2382_v15 = vadd.f32 %v5773_v5, %v5772_v36 }
 0x3ce   : > { %v2868_v61 = vpack.c.bf16 %v2842_v21, %v2842_v21  ;;  %v2761_v62 = vmax.f32 %v2636_v24, %v2701_v23  ;;  %v5774_v23 = vld [vmem:[#allocation33_spill] sm:$0xff]  ;;  %v5775_v21 = vld [vmem:[#allocation62_spill] sm:$0xff] }
 0x3cf   : > { %v2642_v46 = vpop.f32.mrf.mxu2  ;;  %v2710_v7 = vpop.f32.mrf.mxu3  ;;  %v5776_v24 = vmax.f32 %v5774_v23, %v5775_v21 }
 0x3d0   : > { %2895 = vst.msk [vmem:[%s5367_s27 + $0x4c] sm:$0xf] %vm2875_vm1, %v2868_v61  ;;  %v2787_v26 = vmax.f32 %v5759_v18, %v2761_v62  ;;  %v2099_v14 = vpop.f32.mrf.mxu0  ;;  %v5777_v18 = vld [vmem:[#allocation36_spill] sm:$0xff] }
 0x3d1   : > { %v2368_v34 = vpop.f32.mrf.mxu1 }
 0x3d2   : > { %v2817_v3 = vadd.f32 %v5351_v39, %v2787_v26  ;;  %v2369_v53 = vadd.f32 %v2368_v34, %v2099_v14  ;;  %v5778_v26 = vld [vmem:[#allocation65_spill] sm:$0xff]  ;;  %v5779_v34 = vld [vmem:[#allocation68_spill] sm:$0xff] }
 0x3d4   : > { %v2843_v11 = vmax.f32 %v2817_v3, 0.0  ;;  %v2638_v9 = vadd.f32 %v2637_v29, %v2369_v53  ;;  %v5780_v53 = vld [vmem:[#allocation3_spill] sm:$0xff] }
 0x3d6   : > { %v2869_v20 = vpack.c.bf16 %v2843_v11, %v2843_v11  ;;  %v2762_v51 = vmax.f32 %v2638_v9, %v2703_v22  ;;  %v5782_v22 = vmax.f32 %v5780_v53, %v5781_v17 }
 0x3d7   : > { %v2645_v10 = vpop.f32.mrf.mxu2 }
 0x3d8   : > { %2896 = vst.msk [vmem:[%s5367_s27 + $0x50] sm:$0xf] %vm2875_vm1, %v2869_v20  ;;  %v2788_v25 = vmax.f32 %v5764_v33, %v2762_v51  ;;  %v2102_v40 = vpop.f32.mrf.mxu0  ;;  %v5783_v20 = vld [vmem:[#allocation6_spill] sm:$0xff] }
 0x3d9   : > { %v2371_v58 = vpop.f32.mrf.mxu1  ;;  %v5784_v51 = vld [vmem:[#allocation42_spill] sm:$0xff] }
 0x3da   : > { %v2818_v6 = vadd.f32 %v5351_v39, %v2788_v25  ;;  %v2372_v31 = vadd.f32 %v2371_v58, %v2102_v40  ;;  %v2384_v38 = vadd.f32 %v5784_v51, %v5783_v20  ;;  %v5806_v51 = vld [vmem:[#allocation9_spill] sm:$0xff] }
 0x3dc   : > { %v2844_v29 = vmax.f32 %v2818_v6, 0.0  ;;  %v2641_v48 = vadd.f32 %v2640_v12, %v2372_v31  ;;  %v2708_v12 = vadd.f32 %v2707_v60, %v2439_v56  ;;  %v2712_v60 = vpop.f32.mrf.mxu3  ;;  %v5793_v56 = vmax.f32 %v5791_v37, %v5792_v2 }
 0x3de   : > { %v2870_v28 = vpack.c.bf16 %v2844_v29, %v2844_v29  ;;  %v2763_v16 = vmax.f32 %v2641_v48, %v2706_v49  ;;  %v5788_v29 = vld [vmem:[#allocation38_spill] sm:$0xff] }
 0x3df   : > { %v2647_v55 = vpop.f32.mrf.mxu2 }
 0x3e0   : > { %2897 = vst.msk [vmem:[%s5367_s27 + $0x54] sm:$0xf] %vm2875_vm1, %v2870_v28  ;;  %v2789_v44 = vmax.f32 %v5769_v43, %v2763_v16  ;;  %v2104_v32 = vpop.f32.mrf.mxu0 }
 0x3e1   : > { %v2373_v63 = vpop.f32.mrf.mxu1 }
 0x3e2   : > { %v2819_v42 = vadd.f32 %v5351_v39, %v2789_v44  ;;  %v2374_v0 = vadd.f32 %v2373_v63, %v2104_v32 }
 0x3e4   : > { %v2845_v41 = vmax.f32 %v2819_v42, 0.0  ;;  %v2643_v8 = vadd.f32 %v2642_v46, %v2374_v0  ;;  %v2442_v46 = vadd.f32 %v5778_v26, %v5777_v18  ;;  %v5800_v18 = vld [vmem:[#allocation7_spill] sm:$0xff] }
 0x3e5   : > { %v5801_v26 = vld [vmem:[#allocation43_spill] sm:$0xff] }
 0x3e6   : > { %v2871_v19 = vpack.c.bf16 %v2845_v41, %v2845_v41  ;;  %v2764_v47 = vmax.f32 %v2643_v8, %v2708_v12  ;;  %v2711_v54 = vadd.f32 %v2710_v7, %v2442_v46  ;;  %v5794_v12 = vld [vmem:[#allocation8_spill] sm:$0xff]  ;;  %v5796_v7 = vld [vmem:[#allocation37_spill] sm:$0xff]  ;;  %v5802_v46 = vmax.f32 %v5800_v18, %v5801_v26 }
 0x3e7   : > { %v2650_v1 = vpop.f32.mrf.mxu2  ;;  %v5795_v41 = vld [vmem:[#allocation44_spill] sm:$0xff] }
 0x3e8   : > { %2898 = vst.msk [vmem:[%s5367_s27 + $0x58] sm:$0xf] %vm2875_vm1, %v2871_v19  ;;  %v2790_v61 = vmax.f32 %v5776_v24, %v2764_v47  ;;  %v2651_v62 = vadd.f32 %v2650_v1, %v2382_v15  ;;  %v2107_v27 = vpop.f32.mrf.mxu0  ;;  %v2387_v8 = vadd.f32 %v5795_v41, %v5794_v12  ;;  %v5797_v1 = vld [vmem:[#allocation66_spill] sm:$0xff] }
 0x3e9   : > { %v2376_v13 = vpop.f32.mrf.mxu1  ;;  %v5798_v23 = vmax.f32 %v5796_v7, %v5797_v1 }
 0x3ea   : > { %v2820_v14 = vadd.f32 %v5351_v39, %v2790_v61  ;;  %v2741_v45 = vmax.f32 %v5779_v34, %v2651_v62  ;;  %v2377_v30 = vadd.f32 %v2376_v13, %v2107_v27  ;;  %v5799_v62 = vld [vmem:[#allocation70_spill] sm:$0xff] }
 0x3eb   : > { %v5803_v34 = vld [vmem:[#allocation10_spill] sm:$0xff] }
 0x3ec   : > { %v2846_v3 = vmax.f32 %v2820_v14, 0.0  ;;  %v2767_v11 = vmax.f32 %v5782_v22, %v2741_v45  ;;  %v2646_v9 = vadd.f32 %v2645_v10, %v2377_v30  ;;  %v5789_v10 = vld [vmem:[#allocation67_spill] sm:$0xff]  ;;  %v5804_v45 = vld [vmem:[#allocation46_spill] sm:$0xff] }
 0x3ed   : > { %v2444_v48 = vadd.f32 %v5789_v10, %v5788_v29  ;;  %v2389_v30 = vadd.f32 %v5804_v45, %v5803_v34 }
 0x3ee   : > { %v2872_v50 = vpack.c.bf16 %v2846_v3, %v2846_v3  ;;  %v2797_v33 = vadd.f32 %v5351_v39, %v2767_v11  ;;  %v2765_v25 = vmax.f32 %v2646_v9, %v2711_v54  ;;  %v5805_v9 = vld [vmem:[#allocation71_spill] sm:$0xff] }
 0x3ef   : > { %v2652_v40 = vpop.f32.mrf.mxu2  ;;  %v2713_v32 = vadd.f32 %v2712_v60, %v2444_v48 }
 0x3f0   : > { %2899 = vst.msk [vmem:[%s5367_s27 + $0x5c] sm:$0xf] %vm2875_vm1, %v2872_v50  ;;  %v2823_v58 = vmax.f32 %v2797_v33, 0.0  ;;  %v2791_v6 = vmax.f32 %v5787_v35, %v2765_v25  ;;  %v2653_v31 = vadd.f32 %v2652_v40, %v2384_v38  ;;  %v2109_v49 = vpop.f32.mrf.mxu0  ;;  %v5807_v38 = vld [vmem:[#allocation45_spill] sm:$0xff] }
 0x3f1   : > { %v2378_v28 = vpop.f32.mrf.mxu1  ;;  %v5808_v50 = vmax.f32 %v5806_v51, %v5807_v38 }
 0x3f2   : > { %v2849_v16 = vpack.c.bf16 %v2823_v58, %v2823_v58  ;;  %v2821_v57 = vadd.f32 %v5351_v39, %v2791_v6  ;;  %v2742_v43 = vmax.f32 %v5790_v52, %v2653_v31  ;;  %v2379_v44 = vadd.f32 %v2378_v28, %v2109_v49 }
 0x3f4   : > { %2876 = vst.msk [vmem:[%s5367_s27] sm:$0xf] %vm2875_vm1, %v2849_v16  ;;  %v2847_v63 = vmax.f32 %v2821_v57, 0.0  ;;  %v2768_v42 = vmax.f32 %v5793_v56, %v2742_v43  ;;  %v2648_v0 = vadd.f32 %v2647_v55, %v2379_v44 }
 0x3f6   : > { %v2873_v36 = vpack.c.bf16 %v2847_v63, %v2847_v63  ;;  %v2798_v5 = vadd.f32 %v5351_v39, %v2768_v42  ;;  %v2766_v15 = vmax.f32 %v2648_v0, %v2713_v32 }
 0x3f7   : > { %v2655_v19 = vpop.f32.mrf.mxu2 }
 0x3f8   : > { %2900 = vst.msk [vmem:[%s5367_s27 + $0x60] sm:$0xf] %vm2875_vm1, %v2873_v36  ;;  %v2824_v47 = vmax.f32 %v2798_v5, 0.0  ;;  %v2792_v21 = vmax.f32 %v5798_v23, %v2766_v15  ;;  %v2656_v24 = vadd.f32 %v2655_v19, %v2387_v8 }
 0x3fa   : > { %v2850_v61 = vpack.c.bf16 %v2824_v47, %v2824_v47  ;;  %v2822_v55 = vadd.f32 %v5351_v39, %v2792_v21  ;;  %v2743_v27 = vmax.f32 %v5799_v62, %v2656_v24 }
 0x3fc   : > { %2877 = vst.msk [vmem:[%s5367_s27 + $0x4] sm:$0xf] %vm2875_vm1, %v2850_v61  ;;  %v2848_v13 = vmax.f32 %v2822_v55, 0.0  ;;  %v2769_v14 = vmax.f32 %v5802_v46, %v2743_v27 }
 0x3fe   : > { %v2874_v54 = vpack.c.bf16 %v2848_v13, %v2848_v13  ;;  %v2799_v3 = vadd.f32 %v5351_v39, %v2769_v14 }
 0x3ff   : > { %v2657_v53 = vpop.f32.mrf.mxu2 }
 0x400   : > { %2901 = vst.msk [vmem:[%s5367_s27 + $0x64] sm:$0xf] %vm2875_vm1, %v2874_v54  ;;  %v2825_v17 = vmax.f32 %v2799_v3, 0.0  ;;  %v2658_v22 = vadd.f32 %v2657_v53, %v2389_v30 }
 0x402   : > { %v2851_v11 = vpack.c.bf16 %v2825_v17, %v2825_v17  ;;  %v2744_v20 = vmax.f32 %v5805_v9, %v2658_v22 }
 0x404   : > { %2878 = vst.msk [vmem:[%s5367_s27 + $0x8] sm:$0xf] %vm2875_vm1, %v2851_v11  ;;  %v2770_v33 = vmax.f32 %v5808_v50, %v2744_v20 }
 0x406   : > { %v2800_v25 = vadd.f32 %v5351_v39, %v2770_v33 }
 0x408   : > { %v2826_v40 = vmax.f32 %v2800_v25, 0.0 }
 0x40a   : > { %v2852_v58 = vpack.c.bf16 %v2826_v40, %v2826_v40 }
 0x40c   : > { %2879 = vst.msk [vmem:[%s5367_s27 + $0xc] sm:$0xf] %vm2875_vm1, %v2852_v58 }
 0x40d PF: > { %p10_p9 = scmp.ge.s32.totalorder %s4215_s16, 4   ;;  %s5809_s12 = smov %s4172_s13 }
 0x40e   : > { %s5810_s13 = smov %s4224_s19  ;;  %s5811_s14 = smov %s4215_s16 }
 0x40f   :  { %12 = sbr.rel (!%p10_p9) target bundleno = 2 (0x2), region = 99 }

// kernel: critic_forward.8
= control target key start
LH: loop header
LB: loop body
LE: loop exit
PB: predicated region body
PF: predicated region fallthrough
CT: control target
= control target key end

     0   :  { %s2148_s12 = smov 0   ;;  %s2150_s13 = smov 0   ;;  %s2777_s0 = inlined_call_operand.vmem [shape: bf16[4,96,576], index: 0, kind: input, shape index: {}]   ;;  %s2778_s1 = inlined_call_operand.vmem [shape: bf16[576,64], index: 1, kind: input, shape index: {}]   ;;  %s2779_s2 = inlined_call_operand.vmem [shape: f32[1,64], index: 2, kind: input, shape index: {}]   ;;  %s2780_s3 = inlined_call_operand.vmem [shape: bf16[96,64], index: 3, kind: output, shape index: {}]  }
   0x1   :  { %s2152_s14 = smov 0  }
   0x2 LB: > { %s1502_s15 = sadd.s32 4294967295, %s2126_s14   ;;  %s2165_s16 = sadd.s32 1, %s2126_s14   ;;  %s2126_s14 = sphi %s2152_s14, %s2789_s14   ;;  %s2122_s13 = sphi %s2150_s13, %s2788_s13   ;;  %s2118_s12 = sphi %s2148_s12, %s2787_s12  }
   0x3   : > { %s17_s17 = ssub.s32 %s2126_s14, %s2165_s16  ;;  %s20_s18 = sadd.s32 1, %s2122_s13 }
   0x4   : > { %p18_p0 = scmp.eq.s32.totalorder %s17_s17, 0  ;;  %p27_p1 = scmp.ne.s32.totalorder %s2122_s13, %s2118_s12 }
   0x5   : > { %p28_p2 = scmp.eq.s32.totalorder %s2126_s14, 0  ;;  %p1505_p4 = scmp.ge.s32.totalorder %s2126_s14, 2 }
   0x6   : > { %s2174_s19 = scalar_select %p18_p0, %s2122_s13, %s20_s18  }
   0x7   : > { %p29_p3 = por %p28_p2, %p27_p1  ;;  %127 = sbr.rel (%p1505_p4) target bundleno = 90 (0x5a), region = 24 }
   0xc   : > { %130 = sbr.rel (!%p29_p3) target bundleno = 90 (0x5a), region = 28  ;;  %s132_s20 = sand.u32 (%p29_p3), 1, %s2122_s13  }
   0xd   : > { %s2075_s21 = smul.u32 (%p29_p3), 480, %s132_s20 }
   0xe   : > { %s2078_s22 = smul.u32 (%p29_p3), 120, %s2126_s14 }
   0xf   : > { %s2187_s26 = scalar_lea.vmem (%p29_p3), [#allocation2], %s2075_s21 }
  0x10   : > { %s2182_s25 = scalar_lea.vmem (%p29_p3), %s2777_s0, %s2078_s22 }
  0x11   : > { %v153_v0 = vld [vmem:[%s2182_s25] sm:$0xff]  ;;  %v155_v1 = vld [vmem:[%s2182_s25 + $0x8] sm:$0xff]  ;;  %v157_v2 = vld [vmem:[%s2182_s25 + $0x14] sm:$0xff] }
  0x12   : > { %154 = vst [vmem:[%s2187_s26] sm:$0xff] %v153_v0  ;;  %v159_v3 = vld [vmem:[%s2182_s25 + $0x1c] sm:$0xff]  ;;  %v161_v4 = vld [vmem:[%s2182_s25 + $0x28] sm:$0xff]  ;;  %v163_v5 = vld [vmem:[%s2182_s25 + $0x30] sm:$0xff] }
  0x13   : > { %156 = vst [vmem:[%s2187_s26 + $0x8] sm:$0xff] %v155_v1  ;;  %v165_v6 = vld [vmem:[%s2182_s25 + $0x3c] sm:$0xff]  ;;  %v167_v7 = vld [vmem:[%s2182_s25 + $0x44] sm:$0xff]  ;;  %v169_v8 = vld [vmem:[%s2182_s25 + $0x50] sm:$0xff] }
  0x14   : > { %158 = vst [vmem:[%s2187_s26 + $0x14] sm:$0xff] %v157_v2  ;;  %v171_v9 = vld [vmem:[%s2182_s25 + $0x58] sm:$0xff]  ;;  %v173_v10 = vld [vmem:[%s2182_s25 + $0x64] sm:$0xff]  ;;  %v175_v11 = vld [vmem:[%s2182_s25 + $0x6c] sm:$0xff] }
  0x15   : > { %160 = vst [vmem:[%s2187_s26 + $0x1c] sm:$0xff] %v159_v3  ;;  %v177_v12 = vld [vmem:[%s2182_s25 + $0xf0] sm:$0xff]  ;;  %v179_v13 = vld [vmem:[%s2182_s25 + $0xf8] sm:$0xff]  ;;  %v181_v14 = vld [vmem:[%s2182_s25 + $0x104] sm:$0xff] }
  0x16   : > { %162 = vst [vmem:[%s2187_s26 + $0x28] sm:$0xff] %v161_v4  ;;  %v183_v15 = vld [vmem:[%s2182_s25 + $0x10c] sm:$0xff]  ;;  %v185_v16 = vld [vmem:[%s2182_s25 + $0x118] sm:$0xff]  ;;  %v187_v17 = vld [vmem:[%s2182_s25 + $0x120] sm:$0xff] }
  0x17   : > { %164 = vst [vmem:[%s2187_s26 + $0x30] sm:$0xff] %v163_v5  ;;  %v189_v18 = vld [vmem:[%s2182_s25 + $0x12c] sm:$0xff]  ;;  %v191_v19 = vld [vmem:[%s2182_s25 + $0x134] sm:$0xff]  ;;  %v193_v20 = vld [vmem:[%s2182_s25 + $0x140] sm:$0xff] }
  0x18   : > { %166 = vst [vmem:[%s2187_s26 + $0x3c] sm:$0xff] %v165_v6  ;;  %v195_v21 = vld [vmem:[%s2182_s25 + $0x148] sm:$0xff]  ;;  %v197_v22 = vld [vmem:[%s2182_s25 + $0x154] sm:$0xff]  ;;  %v199_v23 = vld [vmem:[%s2182_s25 + $0x15c] sm:$0xff] }
  0x19   : > { %168 = vst [vmem:[%s2187_s26 + $0x44] sm:$0xff] %v167_v7  ;;  %v201_v24 = vld [vmem:[%s2182_s25 + $0x1e0] sm:$0xff]  ;;  %v203_v25 = vld [vmem:[%s2182_s25 + $0x1e8] sm:$0xff]  ;;  %v205_v26 = vld [vmem:[%s2182_s25 + $0x1f4] sm:$0xff] }
  0x1a   : > { %170 = vst [vmem:[%s2187_s26 + $0x50] sm:$0xff] %v169_v8  ;;  %v207_v27 = vld [vmem:[%s2182_s25 + $0x1fc] sm:$0xff]  ;;  %v209_v28 = vld [vmem:[%s2182_s25 + $0x208] sm:$0xff]  ;;  %v211_v29 = vld [vmem:[%s2182_s25 + $0x210] sm:$0xff] }
  0x1b   : > { %172 = vst [vmem:[%s2187_s26 + $0x58] sm:$0xff] %v171_v9  ;;  %v213_v30 = vld [vmem:[%s2182_s25 + $0x21c] sm:$0xff]  ;;  %v215_v31 = vld [vmem:[%s2182_s25 + $0x224] sm:$0xff]  ;;  %v217_v32 = vld [vmem:[%s2182_s25 + $0x230] sm:$0xff] }
  0x1c   : > { %174 = vst [vmem:[%s2187_s26 + $0x64] sm:$0xff] %v173_v10  ;;  %v219_v33 = vld [vmem:[%s2182_s25 + $0x238] sm:$0xff]  ;;  %v221_v34 = vld [vmem:[%s2182_s25 + $0x244] sm:$0xff]  ;;  %v223_v35 = vld [vmem:[%s2182_s25 + $0x24c] sm:$0xff] }
  0x1d   : > { %176 = vst [vmem:[%s2187_s26 + $0x6c] sm:$0xff] %v175_v11  ;;  %v225_v36 = vld [vmem:[%s2182_s25 + $0x2d0] sm:$0xff]  ;;  %v227_v37 = vld [vmem:[%s2182_s25 + $0x2d8] sm:$0xff]  ;;  %v229_v38 = vld [vmem:[%s2182_s25 + $0x2e4] sm:$0xff] }
  0x1e   : > { %178 = vst [vmem:[%s2187_s26 + $0x78] sm:$0xff] %v177_v12  ;;  %v231_v39 = vld [vmem:[%s2182_s25 + $0x2ec] sm:$0xff]  ;;  %v233_v40 = vld [vmem:[%s2182_s25 + $0x2f8] sm:$0xff]  ;;  %v235_v41 = vld [vmem:[%s2182_s25 + $0x300] sm:$0xff] }
  0x1f   : > { %180 = vst [vmem:[%s2187_s26 + $0x80] sm:$0xff] %v179_v13  ;;  %v237_v42 = vld [vmem:[%s2182_s25 + $0x30c] sm:$0xff]  ;;  %v239_v43 = vld [vmem:[%s2182_s25 + $0x314] sm:$0xff]  ;;  %v241_v44 = vld [vmem:[%s2182_s25 + $0x320] sm:$0xff] }
  0x20   : > { %182 = vst [vmem:[%s2187_s26 + $0x8c] sm:$0xff] %v181_v14  ;;  %v243_v45 = vld [vmem:[%s2182_s25 + $0x328] sm:$0xff]  ;;  %v245_v46 = vld [vmem:[%s2182_s25 + $0x334] sm:$0xff]  ;;  %v247_v47 = vld [vmem:[%s2182_s25 + $0x33c] sm:$0xff] }
  0x21   : > { %184 = vst [vmem:[%s2187_s26 + $0x94] sm:$0xff] %v183_v15  ;;  %v1507_v48 = vld [vmem:[%s2182_s25 + $0x10] sm:$0xf]  ;;  %v1509_v49 = vld [vmem:[%s2182_s25 + $0x24] sm:$0xf] }
  0x22   : > { %186 = vst [vmem:[%s2187_s26 + $0xa0] sm:$0xff] %v185_v16  ;;  %v1511_v50 = vld [vmem:[%s2182_s25 + $0x38] sm:$0xf]  ;;  %v1513_v51 = vld [vmem:[%s2182_s25 + $0x4c] sm:$0xf] }
  0x23   : > { %188 = vst [vmem:[%s2187_s26 + $0xa8] sm:$0xff] %v187_v17  ;;  %v1515_v52 = vld [vmem:[%s2182_s25 + $0x60] sm:$0xf]  ;;  %v1517_v53 = vld [vmem:[%s2182_s25 + $0x74] sm:$0xf] }
  0x24   : > { %190 = vst [vmem:[%s2187_s26 + $0xb4] sm:$0xff] %v189_v18  ;;  %v1519_v54 = vld [vmem:[%s2182_s25 + $0x100] sm:$0xf]  ;;  %v1521_v55 = vld [vmem:[%s2182_s25 + $0x114] sm:$0xf] }
  0x25   : > { %192 = vst [vmem:[%s2187_s26 + $0xbc] sm:$0xff] %v191_v19  ;;  %v1523_v56 = vld [vmem:[%s2182_s25 + $0x128] sm:$0xf]  ;;  %v1525_v57 = vld [vmem:[%s2182_s25 + $0x13c] sm:$0xf] }
  0x26   : > { %194 = vst [vmem:[%s2187_s26 + $0xc8] sm:$0xff] %v193_v20  ;;  %v1527_v58 = vld [vmem:[%s2182_s25 + $0x150] sm:$0xf]  ;;  %v1529_v59 = vld [vmem:[%s2182_s25 + $0x164] sm:$0xf] }
  0x27   : > { %196 = vst [vmem:[%s2187_s26 + $0xd0] sm:$0xff] %v195_v21  ;;  %v1531_v60 = vld [vmem:[%s2182_s25 + $0x1f0] sm:$0xf]  ;;  %v1533_v61 = vld [vmem:[%s2182_s25 + $0x204] sm:$0xf] }
  0x28   : > { %198 = vst [vmem:[%s2187_s26 + $0xdc] sm:$0xff] %v197_v22  ;;  %v1535_v62 = vld [vmem:[%s2182_s25 + $0x218] sm:$0xf]  ;;  %v1537_v63 = vld [vmem:[%s2182_s25 + $0x22c] sm:$0xf] }
  0x29   : > { %200 = vst [vmem:[%s2187_s26 + $0xe4] sm:$0xff] %v199_v23  ;;  %v1539_v0 = vld [vmem:[%s2182_s25 + $0x240] sm:$0xf]  ;;  %v1541_v1 = vld [vmem:[%s2182_s25 + $0x254] sm:$0xf] }
  0x2a   : > { %202 = vst [vmem:[%s2187_s26 + $0xf0] sm:$0xff] %v201_v24  ;;  %v1543_v2 = vld [vmem:[%s2182_s25 + $0x2e0] sm:$0xf]  ;;  %v1545_v3 = vld [vmem:[%s2182_s25 + $0x2f4] sm:$0xf] }
  0x2b   : > { %204 = vst [vmem:[%s2187_s26 + $0xf8] sm:$0xff] %v203_v25  ;;  %v1547_v4 = vld [vmem:[%s2182_s25 + $0x308] sm:$0xf]  ;;  %v1549_v5 = vld [vmem:[%s2182_s25 + $0x31c] sm:$0xf] }
  0x2c   : > { %206 = vst [vmem:[%s2187_s26 + $0x104] sm:$0xff] %v205_v26  ;;  %v1551_v6 = vld [vmem:[%s2182_s25 + $0x330] sm:$0xf]  ;;  %v1553_v7 = vld [vmem:[%s2182_s25 + $0x344] sm:$0xf] }
  0x2d   : > { %208 = vst [vmem:[%s2187_s26 + $0x10c] sm:$0xff] %v207_v27 }
  0x2e   : > { %210 = vst [vmem:[%s2187_s26 + $0x118] sm:$0xff] %v209_v28 }
  0x2f   : > { %212 = vst [vmem:[%s2187_s26 + $0x120] sm:$0xff] %v211_v29 }
  0x30   : > { %214 = vst [vmem:[%s2187_s26 + $0x12c] sm:$0xff] %v213_v30 }
  0x31   : > { %216 = vst [vmem:[%s2187_s26 + $0x134] sm:$0xff] %v215_v31 }
  0x32   : > { %218 = vst [vmem:[%s2187_s26 + $0x140] sm:$0xff] %v217_v32 }
  0x33   : > { %220 = vst [vmem:[%s2187_s26 + $0x148] sm:$0xff] %v219_v33 }
  0x34   : > { %222 = vst [vmem:[%s2187_s26 + $0x154] sm:$0xff] %v221_v34 }
  0x35   : > { %224 = vst [vmem:[%s2187_s26 + $0x15c] sm:$0xff] %v223_v35 }
  0x36   : > { %226 = vst [vmem:[%s2187_s26 + $0x168] sm:$0xff] %v225_v36 }
  0x37   : > { %228 = vst [vmem:[%s2187_s26 + $0x170] sm:$0xff] %v227_v37 }
  0x38   : > { %230 = vst [vmem:[%s2187_s26 + $0x17c] sm:$0xff] %v229_v38 }
  0x39   : > { %232 = vst [vmem:[%s2187_s26 + $0x184] sm:$0xff] %v231_v39 }
  0x3a   : > { %234 = vst [vmem:[%s2187_s26 + $0x190] sm:$0xff] %v233_v40 }
  0x3b   : > { %236 = vst [vmem:[%s2187_s26 + $0x198] sm:$0xff] %v235_v41 }
  0x3c   : > { %238 = vst [vmem:[%s2187_s26 + $0x1a4] sm:$0xff] %v237_v42 }
  0x3d   : > { %240 = vst [vmem:[%s2187_s26 + $0x1ac] sm:$0xff] %v239_v43 }
  0x3e   : > { %242 = vst [vmem:[%s2187_s26 + $0x1b8] sm:$0xff] %v241_v44 }
  0x3f   : > { %244 = vst [vmem:[%s2187_s26 + $0x1c0] sm:$0xff] %v243_v45 }
  0x40   : > { %246 = vst [vmem:[%s2187_s26 + $0x1cc] sm:$0xff] %v245_v46 }
  0x41   : > { %248 = vst [vmem:[%s2187_s26 + $0x1d4] sm:$0xff] %v247_v47 }
  0x42   : > { %1508 = vst [vmem:[%s2187_s26 + $0x10] sm:$0xf] %v1507_v48 }
  0x43   : > { %1510 = vst [vmem:[%s2187_s26 + $0x24] sm:$0xf] %v1509_v49 }
  0x44   : > { %1512 = vst [vmem:[%s2187_s26 + $0x38] sm:$0xf] %v1511_v50 }
  0x45   : > { %1514 = vst [vmem:[%s2187_s26 + $0x4c] sm:$0xf] %v1513_v51 }
  0x46   : > { %1516 = vst [vmem:[%s2187_s26 + $0x60] sm:$0xf] %v1515_v52 }
  0x47   : > { %1518 = vst [vmem:[%s2187_s26 + $0x74] sm:$0xf] %v1517_v53 }
  0x48   : > { %1520 = vst [vmem:[%s2187_s26 + $0x88] sm:$0xf] %v1519_v54 }
  0x49   : > { %1522 = vst [vmem:[%s2187_s26 + $0x9c] sm:$0xf] %v1521_v55 }
  0x4a   : > { %1524 = vst [vmem:[%s2187_s26 + $0xb0] sm:$0xf] %v1523_v56 }
  0x4b   : > { %1526 = vst [vmem:[%s2187_s26 + $0xc4] sm:$0xf] %v1525_v57 }
  0x4c   : > { %1528 = vst [vmem:[%s2187_s26 + $0xd8] sm:$0xf] %v1527_v58 }
  0x4d   : > { %1530 = vst [vmem:[%s2187_s26 + $0xec] sm:$0xf] %v1529_v59 }
  0x4e   : > { %1532 = vst [vmem:[%s2187_s26 + $0x100] sm:$0xf] %v1531_v60 }
  0x4f   : > { %1534 = vst [vmem:[%s2187_s26 + $0x114] sm:$0xf] %v1533_v61 }
  0x50   : > { %1536 = vst [vmem:[%s2187_s26 + $0x128] sm:$0xf] %v1535_v62 }
  0x51   : > { %1538 = vst [vmem:[%s2187_s26 + $0x13c] sm:$0xf] %v1537_v63 }
  0x52   : > { %1540 = vst [vmem:[%s2187_s26 + $0x150] sm:$0xf] %v1539_v0 }
  0x53   : > { %1542 = vst [vmem:[%s2187_s26 + $0x164] sm:$0xf] %v1541_v1 }
  0x54   : > { %1544 = vst [vmem:[%s2187_s26 + $0x178] sm:$0xf] %v1543_v2 }
  0x55   : > { %1546 = vst [vmem:[%s2187_s26 + $0x18c] sm:$0xf] %v1545_v3 }
  0x56   : > { %1548 = vst [vmem:[%s2187_s26 + $0x1a0] sm:$0xf] %v1547_v4 }
  0x57   : > { %1550 = vst [vmem:[%s2187_s26 + $0x1b4] sm:$0xf] %v1549_v5 }
  0x58   : > { %1552 = vst [vmem:[%s2187_s26 + $0x1c8] sm:$0xf] %v1551_v6 }
  0x59   : > { %1554 = vst [vmem:[%s2187_s26 + $0x1dc] sm:$0xf] %v1553_v7 }
  0x5a PF: > { %p1555_p5 = scmp.ge.s32.totalorder %s2126_s14, 1  ;;  %p309_p6 = scmp.lt.s32.totalorder %s2126_s14, 3 }
  0x5c   : > { %p310_p7 = pnand %p1555_p5, %p309_p6 }
  0x5d   : > { %s316_s10 = sand.u32 (!%p310_p7), 1, %s2118_s12  }
  0x5e   : > { %313 = sbr.rel (%p310_p7) target bundleno = 512 (0x200), region = 54 }
  0x5f   : > { %s2077_s18 = smul.u32 (!%p310_p7), 480, %s316_s10 }
  0x61   : > { %s2357_s12 = scalar_lea.vmem (!%p310_p7), [#allocation2], %s2077_s18 }
  0x63   : > { %v2022_v8 = vld [vmem:[%s2778_s1 + $0x38] sm:$0xff]  ;;  %v2021_v9 = vld [vmem:[%s2778_s1 + $0x30] sm:$0xff]  ;;  %v2020_v10 = vld [vmem:[%s2778_s1 + $0x28] sm:$0xff]  ;;  %vm1007_vm0 = vcmask 523264   ;;  %vm1429_vm1 = vcmask 519168  }
  0x64   : > { %2051 = vmatpush.bf16.msra.mxu1 %v2022_v8  ;;  %2052 = vmatpush.bf16.msra.mxu2 %v2022_v8  ;;  %v2019_v11 = vld [vmem:[%s2778_s1 + $0x20] sm:$0xff]  ;;  %v2018_v12 = vld [vmem:[%s2778_s1 + $0x18] sm:$0xff]  ;;  %v2017_v13 = vld [vmem:[%s2778_s1 + $0x10] sm:$0xff] }
  0x65   : > { %2053 = vmatpush.bf16.msra.mxu3 %v2022_v8  ;;  %1044 = vmatpush.bf16.msra.mxu0 %v2022_v8  ;;  %v2016_v14 = vld [vmem:[%s2778_s1 + $0x8] sm:$0xff]  ;;  %v2015_v15 = vld [vmem:[%s2778_s1] sm:$0xff]  ;;  %v1619_v16 = vld [vmem:[%s2357_s12 + $0x78] sm:$0xf] }
  0x66   : > { %v1972_v17 = vld [vmem:[%s2357_s12 + $0x88] sm:$0xf0]  ;;  %v1679_v18 = vld [vmem:[%s2357_s12 + $0xf0] sm:$0xf]  ;;  %v1987_v19 = vld [vmem:[%s2357_s12 + $0x100] sm:$0xf0] }
  0x67   : > { %v1739_v20 = vld [vmem:[%s2357_s12 + $0x168] sm:$0xf]  ;;  %v2002_v21 = vld [vmem:[%s2357_s12 + $0x178] sm:$0xf0]  ;;  %v1559_v22 = vld [vmem:[%s2357_s12] sm:$0xf]  ;;  %v1620_v26 = vor.u32 %v1972_v17, %v1619_v16  ;;  %v1680_v27 = vor.u32 %v1987_v19, %v1679_v18 }
  0x68   : > { %2054 = vmatpush.bf16.msra.mxu1 %v2021_v9  ;;  %2055 = vmatpush.bf16.msra.mxu2 %v2021_v9  ;;  %v1957_v23 = vld [vmem:[%s2357_s12 + $0x10] sm:$0xf0]  ;;  %v2038_v24 = vld [vmem:[%s2778_s1 + $0xb8] sm:$0xff]  ;;  %v1740_v28 = vor.u32 %v2002_v21, %v1739_v20  ;;  %v2036_v36 = vld [vmem:[%s2778_s1 + $0xa8] sm:$0xff] }
  0x69   : > { %2056 = vmatpush.bf16.msra.mxu3 %v2021_v9  ;;  %1045 = vmatpush.bf16.msra.mxu0 %v2021_v9  ;;  %v2046_v25 = vld [vmem:[%s2778_s1 + $0xf8] sm:$0xff]  ;;  %v1560_v29 = vor.u32 %v1957_v23, %v1559_v22  ;;  %v2037_v32 = vld [vmem:[%s2778_s1 + $0xb0] sm:$0xff]  ;;  %v2044_v37 = vld [vmem:[%s2778_s1 + $0xe8] sm:$0xff] }
  0x6a   : > { %v2030_v30 = vld [vmem:[%s2778_s1 + $0x78] sm:$0xff]  ;;  %v2045_v33 = vld [vmem:[%s2778_s1 + $0xf0] sm:$0xff]  ;;  %v2028_v38 = vld [vmem:[%s2778_s1 + $0x68] sm:$0xff] }
  0x6b   : > { %v2050_v31 = vld [vmem:[%s2778_s1 + $0x118] sm:$0xff]  ;;  %v2029_v34 = vld [vmem:[%s2778_s1 + $0x70] sm:$0xff]  ;;  %v2048_v39 = vld [vmem:[%s2778_s1 + $0x108] sm:$0xff] }
  0x6c   : > { %2057 = vmatpush.bf16.msra.mxu1 %v2020_v10  ;;  %2058 = vmatpush.bf16.msra.mxu2 %v2020_v10  ;;  %v2049_v35 = vld [vmem:[%s2778_s1 + $0x110] sm:$0xff]  ;;  %v1639_v40 = vld [vmem:[%s2357_s12 + $0xa0] sm:$0xf]  ;;  %v1699_v44 = vld [vmem:[%s2357_s12 + $0x118] sm:$0xf] }
  0x6d   : > { %2059 = vmatpush.bf16.msra.mxu3 %v2020_v10  ;;  %1046 = vmatpush.bf16.msra.mxu0 %v2020_v10  ;;  %v2035_v41 = vld [vmem:[%s2778_s1 + $0xa0] sm:$0xff]  ;;  %v1977_v43 = vld [vmem:[%s2357_s12 + $0xb0] sm:$0xf0]  ;;  %v1992_v45 = vld [vmem:[%s2357_s12 + $0x128] sm:$0xf0] }
  0x6e   : > { %v2043_v42 = vld [vmem:[%s2778_s1 + $0xe0] sm:$0xff]  ;;  %v1759_v46 = vld [vmem:[%s2357_s12 + $0x190] sm:$0xf]  ;;  %v1579_v48 = vld [vmem:[%s2357_s12 + $0x28] sm:$0xf]  ;;  %v1640_v54 = vor.u32 %v1977_v43, %v1639_v40  ;;  %v1700_v55 = vor.u32 %v1992_v45, %v1699_v44 }
  0x6f   : > { %v2007_v47 = vld [vmem:[%s2357_s12 + $0x1a0] sm:$0xf0]  ;;  %v1962_v49 = vld [vmem:[%s2357_s12 + $0x38] sm:$0xf0]  ;;  %v2033_v59 = vld [vmem:[%s2778_s1 + $0x90] sm:$0xff] }
  0x70   : > { %2060 = vmatpush.bf16.msra.mxu1 %v2019_v11  ;;  %2061 = vmatpush.bf16.msra.mxu2 %v2019_v11  ;;  %v2027_v50 = vld [vmem:[%s2778_s1 + $0x60] sm:$0xff]  ;;  %v2034_v52 = vld [vmem:[%s2778_s1 + $0x98] sm:$0xff]  ;;  %v1760_v56 = vor.u32 %v2007_v47, %v1759_v46  ;;  %v1580_v57 = vor.u32 %v1962_v49, %v1579_v48  ;;  %v2041_v60 = vld [vmem:[%s2778_s1 + $0xd0] sm:$0xff] }
  0x71   : > { %2062 = vmatpush.bf16.msra.mxu3 %v2019_v11  ;;  %1047 = vmatpush.bf16.msra.mxu0 %v2019_v11  ;;  %v2047_v51 = vld [vmem:[%s2778_s1 + $0x100] sm:$0xff]  ;;  %v2042_v53 = vld [vmem:[%s2778_s1 + $0xd8] sm:$0xff]  ;;  %v2025_v61 = vld [vmem:[%s2778_s1 + $0x50] sm:$0xff] }
  0x72   : > { %v2026_v58 = vld [vmem:[%s2778_s1 + $0x58] sm:$0xff]  ;;  %v2032_v62 = vld [vmem:[%s2778_s1 + $0x88] sm:$0xff]  ;;  %v2031_v1 = vld [vmem:[%s2778_s1 + $0x80] sm:$0xff] }
  0x73   : > { %v2040_v63 = vld [vmem:[%s2778_s1 + $0xc8] sm:$0xff]  ;;  %v2039_v2 = vld [vmem:[%s2778_s1 + $0xc0] sm:$0xff]  ;;  %v1982_v4 = vld [vmem:[%s2357_s12 + $0xd8] sm:$0xf0] }
  0x74   : > { %2063 = vmatpush.bf16.msra.mxu1 %v2018_v12  ;;  %2064 = vmatpush.bf16.msra.mxu2 %v2018_v12  ;;  %v2024_v0 = vld [vmem:[%s2778_s1 + $0x48] sm:$0xff]  ;;  %v1719_v5 = vld [vmem:[%s2357_s12 + $0x140] sm:$0xf]  ;;  %v1997_v6 = vld [vmem:[%s2357_s12 + $0x150] sm:$0xf0] }
  0x75   : > { %2065 = vmatpush.bf16.msra.mxu3 %v2018_v12  ;;  %1048 = vmatpush.bf16.msra.mxu0 %v2018_v12  ;;  %v1659_v3 = vld [vmem:[%s2357_s12 + $0xc8] sm:$0xf]  ;;  %v1779_v7 = vld [vmem:[%s2357_s12 + $0x1b8] sm:$0xf]  ;;  %v2012_v8 = vld [vmem:[%s2357_s12 + $0x1c8] sm:$0xf0] }
  0x76   : > { %v1599_v9 = vld [vmem:[%s2357_s12 + $0x50] sm:$0xf]  ;;  %v1967_v10 = vld [vmem:[%s2357_s12 + $0x60] sm:$0xf0]  ;;  %v1660_v12 = vor.u32 %v1982_v4, %v1659_v3  ;;  %v1561_v17 = vld [vmem:[%s2357_s12 + $0x14] sm:$0xf0] }
  0x77   : > { %v2023_v11 = vld [vmem:[%s2778_s1 + $0x40] sm:$0xff]  ;;  %v1567_v18 = vld [vmem:[%s2357_s12 + $0x8] sm:$0xf]  ;;  %v1958_v19 = vld [vmem:[%s2357_s12 + $0x18] sm:$0xf0] }
  0x78   : > { %2066 = vmatpush.bf16.msra.mxu1 %v2017_v13  ;;  %2067 = vmatpush.bf16.msra.mxu2 %v2017_v13  ;;  %v1955_v16 = vld [vmem:[%s2357_s12 + $0x4] sm:$0xf]  ;;  %v1956_v20 = vld [vmem:[%s2357_s12 + $0xc] sm:$0xf]  ;;  %v1569_v21 = vld [vmem:[%s2357_s12 + $0x1c] sm:$0xf0] }
  0x79   : > { %2068 = vmatpush.bf16.msra.mxu3 %v2017_v13  ;;  %1049 = vmatpush.bf16.msra.mxu0 %v2017_v13  ;;  %v1720_v13 = vor.u32 %v1997_v6, %v1719_v5  ;;  %v1575_v22 = vld [vmem:[%s2357_s12 + $0x10] sm:$0xf]  ;;  %v1959_v23 = vld [vmem:[%s2357_s12 + $0x20] sm:$0xf0]  ;;  %v1965_v40 = vld [vmem:[%s2357_s12 + $0x54] sm:$0xf] }
  0x7a   : > { %v1968_v43 = vld [vmem:[%s2357_s12 + $0x68] sm:$0xf0]  ;;  %v1966_v44 = vld [vmem:[%s2357_s12 + $0x5c] sm:$0xf]  ;;  %v1609_v45 = vld [vmem:[%s2357_s12 + $0x6c] sm:$0xf0] }
  0x7b   : > { %v1615_v46 = vld [vmem:[%s2357_s12 + $0x60] sm:$0xf]  ;;  %v1969_v47 = vld [vmem:[%s2357_s12 + $0x70] sm:$0xf0]  ;;  %v1978_v3 = vld [vmem:[%s2357_s12 + $0xb8] sm:$0xf0] }
  0x7c   : > { %2069 = vmatpush.bf16.msra.mxu1 %v2016_v14  ;;  %2070 = vmatpush.bf16.msra.mxu2 %v2016_v14  ;;  %v1976_v4 = vld [vmem:[%s2357_s12 + $0xac] sm:$0xf]  ;;  %v1649_v5 = vld [vmem:[%s2357_s12 + $0xbc] sm:$0xf0]  ;;  %v1655_v6 = vld [vmem:[%s2357_s12 + $0xb0] sm:$0xf] }
  0x7d   : > { %2071 = vmatpush.bf16.msra.mxu3 %v2016_v14  ;;  %1050 = vmatpush.bf16.msra.mxu0 %v2016_v14  ;;  %v1780_v14 = vor.u32 %v2012_v8, %v1779_v7  ;;  %v1979_v7 = vld [vmem:[%s2357_s12 + $0xc0] sm:$0xf0] }
  0x80   : > { %2072 = vmatpush.bf16.msra.mxu1 %v2015_v15  ;;  %2073 = vmatpush.bf16.msra.mxu2 %v2015_v15 }
  0x81   : > { %2074 = vmatpush.bf16.msra.mxu3 %v2015_v15  ;;  %1051 = vmatpush.bf16.msra.mxu0 %v2015_v15  ;;  %v1600_v15 = vor.u32 %v1967_v10, %v1599_v9  ;;  %v1652_v10 = vor.u32 %v1976_v4, %v1649_v5 }
  0x83   : > { %1067 = vmatmul.bf16.vlgmr.msra.gmra.mxu1 %v1620_v26  ;;  %1082 = vmatmul.bf16.vlgmr.msra.gmra.mxu2 %v1680_v27  ;;  %v1572_v26 = vor.u32 %v1956_v20, %v1569_v21  ;;  %v1576_v27 = vor.u32 %v1959_v23, %v1575_v22 }
  0x84   : > { %1182 = vmatpush.bf16.msrb.mxu2 %v2038_v24  ;;  %1097 = vmatmul.bf16.vlgmr.msra.gmra.mxu3 %v1740_v28  ;;  %v1564_v24 = vor.u32 %v1955_v16, %v1561_v17  ;;  %v1960_v28 = vld [vmem:[%s2357_s12 + $0x2c] sm:$0xf]  ;;  %v1981_v16 = vld [vmem:[%s2357_s12 + $0xd4] sm:$0xf]  ;;  %v1669_v17 = vld [vmem:[%s2357_s12 + $0xe4] sm:$0xf0] }
  0x85   : > { %1251 = vmatpush.bf16.msrb.mxu3 %v2046_v25  ;;  %1052 = vmatmul.bf16.vlgmr.msra.gmra.mxu0 %v1560_v29  ;;  %v1568_v25 = vor.u32 %v1958_v19, %v1567_v18  ;;  %v1581_v29 = vld [vmem:[%s2357_s12 + $0x3c] sm:$0xf0]  ;;  %v1675_v18 = vld [vmem:[%s2357_s12 + $0xd8] sm:$0xf]  ;;  %v1984_v19 = vld [vmem:[%s2357_s12 + $0xe8] sm:$0xf0]  ;;  %v1672_v23 = vor.u32 %v1981_v16, %v1669_v17 }
  0x86   : > { %1113 = vmatpush.bf16.msrb.mxu1 %v2030_v30  ;;  %1324 = vmatpush.bf16.msrb.mxu0 %v2050_v31  ;;  %v1587_v30 = vld [vmem:[%s2357_s12 + $0x30] sm:$0xf]  ;;  %v1963_v31 = vld [vmem:[%s2357_s12 + $0x40] sm:$0xf0] }
  0x88   : > { %1183 = vmatpush.bf16.msrb.mxu2 %v2037_v32  ;;  %v1961_v32 = vld [vmem:[%s2357_s12 + $0x34] sm:$0xf] }
  0x89   : > { %1252 = vmatpush.bf16.msrb.mxu3 %v2045_v33  ;;  %v1589_v33 = vld [vmem:[%s2357_s12 + $0x44] sm:$0xf0] }
  0x8a   : > { %1114 = vmatpush.bf16.msrb.mxu1 %v2029_v34  ;;  %1325 = vmatpush.bf16.msrb.mxu0 %v2049_v35  ;;  %v1595_v34 = vld [vmem:[%s2357_s12 + $0x38] sm:$0xf]  ;;  %v1964_v35 = vld [vmem:[%s2357_s12 + $0x48] sm:$0xf0] }
  0x8c   : > { %1184 = vmatpush.bf16.msrb.mxu2 %v2036_v36  ;;  %v1584_v36 = vor.u32 %v1960_v28, %v1581_v29 }
  0x8d   : > { %1253 = vmatpush.bf16.msrb.mxu3 %v2044_v37  ;;  %v1588_v37 = vor.u32 %v1963_v31, %v1587_v30  ;;  %v1985_v30 = vld [vmem:[%s2357_s12 + $0xf4] sm:$0xf]  ;;  %v1681_v31 = vld [vmem:[%s2357_s12 + $0x104] sm:$0xf0] }
  0x8e   : > { %1115 = vmatpush.bf16.msrb.mxu1 %v2028_v38  ;;  %1326 = vmatpush.bf16.msrb.mxu0 %v2048_v39  ;;  %v1592_v38 = vor.u32 %v1961_v32, %v1589_v33  ;;  %v1596_v39 = vor.u32 %v1964_v35, %v1595_v34  ;;  %v1687_v32 = vld [vmem:[%s2357_s12 + $0xf8] sm:$0xf]  ;;  %v1988_v33 = vld [vmem:[%s2357_s12 + $0x108] sm:$0xf0]  ;;  %v1986_v34 = vld [vmem:[%s2357_s12 + $0xfc] sm:$0xf] }
  0x8f   : > { %v1689_v35 = vld [vmem:[%s2357_s12 + $0x10c] sm:$0xf0] }
  0x90   : > { %1185 = vmatpush.bf16.msrb.mxu2 %v2035_v41  ;;  %v1601_v41 = vld [vmem:[%s2357_s12 + $0x64] sm:$0xf0] }
  0x91   : > { %1254 = vmatpush.bf16.msrb.mxu3 %v2043_v42  ;;  %v1607_v42 = vld [vmem:[%s2357_s12 + $0x58] sm:$0xf]  ;;  %v1604_v48 = vor.u32 %v1965_v40, %v1601_v41  ;;  %v1684_v40 = vor.u32 %v1985_v30, %v1681_v31  ;;  %v1688_v41 = vor.u32 %v1988_v33, %v1687_v32 }
  0x92   : > { %1116 = vmatpush.bf16.msrb.mxu1 %v2027_v50  ;;  %1327 = vmatpush.bf16.msrb.mxu0 %v2047_v51  ;;  %v1608_v49 = vor.u32 %v1968_v43, %v1607_v42  ;;  %v1612_v50 = vor.u32 %v1966_v44, %v1609_v45  ;;  %v1616_v51 = vor.u32 %v1969_v47, %v1615_v46 }
  0x93   : > { %1072 = vmatmul.bf16.gmra.mxu1 %v1640_v54  ;;  %1087 = vmatmul.bf16.gmra.mxu2 %v1700_v55  ;;  %v1627_v54 = vld [vmem:[%s2357_s12 + $0x80] sm:$0xf]  ;;  %v1973_v55 = vld [vmem:[%s2357_s12 + $0x90] sm:$0xf0]  ;;  %v1692_v43 = vor.u32 %v1986_v34, %v1689_v35 }
  0x94   : > { %1186 = vmatpush.bf16.msrb.mxu2 %v2034_v52  ;;  %1102 = vmatmul.bf16.gmra.mxu3 %v1760_v56  ;;  %v1970_v52 = vld [vmem:[%s2357_s12 + $0x7c] sm:$0xf]  ;;  %v1971_v56 = vld [vmem:[%s2357_s12 + $0x84] sm:$0xf] }
  0x95   : > { %1255 = vmatpush.bf16.msrb.mxu3 %v2042_v53  ;;  %1057 = vmatmul.bf16.gmra.mxu0 %v1580_v57  ;;  %v1621_v53 = vld [vmem:[%s2357_s12 + $0x8c] sm:$0xf0]  ;;  %v1629_v57 = vld [vmem:[%s2357_s12 + $0x94] sm:$0xf0] }
  0x96   : > { %1117 = vmatpush.bf16.msrb.mxu1 %v2026_v58  ;;  %v1635_v58 = vld [vmem:[%s2357_s12 + $0x88] sm:$0xf] }
  0x98   : > { %1187 = vmatpush.bf16.msrb.mxu2 %v2033_v59  ;;  %v1974_v59 = vld [vmem:[%s2357_s12 + $0x98] sm:$0xf0] }
  0x99   : > { %1256 = vmatpush.bf16.msrb.mxu3 %v2041_v60  ;;  %v1624_v60 = vor.u32 %v1970_v52, %v1621_v53  ;;  %v1707_v52 = vld [vmem:[%s2357_s12 + $0x120] sm:$0xf]  ;;  %v1993_v53 = vld [vmem:[%s2357_s12 + $0x130] sm:$0xf0] }
  0x9a   : > { %1118 = vmatpush.bf16.msrb.mxu1 %v2025_v61  ;;  %v1628_v61 = vor.u32 %v1973_v55, %v1627_v54  ;;  %v1991_v54 = vld [vmem:[%s2357_s12 + $0x124] sm:$0xf]  ;;  %v1709_v55 = vld [vmem:[%s2357_s12 + $0x134] sm:$0xf0] }
  0x9c   : > { %1188 = vmatpush.bf16.msrb.mxu2 %v2032_v62  ;;  %v1632_v62 = vor.u32 %v1971_v56, %v1629_v57  ;;  %v1715_v56 = vld [vmem:[%s2357_s12 + $0x128] sm:$0xf]  ;;  %v1994_v57 = vld [vmem:[%s2357_s12 + $0x138] sm:$0xf0] }
  0x9d   : > { %1257 = vmatpush.bf16.msrb.mxu3 %v2040_v63  ;;  %v1636_v63 = vor.u32 %v1974_v59, %v1635_v58 }
  0x9e   : > { %1119 = vmatpush.bf16.msrb.mxu1 %v2024_v0  ;;  %v1975_v0 = vld [vmem:[%s2357_s12 + $0xa4] sm:$0xf] }
  0xa0   : > { %1189 = vmatpush.bf16.msrb.mxu2 %v2031_v1  ;;  %v1641_v1 = vld [vmem:[%s2357_s12 + $0xb4] sm:$0xf0] }
  0xa1   : > { %1258 = vmatpush.bf16.msrb.mxu3 %v2039_v2  ;;  %v1647_v2 = vld [vmem:[%s2357_s12 + $0xa8] sm:$0xf]  ;;  %v1644_v8 = vor.u32 %v1975_v0, %v1641_v1  ;;  %v1716_v0 = vor.u32 %v1994_v57, %v1715_v56 }
  0xa2   : > { %1120 = vmatpush.bf16.msrb.mxu1 %v2023_v11  ;;  %v1648_v9 = vor.u32 %v1978_v3, %v1647_v2  ;;  %v1656_v11 = vor.u32 %v1979_v7, %v1655_v6  ;;  %v1995_v6 = vld [vmem:[%s2357_s12 + $0x144] sm:$0xf]  ;;  %v1721_v7 = vld [vmem:[%s2357_s12 + $0x154] sm:$0xf0] }
  0xa3   : > { %1077 = vmatmul.bf16.gmra.mxu1 %v1660_v12  ;;  %1092 = vmatmul.bf16.gmra.mxu2 %v1720_v13  ;;  %v1980_v12 = vld [vmem:[%s2357_s12 + $0xcc] sm:$0xf]  ;;  %v1661_v13 = vld [vmem:[%s2357_s12 + $0xdc] sm:$0xf0]  ;;  %v1724_v16 = vor.u32 %v1995_v6, %v1721_v7 }
  0xa4   : > { %1107 = vmatmul.bf16.gmra.mxu3 %v1780_v14  ;;  %v1667_v14 = vld [vmem:[%s2357_s12 + $0xd0] sm:$0xf]  ;;  %v1664_v20 = vor.u32 %v1980_v12, %v1661_v13  ;;  %v1999_v13 = vld [vmem:[%s2357_s12 + $0x160] sm:$0xf0] }
  0xa5   : > { %1062 = vmatmul.bf16.gmra.mxu0 %v1600_v15  ;;  %v1983_v15 = vld [vmem:[%s2357_s12 + $0xe0] sm:$0xf0]  ;;  %v1735_v12 = vld [vmem:[%s2357_s12 + $0x150] sm:$0xf] }
  0xa6   : > { %v1668_v21 = vor.u32 %v1983_v15, %v1667_v14 }
  0xb3   : > { %1121 = vmatmul.bf16.vlgmr.msrb.gmra.mxu1 %v1564_v24  ;;  %1190 = vmatmul.bf16.vlgmr.msrb.gmra.mxu2 %v1568_v25  ;;  %v1676_v24 = vor.u32 %v1984_v19, %v1675_v18 }
  0xb4   : > { %1259 = vmatmul.bf16.vlgmr.msrb.gmra.mxu3 %v1572_v26 }
  0xb5   : > { %1941 = vmatmul.msk.bf16.vlgmr.msrb.gmra.mxu0 %vm1007_vm0, %v1576_v27 }
  0xc3   : > { %1126 = vmatmul.bf16.gmra.mxu1 %v1584_v36  ;;  %1195 = vmatmul.bf16.gmra.mxu2 %v1588_v37  ;;  %v1695_v36 = vld [vmem:[%s2357_s12 + $0x100] sm:$0xf]  ;;  %v1989_v37 = vld [vmem:[%s2357_s12 + $0x110] sm:$0xf0] }
  0xc4   : > { %1264 = vmatmul.bf16.gmra.mxu3 %v1592_v38  ;;  %v1696_v44 = vor.u32 %v1989_v37, %v1695_v36  ;;  %v2000_v36 = vld [vmem:[%s2357_s12 + $0x16c] sm:$0xf]  ;;  %v1741_v37 = vld [vmem:[%s2357_s12 + $0x17c] sm:$0xf0] }
  0xc5   : > { %1942 = vmatmul.msk.bf16.gmra.mxu0 %vm1007_vm0, %v1596_v39 }
  0xd3   : > { %1131 = vmatmul.bf16.gmra.mxu1 %v1604_v48  ;;  %1200 = vmatmul.bf16.gmra.mxu2 %v1608_v49 }
  0xd4   : > { %1269 = vmatmul.bf16.gmra.mxu3 %v1612_v50  ;;  %v1990_v50 = vld [vmem:[%s2357_s12 + $0x11c] sm:$0xf] }
  0xd5   : > { %1943 = vmatmul.msk.bf16.gmra.mxu0 %vm1007_vm0, %v1616_v51  ;;  %v1701_v51 = vld [vmem:[%s2357_s12 + $0x12c] sm:$0xf0] }
  0xe3   : > { %1136 = vmatmul.bf16.gmra.mxu1 %v1624_v60  ;;  %1205 = vmatmul.bf16.gmra.mxu2 %v1628_v61  ;;  %v1704_v60 = vor.u32 %v1990_v50, %v1701_v51  ;;  %v1708_v61 = vor.u32 %v1993_v53, %v1707_v52  ;;  %v1755_v50 = vld [vmem:[%s2357_s12 + $0x178] sm:$0xf]  ;;  %v2004_v51 = vld [vmem:[%s2357_s12 + $0x188] sm:$0xf0] }
  0xe4   : > { %1274 = vmatmul.bf16.gmra.mxu3 %v1632_v62 }
  0xe5   : > { %1944 = vmatmul.msk.bf16.gmra.mxu0 %vm1007_vm0, %v1636_v63  ;;  %v1712_v63 = vor.u32 %v1991_v54, %v1709_v55  ;;  %v1744_v55 = vor.u32 %v2000_v36, %v1741_v37 }
  0xf3   : > { %1141 = vmatmul.bf16.gmra.mxu1 %v1644_v8  ;;  %1210 = vmatmul.bf16.gmra.mxu2 %v1648_v9  ;;  %v1727_v8 = vld [vmem:[%s2357_s12 + $0x148] sm:$0xf]  ;;  %v1998_v9 = vld [vmem:[%s2357_s12 + $0x158] sm:$0xf0] }
  0xf4   : > { %1279 = vmatmul.bf16.gmra.mxu3 %v1652_v10  ;;  %v1996_v10 = vld [vmem:[%s2357_s12 + $0x14c] sm:$0xf]  ;;  %v1728_v17 = vor.u32 %v1998_v9, %v1727_v8 }
  0xf5   : > { %1945 = vmatmul.msk.bf16.gmra.mxu0 %vm1007_vm0, %v1656_v11  ;;  %v1729_v11 = vld [vmem:[%s2357_s12 + $0x15c] sm:$0xf0] }
  0xf6   : > { %v1732_v19 = vor.u32 %v1996_v10, %v1729_v11 }
 0x100   : > { %v2520_v22 = vpop.f32.mrf.mxu1 }
 0x102   : > { %v2522_v25 = vpop.f32.mrf.mxu0 }
 0x103   : > { %1146 = vmatmul.bf16.gmra.mxu1 %v1664_v20  ;;  %1215 = vmatmul.bf16.gmra.mxu2 %v1668_v21  ;;  %v1736_v20 = vor.u32 %v1999_v13, %v1735_v12 }
 0x104   : > { %1284 = vmatmul.bf16.gmra.mxu3 %v1672_v23 }
 0x105   : > { %1946 = vmatmul.msk.bf16.gmra.mxu0 %vm1007_vm0, %v1676_v24 }
 0x106   : > { %v2525_v26 = vpop.f32.mrf.mxu2 }
 0x107   : > { %v2527_v27 = vpop.f32.mrf.mxu3 }
 0x108   : > { %v2529_v28 = vpop.f32.mrf.mxu1 }
 0x10a   : > { %v2531_v29 = vpop.f32.mrf.mxu0 }
 0x10e   : > { %v2541_v38 = vpop.f32.mrf.mxu2 }
 0x10f   : > { %v2543_v39 = vpop.f32.mrf.mxu3 }
 0x110   : > { %v2545_v42 = vpop.f32.mrf.mxu1 }
 0x112   : > { %v2547_v45 = vpop.f32.mrf.mxu0 }
 0x113   : > { %1151 = vmatmul.bf16.gmra.mxu1 %v1684_v40  ;;  %1220 = vmatmul.bf16.gmra.mxu2 %v1688_v41  ;;  %v1747_v40 = vld [vmem:[%s2357_s12 + $0x170] sm:$0xf]  ;;  %v2003_v41 = vld [vmem:[%s2357_s12 + $0x180] sm:$0xf0] }
 0x114   : > { %1289 = vmatmul.bf16.gmra.mxu3 %v1692_v43  ;;  %v2001_v43 = vld [vmem:[%s2357_s12 + $0x174] sm:$0xf]  ;;  %v1748_v56 = vor.u32 %v2003_v41, %v1747_v40 }
 0x115   : > { %1947 = vmatmul.msk.bf16.gmra.mxu0 %vm1007_vm0, %v1696_v44  ;;  %v1749_v44 = vld [vmem:[%s2357_s12 + $0x184] sm:$0xf0] }
 0x116   : > { %v2550_v46 = vpop.f32.mrf.mxu2 }
 0x117   : > { %v2552_v47 = vpop.f32.mrf.mxu3 }
 0x118   : > { %v2554_v48 = vpop.f32.mrf.mxu1 }
 0x11a   : > { %v2556_v49 = vpop.f32.mrf.mxu0 }
 0x11e   : > { %v2566_v58 = vpop.f32.mrf.mxu2 }
 0x11f   : > { %v2568_v59 = vpop.f32.mrf.mxu3 }
 0x120   : > { %v2570_v62 = vpop.f32.mrf.mxu1 }
 0x122   : > { %v2572_v1 = vpop.f32.mrf.mxu0 }
 0x123   : > { %1156 = vmatmul.bf16.gmra.mxu1 %v1704_v60  ;;  %1225 = vmatmul.bf16.gmra.mxu2 %v1708_v61  ;;  %v1752_v60 = vor.u32 %v2001_v43, %v1749_v44  ;;  %v1756_v61 = vor.u32 %v2004_v51, %v1755_v50 }
 0x124   : > { %1294 = vmatmul.bf16.gmra.mxu3 %v1712_v63 }
 0x125   : > { %1948 = vmatmul.msk.bf16.gmra.mxu0 %vm1007_vm0, %v1716_v0 }
 0x126   : > { %v2575_v2 = vpop.f32.mrf.mxu2 }
 0x127   : > { %v2577_v3 = vpop.f32.mrf.mxu3 }
 0x128   : > { %v2579_v4 = vpop.f32.mrf.mxu1 }
 0x12a   : > { %v2581_v5 = vpop.f32.mrf.mxu0 }
 0x12e   : > { %v2591_v14 = vpop.f32.mrf.mxu2 }
 0x12f   : > { %v2593_v15 = vpop.f32.mrf.mxu3 }
 0x130   : > { %v1122_v18 = vpop.f32.mrf.mxu1 }
 0x131   : > { %v1123_v21 = vadd.f32 %v1122_v18, %v2522_v25  ;;  %v1767_v18 = vld [vmem:[%s2357_s12 + $0x198] sm:$0xf] }
 0x132   : > { %v1329_v23 = vpop.f32.mrf.mxu0 }
 0x133   : > { %1161 = vmatmul.bf16.gmra.mxu1 %v1724_v16  ;;  %1230 = vmatmul.bf16.gmra.mxu2 %v1728_v17  ;;  %v2005_v16 = vld [vmem:[%s2357_s12 + $0x194] sm:$0xf]  ;;  %v1761_v17 = vld [vmem:[%s2357_s12 + $0x1a4] sm:$0xf0] }
 0x134   : > { %1299 = vmatmul.bf16.gmra.mxu3 %v1732_v19  ;;  %v2008_v19 = vld [vmem:[%s2357_s12 + $0x1a8] sm:$0xf0] }
 0x135   : > { %1949 = vmatmul.msk.bf16.gmra.mxu0 %vm1007_vm0, %v1736_v20  ;;  %v2006_v20 = vld [vmem:[%s2357_s12 + $0x19c] sm:$0xf] }
 0x136   : > { %v1191_v24 = vpop.f32.mrf.mxu2 }
 0x137   : > { %v1192_v30 = vadd.f32 %v1191_v24, %v1123_v21  ;;  %v1260_v31 = vpop.f32.mrf.mxu3  ;;  %v1769_v21 = vld [vmem:[%s2357_s12 + $0x1ac] sm:$0xf0]  ;;  %v2009_v24 = vld [vmem:[%s2357_s12 + $0x1b0] sm:$0xf0] }
 0x138   : > { %v1124_v32 = vpop.f32.mrf.mxu1  ;;  %v1772_v36 = vor.u32 %v2006_v20, %v1769_v21 }
 0x139   : > { %v1261_v33 = vadd.f32 %v1260_v31, %v1192_v30  ;;  %v1125_v34 = vadd.f32 %v1124_v32, %v2531_v29 }
 0x13a   : > { %v1331_v25 = vpop.f32.mrf.mxu0 }
 0x13b   : > { %v2598_v35 = vadd.f32 %v1329_v23, %v1261_v33  ;;  %v1775_v23 = vld [vmem:[%s2357_s12 + $0x1a0] sm:$0xf]  ;;  %v1764_v33 = vor.u32 %v2005_v16, %v1761_v17 }
 0x13c   : > { %v1776_v37 = vor.u32 %v2009_v24, %v1775_v23 }
 0x13e   : > { %v1193_v52 = vpop.f32.mrf.mxu2 }
 0x13f   : > { %v1194_v53 = vadd.f32 %v1193_v52, %v1125_v34  ;;  %v1262_v54 = vpop.f32.mrf.mxu3  ;;  %v1768_v34 = vor.u32 %v2008_v19, %v1767_v18 }
 0x140   : > { %v1127_v57 = vpop.f32.mrf.mxu1 }
 0x141   : > { %v1263_v29 = vadd.f32 %v1262_v54, %v1194_v53  ;;  %v1128_v63 = vadd.f32 %v1127_v57, %v2547_v45  ;;  %v1781_v57 = vld [vmem:[%s2357_s12 + $0x1cc] sm:$0xf0] }
 0x142   : > { %v1334_v0 = vpop.f32.mrf.mxu0 }
 0x143   : > { %v2609_v6 = vadd.f32 %v1331_v25, %v1263_v29  ;;  %1166 = vmatmul.bf16.gmra.mxu1 %v1744_v55  ;;  %1235 = vmatmul.bf16.gmra.mxu2 %v1748_v56  ;;  %v2010_v56 = vld [vmem:[%s2357_s12 + $0x1bc] sm:$0xf]  ;;  %v2011_v29 = vld [vmem:[%s2357_s12 + $0x1c4] sm:$0xf] }
 0x144   : > { %1304 = vmatmul.bf16.gmra.mxu3 %v1752_v60  ;;  %v1787_v60 = vld [vmem:[%s2357_s12 + $0x1c0] sm:$0xf] }
 0x145   : > { %1950 = vmatmul.msk.bf16.gmra.mxu0 %vm1007_vm0, %v1756_v61  ;;  %v2013_v61 = vld [vmem:[%s2357_s12 + $0x1d0] sm:$0xf0] }
 0x146   : > { %v1196_v7 = vpop.f32.mrf.mxu2 }
 0x147   : > { %v1197_v8 = vadd.f32 %v1196_v7, %v1128_v63  ;;  %v1265_v9 = vpop.f32.mrf.mxu3  ;;  %v1789_v63 = vld [vmem:[%s2357_s12 + $0x1d4] sm:$0xf0]  ;;  %v2014_v7 = vld [vmem:[%s2357_s12 + $0x1d8] sm:$0xf0] }
 0x148   : > { %v1129_v10 = vpop.f32.mrf.mxu1  ;;  %v1792_v16 = vor.u32 %v2011_v29, %v1789_v63 }
 0x149   : > { %v1266_v45 = vadd.f32 %v1265_v9, %v1197_v8  ;;  %v1130_v11 = vadd.f32 %v1129_v10, %v2556_v49 }
 0x14a   : > { %v1336_v12 = vpop.f32.mrf.mxu0 }
 0x14b   : > { %v2613_v13 = vadd.f32 %v1334_v0, %v1266_v45  ;;  %v1795_v0 = vld [vmem:[%s2357_s12 + $0x1c8] sm:$0xf]  ;;  %v1784_v45 = vor.u32 %v2010_v56, %v1781_v57  ;;  %s340_s12 = smul.u32 6, %s1502_s15 }
 0x14c   : > { %v1796_v17 = vor.u32 %v2014_v7, %v1795_v0 }
 0x14d   : > { %p341_p8 = scmp.lt.s32.totalorder %s340_s12, 11 }
 0x14e   : > { %v1198_v30 = vpop.f32.mrf.mxu2 }
 0x14f   : > { %v1199_v31 = vadd.f32 %v1198_v30, %v1130_v11  ;;  %v1267_v32 = vpop.f32.mrf.mxu3  ;;  %v1788_v11 = vor.u32 %v2013_v61, %v1787_v60  ;;  %s2791_s12 = smov (!%p341_p8, %s340_s12), 11 }
 0x150   : > { %v1132_v25 = vpop.f32.mrf.mxu1  ;;  %s1556_s14 = sshll.u32 %s2791_s12, 2 }
 0x151   : > { %v1268_v49 = vadd.f32 %v1267_v32, %v1199_v31  ;;  %v1133_v40 = vadd.f32 %v1132_v25, %v2572_v1  ;;  %s2714_s20 = scalar_lea.vmem %s2780_s3, %s1556_s14 }
 0x152   : > { %v1339_v41 = vpop.f32.mrf.mxu0 }
 0x153   : > { %v2624_v43 = vadd.f32 %v1336_v12, %v1268_v49  ;;  %1171 = vmatmul.bf16.gmra.mxu1 %v1764_v33  ;;  %1240 = vmatmul.bf16.gmra.mxu2 %v1768_v34 }
 0x154   : > { %1309 = vmatmul.bf16.gmra.mxu3 %v1772_v36 }
 0x155   : > { %1951 = vmatmul.msk.bf16.gmra.mxu0 %vm1007_vm0, %v1776_v37 }
 0x156   : > { %v1201_v44 = vpop.f32.mrf.mxu2 }
 0x157   : > { %v1202_v50 = vadd.f32 %v1201_v44, %v1133_v40  ;;  %v1270_v51 = vpop.f32.mrf.mxu3 }
 0x158   : > { %v1134_v52 = vpop.f32.mrf.mxu1 }
 0x159   : > { %v1271_v1 = vadd.f32 %v1270_v51, %v1202_v50  ;;  %v1135_v53 = vadd.f32 %v1134_v52, %v2581_v5 }
 0x15a   : > { %v1341_v54 = vpop.f32.mrf.mxu0 }
 0x15b   : > { %v2628_v55 = vadd.f32 %v1339_v41, %v1271_v1 }
 0x15e   : > { %v1203_v8 = vpop.f32.mrf.mxu2 }
 0x15f   : > { %v1204_v9 = vadd.f32 %v1203_v8, %v1135_v53  ;;  %v1272_v10 = vpop.f32.mrf.mxu3 }
 0x160   : > { %v1137_v12 = vpop.f32.mrf.mxu1 }
 0x161   : > { %v1273_v5 = vadd.f32 %v1272_v10, %v1204_v9  ;;  %v1138_v20 = vadd.f32 %v1137_v12, %v2520_v22 }
 0x162   : > { %v1344_v18 = vpop.f32.mrf.mxu0 }
 0x163   : > { %v2638_v19 = vadd.f32 %v1341_v54, %v1273_v5  ;;  %1176 = vmatmul.bf16.gmra.mxu1 %v1784_v45  ;;  %1245 = vmatmul.bf16.gmra.mxu2 %v1788_v11 }
 0x164   : > { %1314 = vmatmul.bf16.gmra.mxu3 %v1792_v16 }
 0x165   : > { %1952 = vmatmul.msk.bf16.gmra.mxu0 %vm1007_vm0, %v1796_v17 }
 0x166   : > { %v1206_v21 = vpop.f32.mrf.mxu2 }
 0x167   : > { %v1207_v23 = vadd.f32 %v1206_v21, %v1138_v20  ;;  %v1275_v24 = vpop.f32.mrf.mxu3 }
 0x168   : > { %v1139_v30 = vpop.f32.mrf.mxu1 }
 0x169   : > { %v1276_v31 = vadd.f32 %v1275_v24, %v1207_v23  ;;  %v1140_v25 = vadd.f32 %v1139_v30, %v2529_v28 }
 0x16a   : > { %v1346_v32 = vpop.f32.mrf.mxu0 }
 0x16b   : > { %v2642_v33 = vadd.f32 %v1344_v18, %v1276_v31 }
 0x16e   : > { %v1208_v36 = vpop.f32.mrf.mxu2 }
 0x16f   : > { %v1209_v37 = vadd.f32 %v1208_v36, %v1140_v25  ;;  %v1277_v49 = vpop.f32.mrf.mxu3 }
 0x170   : > { %v1142_v40 = vpop.f32.mrf.mxu1 }
 0x171   : > { %v1278_v41 = vadd.f32 %v1277_v49, %v1209_v37  ;;  %v1143_v51 = vadd.f32 %v1142_v40, %v2545_v42 }
 0x172   : > { %v1349_v44 = vpop.f32.mrf.mxu0 }
 0x173   : > { %v2647_v22 = vadd.f32 %v1346_v32, %v1278_v41 }
 0x176   : > { %v1211_v52 = vpop.f32.mrf.mxu2 }
 0x177   : > { %v1212_v1 = vadd.f32 %v1211_v52, %v1143_v51  ;;  %v1280_v53 = vpop.f32.mrf.mxu3 }
 0x178   : > { %v1144_v54 = vpop.f32.mrf.mxu1 }
 0x179   : > { %v1281_v56 = vadd.f32 %v1280_v53, %v1212_v1  ;;  %v1145_v61 = vadd.f32 %v1144_v54, %v2554_v48 }
 0x17a   : > { %v1351_v57 = vpop.f32.mrf.mxu0 }
 0x17b   : > { %v2652_v28 = vadd.f32 %v1349_v44, %v1281_v56 }
 0x17e   : > { %v1213_v29 = vpop.f32.mrf.mxu2 }
 0x17f   : > { %v1214_v63 = vadd.f32 %v1213_v29, %v1145_v61  ;;  %v1282_v0 = vpop.f32.mrf.mxu3 }
 0x180   : > { %v1147_v7 = vpop.f32.mrf.mxu1 }
 0x181   : > { %v1283_v8 = vadd.f32 %v1282_v0, %v1214_v63  ;;  %v1148_v45 = vadd.f32 %v1147_v7, %v2570_v62 }
 0x182   : > { %v1354_v9 = vpop.f32.mrf.mxu0 }
 0x183   : > { %v2657_v42 = vadd.f32 %v1351_v57, %v1283_v8 }
 0x186   : > { %v1216_v11 = vpop.f32.mrf.mxu2 }
 0x187   : > { %v1217_v12 = vadd.f32 %v1216_v11, %v1148_v45  ;;  %v1285_v16 = vpop.f32.mrf.mxu3 }
 0x188   : > { %v1149_v17 = vpop.f32.mrf.mxu1 }
 0x189   : > { %v1286_v5 = vadd.f32 %v1285_v16, %v1217_v12  ;;  %v1150_v21 = vadd.f32 %v1149_v17, %v2579_v4 }
 0x18a   : > { %v1356_v18 = vpop.f32.mrf.mxu0 }
 0x18b   : > { %v2662_v48 = vadd.f32 %v1354_v9, %v1286_v5 }
 0x18e   : > { %v1218_v23 = vpop.f32.mrf.mxu2 }
 0x18f   : > { %v1219_v24 = vadd.f32 %v1218_v23, %v1150_v21  ;;  %v1287_v30 = vpop.f32.mrf.mxu3 }
 0x190   : > { %v1152_v31 = vpop.f32.mrf.mxu1 }
 0x191   : > { %v1288_v32 = vadd.f32 %v1287_v30, %v1219_v24  ;;  %v1153_v16 = vadd.f32 %v1152_v31, %v2525_v26 }
 0x192   : > { %v1359_v25 = vpop.f32.mrf.mxu0 }
 0x193   : > { %v2667_v62 = vadd.f32 %v1356_v18, %v1288_v32 }
 0x196   : > { %v1221_v37 = vpop.f32.mrf.mxu2 }
 0x197   : > { %v1290_v49 = vpop.f32.mrf.mxu3  ;;  %v1222_v5 = vadd.f32 %v1221_v37, %v1153_v16 }
 0x198   : > { %v1154_v40 = vpop.f32.mrf.mxu1 }
 0x199   : > { %v1291_v23 = vadd.f32 %v1290_v49, %v1222_v5  ;;  %v1155_v36 = vadd.f32 %v1154_v40, %v2541_v38  ;;  %v2781_v38 = vmax.f32 %v2598_v35, %v2642_v33 }
 0x19a   : > { %v1361_v41 = vpop.f32.mrf.mxu0 }
 0x19b   : > { %v1360_v60 = vadd.f32 %v1359_v25, %v1291_v23 }
 0x19e   : > { %v1223_v44 = vpop.f32.mrf.mxu2 }
 0x19f   : > { %v1292_v51 = vpop.f32.mrf.mxu3  ;;  %v1224_v50 = vadd.f32 %v1223_v44, %v1155_v36 }
 0x1a0   : > { %v1157_v52 = vpop.f32.mrf.mxu1 }
 0x1a1   : > { %v1293_v49 = vadd.f32 %v1292_v51, %v1224_v50 }
 0x1a2   : > { %v2671_v1 = vpop.f32.mrf.mxu0 }
 0x1a3   : > { %v1362_v36 = vadd.f32 %v1361_v41, %v1293_v49  ;;  %v2782_v41 = vmax.f32 %v2609_v6, %v2647_v22 }
 0x1a6   : > { %v1226_v4 = vpop.f32.mrf.mxu2 }
 0x1a7   : > { %v1295_v53 = vpop.f32.mrf.mxu3 }
 0x1a8   : > { %v1159_v54 = vpop.f32.mrf.mxu1 }
 0x1aa   : > { %v2673_v56 = vpop.f32.mrf.mxu0 }
 0x1ae   : > { %v2675_v57 = vpop.f32.mrf.mxu2 }
 0x1af   : > { %v2677_v61 = vpop.f32.mrf.mxu3 }
 0x1b0   : > { %v2679_v29 = vpop.f32.mrf.mxu1 }
 0x1b2   : > { %v2681_v63 = vpop.f32.mrf.mxu0 }
 0x1b6   : > { %v2683_v0 = vpop.f32.mrf.mxu2 }
 0x1b7   : > { %v2685_v7 = vpop.f32.mrf.mxu3 }
 0x1b8   : > { %v2687_v8 = vpop.f32.mrf.mxu1 }
 0x1ba   : > { %v2689_v9 = vpop.f32.mrf.mxu0 }
 0x1be   : > { %v2691_v45 = vpop.f32.mrf.mxu2 }
 0x1bf   : > { %v2693_v11 = vpop.f32.mrf.mxu3 }
 0x1c0   : > { %v1167_v12 = vpop.f32.mrf.mxu1 }
 0x1c1   : > { %v1168_v18 = vadd.f32 %v1167_v12, %v2527_v27  ;;  %v2703_v27 = vld [vmem:[%s2779_s2] ss:$0 sm:$0xff] }
 0x1c2   : > { %v1374_v17 = vpop.f32.mrf.mxu0 }
 0x1c6   : > { %v1236_v21 = vpop.f32.mrf.mxu2 }
 0x1c7   : > { %v1237_v24 = vadd.f32 %v1236_v21, %v1168_v18  ;;  %v1305_v30 = vpop.f32.mrf.mxu3  ;;  %v1160_v21 = vadd.f32 %v1159_v54, %v2566_v58  ;;  %v2783_v58 = vmax.f32 %v2613_v13, %v2652_v28 }
 0x1c8   : > { %v1169_v32 = vpop.f32.mrf.mxu1 }
 0x1c9   : > { %v1306_v20 = vadd.f32 %v1305_v30, %v1237_v24  ;;  %v1170_v31 = vadd.f32 %v1169_v32, %v2543_v39 }
 0x1ca   : > { %v1376_v10 = vpop.f32.mrf.mxu0 }
 0x1cb   : > { %v1375_v34 = vadd.f32 %v1374_v17, %v1306_v20  ;;  %v1158_v20 = vadd.f32 %v1157_v52, %v2550_v46 }
 0x1cd   : > { %v1395_v26 = vmax.f32 %v1360_v60, %v1375_v34  ;;  %v1227_v44 = vadd.f32 %v1226_v4, %v1158_v20 }
 0x1ce   : > { %v1238_v37 = vpop.f32.mrf.mxu2 }
 0x1cf   : > { %v1401_v40 = vmax.f32 %v2781_v38, %v1395_v26  ;;  %v1239_v12 = vadd.f32 %v1238_v37, %v1170_v31  ;;  %v1307_v16 = vpop.f32.mrf.mxu3  ;;  %v1296_v51 = vadd.f32 %v1295_v53, %v1227_v44 }
 0x1d0   : > { %v1172_v25 = vpop.f32.mrf.mxu1 }
 0x1d1   : > { %v1411_v34 = vadd.f32 %v2703_v27, %v1401_v40  ;;  %v1308_v60 = vadd.f32 %v1307_v16, %v1239_v12  ;;  %v1173_v46 = vadd.f32 %v1172_v25, %v2552_v47  ;;  %v1365_v30 = vadd.f32 %v2671_v1, %v1296_v51 }
 0x1d2   : > { %v1379_v39 = vpop.f32.mrf.mxu0  ;;  %v1229_v47 = vadd.f32 %v2675_v57, %v1160_v21  ;;  %v1163_v40 = vadd.f32 %v2679_v29, %v2575_v2  ;;  %v2784_v2 = vmax.f32 %v2624_v43, %v2657_v42 }
 0x1d3   : > { %v1417_v17 = vmax.f32 %v1411_v34, 0.0  ;;  %v1377_v5 = vadd.f32 %v1376_v10, %v1308_v60 }
 0x1d4   : > { %v1298_v49 = vadd.f32 %v2677_v61, %v1229_v47  ;;  %v1232_v61 = vadd.f32 %v2683_v0, %v1163_v40  ;;  %v1165_v0 = vadd.f32 %v2687_v8, %v2591_v14  ;;  %v2785_v14 = vmax.f32 %v2628_v55, %v2662_v48 }
 0x1d5   : > { %v1423_v35 = vpack.c.bf16 %v1417_v17, %v1417_v17  ;;  %v1396_v33 = vmax.f32 %v1362_v36, %v1377_v5 }
 0x1d6   : > { %v1241_v50 = vpop.f32.mrf.mxu2  ;;  %v1367_v16 = vadd.f32 %v2673_v56, %v1298_v49  ;;  %v1301_v36 = vadd.f32 %v2685_v7, %v1232_v61  ;;  %v1234_v7 = vadd.f32 %v2691_v45, %v1165_v0 }
 0x1d7   : > { %1430 = vst.msk [vmem:[%s2714_s20] sm:$0xf] %vm1429_vm1, %v1423_v35  ;;  %v1402_v10 = vmax.f32 %v2782_v41, %v1396_v33  ;;  %v1242_v52 = vadd.f32 %v1241_v50, %v1173_v46  ;;  %v1310_v4 = vpop.f32.mrf.mxu3 }
 0x1d8   : > { %v1174_v18 = vpop.f32.mrf.mxu1  ;;  %v1370_v35 = vadd.f32 %v2681_v63, %v1301_v36  ;;  %v1303_v41 = vadd.f32 %v2693_v11, %v1234_v7  ;;  %v2786_v11 = vmax.f32 %v2638_v19, %v2667_v62 }
 0x1d9   : > { %v1412_v23 = vadd.f32 %v2703_v27, %v1402_v10  ;;  %v1311_v24 = vadd.f32 %v1310_v4, %v1242_v52  ;;  %v1175_v6 = vadd.f32 %v1174_v18, %v2568_v59 }
 0x1da   : > { %v1381_v22 = vpop.f32.mrf.mxu0  ;;  %v1372_v18 = vadd.f32 %v2689_v9, %v1303_v41 }
 0x1db   : > { %v1418_v53 = vmax.f32 %v1412_v23, 0.0  ;;  %v1380_v32 = vadd.f32 %v1379_v39, %v1311_v24 }
 0x1dd   : > { %v1424_v26 = vpack.c.bf16 %v1418_v53, %v1418_v53  ;;  %v1397_v31 = vmax.f32 %v1365_v30, %v1380_v32 }
 0x1de   : > { %v1243_v37 = vpop.f32.mrf.mxu2 }
 0x1df   : > { %1431 = vst.msk [vmem:[%s2714_s20 + $0x4] sm:$0xf] %vm1429_vm1, %v1424_v26  ;;  %v1403_v54 = vmax.f32 %v2783_v58, %v1397_v31  ;;  %v1244_v1 = vadd.f32 %v1243_v37, %v1175_v6  ;;  %v1312_v38 = vpop.f32.mrf.mxu3 }
 0x1e0   : > { %v1177_v57 = vpop.f32.mrf.mxu1 }
 0x1e1   : > { %v1413_v12 = vadd.f32 %v2703_v27, %v1403_v54  ;;  %v1313_v59 = vadd.f32 %v1312_v38, %v1244_v1  ;;  %v1178_v13 = vadd.f32 %v1177_v57, %v2577_v3 }
 0x1e2   : > { %v1384_v17 = vpop.f32.mrf.mxu0 }
 0x1e3   : > { %v1419_v25 = vmax.f32 %v1413_v12, 0.0  ;;  %v1382_v20 = vadd.f32 %v1381_v22, %v1313_v59 }
 0x1e5   : > { %v1425_v34 = vpack.c.bf16 %v1419_v25, %v1419_v25  ;;  %v1398_v60 = vmax.f32 %v1367_v16, %v1382_v20 }
 0x1e6   : > { %v1246_v28 = vpop.f32.mrf.mxu2 }
 0x1e7   : > { %1432 = vst.msk [vmem:[%s2714_s20 + $0x8] sm:$0xf] %vm1429_vm1, %v1425_v34  ;;  %v1404_v29 = vmax.f32 %v2784_v2, %v1398_v60  ;;  %v1247_v44 = vadd.f32 %v1246_v28, %v1178_v13  ;;  %v1315_v56 = vpop.f32.mrf.mxu3 }
 0x1e8   : > { %v1179_v3 = vpop.f32.mrf.mxu1 }
 0x1e9   : > { %v1414_v5 = vadd.f32 %v2703_v27, %v1404_v29  ;;  %v1316_v39 = vadd.f32 %v1315_v56, %v1247_v44  ;;  %v1180_v42 = vadd.f32 %v1179_v3, %v2593_v15 }
 0x1ea   : > { %v1386_v4 = vpop.f32.mrf.mxu0 }
 0x1eb   : > { %v1420_v33 = vmax.f32 %v1414_v5, 0.0  ;;  %v1385_v46 = vadd.f32 %v1384_v17, %v1316_v39 }
 0x1ed   : > { %v1426_v50 = vpack.c.bf16 %v1420_v33, %v1420_v33  ;;  %v1399_v43 = vmax.f32 %v1370_v35, %v1385_v46 }
 0x1ee   : > { %v1248_v51 = vpop.f32.mrf.mxu2 }
 0x1ef   : > { %1433 = vst.msk [vmem:[%s2714_s20 + $0xc] sm:$0xf] %vm1429_vm1, %v1426_v50  ;;  %v1405_v8 = vmax.f32 %v2785_v14, %v1399_v43  ;;  %v1249_v63 = vadd.f32 %v1248_v51, %v1180_v42  ;;  %v1317_v10 = vpop.f32.mrf.mxu3 }
 0x1f1   : > { %v1415_v45 = vadd.f32 %v2703_v27, %v1405_v8  ;;  %v1318_v52 = vadd.f32 %v1317_v10, %v1249_v63 }
 0x1f3   : > { %v1421_v21 = vmax.f32 %v1415_v45, 0.0  ;;  %v1387_v15 = vadd.f32 %v1386_v4, %v1318_v52 }
 0x1f5   : > { %v1427_v23 = vpack.c.bf16 %v1421_v21, %v1421_v21  ;;  %v1400_v24 = vmax.f32 %v1372_v18, %v1387_v15 }
 0x1f7   : > { %1434 = vst.msk [vmem:[%s2714_s20 + $0x10] sm:$0xf] %vm1429_vm1, %v1427_v23  ;;  %v1406_v55 = vmax.f32 %v2786_v11, %v1400_v24 }
 0x1f9   : > { %v1416_v48 = vadd.f32 %v2703_v27, %v1406_v55 }
 0x1fb   : > { %v1422_v30 = vmax.f32 %v1416_v48, 0.0 }
 0x1fd   : > { %v1428_v47 = vpack.c.bf16 %v1422_v30, %v1422_v30 }
 0x1ff   : > { %1435 = vst.msk [vmem:[%s2714_s20 + $0x14] sm:$0xf] %vm1429_vm1, %v1428_v47 }
 0x200 PF: > { %p10_p9 = scmp.ge.s32.totalorder %s2165_s16, 4   ;;  %s2787_s12 = smov %s2122_s13 }
 0x201   : > { %s2788_s13 = smov %s2174_s19  ;;  %s2789_s14 = smov %s2165_s16 }
 0x202   :  { %12 = sbr.rel (!%p10_p9) target bundleno = 2 (0x2), region = 99 }

// kernel: critic_forward.10
= control target key start
LH: loop header
LB: loop body
LE: loop exit
PB: predicated region body
PF: predicated region fallthrough
CT: control target
= control target key end

     0   :  { %s313_s1 = inlined_call_operand.vmem [shape: bf16[128,128], index: 1, kind: input, shape index: {}]   ;;  %s314_s0 = inlined_call_operand.vmem [shape: bf16[4,16,128], index: 0, kind: input, shape index: {}]   ;;  %s315_s2 = inlined_call_operand.vmem [shape: f32[1,128], index: 2, kind: input, shape index: {}]   ;;  %s316_s3 = inlined_call_operand.vmem [shape: bf16[16,128], index: 3, kind: output, shape index: {}]  }
   0x1   :  { %v220_v0 = vld [vmem:[%s313_s1 + $0x38] sm:$0xff]  ;;  %v219_v1 = vld [vmem:[%s313_s1 + $0x30] sm:$0xff]  ;;  %v218_v2 = vld [vmem:[%s313_s1 + $0x28] sm:$0xff] }
   0x2   :  { %110 = vmatpush.bf16.msra.mxu0 %v220_v0  ;;  %226 = vmatpush.bf16.msra.mxu1 %v220_v0  ;;  %v217_v3 = vld [vmem:[%s313_s1 + $0x20] sm:$0xff]  ;;  %v216_v4 = vld [vmem:[%s313_s1 + $0x18] sm:$0xff]  ;;  %v215_v5 = vld [vmem:[%s313_s1 + $0x10] sm:$0xff] }
   0x3   :  { %227 = vmatpush.bf16.msra.mxu2 %v220_v0  ;;  %228 = vmatpush.bf16.msra.mxu3 %v220_v0  ;;  %v214_v6 = vld [vmem:[%s313_s1 + $0x8] sm:$0xff]  ;;  %v213_v7 = vld [vmem:[%s313_s1] sm:$0xff]  ;;  %v211_v10 = vld [vmem:[%s314_s0 + $0x10] sm:$0xff] }
   0x4   :  { %v209_v8 = vld [vmem:[%s314_s0] sm:$0xff]  ;;  %v210_v9 = vld [vmem:[%s314_s0 + $0x8] sm:$0xff]  ;;  %v212_v11 = vld [vmem:[%s314_s0 + $0x18] sm:$0xff] }
   0x5   :  { %v250_v21 = vld [vmem:[%s315_s2] ss:$0 sm:$0xff] }
   0x6   :  { %111 = vmatpush.bf16.msra.mxu0 %v219_v1  ;;  %229 = vmatpush.bf16.msra.mxu1 %v219_v1 }
   0x7   :  { %230 = vmatpush.bf16.msra.mxu2 %v219_v1  ;;  %231 = vmatpush.bf16.msra.mxu3 %v219_v1 }
   0xa   :  { %112 = vmatpush.bf16.msra.mxu0 %v218_v2  ;;  %232 = vmatpush.bf16.msra.mxu1 %v218_v2 }
   0xb   :  { %233 = vmatpush.bf16.msra.mxu2 %v218_v2  ;;  %234 = vmatpush.bf16.msra.mxu3 %v218_v2 }
   0xe   :  { %113 = vmatpush.bf16.msra.mxu0 %v217_v3  ;;  %235 = vmatpush.bf16.msra.mxu1 %v217_v3 }
   0xf   :  { %236 = vmatpush.bf16.msra.mxu2 %v217_v3  ;;  %237 = vmatpush.bf16.msra.mxu3 %v217_v3 }
  0x12   :  { %114 = vmatpush.bf16.msra.mxu0 %v216_v4  ;;  %238 = vmatpush.bf16.msra.mxu1 %v216_v4 }
  0x13   :  { %239 = vmatpush.bf16.msra.mxu2 %v216_v4  ;;  %240 = vmatpush.bf16.msra.mxu3 %v216_v4 }
  0x16   :  { %115 = vmatpush.bf16.msra.mxu0 %v215_v5  ;;  %241 = vmatpush.bf16.msra.mxu1 %v215_v5 }
  0x17   :  { %242 = vmatpush.bf16.msra.mxu2 %v215_v5  ;;  %243 = vmatpush.bf16.msra.mxu3 %v215_v5 }
  0x1a   :  { %116 = vmatpush.bf16.msra.mxu0 %v214_v6  ;;  %244 = vmatpush.bf16.msra.mxu1 %v214_v6 }
  0x1b   :  { %245 = vmatpush.bf16.msra.mxu2 %v214_v6  ;;  %246 = vmatpush.bf16.msra.mxu3 %v214_v6 }
  0x1e   :  { %117 = vmatpush.bf16.msra.mxu0 %v213_v7  ;;  %247 = vmatpush.bf16.msra.mxu1 %v213_v7 }
  0x1f   :  { %248 = vmatpush.bf16.msra.mxu2 %v213_v7  ;;  %249 = vmatpush.bf16.msra.mxu3 %v213_v7 }
  0x21   :  { %118 = vmatmul.bf16.vlgmr.msra.gmra.mxu0 %v209_v8  ;;  %123 = vmatmul.bf16.vlgmr.msra.gmra.mxu1 %v210_v9 }
  0x22   :  { %128 = vmatmul.bf16.vlgmr.msra.gmra.mxu2 %v211_v10  ;;  %133 = vmatmul.bf16.vlgmr.msra.gmra.mxu3 %v212_v11 }
  0x9e   :  { %v119_v12 = vpop.f32.mrf.mxu0  ;;  %v124_v13 = vpop.f32.mrf.mxu1 }
  0x9f   :  { %v139_v16 = vmax.f32 %v119_v12, %v124_v13 }
  0xa5   :  { %v129_v14 = vpop.f32.mrf.mxu2  ;;  %v134_v15 = vpop.f32.mrf.mxu3 }
  0xa6   :  { %v141_v17 = vmax.f32 %v129_v14, %v134_v15  ;;  %v121_v18 = vpop.f32.mrf.mxu0  ;;  %v126_v19 = vpop.f32.mrf.mxu1 }
  0xa7   :  { %v140_v24 = vmax.f32 %v121_v18, %v126_v19 }
  0xa8   :  { %v143_v20 = vmax.f32 %v139_v16, %v141_v17 }
  0xaa   :  { %v149_v26 = vadd.f32 %v250_v21, %v143_v20 }
  0xac   :  { %v151_v29 = vmax.f32 %v149_v26, 0.0 }
  0xad   :  { %v131_v22 = vpop.f32.mrf.mxu2  ;;  %v136_v23 = vpop.f32.mrf.mxu3 }
  0xae   :  { %v142_v25 = vmax.f32 %v131_v22, %v136_v23 }
  0xb0   :  { %v144_v27 = vmax.f32 %v140_v24, %v142_v25 }
  0xb2   :  { %v150_v28 = vadd.f32 %v250_v21, %v144_v27 }
  0xb4   :  { %v152_v30 = vmax.f32 %v150_v28, 0.0 }
  0xb6   :  { %v224_v31 = vpack.c.bf16 %v152_v30, %v151_v29 }
  0xb8   :  { %225 = vst [vmem:[%s316_s3] sm:$0xff] %v224_v31  }

// kernel: critic_forward.9
= control target key start
LH: loop header
LB: loop body
LE: loop exit
PB: predicated region body
PF: predicated region fallthrough
CT: control target
= control target key end

     0   :  { %vm427_vm0 = vcmask 523264   ;;  %s1171_s1 = inlined_call_operand.vmem [shape: bf16[576,128], index: 1, kind: input, shape index: {}]   ;;  %s1172_s0 = inlined_call_operand.vmem [shape: bf16[4,16,576], index: 0, kind: input, shape index: {}]   ;;  %s1173_s2 = inlined_call_operand.vmem [shape: f32[1,128], index: 2, kind: input, shape index: {}]   ;;  %s1174_s3 = inlined_call_operand.vmem [shape: bf16[16,128], index: 3, kind: output, shape index: {}]  }
   0x1   :  { %v862_v0 = vld [vmem:[%s1171_s1 + $0x38] sm:$0xff]  ;;  %v861_v1 = vld [vmem:[%s1171_s1 + $0x30] sm:$0xff]  ;;  %v860_v4 = vld [vmem:[%s1171_s1 + $0x28] sm:$0xff] }
   0x2   :  { %896 = vmatpush.bf16.msra.mxu1 %v862_v0  ;;  %897 = vmatpush.bf16.msra.mxu2 %v862_v0  ;;  %v886_v2 = vld [vmem:[%s1171_s1 + $0xf8] sm:$0xff]  ;;  %v885_v3 = vld [vmem:[%s1171_s1 + $0xf0] sm:$0xff]  ;;  %v884_v5 = vld [vmem:[%s1171_s1 + $0xe8] sm:$0xff] }
   0x3   :  { %440 = vmatpush.bf16.msra.mxu0 %v862_v0  ;;  %527 = vmatpush.bf16.msra.mxu3 %v886_v2  ;;  %v859_v6 = vld [vmem:[%s1171_s1 + $0x20] sm:$0xff]  ;;  %v858_v8 = vld [vmem:[%s1171_s1 + $0x18] sm:$0xff]  ;;  %v857_v10 = vld [vmem:[%s1171_s1 + $0x10] sm:$0xff] }
   0x4   :  { %v883_v7 = vld [vmem:[%s1171_s1 + $0xe0] sm:$0xff]  ;;  %v882_v9 = vld [vmem:[%s1171_s1 + $0xd8] sm:$0xff]  ;;  %v881_v11 = vld [vmem:[%s1171_s1 + $0xd0] sm:$0xff] }
   0x5   :  { %v856_v12 = vld [vmem:[%s1171_s1 + $0x8] sm:$0xff]  ;;  %v855_v14 = vld [vmem:[%s1171_s1] sm:$0xff]  ;;  %v842_v16 = vld [vmem:[%s1172_s0 + $0x38] sm:$0xf0] }
   0x6   :  { %898 = vmatpush.bf16.msra.mxu1 %v861_v1  ;;  %899 = vmatpush.bf16.msra.mxu2 %v861_v1  ;;  %v880_v13 = vld [vmem:[%s1171_s1 + $0xc8] sm:$0xff]  ;;  %v669_v17 = vld [vmem:[%s1172_s0 + $0x78] sm:$0xf]  ;;  %v609_v21 = vld [vmem:[%s1172_s0] sm:$0xf] }
   0x7   :  { %441 = vmatpush.bf16.msra.mxu0 %v861_v1  ;;  %528 = vmatpush.bf16.msra.mxu3 %v885_v3  ;;  %v629_v15 = vld [vmem:[%s1172_s0 + $0x28] sm:$0xf]  ;;  %v852_v18 = vld [vmem:[%s1172_s0 + $0x88] sm:$0xf0]  ;;  %v878_v19 = vld [vmem:[%s1171_s1 + $0xb8] sm:$0xff] }
   0x8   :  { %v870_v20 = vld [vmem:[%s1171_s1 + $0x78] sm:$0xff]  ;;  %v879_v22 = vld [vmem:[%s1171_s1 + $0xc0] sm:$0xff]  ;;  %v630_v23 = vor.u32 %v842_v16, %v629_v15  ;;  %v670_v24 = vor.u32 %v852_v18, %v669_v17  ;;  %v837_v25 = vld [vmem:[%s1172_s0 + $0x10] sm:$0xf0] }
   0x9   :  { %v836_v26 = vld [vmem:[%s1172_s0 + $0xc] sm:$0xf]  ;;  %v619_v27 = vld [vmem:[%s1172_s0 + $0x1c] sm:$0xf0]  ;;  %v890_v28 = vld [vmem:[%s1171_s1 + $0x118] sm:$0xff]  ;;  %v610_v31 = vor.u32 %v837_v25, %v609_v21 }
   0xa   :  { %900 = vmatpush.bf16.msra.mxu1 %v860_v4  ;;  %901 = vmatpush.bf16.msra.mxu2 %v860_v4  ;;  %v877_v29 = vld [vmem:[%s1171_s1 + $0xb0] sm:$0xff]  ;;  %v622_v32 = vor.u32 %v836_v26, %v619_v27  ;;  %v876_v34 = vld [vmem:[%s1171_s1 + $0xa8] sm:$0xff]  ;;  %v875_v37 = vld [vmem:[%s1171_s1 + $0xa0] sm:$0xff] }
   0xb   :  { %442 = vmatpush.bf16.msra.mxu0 %v860_v4  ;;  %529 = vmatpush.bf16.msra.mxu3 %v884_v5  ;;  %v869_v30 = vld [vmem:[%s1171_s1 + $0x70] sm:$0xff]  ;;  %v868_v35 = vld [vmem:[%s1171_s1 + $0x68] sm:$0xff]  ;;  %v867_v38 = vld [vmem:[%s1171_s1 + $0x60] sm:$0xff] }
   0xc   :  { %v889_v33 = vld [vmem:[%s1171_s1 + $0x110] sm:$0xff]  ;;  %v888_v36 = vld [vmem:[%s1171_s1 + $0x108] sm:$0xff]  ;;  %v847_v40 = vld [vmem:[%s1172_s0 + $0x60] sm:$0xf0] }
   0xd   :  { %v649_v39 = vld [vmem:[%s1172_s0 + $0x50] sm:$0xf]  ;;  %v887_v41 = vld [vmem:[%s1171_s1 + $0x100] sm:$0xff]  ;;  %v874_v42 = vld [vmem:[%s1171_s1 + $0x98] sm:$0xff] }
   0xe   :  { %902 = vmatpush.bf16.msra.mxu1 %v859_v6  ;;  %903 = vmatpush.bf16.msra.mxu2 %v859_v6  ;;  %v866_v43 = vld [vmem:[%s1171_s1 + $0x58] sm:$0xff]  ;;  %v625_v44 = vld [vmem:[%s1172_s0 + $0x10] sm:$0xf]  ;;  %v650_v45 = vor.u32 %v847_v40, %v649_v39  ;;  %v839_v46 = vld [vmem:[%s1172_s0 + $0x20] sm:$0xf0] }
   0xf   :  { %443 = vmatpush.bf16.msra.mxu0 %v859_v6  ;;  %530 = vmatpush.bf16.msra.mxu3 %v883_v7  ;;  %v841_v47 = vld [vmem:[%s1172_s0 + $0x34] sm:$0xf]  ;;  %v639_v48 = vld [vmem:[%s1172_s0 + $0x44] sm:$0xf0]  ;;  %v626_v51 = vor.u32 %v839_v46, %v625_v44  ;;  %v871_v55 = vld [vmem:[%s1171_s1 + $0x80] sm:$0xff] }
  0x10   :  { %v873_v49 = vld [vmem:[%s1171_s1 + $0x90] sm:$0xff]  ;;  %v642_v52 = vor.u32 %v841_v47, %v639_v48  ;;  %v872_v53 = vld [vmem:[%s1171_s1 + $0x88] sm:$0xff]  ;;  %v863_v56 = vld [vmem:[%s1171_s1 + $0x40] sm:$0xff] }
  0x11   :  { %v865_v50 = vld [vmem:[%s1171_s1 + $0x50] sm:$0xff]  ;;  %v864_v54 = vld [vmem:[%s1171_s1 + $0x48] sm:$0xff]  ;;  %v838_v58 = vld [vmem:[%s1172_s0 + $0x18] sm:$0xf0] }
  0x12   :  { %904 = vmatpush.bf16.msra.mxu1 %v858_v8  ;;  %905 = vmatpush.bf16.msra.mxu2 %v858_v8  ;;  %v617_v57 = vld [vmem:[%s1172_s0 + $0x8] sm:$0xf]  ;;  %v835_v60 = vld [vmem:[%s1172_s0 + $0x4] sm:$0xf]  ;;  %v611_v61 = vld [vmem:[%s1172_s0 + $0x14] sm:$0xf0] }
  0x13   :  { %444 = vmatpush.bf16.msra.mxu0 %v858_v8  ;;  %531 = vmatpush.bf16.msra.mxu3 %v882_v9  ;;  %v618_v59 = vor.u32 %v838_v58, %v617_v57  ;;  %v645_v62 = vld [vmem:[%s1172_s0 + $0x38] sm:$0xf]  ;;  %v614_v63 = vor.u32 %v835_v60, %v611_v61  ;;  %v844_v0 = vld [vmem:[%s1172_s0 + $0x48] sm:$0xf0]  ;;  %v846_v1 = vld [vmem:[%s1172_s0 + $0x5c] sm:$0xf] }
  0x14   :  { %v659_v2 = vld [vmem:[%s1172_s0 + $0x6c] sm:$0xf0]  ;;  %v646_v3 = vor.u32 %v844_v0, %v645_v62  ;;  %v843_v6 = vld [vmem:[%s1172_s0 + $0x40] sm:$0xf0]  ;;  %v840_v8 = vld [vmem:[%s1172_s0 + $0x2c] sm:$0xf] }
  0x15   :  { %v662_v4 = vor.u32 %v846_v1, %v659_v2  ;;  %v637_v5 = vld [vmem:[%s1172_s0 + $0x30] sm:$0xf]  ;;  %v631_v9 = vld [vmem:[%s1172_s0 + $0x3c] sm:$0xf0]  ;;  %v657_v17 = vld [vmem:[%s1172_s0 + $0x58] sm:$0xf] }
  0x16   :  { %906 = vmatpush.bf16.msra.mxu1 %v857_v10  ;;  %907 = vmatpush.bf16.msra.mxu2 %v857_v10  ;;  %v638_v7 = vor.u32 %v843_v6, %v637_v5  ;;  %v848_v18 = vld [vmem:[%s1172_s0 + $0x68] sm:$0xf0]  ;;  %v651_v21 = vld [vmem:[%s1172_s0 + $0x64] sm:$0xf0]  ;;  %v677_v26 = vld [vmem:[%s1172_s0 + $0x80] sm:$0xf] }
  0x17   :  { %445 = vmatpush.bf16.msra.mxu0 %v857_v10  ;;  %532 = vmatpush.bf16.msra.mxu3 %v881_v11  ;;  %v665_v10 = vld [vmem:[%s1172_s0 + $0x60] sm:$0xf]  ;;  %v634_v11 = vor.u32 %v840_v8, %v631_v9  ;;  %v853_v27 = vld [vmem:[%s1172_s0 + $0x90] sm:$0xf0] }
  0x1a   :  { %908 = vmatpush.bf16.msra.mxu1 %v856_v12  ;;  %909 = vmatpush.bf16.msra.mxu2 %v856_v12 }
  0x1b   :  { %446 = vmatpush.bf16.msra.mxu0 %v856_v12  ;;  %533 = vmatpush.bf16.msra.mxu3 %v880_v13  ;;  %v849_v12 = vld [vmem:[%s1172_s0 + $0x70] sm:$0xf0]  ;;  %v851_v13 = vld [vmem:[%s1172_s0 + $0x84] sm:$0xf] }
  0x1c   :  { %v666_v15 = vor.u32 %v849_v12, %v665_v10 }
  0x1e   :  { %910 = vmatpush.bf16.msra.mxu1 %v855_v14  ;;  %911 = vmatpush.bf16.msra.mxu2 %v855_v14 }
  0x1f   :  { %447 = vmatpush.bf16.msra.mxu0 %v855_v14  ;;  %534 = vmatpush.bf16.msra.mxu3 %v879_v22  ;;  %v679_v14 = vld [vmem:[%s1172_s0 + $0x94] sm:$0xf0] }
  0x20   :  { %v682_v16 = vor.u32 %v851_v13, %v679_v14 }
  0x21   :  { %453 = vmatmul.bf16.vlgmr.msra.gmra.mxu1 %v630_v23  ;;  %463 = vmatmul.bf16.vlgmr.msra.gmra.mxu2 %v670_v24  ;;  %v685_v23 = vld [vmem:[%s1172_s0 + $0x88] sm:$0xf]  ;;  %v854_v24 = vld [vmem:[%s1172_s0 + $0x98] sm:$0xf0] }
  0x22   :  { %498 = vmatpush.bf16.msrb.mxu2 %v878_v19  ;;  %469 = vmatpush.bf16.msrb.mxu1 %v870_v20  ;;  %v658_v19 = vor.u32 %v848_v18, %v657_v17  ;;  %v845_v20 = vld [vmem:[%s1172_s0 + $0x54] sm:$0xf]  ;;  %v686_v25 = vor.u32 %v854_v24, %v685_v23 }
  0x23   :  { %560 = vmatpush.bf16.msrb.mxu0 %v890_v28  ;;  %535 = vmatmul.bf16.vlgmr.msra.gmra.mxu3 %v622_v32  ;;  %v654_v22 = vor.u32 %v845_v20, %v651_v21  ;;  %v678_v28 = vor.u32 %v853_v27, %v677_v26 }
  0x24   :  { %448 = vmatmul.bf16.vlgmr.msra.gmra.mxu0 %v610_v31 }
  0x26   :  { %499 = vmatpush.bf16.msrb.mxu2 %v877_v29  ;;  %470 = vmatpush.bf16.msrb.mxu1 %v869_v30  ;;  %v850_v29 = vld [vmem:[%s1172_s0 + $0x7c] sm:$0xf]  ;;  %v671_v30 = vld [vmem:[%s1172_s0 + $0x8c] sm:$0xf0] }
  0x27   :  { %561 = vmatpush.bf16.msrb.mxu0 %v889_v33  ;;  %v674_v31 = vor.u32 %v850_v29, %v671_v30 }
  0x2a   :  { %500 = vmatpush.bf16.msrb.mxu2 %v876_v34  ;;  %471 = vmatpush.bf16.msrb.mxu1 %v868_v35 }
  0x2b   :  { %562 = vmatpush.bf16.msrb.mxu0 %v888_v36 }
  0x2e   :  { %501 = vmatpush.bf16.msrb.mxu2 %v875_v37  ;;  %472 = vmatpush.bf16.msrb.mxu1 %v867_v38 }
  0x2f   :  { %563 = vmatpush.bf16.msrb.mxu0 %v887_v41 }
  0x31   :  { %458 = vmatmul.bf16.gmra.mxu1 %v650_v45 }
  0x32   :  { %502 = vmatpush.bf16.msrb.mxu2 %v874_v42  ;;  %473 = vmatpush.bf16.msrb.mxu1 %v866_v43 }
  0x33   :  { %540 = vmatmul.bf16.gmra.mxu3 %v642_v52 }
  0x34   :  { %831 = vmatmul.msk.bf16.vlgmr.msrb.gmra.mxu0 %vm427_vm0, %v626_v51 }
  0x36   :  { %503 = vmatpush.bf16.msrb.mxu2 %v873_v49  ;;  %474 = vmatpush.bf16.msrb.mxu1 %v865_v50 }
  0x3a   :  { %504 = vmatpush.bf16.msrb.mxu2 %v872_v53  ;;  %475 = vmatpush.bf16.msrb.mxu1 %v864_v54 }
  0x3e   :  { %505 = vmatpush.bf16.msrb.mxu2 %v871_v55  ;;  %476 = vmatpush.bf16.msrb.mxu1 %v863_v56 }
  0x41   :  { %506 = vmatmul.bf16.vlgmr.msrb.gmra.mxu2 %v618_v59  ;;  %477 = vmatmul.bf16.vlgmr.msrb.gmra.mxu1 %v614_v63 }
  0x43   :  { %545 = vmatmul.bf16.gmra.mxu3 %v662_v4 }
  0x44   :  { %832 = vmatmul.msk.bf16.gmra.mxu0 %vm427_vm0, %v646_v3 }
  0x51   :  { %511 = vmatmul.bf16.gmra.mxu2 %v638_v7  ;;  %482 = vmatmul.bf16.gmra.mxu1 %v634_v11 }
  0x53   :  { %550 = vmatmul.bf16.gmra.mxu3 %v682_v16 }
  0x54   :  { %833 = vmatmul.msk.bf16.gmra.mxu0 %vm427_vm0, %v666_v15 }
  0x61   :  { %516 = vmatmul.bf16.gmra.mxu2 %v658_v19  ;;  %487 = vmatmul.bf16.gmra.mxu1 %v654_v22 }
  0x64   :  { %834 = vmatmul.msk.bf16.gmra.mxu0 %vm427_vm0, %v686_v25 }
  0x71   :  { %521 = vmatmul.bf16.gmra.mxu2 %v678_v28  ;;  %492 = vmatmul.bf16.gmra.mxu1 %v674_v31 }
  0x9e   :  { %v454_v32 = vpop.f32.mrf.mxu1 }
  0xa1   :  { %v449_v33 = vpop.f32.mrf.mxu0 }
  0xa4   :  { %v464_v37 = vpop.f32.mrf.mxu2 }
  0xa6   :  { %v456_v34 = vpop.f32.mrf.mxu1  ;;  %v536_v38 = vpop.f32.mrf.mxu3 }
  0xa9   :  { %v451_v35 = vpop.f32.mrf.mxu0 }
  0xac   :  { %v466_v41 = vpop.f32.mrf.mxu2 }
  0xae   :  { %v459_v36 = vpop.f32.mrf.mxu1  ;;  %v538_v43 = vpop.f32.mrf.mxu3 }
  0xb1   :  { %v565_v40 = vpop.f32.mrf.mxu0 }
  0xb6   :  { %v461_v39 = vpop.f32.mrf.mxu1  ;;  %v541_v48 = vpop.f32.mrf.mxu3 }
  0xb9   :  { %v567_v45 = vpop.f32.mrf.mxu0 }
  0xbe   :  { %v478_v42 = vpop.f32.mrf.mxu1  ;;  %v543_v57 = vpop.f32.mrf.mxu3 }
  0xbf   :  { %v479_v49 = vadd.f32 %v478_v42, %v449_v33 }
  0xc1   :  { %v570_v50 = vpop.f32.mrf.mxu0 }
  0xc4   :  { %v507_v44 = vpop.f32.mrf.mxu2 }
  0xc5   :  { %v508_v51 = vadd.f32 %v507_v44, %v479_v49  ;;  %v912_v44 = vld [vmem:[%s1173_s2] ss:$0 sm:$0xff] }
  0xc6   :  { %v480_v46 = vpop.f32.mrf.mxu1  ;;  %v546_v1 = vpop.f32.mrf.mxu3 }
  0xc7   :  { %v537_v55 = vadd.f32 %v536_v38, %v508_v51  ;;  %v481_v16 = vadd.f32 %v480_v46, %v451_v35 }
  0xc9   :  { %v572_v59 = vpop.f32.mrf.mxu0  ;;  %v566_v60 = vadd.f32 %v565_v40, %v537_v55 }
  0xcc   :  { %v509_v47 = vpop.f32.mrf.mxu2 }
  0xcd   :  { %v510_v23 = vadd.f32 %v509_v47, %v481_v16 }
  0xce   :  { %v483_v52 = vpop.f32.mrf.mxu1  ;;  %v548_v6 = vpop.f32.mrf.mxu3 }
  0xcf   :  { %v484_v53 = vadd.f32 %v483_v52, %v454_v32  ;;  %v539_v32 = vadd.f32 %v538_v43, %v510_v23 }
  0xd1   :  { %v575_v3 = vpop.f32.mrf.mxu0  ;;  %v568_v40 = vadd.f32 %v567_v45, %v539_v32 }
  0xd4   :  { %v512_v54 = vpop.f32.mrf.mxu2 }
  0xd5   :  { %v513_v56 = vadd.f32 %v512_v54, %v484_v53 }
  0xd6   :  { %v485_v62 = vpop.f32.mrf.mxu1  ;;  %v551_v14 = vpop.f32.mrf.mxu3 }
  0xd7   :  { %v542_v58 = vadd.f32 %v541_v48, %v513_v56  ;;  %v486_v13 = vadd.f32 %v485_v62, %v456_v34 }
  0xd9   :  { %v571_v61 = vadd.f32 %v570_v50, %v542_v58  ;;  %v577_v7 = vpop.f32.mrf.mxu0 }
  0xdb   :  { %v585_v63 = vmax.f32 %v566_v60, %v571_v61 }
  0xdc   :  { %v514_v0 = vpop.f32.mrf.mxu2 }
  0xdd   :  { %v515_v21 = vadd.f32 %v514_v0, %v486_v13 }
  0xde   :  { %v488_v2 = vpop.f32.mrf.mxu1  ;;  %v553_v35 = vpop.f32.mrf.mxu3 }
  0xdf   :  { %v489_v9 = vadd.f32 %v488_v2, %v459_v36  ;;  %v544_v29 = vadd.f32 %v543_v57, %v515_v21 }
  0xe1   :  { %v580_v20 = vpop.f32.mrf.mxu0 }
  0xe4   :  { %v517_v4 = vpop.f32.mrf.mxu2 }
  0xe5   :  { %v518_v10 = vadd.f32 %v517_v4, %v489_v9 }
  0xe6   :  { %v490_v5 = vpop.f32.mrf.mxu1 }
  0xe7   :  { %v547_v17 = vadd.f32 %v546_v1, %v518_v10  ;;  %v491_v18 = vadd.f32 %v490_v5, %v461_v39 }
  0xe9   :  { %v576_v24 = vadd.f32 %v575_v3, %v547_v17  ;;  %v582_v39 = vpop.f32.mrf.mxu0 }
  0xec   :  { %v519_v8 = vpop.f32.mrf.mxu2 }
  0xed   :  { %v520_v25 = vadd.f32 %v519_v8, %v491_v18 }
  0xee   :  { %v493_v11 = vpop.f32.mrf.mxu1 }
  0xef   :  { %v494_v12 = vadd.f32 %v493_v11, %v464_v37  ;;  %v549_v33 = vadd.f32 %v548_v6, %v520_v25  ;;  %v573_v37 = vadd.f32 %v572_v59, %v544_v29 }
  0xf1   :  { %v578_v42 = vadd.f32 %v577_v7, %v549_v33  ;;  %v586_v47 = vmax.f32 %v568_v40, %v573_v37 }
  0xf4   :  { %v522_v15 = vpop.f32.mrf.mxu2 }
  0xf5   :  { %v523_v19 = vadd.f32 %v522_v15, %v494_v12 }
  0xf6   :  { %v495_v27 = vpop.f32.mrf.mxu1 }
  0xf7   :  { %v552_v22 = vadd.f32 %v551_v14, %v523_v19  ;;  %v496_v28 = vadd.f32 %v495_v27, %v466_v41 }
  0xf9   :  { %v581_v26 = vadd.f32 %v580_v20, %v552_v22 }
  0xfb   :  { %v587_v30 = vmax.f32 %v576_v24, %v581_v26 }
  0xfc   :  { %v524_v31 = vpop.f32.mrf.mxu2 }
  0xfd   :  { %v589_v34 = vmax.f32 %v585_v63, %v587_v30  ;;  %v525_v36 = vadd.f32 %v524_v31, %v496_v28 }
  0xff   :  { %v554_v38 = vadd.f32 %v553_v35, %v525_v36  ;;  %v595_v48 = vadd.f32 %v912_v44, %v589_v34 }
 0x101   :  { %v583_v46 = vadd.f32 %v582_v39, %v554_v38  ;;  %v597_v43 = vmax.f32 %v595_v48, 0.0 }
 0x103   :  { %v588_v41 = vmax.f32 %v578_v42, %v583_v46 }
 0x105   :  { %v590_v49 = vmax.f32 %v586_v47, %v588_v41 }
 0x107   :  { %v596_v50 = vadd.f32 %v912_v44, %v590_v49 }
 0x109   :  { %v598_v51 = vmax.f32 %v596_v50, 0.0 }
 0x10b   :  { %v894_v52 = vpack.c.bf16 %v598_v51, %v597_v43 }
 0x10d   :  { %895 = vst [vmem:[%s1174_s3] sm:$0xff] %v894_v52  }

// kernel: critic_forward.11
= control target key start
LH: loop header
LB: loop body
LE: loop exit
PB: predicated region body
PF: predicated region fallthrough
CT: control target
= control target key end

     0   :  { %vm79_vm0 = vcmask 1043456   ;;  %vm75_vm1 = vcmask 64512   ;;  %vm164_vm2 = vcmask 254976   ;;  %v391_v20 = vmov 32.0   ;;  %s563_s3 = inlined_call_operand.vmem [shape: bf16[128,32], index: 3, kind: input, shape index: {}]   ;;  %s564_s4 = inlined_call_operand.vmem [shape: bf16[8,32], index: 4, kind: input, shape index: {}]   ;;  %s565_s1 = inlined_call_operand.vmem [shape: bf16[2,8], index: 1, kind: input, shape index: {}]   ;;  %s566_s0 = inlined_call_operand.vmem [shape: bf16[2,128], index: 0, kind: input, shape index: {}]   ;;  %s567_s5 = inlined_call_operand.vmem [shape: f32[1,32], index: 5, kind: input, shape index: {}]   ;;  %s568_s6 = inlined_call_operand.vmem [shape: f32[1,32], index: 6, kind: input, shape index: {}, may-alias: {6,10}]   ;;  %s569_s7 = inlined_call_operand.vmem [shape: f32[1,32], index: 7, kind: input, shape index: {}, may-alias: {7,11}]   ;;  %s570_s9 = inlined_call_operand.vmem [shape: f32[1,32], index: 9, kind: input, shape index: {}]   ;;  %s571_s8 = inlined_call_operand.vmem [shape: bf16[32,32], index: 8, kind: input, shape index: {}]   ;;  %s572_s12 = inlined_call_operand.vmem [shape: bf16[4,32], index: 12, kind: input, shape index: {}]   ;;  %s573_s2 = inlined_call_operand.vmem [shape: bf16[2,4], index: 2, kind: input, shape index: {}]   ;;  %s574_s10 = inlined_call_operand.vmem [shape: f32[1,32], index: 10, kind: input, shape index: {}, may-alias: {6,10}]   ;;  %s575_s11 = inlined_call_operand.vmem [shape: f32[1,32], index: 11, kind: input, shape index: {}, may-alias: {7,11}]   ;;  %s576_s13 = inlined_call_operand.vmem [shape: f32[1,32], index: 13, kind: input, shape index: {}]   ;;  %s577_s14 = inlined_call_operand.vmem [shape: f32[1,32], index: 14, kind: input, shape index: {}]   ;;  %s578_s15 = inlined_call_operand.<no memory space> [shape: f32[1,1], index: 15, kind: input, shape index: {}]   ;;  %s579_s16 = inlined_call_operand.vmem [shape: f32[2,1], index: 16, kind: output, shape index: {}]  }
   0x1   :  { %581 = sst [smem:[#allocation3_spill]] %s563_s3  ;;  %v74_v1 = vld [vmem:[%s564_s4] sm:$0xf]  ;;  %385 = vrcp.f32 %v391_v20  ;;  %v374_v32 = vld [vmem:[%s571_s8 + $0x8] sm:$0xff]  ;;  %vm224_vm7 = vcmask 261120   ;;  %vm283_vm8 = vcmask 1041408  }
   0x2   :  { %s582_s23 = sld [smem:[#allocation3_spill]]  ;;  %v81_v3 = vsel %vm79_vm0, %v74_v1, 0  ;;  %v73_v4 = vld [vmem:[%s565_s1] sm:$0x1]  ;;  %234 = vmatpush.bf16.msra.mxu2 %v374_v32  ;;  %vm279_vm9 = vcmask 31744   ;;  %vm316_vm13 = vcmask 1024  }
   0x3   :  { %90 = vmatpush.bf16.msra.mxu0 %v81_v3  ;;  %v56_v11 = vld [vmem:[%s566_s0] sm:$0x1] }
   0x4   :  { %v376_v14 = vld [vmem:[%s567_s5] ss:$0 sm:$0xff] }
   0x5   :  { %v373_v33 = vld [vmem:[%s571_s8] sm:$0xff] }
   0x6   :  { %322 = vmatmul.msk.bf16.vlgmr.msra.gmra.mxu0 %vm75_vm1, %v73_v4  ;;  %235 = vmatpush.bf16.msra.mxu2 %v373_v33  ;;  %v377_v43 = vld [vmem:[%s568_s6] ss:$0 sm:$0xff] }
   0x7   :  { %v386_v21 = vpop.eup %385  ;;  %v378_v46 = vld [vmem:[%s569_s7] ss:$0 sm:$0xff] }
   0x8   :  { %v372_v0 = vld [vmem:[%s582_s23 + $0x38] sm:$0xff]  ;;  %v371_v2 = vld [vmem:[%s582_s23 + $0x30] sm:$0xff]  ;;  %v370_v5 = vld [vmem:[%s582_s23 + $0x28] sm:$0xff]  ;;  %v169_v22 = vmul.f32 32.0, %v386_v21  ;;  %vm173_vm3 = vweird.f32 %v386_v21 }
   0x9   :  { %144 = vmatpush.bf16.msra.mxu1 %v372_v0  ;;  %v369_v6 = vld [vmem:[%s582_s23 + $0x20] sm:$0xff]  ;;  %v368_v7 = vld [vmem:[%s582_s23 + $0x18] sm:$0xff]  ;;  %v367_v8 = vld [vmem:[%s582_s23 + $0x10] sm:$0xff] }
   0xa   :  { %v366_v9 = vld [vmem:[%s582_s23 + $0x8] sm:$0xff]  ;;  %v365_v10 = vld [vmem:[%s582_s23] sm:$0xff]  ;;  %v170_v23 = vsub.f32 1.0, %v169_v22 }
   0xb   :  { %v379_v51 = vld [vmem:[%s570_s9] ss:$0 sm:$0xff] }
   0xc   :  { %v171_v24 = vmul.f32 %v386_v21, %v170_v23  ;;  %v274_v56 = vld [vmem:[%s572_s12] sm:$0x3] }
   0xd   :  { %145 = vmatpush.bf16.msra.mxu1 %v371_v2  ;;  %v285_v57 = vsel %vm283_vm8, %v274_v56, 0  ;;  %v273_v58 = vld [vmem:[%s573_s2] sm:$0x1] }
   0xe   :  { %v172_v25 = vadd.f32 %v386_v21, %v171_v24  ;;  %294 = vmatpush.bf16.msra.mxu3 %v285_v57  ;;  %v383_v22 = vld [vmem:[%s577_s14] ss:$0 sm:$0xff] }
  0x10   :  { %v514_v26 = vsel %vm173_vm3, %v386_v21, %v172_v25 }
  0x11   :  { %146 = vmatpush.bf16.msra.mxu1 %v370_v5  ;;  %364 = vmatmul.msk.bf16.vlgmr.msra.gmra.mxu3 %vm279_vm9, %v273_v58  ;;  %v21_v5 = vstv %s578_s15 }
  0x12   :  { %22 = vst [vmem:[#allocation2] sm:$0x1] %v21_v5 }
  0x15   :  { %147 = vmatpush.bf16.msra.mxu1 %v369_v6 }
  0x19   :  { %148 = vmatpush.bf16.msra.mxu1 %v368_v7 }
  0x1d   :  { %149 = vmatpush.bf16.msra.mxu1 %v367_v8 }
  0x21   :  { %150 = vmatpush.bf16.msra.mxu1 %v366_v9 }
  0x25   :  { %151 = vmatpush.bf16.msra.mxu1 %v365_v10  ;;  %v382_v10 = vld [vmem:[%s576_s13] ss:$0 sm:$0xff] }
  0x28   :  { %152 = vmatmul.bf16.vlgmr.msra.gmra.mxu1 %v56_v11 }
  0x83   :  { %v92_v12 = vpop.f32.mrf.mxu0 }
  0x8b   :  { %v94_v13 = vpop.f32.mrf.mxu0 }
  0x8c   :  { %v380_v13 = vld [vmem:[%s574_s10] ss:$0 sm:$0xff] }
  0x94   :  { %v296_v0 = vpop.f32.mrf.mxu3 }
  0x9c   :  { %v298_v1 = vpop.f32.mrf.mxu3 }
  0xa5   :  { %v153_v15 = vpop.f32.mrf.mxu1 }
  0xa6   :  { %v154_v16 = vadd.f32 %v153_v15, %v92_v12 }
  0xa8   :  { %v161_v17 = vadd.f32 %v376_v14, %v154_v16  ;;  %v297_v14 = vadd.f32 %v382_v10, %v296_v0 }
  0xaa   :  { %v165_v18 = vsel %vm164_vm2, %v161_v17, 0.0 }
  0xab   :  { %166 = vadd.xlane.f32.xlu0 %v165_v18 }
  0xad   :  { %v155_v19 = vpop.f32.mrf.mxu1 }
  0xae   :  { %v300_v19 = vmax.f32 %v297_v14, 0.0 }
 0x11e   :  { %v167_v27 = vpop.xlane.xlu0 %166 }
 0x11f   :  { %v175_v28 = vmul.f32 %v514_v26, %v167_v27 }
 0x121   :  { %v176_v29 = vsub.f32 %v161_v17, %v175_v28  ;;  %v381_v17 = vld [vmem:[%s575_s11] ss:$0 sm:$0xff] }
 0x123   :  { %v177_v30 = vmul.f32 %v176_v29, %v176_v29 }
 0x125   :  { %v178_v31 = vsel %vm164_vm2, %v177_v30, 0.0 }
 0x126   :  { %179 = vadd.xlane.f32.xlu0 %v178_v31 }
 0x199   :  { %v180_v34 = vpop.xlane.xlu0 %179 }
 0x19a   :  { %v181_v35 = vmul.f32 %v180_v34, %v514_v26 }
 0x19c   :  { %v182_v36 = vadd.f32 1e-05, %v181_v35 }
 0x19e   :  { %387 = vrsqrt.f32 %v182_v36  ;;  %vm189_vm5 = vweird.f32 %v182_v36 }
 0x1a4   :  { %v388_v37 = vpop.eup %387 }
 0x1a5   :  { %v184_v38 = vmul.f32 %v388_v37, %v182_v36  ;;  %vm190_vm4 = vweird.f32 %v388_v37 }
 0x1a6   :  { %vm191_vm6 = vmor %vm189_vm5, %vm190_vm4 }
 0x1a7   :  { %v185_v39 = vmul.f32 %v388_v37, %v184_v38 }
 0x1a9   :  { %v186_v40 = vmul.f32 0.5, %v185_v39 }
 0x1ab   :  { %v187_v41 = vsub.f32 1.5, %v186_v40 }
 0x1ad   :  { %v188_v42 = vmul.f32 %v388_v37, %v187_v41 }
 0x1af   :  { %v192_v44 = vsel %vm191_vm6, %v388_v37, %v188_v42 }
 0x1b0   :  { %v193_v45 = vmul.f32 %v192_v44, %v176_v29 }
 0x1b2   :  { %v197_v47 = vmul.f32 %v377_v43, %v193_v45 }
 0x1b4   :  { %v201_v48 = vadd.f32 %v378_v46, %v197_v47 }
 0x1b6   :  { %v202_v49 = vmax.f32 %v201_v48, 0.0 }
 0x1b8   :  { %v203_v50 = vpack.c.bf16 %v202_v49, %v202_v49 }
 0x1ba   :  { %363 = vmatmul.msk.bf16.vlgmr.msra.gmra.mxu2 %vm224_vm7, %v203_v50 }
 0x23d   :  { %v237_v52 = vpop.f32.mrf.mxu2 }
 0x23e   :  { %v238_v53 = vadd.f32 %v379_v51, %v237_v52 }
 0x240   :  { %v243_v54 = vsel %vm164_vm2, %v238_v53, 0.0 }
 0x241   :  { %244 = vadd.xlane.f32.xlu1 %v243_v54 }
 0x245   :  { %v239_v55 = vpop.f32.mrf.mxu2 }
 0x2b4   :  { %v245_v59 = vpop.xlane.xlu1 %244 }
 0x2b5   :  { %v246_v60 = vmul.f32 %v245_v59, %v514_v26 }
 0x2b7   :  { %v247_v61 = vsub.f32 %v238_v53, %v246_v60 }
 0x2b9   :  { %v248_v62 = vmul.f32 %v247_v61, %v247_v61 }
 0x2bb   :  { %v249_v63 = vsel %vm164_vm2, %v248_v62, 0.0 }
 0x2bc   :  { %250 = vadd.xlane.f32.xlu1 %v249_v63 }
 0x32f   :  { %v251_v2 = vpop.xlane.xlu1 %250 }
 0x330   :  { %v252_v3 = vmul.f32 %v251_v2, %v514_v26  ;;  %v384_v26 = vld [vmem:[#allocation2] ss:$0 sm:$0xff] }
 0x332   :  { %v253_v4 = vadd.f32 1e-05, %v252_v3 }
 0x334   :  { %389 = vrsqrt.f32 %v253_v4  ;;  %vm260_vm11 = vweird.f32 %v253_v4 }
 0x33a   :  { %v390_v6 = vpop.eup %389 }
 0x33b   :  { %v255_v7 = vmul.f32 %v390_v6, %v253_v4  ;;  %vm261_vm10 = vweird.f32 %v390_v6 }
 0x33c   :  { %vm262_vm12 = vmor %vm260_vm11, %vm261_vm10 }
 0x33d   :  { %v256_v8 = vmul.f32 %v390_v6, %v255_v7 }
 0x33f   :  { %v257_v9 = vmul.f32 0.5, %v256_v8 }
 0x341   :  { %v258_v11 = vsub.f32 1.5, %v257_v9 }
 0x343   :  { %v259_v12 = vmul.f32 %v390_v6, %v258_v11 }
 0x345   :  { %v263_v15 = vsel %vm262_vm12, %v390_v6, %v259_v12 }
 0x346   :  { %v264_v16 = vmul.f32 %v263_v15, %v247_v61 }
 0x348   :  { %v268_v18 = vmul.f32 %v380_v13, %v264_v16 }
 0x34a   :  { %v272_v20 = vadd.f32 %v381_v17, %v268_v18 }
 0x34c   :  { %v301_v21 = vadd.f32 %v300_v19, %v272_v20 }
 0x34e   :  { %v302_v23 = vmax.f32 %v301_v21, 0.0 }
 0x350   :  { %v307_v24 = vmul.f32 %v383_v22, %v302_v23 }
 0x352   :  { %v308_v25 = vsel %vm164_vm2, %v307_v24, 0.0 }
 0x353   :  { %309 = vadd.xlane.f32.xlu2 %v308_v25 }
 0x3c6   :  { %v310_v27 = vpop.xlane.xlu2 %309 }
 0x3c7   :  { %v315_v28 = vadd.f32 %v384_v26, %v310_v27 }
 0x3c9   :  { %317 = vst.msk [vmem:[%s579_s16] sm:$0x3] %vm316_vm13, %v315_v28 }

</bundles_post_ra>
